<compile_context>
chip_gen: v7x
topology: tpu7x:2x2x1
jax: 0.10.0
libtpu: 0.0.40
codegen_flags: <defaults>
</compile_context>

<pallas_src>
import jax
import jax.numpy as jnp
from jax import lax
from jax.experimental import pallas as pl
from jax.experimental.pallas import tpu as pltpu

BF16 = jnp.bfloat16
_VMEM_LIMIT = 24 * 1024 * 1024   # modest scoped-VMEM request; fits v7x easily

# pooled pixels packed per patch row (chosen so pooled lanes = 128 for both convs)
PX_GROUP1 = 8   # conv1: 8 pooled px * 16 ch = 128 lanes
PX_GROUP2 = 4   # conv2: 4 pooled px * 32 ch = 128 lanes


def _round_up(x, m):
    return -(-x // m) * m


# ----------------------------------------------------------------------------
# Pallas kernels
# ----------------------------------------------------------------------------
def _conv_relu_pool_kernel(p_ref, w_ref, b_ref, o_ref):
    """Fused conv(3x3,s2,p1) + bias + ReLU + 2x2 maxpool.

    p_ref : (tm, 2*kc) bf16 patch rows; the two kc chunks are the a=0 / a=1
            conv-output rows of each 2x2 pool window, each chunk ordered
            (px, d, ky, kx, cin) and zero-padded to kc (128-lane aligned).
    w_ref : (kc, 2*n) bf16 weight, block-diagonal over the joint (px, d) index,
            output columns ordered (d, px, cout).
    b_ref : (1, n) f32 bias tiled over px (post-pool width).
    o_ref : (tm, n) bf16 pooled output, n = g*cout = 128 lanes (lane-dense).
    """
    kc = w_ref.shape[0]
    n = o_ref.shape[-1]
    w = w_ref[...]
    # Two dots against the same small weight: no all-zero MXU tile passes from
    # the old 4*g block-diagonal layout, 4x smaller weight stream.
    acc0 = jnp.dot(p_ref[:, :kc], w, preferred_element_type=jnp.float32)
    acc1 = jnp.dot(p_ref[:, kc:], w, preferred_element_type=jnp.float32)
    m = jnp.maximum(acc0, acc1)              # vertical pool (a): whole-vreg VPU max
    m = jnp.maximum(m[:, :n], m[:, n:])      # horizontal pool (d): two contiguous halves
    # Pool first, then one bias + ReLU on 128 lanes (ReLU monotone, bias constant
    # over the pool window) — 1/4 of the old epilogue VPU work.
    o_ref[...] = jnp.maximum(m + b_ref[...], 0.0).astype(o_ref.dtype)


def _mlp_head_kernel(x_ref, w1_ref, b1_ref, w2_ref, b2_ref, o_ref):
    """out = relu(x @ w1 + b1) @ w2 + b2 — fused fc1+fc2 in a single dispatch."""
    h = jnp.dot(x_ref[...], w1_ref[...], preferred_element_type=jnp.float32)
    h = jnp.maximum(h + b1_ref[...], 0.0).astype(BF16)        # in-register recast
    o = jnp.dot(h, w2_ref[...], preferred_element_type=jnp.float32)
    o_ref[...] = o + b2_ref[...]


# ----------------------------------------------------------------------------
# Glue: patch extraction (streaming XLA gather in bf16, consumed exactly once)
# ----------------------------------------------------------------------------
def _build_patch_rows(x_nhwc, g, kc_pad):
    """im2col for conv(3x3,s2,p1) grouped by 2x2 pool window, lane-friendly.

    Returns (B*poh*ng, 2*kc_pad): row index (b, py, pxg); columns split into two
    kc_pad chunks (vertical pool tap a), each chunk ordered (px, d, ky, kx, c)
    and zero-padded from g*2*9*C to kc_pad.  The only XLA permutation is the
    coarse a<->pxg swap (contiguous unit g*2*9*C elements); the fine-grained
    d/px swizzle of the previous revision is handled in-kernel instead.
    """
    B, H, W, C = x_nhwc.shape
    assert H % 4 == 0 and W % 4 == 0, (H, W)
    oh, ow = H // 2, W // 2          # conv output (k3, s2, p1, even H/W)
    poh, pow_ = oh // 2, ow // 2     # pooled output
    assert pow_ % g == 0, (pow_, g)
    ng = pow_ // g
    kc = g * 2 * 9 * C
    assert kc_pad >= kc, (kc_pad, kc)

    xp = jnp.pad(x_nhwc, ((0, 0), (1, 1), (1, 1), (0, 0)))
    taps = [xp[:, ky:ky + 2 * oh:2, kx:kx + 2 * ow:2, :]
            for ky in range(3) for kx in range(3)]
    t = jnp.stack(taps, axis=3)                      # (B, oh, ow, 9, C)
    # oy = 2*py + a ; ox = 2*(g*pxg + px) + d
    t = t.reshape(B, poh, 2, ng, g, 2, 9 * C)        # (b, py, a, pxg, px, d, tapc)
    t = t.transpose(0, 1, 3, 2, 4, 5, 6)             # (b, py, pxg, a, px, d, tapc)
    t = t.reshape(B, poh, ng, 2, kc)
    if kc_pad > kc:
        t = jnp.pad(t, ((0, 0), (0, 0), (0, 0), (0, 0), (0, kc_pad - kc)))
    return t.reshape(B * poh * ng, 2 * kc_pad)


# ----------------------------------------------------------------------------
# Pallas wrappers
# ----------------------------------------------------------------------------
def conv_relu_pool(x_nhwc, w_pack, b_pack, *, px_group, tm):
    """Fused conv(3x3,s2,p1) + bias + ReLU + maxpool(2x2) on NHWC input."""
    B, H, W, _ = x_nhwc.shape
    poh, pow_ = H // 4, W // 4
    kc_pad, n2 = w_pack.shape
    n = n2 // 2
    cout = n // px_group

    patches = _build_patch_rows(x_nhwc, px_group, kc_pad)
    rows = patches.shape[0]
    tm = min(tm, rows)
    grid = (pl.cdiv(rows, tm),)

    cost = pl.CostEstimate(
        flops=4 * rows * kc_pad * n2,
        transcendentals=0,
        bytes_accessed=(rows * 2 * kc_pad * 2) + (kc_pad * n2 * 2)
                       + (n * 4) + (rows * n * 2))

    out = pl.pallas_call(
        _conv_relu_pool_kernel,
        out_shape=jax.ShapeDtypeStruct((rows, n), BF16),
        grid=grid,
        in_specs=[
            pl.BlockSpec((tm, 2 * kc_pad), lambda i: (i, 0)),   # patch rows (pipelined)
            pl.BlockSpec((kc_pad, n2), lambda i: (0, 0)),        # small block-diag weight
            pl.BlockSpec((1, n), lambda i: (0, 0)),               # post-pool bias
        ],
        out_specs=pl.BlockSpec((tm, n), lambda i: (i, 0)),
        compiler_params=pltpu.CompilerParams(
            dimension_semantics=("parallel",),
            vmem_limit_bytes=_VMEM_LIMIT,
        ),
        cost_estimate=cost,
    )(patches, w_pack, b_pack)
    # rows are (b, py, pxg); lanes are (px, cout)  ->  NHWC pooled activation
    return out.reshape(B, poh, pow_, cout)


def mlp_head(x, w1, b1, w2, b2):
    """Fused fc1(+ReLU)+fc2 in one pallas_call; all operands VMEM-resident."""
    M, K1 = x.shape
    N1 = w1.shape[1]
    N2 = w2.shape[1]
    cost = pl.CostEstimate(
        flops=2 * M * K1 * N1 + 2 * M * N1 * N2,
        transcendentals=0,
        bytes_accessed=(M * K1 * 2) + (K1 * N1 * 2) + (N1 * 4)
                       + (N1 * N2 * 2) + (N2 * 4) + (M * N2 * 4))
    # NOTE: if the deployment batch grows, tile M in multiples of 8 (ideally
    # 128) and grid over it; at batch 2 a single full-block step is optimal.
    return pl.pallas_call(
        _mlp_head_kernel,
        out_shape=jax.ShapeDtypeStruct((M, N2), jnp.float32),
        grid=(1,),
        in_specs=[
            pl.BlockSpec((M, K1), lambda i: (0, 0)),
            pl.BlockSpec((K1, N1), lambda i: (0, 0)),
            pl.BlockSpec((1, N1), lambda i: (0, 0)),
            pl.BlockSpec((N1, N2), lambda i: (0, 0)),
            pl.BlockSpec((1, N2), lambda i: (0, 0)),
        ],
        out_specs=pl.BlockSpec((M, N2), lambda i: (0, 0)),
        compiler_params=pltpu.CompilerParams(
            dimension_semantics=("arbitrary",),
            vmem_limit_bytes=_VMEM_LIMIT,
        ),
        cost_estimate=cost,
    )(x, w1, b1, w2, b2)


# ----------------------------------------------------------------------------
# Parameters
# ----------------------------------------------------------------------------
def init_params(key, num_classes: int):
    """He (fan_out) weights, U(-0.1, 0.1) biases — canonical (PyTorch-like) layout."""
    ks = jax.random.split(key, 8)
    f32 = jnp.float32

    def he(k, shape, fan_out):
        return jax.random.normal(k, shape, f32) * jnp.sqrt(2.0 / fan_out)

    def bias(k, n):
        return jax.random.uniform(k, (n,), f32, minval=-0.1, maxval=0.1)

    return {
        # conv weights in HWIO; conv fan_out = Cout * kH * kW
        "w1": he(ks[0], (3, 3, 3, 16), 16 * 9),
        "b1": bias(ks[1], 16),
        "w2": he(ks[2], (3, 3, 16, 32), 32 * 9),
        "b2": bias(ks[3], 32),
        # fc weights as (in, out); fc1 "in" index in PyTorch NCHW-flatten order
        "wfc1": he(ks[4], (32 * 16 * 16, 256), 256),
        "bfc1": bias(ks[5], 256),
        "wfc2": he(ks[6], (256, num_classes), num_classes),
        "bfc2": bias(ks[7], num_classes),
    }


def prepare_params(params):
    """One-time packing: per-pool-row block-diagonal conv weights (bf16, K padded
    to a lane multiple, N ordered (d, px, cout)), post-pool biases, and the fc1
    weight rows permuted so the runtime flatten is a free NHWC reshape."""

    def conv_pack(w, b, g):
        cin, cout = w.shape[2], w.shape[3]
        kc = g * 2 * 9 * cin
        kc_pad = _round_up(kc, 128)
        wflat = w.reshape(9 * cin, cout)                        # rows = (ky, kx, cin)
        # block-diagonal over the joint (px, d) index: K order (px, d, ky, kx, cin)
        wg = jnp.kron(jnp.eye(2 * g, dtype=w.dtype), wflat)     # (kc, 2*g*cout)
        # reorder N from (px, d, cout) to (d, px, cout) so the in-kernel
        # horizontal pool is a max of two contiguous g*cout-lane halves
        wg = wg.reshape(kc, g, 2, cout).transpose(0, 2, 1, 3).reshape(kc, 2 * g * cout)
        wg = jnp.pad(wg, ((0, kc_pad - kc), (0, 0)))
        bg = jnp.tile(b, g).reshape(1, g * cout)                # post-pool bias
        return wg.astype(BF16), bg.astype(jnp.float32)

    w1p, b1p = conv_pack(params["w1"], params["b1"], PX_GROUP1)
    w2p, b2p = conv_pack(params["w2"], params["b2"], PX_GROUP2)

    # PyTorch flatten order is (c, h, w); our activation flatten is (h, w, c).
    wfc1 = params["wfc1"].reshape(32, 16, 16, -1)                 # (c, h, w, out)
    wfc1 = wfc1.transpose(1, 2, 0, 3).reshape(32 * 16 * 16, -1)   # rows = (h, w, c)

    return {
        "w1_pack": w1p, "b1_pack": b1p,
        "w2_pack": w2p, "b2_pack": b2p,
        "wfc1": wfc1.astype(BF16),
        "bfc1": params["bfc1"].reshape(1, -1).astype(jnp.float32),
        "wfc2": params["wfc2"].astype(BF16),
        "bfc2": params["bfc2"].reshape(1, -1).astype(jnp.float32),
    }


# ----------------------------------------------------------------------------
# Forward pass
# ----------------------------------------------------------------------------
def mycnn_forward(prep, x_nchw):
    """MyCNN.forward on NCHW input (B, 3, 256, 256) -> (B, num_classes)."""
    x = jnp.transpose(x_nchw, (0, 2, 3, 1)).astype(BF16)          # NHWC, bf16

    # conv1 + ReLU + pool : 256x256x3 -> 64x64x16
    # tm=512 -> grid 2: one step per v7x TensorCore, two cheap serial steps on v5e/v6e.
    y = conv_relu_pool(x, prep["w1_pack"], prep["b1_pack"],
                       px_group=PX_GROUP1, tm=512)
    # conv2 + ReLU + pool : 64x64x16 -> 16x16x32   (tm=64 -> grid 2)
    # TODO(synk): assemble conv2 patches in-kernel from the VMEM-resident conv1
    # activation (Cin=16) instead of the XLA im2col pass inside conv_relu_pool.
    y = conv_relu_pool(y, prep["w2_pack"], prep["b2_pack"],
                       px_group=PX_GROUP2, tm=64)

    # Flatten: free reshape (NCHW permutation already folded into wfc1 at prep time).
    y = y.reshape(y.shape[0], -1)                                  # (B, 8192) bf16

    # fc1 + ReLU + fc2 fused in a single Pallas dispatch.
    return mlp_head(y, prep["wfc1"], prep["bfc1"], prep["wfc2"], prep["bfc2"])


# ----------------------------------------------------------------------------
# Pure-JAX reference (same bf16-operand / f32-accumulation precision schedule)
# ----------------------------------------------------------------------------
def reference_forward(params, x_nchw):
    x = jnp.transpose(x_nchw, (0, 2, 3, 1)).astype(BF16)

    def conv(x, w, b):
        y = lax.conv_general_dilated(
            x, w.astype(BF16), window_strides=(2, 2), padding=((1, 1), (1, 1)),
            dimension_numbers=("NHWC", "HWIO", "NHWC"),
            preferred_element_type=jnp.float32)
        return jnp.maximum(y + b, 0.0)

    def pool(y):
        return lax.reduce_window(
            y, -jnp.inf, lax.max,
            window_dimensions=(1, 2, 2, 1), window_strides=(1, 2, 2, 1),
            padding="VALID")

    y = pool(conv(x, params["w1"], params["b1"])).astype(BF16)
    y = pool(conv(y, params["w2"], params["b2"])).astype(BF16)
    # PyTorch-style flatten on NCHW
    y = jnp.transpose(y, (0, 3, 1, 2)).reshape(y.shape[0], -1)
    y = jnp.dot(y, params["wfc1"].astype(BF16),
                preferred_element_type=jnp.float32) + params["bfc1"]
    y = jnp.maximum(y, 0.0).astype(BF16)
    y = jnp.dot(y, params["wfc2"].astype(BF16),
                preferred_element_type=jnp.float32) + params["bfc2"]
    return y


# ----------------------------------------------------------------------------
if __name__ == "__main__":
    num_classes = 10
    batch = 2   # spatial must be 256x256 because fc1 expects 32*16*16 features

    key = jax.random.PRNGKey(0)
    kp, kx = jax.random.split(key)
    params = init_params(kp, num_classes)
    prep = prepare_params(params)
    x = jax.random.normal(kx, (batch, 3, 256, 256), jnp.float32)

    fwd = jax.jit(mycnn_forward)
    out = jax.block_until_ready(fwd(prep, x))
    assert out.shape == (batch, num_classes), out.shape

    ref = jax.block_until_ready(jax.jit(reference_forward)(params, x))
    max_diff = float(jnp.max(jnp.abs(out - ref)))
    # bf16 operands + f32 accumulation on both paths; remaining diff is only
    # accumulation-order / requantization noise (~1e-2 on logits of O(10)).
    assert jnp.allclose(out, ref, rtol=2e-2, atol=5e-2), ("max abs diff", max_diff)

    print("KERNEL_OK")
</pallas_src>

<mosaic_0001>
module attributes {stable_mosaic.version = 11 : i64} {
  func.func @_conv_relu_pool_kernel(%arg0: i32, %arg1: memref<512x1024xbf16, #tpu.memory_space<vmem>>, %arg2: memref<512x256xbf16, #tpu.memory_space<vmem>>, %arg3: memref<1x128xf32, #tpu.memory_space<vmem>>, %arg4: memref<512x128xbf16, #tpu.memory_space<vmem>>) attributes {dimension_semantics = [#tpu.dimension_semantics<parallel>], iteration_bounds = array<i64: 2>, scalar_prefetch = 0 : i64, scratch_operands = 0 : i64, tpu.core_type = #tpu.core_type<tc>, window_params = [{transform_indices = @transform_0, window_bounds = array<i64: 512, 1024>}, {pipeline_mode = #tpu.pipeline_mode<synchronous>, transform_indices = @transform_1, window_bounds = array<i64: 512, 256>}, {pipeline_mode = #tpu.pipeline_mode<synchronous>, transform_indices = @transform_2, window_bounds = array<i64: 1, 128>}, {transform_indices = @transform_3, window_bounds = array<i64: 512, 128>}]} {
    %c0 = arith.constant 0 : index
    %c0_0 = arith.constant 0 : index
    %0 = vector.load %arg2[%c0, %c0_0] : memref<512x256xbf16, #tpu.memory_space<vmem>>, vector<512x256xbf16>
    %c0_1 = arith.constant 0 : index
    %c0_2 = arith.constant 0 : index
    %1 = vector.load %arg1[%c0_1, %c0_2] : memref<512x1024xbf16, #tpu.memory_space<vmem>>, vector<512x512xbf16>
    %cst = arith.constant dense<0.000000e+00> : vector<512x256xf32>
    %2 = tpu.matmul %1, %0, %cst {dimension_numbers = #tpu.dot_dimension_numbers<[1], [0], [0], [1], [0, 0, 1, 1], [], []>} : vector<512x512xbf16>, vector<512x256xbf16>, vector<512x256xf32> -> vector<512x256xf32>
    %c0_3 = arith.constant 0 : index
    %c512 = arith.constant 512 : index
    %3 = vector.load %arg1[%c0_3, %c512] : memref<512x1024xbf16, #tpu.memory_space<vmem>>, vector<512x512xbf16>
    %cst_4 = arith.constant dense<0.000000e+00> : vector<512x256xf32>
    %4 = tpu.matmul %3, %0, %cst_4 {dimension_numbers = #tpu.dot_dimension_numbers<[1], [0], [0], [1], [0, 0, 1, 1], [], []>} : vector<512x512xbf16>, vector<512x256xbf16>, vector<512x256xf32> -> vector<512x256xf32>
    %5 = arith.maximumf %2, %4 : vector<512x256xf32>
    %6 = vector.extract_strided_slice %5 {offsets = [0, 0], sizes = [512, 128], strides = [1, 1]} : vector<512x256xf32> to vector<512x128xf32>
    %7 = vector.extract_strided_slice %5 {offsets = [0, 128], sizes = [512, 128], strides = [1, 1]} : vector<512x256xf32> to vector<512x128xf32>
    %8 = arith.maximumf %6, %7 : vector<512x128xf32>
    %c0_5 = arith.constant 0 : index
    %c0_6 = arith.constant 0 : index
    %9 = vector.load %arg3[%c0_5, %c0_6] : memref<1x128xf32, #tpu.memory_space<vmem>>, vector<1x128xf32>
    %10 = vector.broadcast %9 : vector<1x128xf32> to vector<512x128xf32>
    %11 = arith.addf %8, %10 : vector<512x128xf32>
    %cst_7 = arith.constant 0.000000e+00 : f32
    %12 = vector.broadcast %cst_7 : f32 to vector<512x128xf32>
    %13 = arith.maximumf %11, %12 : vector<512x128xf32>
    %14 = arith.truncf %13 : vector<512x128xf32> to vector<512x128xbf16>
    %c0_8 = arith.constant 0 : index
    %c0_9 = arith.constant 0 : index
    %15 = vector.load %arg4[%c0_8, %c0_9] : memref<512x128xbf16, #tpu.memory_space<vmem>>, vector<512x128xbf16>
    tpu.vector_store %arg4[%c0_8, %c0_9], %14 {strides = array<i32>} : memref<512x128xbf16, #tpu.memory_space<vmem>>, vector<512x128xbf16>,
    return
  }
  func.func @transform_0(%arg0: i32) -> (i32, i32) {
    %c0_i32 = arith.constant 0 : i32
    %c0_i32_0 = arith.constant 0 : i32
    return %arg0, %c0_i32 : i32, i32
  }
  func.func @transform_1(%arg0: i32) -> (i32, i32) {
    %c0_i32 = arith.constant 0 : i32
    %c0_i32_0 = arith.constant 0 : i32
    %c0_i32_1 = arith.constant 0 : i32
    return %c0_i32, %c0_i32_0 : i32, i32
  }
  func.func @transform_2(%arg0: i32) -> (i32, i32) {
    %c0_i32 = arith.constant 0 : i32
    %c0_i32_0 = arith.constant 0 : i32
    %c0_i32_1 = arith.constant 0 : i32
    return %c0_i32, %c0_i32_0 : i32, i32
  }
  func.func @transform_3(%arg0: i32) -> (i32, i32) {
    %c0_i32 = arith.constant 0 : i32
    %c0_i32_0 = arith.constant 0 : i32
    return %arg0, %c0_i32 : i32, i32
  }
}

module attributes {stable_mosaic.version = 11 : i64} {
  func.func @_conv_relu_pool_kernel(%arg0: i32, %arg1: memref<64x2304xbf16, #tpu.memory_space<vmem>>, %arg2: memref<1152x256xbf16, #tpu.memory_space<vmem>>, %arg3: memref<1x128xf32, #tpu.memory_space<vmem>>, %arg4: memref<64x128xbf16, #tpu.memory_space<vmem>>) attributes {dimension_semantics = [#tpu.dimension_semantics<parallel>], iteration_bounds = array<i64: 2>, scalar_prefetch = 0 : i64, scratch_operands = 0 : i64, tpu.core_type = #tpu.core_type<tc>, window_params = [{transform_indices = @transform_0, window_bounds = array<i64: 64, 2304>}, {pipeline_mode = #tpu.pipeline_mode<synchronous>, transform_indices = @transform_1, window_bounds = array<i64: 1152, 256>}, {pipeline_mode = #tpu.pipeline_mode<synchronous>, transform_indices = @transform_2, window_bounds = array<i64: 1, 128>}, {transform_indices = @transform_3, window_bounds = array<i64: 64, 128>}]} {
    %c0 = arith.constant 0 : index
    %c0_0 = arith.constant 0 : index
    %0 = vector.load %arg2[%c0, %c0_0] : memref<1152x256xbf16, #tpu.memory_space<vmem>>, vector<1152x256xbf16>
    %c0_1 = arith.constant 0 : index
    %c0_2 = arith.constant 0 : index
    %1 = vector.load %arg1[%c0_1, %c0_2] : memref<64x2304xbf16, #tpu.memory_space<vmem>>, vector<64x1152xbf16>
    %cst = arith.constant dense<0.000000e+00> : vector<64x256xf32>
    %2 = tpu.matmul %1, %0, %cst {dimension_numbers = #tpu.dot_dimension_numbers<[1], [0], [0], [1], [0, 0, 1, 1], [], []>} : vector<64x1152xbf16>, vector<1152x256xbf16>, vector<64x256xf32> -> vector<64x256xf32>
    %c0_3 = arith.constant 0 : index
    %c1152 = arith.constant 1152 : index
    %3 = vector.load %arg1[%c0_3, %c1152] : memref<64x2304xbf16, #tpu.memory_space<vmem>>, vector<64x1152xbf16>
    %cst_4 = arith.constant dense<0.000000e+00> : vector<64x256xf32>
    %4 = tpu.matmul %3, %0, %cst_4 {dimension_numbers = #tpu.dot_dimension_numbers<[1], [0], [0], [1], [0, 0, 1, 1], [], []>} : vector<64x1152xbf16>, vector<1152x256xbf16>, vector<64x256xf32> -> vector<64x256xf32>
    %5 = arith.maximumf %2, %4 : vector<64x256xf32>
    %6 = vector.extract_strided_slice %5 {offsets = [0, 0], sizes = [64, 128], strides = [1, 1]} : vector<64x256xf32> to vector<64x128xf32>
    %7 = vector.extract_strided_slice %5 {offsets = [0, 128], sizes = [64, 128], strides = [1, 1]} : vector<64x256xf32> to vector<64x128xf32>
    %8 = arith.maximumf %6, %7 : vector<64x128xf32>
    %c0_5 = arith.constant 0 : index
    %c0_6 = arith.constant 0 : index
    %9 = vector.load %arg3[%c0_5, %c0_6] : memref<1x128xf32, #tpu.memory_space<vmem>>, vector<1x128xf32>
    %10 = vector.broadcast %9 : vector<1x128xf32> to vector<64x128xf32>
    %11 = arith.addf %8, %10 : vector<64x128xf32>
    %cst_7 = arith.constant 0.000000e+00 : f32
    %12 = vector.broadcast %cst_7 : f32 to vector<64x128xf32>
    %13 = arith.maximumf %11, %12 : vector<64x128xf32>
    %14 = arith.truncf %13 : vector<64x128xf32> to vector<64x128xbf16>
    %c0_8 = arith.constant 0 : index
    %c0_9 = arith.constant 0 : index
    %15 = vector.load %arg4[%c0_8, %c0_9] : memref<64x128xbf16, #tpu.memory_space<vmem>>, vector<64x128xbf16>
    tpu.vector_store %arg4[%c0_8, %c0_9], %14 {strides = array<i32>} : memref<64x128xbf16, #tpu.memory_space<vmem>>, vector<64x128xbf16>,
    return
  }
  func.func @transform_0(%arg0: i32) -> (i32, i32) {
    %c0_i32 = arith.constant 0 : i32
    %c0_i32_0 = arith.constant 0 : i32
    return %arg0, %c0_i32 : i32, i32
  }
  func.func @transform_1(%arg0: i32) -> (i32, i32) {
    %c0_i32 = arith.constant 0 : i32
    %c0_i32_0 = arith.constant 0 : i32
    %c0_i32_1 = arith.constant 0 : i32
    return %c0_i32, %c0_i32_0 : i32, i32
  }
  func.func @transform_2(%arg0: i32) -> (i32, i32) {
    %c0_i32 = arith.constant 0 : i32
    %c0_i32_0 = arith.constant 0 : i32
    %c0_i32_1 = arith.constant 0 : i32
    return %c0_i32, %c0_i32_0 : i32, i32
  }
  func.func @transform_3(%arg0: i32) -> (i32, i32) {
    %c0_i32 = arith.constant 0 : i32
    %c0_i32_0 = arith.constant 0 : i32
    return %arg0, %c0_i32 : i32, i32
  }
}

module attributes {stable_mosaic.version = 11 : i64} {
  func.func @_mlp_head_kernel(%arg0: i32, %arg1: memref<2x8192xbf16, #tpu.memory_space<vmem>>, %arg2: memref<8192x256xbf16, #tpu.memory_space<vmem>>, %arg3: memref<1x256xf32, #tpu.memory_space<vmem>>, %arg4: memref<256x10xbf16, #tpu.memory_space<vmem>>, %arg5: memref<1x10xf32, #tpu.memory_space<vmem>>, %arg6: memref<2x10xf32, #tpu.memory_space<vmem>>) attributes {dimension_semantics = [#tpu.dimension_semantics<arbitrary>], iteration_bounds = array<i64: 1>, scalar_prefetch = 0 : i64, scratch_operands = 0 : i64, tpu.core_type = #tpu.core_type<tc>, window_params = [{pipeline_mode = #tpu.pipeline_mode<synchronous>, transform_indices = @transform_0, window_bounds = array<i64: 2, 8192>}, {pipeline_mode = #tpu.pipeline_mode<synchronous>, transform_indices = @transform_1, window_bounds = array<i64: 8192, 256>}, {pipeline_mode = #tpu.pipeline_mode<synchronous>, transform_indices = @transform_2, window_bounds = array<i64: 1, 256>}, {pipeline_mode = #tpu.pipeline_mode<synchronous>, transform_indices = @transform_3, window_bounds = array<i64: 256, 10>}, {pipeline_mode = #tpu.pipeline_mode<synchronous>, transform_indices = @transform_4, window_bounds = array<i64: 1, 10>}, {pipeline_mode = #tpu.pipeline_mode<synchronous>, transform_indices = @transform_5, window_bounds = array<i64: 2, 10>}]} {
    %c0 = arith.constant 0 : index
    %c0_0 = arith.constant 0 : index
    %0 = vector.load %arg1[%c0, %c0_0] : memref<2x8192xbf16, #tpu.memory_space<vmem>>, vector<2x8192xbf16>
    %c0_1 = arith.constant 0 : index
    %c0_2 = arith.constant 0 : index
    %1 = vector.load %arg2[%c0_1, %c0_2] : memref<8192x256xbf16, #tpu.memory_space<vmem>>, vector<8192x256xbf16>
    %cst = arith.constant dense<0.000000e+00> : vector<2x256xf32>
    %2 = tpu.matmul %0, %1, %cst {dimension_numbers = #tpu.dot_dimension_numbers<[1], [0], [0], [1], [0, 0, 1, 1], [], []>} : vector<2x8192xbf16>, vector<8192x256xbf16>, vector<2x256xf32> -> vector<2x256xf32>
    %c0_3 = arith.constant 0 : index
    %c0_4 = arith.constant 0 : index
    %3 = vector.load %arg3[%c0_3, %c0_4] : memref<1x256xf32, #tpu.memory_space<vmem>>, vector<1x256xf32>
    %4 = vector.broadcast %3 : vector<1x256xf32> to vector<2x256xf32>
    %5 = arith.addf %2, %4 : vector<2x256xf32>
    %cst_5 = arith.constant 0.000000e+00 : f32
    %6 = vector.broadcast %cst_5 : f32 to vector<2x256xf32>
    %7 = arith.maximumf %5, %6 : vector<2x256xf32>
    %8 = arith.truncf %7 : vector<2x256xf32> to vector<2x256xbf16>
    %c0_6 = arith.constant 0 : index
    %c0_7 = arith.constant 0 : index
    %9 = vector.load %arg4[%c0_6, %c0_7] : memref<256x10xbf16, #tpu.memory_space<vmem>>, vector<256x10xbf16>
    %cst_8 = arith.constant dense<0.000000e+00> : vector<2x10xf32>
    %10 = tpu.matmul %8, %9, %cst_8 {dimension_numbers = #tpu.dot_dimension_numbers<[1], [0], [0], [1], [0, 0, 1, 1], [], []>} : vector<2x256xbf16>, vector<256x10xbf16>, vector<2x10xf32> -> vector<2x10xf32>
    %c0_9 = arith.constant 0 : index
    %c0_10 = arith.constant 0 : index
    %11 = vector.load %arg5[%c0_9, %c0_10] : memref<1x10xf32, #tpu.memory_space<vmem>>, vector<1x10xf32>
    %12 = vector.broadcast %11 : vector<1x10xf32> to vector<2x10xf32>
    %13 = arith.addf %10, %12 : vector<2x10xf32>
    %c0_11 = arith.constant 0 : index
    %c0_12 = arith.constant 0 : index
    %14 = vector.load %arg6[%c0_11, %c0_12] : memref<2x10xf32, #tpu.memory_space<vmem>>, vector<2x10xf32>
    tpu.vector_store %arg6[%c0_11, %c0_12], %13 {strides = array<i32>} : memref<2x10xf32, #tpu.memory_space<vmem>>, vector<2x10xf32>,
    return
  }
  func.func @transform_0(%arg0: i32) -> (i32, i32) {
    %c0_i32 = arith.constant 0 : i32
    %c0_i32_0 = arith.constant 0 : i32
    %c0_i32_1 = arith.constant 0 : i32
    return %c0_i32, %c0_i32_0 : i32, i32
  }
  func.func @transform_1(%arg0: i32) -> (i32, i32) {
    %c0_i32 = arith.constant 0 : i32
    %c0_i32_0 = arith.constant 0 : i32
    %c0_i32_1 = arith.constant 0 : i32
    return %c0_i32, %c0_i32_0 : i32, i32
  }
  func.func @transform_2(%arg0: i32) -> (i32, i32) {
    %c0_i32 = arith.constant 0 : i32
    %c0_i32_0 = arith.constant 0 : i32
    %c0_i32_1 = arith.constant 0 : i32
    return %c0_i32, %c0_i32_0 : i32, i32
  }
  func.func @transform_3(%arg0: i32) -> (i32, i32) {
    %c0_i32 = arith.constant 0 : i32
    %c0_i32_0 = arith.constant 0 : i32
    %c0_i32_1 = arith.constant 0 : i32
    return %c0_i32, %c0_i32_0 : i32, i32
  }
  func.func @transform_4(%arg0: i32) -> (i32, i32) {
    %c0_i32 = arith.constant 0 : i32
    %c0_i32_0 = arith.constant 0 : i32
    %c0_i32_1 = arith.constant 0 : i32
    return %c0_i32, %c0_i32_0 : i32, i32
  }
  func.func @transform_5(%arg0: i32) -> (i32, i32) {
    %c0_i32 = arith.constant 0 : i32
    %c0_i32_0 = arith.constant 0 : i32
    %c0_i32_1 = arith.constant 0 : i32
    return %c0_i32, %c0_i32_0 : i32, i32
  }
}

</mosaic_0001>

<bundles_post_ra>
// kernel: mycnn_forward.3
= control target key start
LH: loop header
LB: loop body
LE: loop exit
PB: predicated region body
PF: predicated region fallthrough
CT: control target
= control target key end

     0   :  { %s5254_s12 = smov 0   ;;  %s5849_s0 = inlined_call_operand.vmem [shape: bf16[1024,1024], index: 0, kind: input, shape index: {}]   ;;  %s5850_s1 = inlined_call_operand.vmem [shape: bf16[512,256], index: 1, kind: input, shape index: {}]   ;;  %s5851_s2 = inlined_call_operand.vmem [shape: f32[1,128], index: 2, kind: input, shape index: {}]   ;;  %s5852_s3 = inlined_call_operand.vmem [shape: bf16[1024,128], index: 3, kind: output, shape index: {}]  }
   0x1 LB: > { %s4212_s13 = sadd.s32 4294967295, %s5232_s12   ;;  %p4216_p0 = scmp.ge.s32.totalorder %s5232_s12, 1  ;;  %s5232_s12 = sphi %s5254_s12, %s13_s12  }
   0x2   : > { %p139_p1 = scmp.lt.s32.totalorder %s5232_s12, 3 }
   0x4   : > { %p140_p2 = pnand %p4216_p0, %p139_p1 }
   0x5   : > { %v5129_v0 = vld [vmem:[%s5850_s1 + $0x4] ss:$8 sps:$4 sm:$0xff] (!%p140_p2)   ;;  %v5131_v1 = vld [vmem:[%s5850_s1] ss:$8 sps:$4 sm:$0xff] (!%p140_p2)   ;;  %v5132_v2 = vld [vmem:[%s5850_s1 + $0x14] ss:$8 sps:$4 sm:$0xff] (!%p140_p2)  }
   0x6   : > { %143 = sbr.rel (%p140_p2) target bundleno = 800 (0x320), region = 32  ;;  %1329 = vmatprep.subr.bf16.mxu0 (!%p140_p2), %v5129_v0  ;;  %2803 = vmatprep.subr.bf16.mxu1 (!%p140_p2), %v5129_v0  ;;  %v5134_v3 = vld [vmem:[%s5850_s1 + $0x10] ss:$8 sps:$4 sm:$0xff] (!%p140_p2)   ;;  %v5135_v4 = vld [vmem:[%s5850_s1 + $0x24] ss:$8 sps:$4 sm:$0xff] (!%p140_p2)   ;;  %s4217_s24 = sshll.u32 (!%p140_p2), %s4212_s13, 6 }
   0x7   : > { %1330 = vmatpush1.bf16.msra.mxu0 (!%p140_p2), %v5131_v1  ;;  %2804 = vmatpush1.bf16.msra.mxu1 (!%p140_p2), %v5131_v1  ;;  %v5137_v5 = vld [vmem:[%s5850_s1 + $0x20] ss:$8 sps:$4 sm:$0xff] (!%p140_p2)   ;;  %p165_p3 = scmp.lt.s32.totalorder (!%p140_p2), %s4217_s24, 127  ;;  %v5138_v6 = vld [vmem:[%s5850_s1 + $0x34] ss:$8 sps:$4 sm:$0xff] (!%p140_p2)  }
   0x8   : > { %1331 = vmatprep.subr.bf16.mxu0 (!%p140_p2), %v5132_v2  ;;  %2805 = vmatprep.subr.bf16.mxu1 (!%p140_p2), %v5132_v2  ;;  %v5140_v7 = vld [vmem:[%s5850_s1 + $0x30] ss:$8 sps:$4 sm:$0xff] (!%p140_p2)   ;;  %v5141_v8 = vld [vmem:[%s5850_s1 + $0x44] ss:$8 sps:$4 sm:$0xff] (!%p140_p2)   ;;  %v5143_v9 = vld [vmem:[%s5850_s1 + $0x40] ss:$8 sps:$4 sm:$0xff] (!%p140_p2)  }
   0x9   : > { %v5144_v10 = vld [vmem:[%s5850_s1 + $0x54] ss:$8 sps:$4 sm:$0xff] (!%p140_p2)   ;;  %v5146_v11 = vld [vmem:[%s5850_s1 + $0x50] ss:$8 sps:$4 sm:$0xff] (!%p140_p2)   ;;  %v5147_v12 = vld [vmem:[%s5850_s1 + $0x64] ss:$8 sps:$4 sm:$0xff] (!%p140_p2)  }
   0xa   : > { %v5149_v18 = vld [vmem:[%s5850_s1 + $0x60] ss:$8 sps:$4 sm:$0xff] (!%p140_p2)   ;;  %v5150_v20 = vld [vmem:[%s5850_s1 + $0x74] ss:$8 sps:$4 sm:$0xff] (!%p140_p2)   ;;  %v5152_v21 = vld [vmem:[%s5850_s1 + $0x70] ss:$8 sps:$4 sm:$0xff] (!%p140_p2)  }
   0xb   : > { %1332 = vmatpush1.bf16.msra.mxu0 (!%p140_p2), %v5134_v3  ;;  %2806 = vmatpush1.bf16.msra.mxu1 (!%p140_p2), %v5134_v3  ;;  %v5153_v22 = vld [vmem:[%s5850_s1 + $0x84] ss:$8 sps:$4 sm:$0xff] (!%p140_p2)   ;;  %v5155_v23 = vld [vmem:[%s5850_s1 + $0x80] ss:$8 sps:$4 sm:$0xff] (!%p140_p2)   ;;  %v5156_v24 = vld [vmem:[%s5850_s1 + $0x94] ss:$8 sps:$4 sm:$0xff] (!%p140_p2)  }
   0xc   : > { %1333 = vmatprep.subr.bf16.mxu0 (!%p140_p2), %v5135_v4  ;;  %2807 = vmatprep.subr.bf16.mxu1 (!%p140_p2), %v5135_v4  ;;  %v5158_v25 = vld [vmem:[%s5850_s1 + $0x90] ss:$8 sps:$4 sm:$0xff] (!%p140_p2)   ;;  %v5159_v26 = vld [vmem:[%s5850_s1 + $0xa4] ss:$8 sps:$4 sm:$0xff] (!%p140_p2)   ;;  %v5161_v27 = vld [vmem:[%s5850_s1 + $0xa0] ss:$8 sps:$4 sm:$0xff] (!%p140_p2)  }
   0xd   : > { %s5854_s24 = smov (!%p165_p3, %s4217_s24), 127  ;;  %v5162_v28 = vld [vmem:[%s5850_s1 + $0xb4] ss:$8 sps:$4 sm:$0xff]   ;;  %v5164_v29 = vld [vmem:[%s5850_s1 + $0xb0] ss:$8 sps:$4 sm:$0xff]  }
   0xe   : > { %s4609_s8 = sshll.u32 %s5854_s24, 5  ;;  %v5165_v30 = vld [vmem:[%s5850_s1 + $0xc4] ss:$8 sps:$4 sm:$0xff]   ;;  %v5167_v31 = vld [vmem:[%s5850_s1 + $0xc0] ss:$8 sps:$4 sm:$0xff]   ;;  %s4221_s28 = sshll.u32 %s5854_s24, 2 }
   0xf   : > { %1334 = vmatpush1.bf16.msra.mxu0 %v5137_v5  ;;  %2808 = vmatpush1.bf16.msra.mxu1 %v5137_v5  ;;  %s5301_s14 = scalar_lea.vmem %s5849_s0, %s4609_s8  ;;  %v5168_v32 = vld [vmem:[%s5850_s1 + $0xd4] ss:$8 sps:$4 sm:$0xff]   ;;  %v5170_v33 = vld [vmem:[%s5850_s1 + $0xd0] ss:$8 sps:$4 sm:$0xff]   ;;  %v5171_v34 = vld [vmem:[%s5850_s1 + $0xe4] ss:$8 sps:$4 sm:$0xff]   ;;  %s5737_s24 = scalar_lea.vmem %s5852_s3, %s4221_s28 }
  0x10   : > { %1335 = vmatprep.subr.bf16.mxu0 %v5138_v6  ;;  %2809 = vmatprep.subr.bf16.mxu1 %v5138_v6  ;;  %v5310_v13 = vld [vmem:[%s5301_s14] sm:$0xff]  ;;  %v5318_v16 = vld [vmem:[%s5301_s14 + $0x10] sm:$0xff] }
  0x11   : > { %v5313_v14 = vld [vmem:[%s5301_s14 + $0x20] sm:$0xff]  ;;  %v5321_v17 = vld [vmem:[%s5301_s14 + $0x30] sm:$0xff] }
  0x12   : > { %v4223_v15 = vcombine.high %v5310_v13, %v5313_v14  ;;  %v4415_v19 = vcombine.high %v5318_v16, %v5321_v17  ;;  %v5173_v35 = vld [vmem:[%s5850_s1 + $0xe0] ss:$8 sps:$4 sm:$0xff]   ;;  %v5174_v36 = vld [vmem:[%s5850_s1 + $0xf4] ss:$8 sps:$4 sm:$0xff]   ;;  %v5176_v37 = vld [vmem:[%s5850_s1 + $0xf0] ss:$8 sps:$4 sm:$0xff]   ;;  %v4222_v43 = vcombine.low %v5310_v13, %v5313_v14  ;;  %v4414_v44 = vcombine.low %v5318_v16, %v5321_v17 }
  0x13   : > { %1336 = vmatpush1.bf16.msra.mxu0 %v5140_v7  ;;  %2810 = vmatpush1.bf16.msra.mxu1 %v5140_v7  ;;  %v5179_v38 = vld [vmem:[%s5850_s1 + $0x104] ss:$8 sps:$4 sm:$0xff]   ;;  %v2039_v41 = vld [vmem:[%s5301_s14 + $0x50] sm:$0xff]  ;;  %v5177_v45 = vld [vmem:[%s5850_s1 + $0x100] ss:$8 sps:$4 sm:$0xff]  }
  0x14   : > { %1337 = vmatprep.subr.bf16.mxu0 %v5141_v8  ;;  %2811 = vmatprep.subr.bf16.mxu1 %v5141_v8  ;;  %v245_v39 = vld [vmem:[%s5301_s14 + $0x40] sm:$0xff]  ;;  %v2041_v42 = vld [vmem:[%s5301_s14 + $0x70] sm:$0xff] }
  0x15   : > { %1361 = vmatprep.mubr.bf16.mxu0 %v4223_v15  ;;  %2835 = vmatprep.mubr.bf16.mxu1 %v4415_v19  ;;  %v247_v40 = vld [vmem:[%s5301_s14 + $0x60] sm:$0xff]  ;;  %v4419_v47 = vcombine.high %v2039_v41, %v2041_v42  ;;  %v5182_v48 = vld [vmem:[%s5850_s1 + $0x114] ss:$8 sps:$4 sm:$0xff]   ;;  %v5180_v51 = vld [vmem:[%s5850_s1 + $0x110] ss:$8 sps:$4 sm:$0xff]   ;;  %v4418_v56 = vcombine.low %v2039_v41, %v2041_v42 }
  0x16   : > { %v4227_v46 = vcombine.high %v245_v39, %v247_v40  ;;  %v249_v49 = vld [vmem:[%s5301_s14 + $0x80] sm:$0xff]  ;;  %v2043_v52 = vld [vmem:[%s5301_s14 + $0x90] sm:$0xff]  ;;  %v4226_v55 = vcombine.low %v245_v39, %v247_v40 }
  0x17   : > { %1338 = vmatpush1.bf16.msra.mxu0 %v5143_v9  ;;  %2812 = vmatpush1.bf16.msra.mxu1 %v5143_v9  ;;  %v251_v50 = vld [vmem:[%s5301_s14 + $0xa0] sm:$0xff]  ;;  %v2045_v53 = vld [vmem:[%s5301_s14 + $0xb0] sm:$0xff] }
  0x18   : > { %1339 = vmatprep.subr.bf16.mxu0 %v5144_v10  ;;  %2813 = vmatprep.subr.bf16.mxu1 %v5144_v10  ;;  %v5185_v54 = vld [vmem:[%s5850_s1 + $0x124] ss:$8 sps:$4 sm:$0xff]   ;;  %v4231_v57 = vcombine.high %v249_v49, %v251_v50  ;;  %v4423_v58 = vcombine.high %v2043_v52, %v2045_v53  ;;  %v5183_v59 = vld [vmem:[%s5850_s1 + $0x120] ss:$8 sps:$4 sm:$0xff]   ;;  %v5188_v60 = vld [vmem:[%s5850_s1 + $0x134] ss:$8 sps:$4 sm:$0xff]   ;;  %v4230_v3 = vcombine.low %v249_v49, %v251_v50 }
  0x19   : > { %v253_v61 = vld [vmem:[%s5301_s14 + $0xc0] sm:$0xff]  ;;  %v2047_v63 = vld [vmem:[%s5301_s14 + $0xd0] sm:$0xff]  ;;  %v4422_v4 = vcombine.low %v2043_v52, %v2045_v53 }
  0x1a   : > { %v255_v62 = vld [vmem:[%s5301_s14 + $0xe0] sm:$0xff]  ;;  %v2049_v0 = vld [vmem:[%s5301_s14 + $0xf0] sm:$0xff] }
  0x1b   : > { %1340 = vmatpush1.bf16.msra.mxu0 %v5146_v11  ;;  %2814 = vmatpush1.bf16.msra.mxu1 %v5146_v11  ;;  %v5186_v1 = vld [vmem:[%s5850_s1 + $0x130] ss:$8 sps:$4 sm:$0xff]   ;;  %v5191_v2 = vld [vmem:[%s5850_s1 + $0x144] ss:$8 sps:$4 sm:$0xff]   ;;  %v4235_v5 = vcombine.high %v253_v61, %v255_v62  ;;  %v4427_v6 = vcombine.high %v2047_v63, %v2049_v0  ;;  %v5189_v7 = vld [vmem:[%s5850_s1 + $0x140] ss:$8 sps:$4 sm:$0xff]   ;;  %v4234_v15 = vcombine.low %v253_v61, %v255_v62 }
  0x1c   : > { %1341 = vmatprep.subr.bf16.mxu0 %v5147_v12  ;;  %2815 = vmatprep.subr.bf16.mxu1 %v5147_v12  ;;  %v5194_v8 = vld [vmem:[%s5850_s1 + $0x154] ss:$8 sps:$4 sm:$0xff]   ;;  %v257_v9 = vld [vmem:[%s5301_s14 + $0x100] sm:$0xff]  ;;  %v5192_v13 = vld [vmem:[%s5850_s1 + $0x150] ss:$8 sps:$4 sm:$0xff]   ;;  %v4426_v16 = vcombine.low %v2047_v63, %v2049_v0 }
  0x1d   : > { %v259_v10 = vld [vmem:[%s5301_s14 + $0x120] sm:$0xff]  ;;  %v2051_v11 = vld [vmem:[%s5301_s14 + $0x110] sm:$0xff] }
  0x1e   : > { %v2053_v12 = vld [vmem:[%s5301_s14 + $0x130] sm:$0xff]  ;;  %v5197_v14 = vld [vmem:[%s5850_s1 + $0x164] ss:$8 sps:$4 sm:$0xff]   ;;  %v4239_v17 = vcombine.high %v257_v9, %v259_v10  ;;  %v5195_v19 = vld [vmem:[%s5850_s1 + $0x160] ss:$8 sps:$4 sm:$0xff]  }
  0x1f   : > { %1342 = vmatpush1.bf16.msra.mxu0 %v5149_v18  ;;  %2816 = vmatpush1.bf16.msra.mxu1 %v5149_v18  ;;  %v4431_v18 = vcombine.high %v2051_v11, %v2053_v12  ;;  %v5210_v52 = vld [vmem:[%s5850_s1 + $0x1b0] ss:$8 sps:$4 sm:$0xff]   ;;  %v5212_v53 = vld [vmem:[%s5850_s1 + $0x1b4] ss:$8 sps:$4 sm:$0xff]   ;;  %v277_v62 = vld [vmem:[%s5301_s14 + $0x240] sm:$0xff] }
  0x20   : > { %1343 = vmatprep.subr.bf16.mxu0 %v5150_v20  ;;  %2817 = vmatprep.subr.bf16.mxu1 %v5150_v20  ;;  %v5200_v20 = vld [vmem:[%s5850_s1 + $0x174] ss:$8 sps:$4 sm:$0xff]   ;;  %v279_v63 = vld [vmem:[%s5301_s14 + $0x260] sm:$0xff] }
  0x21   : > { %v2071_v0 = vld [vmem:[%s5301_s14 + $0x250] sm:$0xff] }
  0x23   : > { %1344 = vmatpush1.bf16.msra.mxu0 %v5152_v21  ;;  %2818 = vmatpush1.bf16.msra.mxu1 %v5152_v21  ;;  %v261_v21 = vld [vmem:[%s5301_s14 + $0x140] sm:$0xff] }
  0x24   : > { %1345 = vmatprep.subr.bf16.mxu0 %v5153_v22  ;;  %2819 = vmatprep.subr.bf16.mxu1 %v5153_v22  ;;  %v263_v22 = vld [vmem:[%s5301_s14 + $0x160] sm:$0xff] }
  0x25   : > { %v4242_v39 = vcombine.low %v261_v21, %v263_v22 }
  0x27   : > { %1346 = vmatpush1.bf16.msra.mxu0 %v5155_v23  ;;  %2820 = vmatpush1.bf16.msra.mxu1 %v5155_v23  ;;  %v2055_v23 = vld [vmem:[%s5301_s14 + $0x150] sm:$0xff] }
  0x28   : > { %1347 = vmatprep.subr.bf16.mxu0 %v5156_v24  ;;  %2821 = vmatprep.subr.bf16.mxu1 %v5156_v24  ;;  %v2057_v24 = vld [vmem:[%s5301_s14 + $0x170] sm:$0xff] }
  0x29   : > { %v4434_v40 = vcombine.low %v2055_v23, %v2057_v24 }
  0x2b   : > { %1348 = vmatpush1.bf16.msra.mxu0 %v5158_v25  ;;  %2822 = vmatpush1.bf16.msra.mxu1 %v5158_v25  ;;  %v5198_v25 = vld [vmem:[%s5850_s1 + $0x170] ss:$8 sps:$4 sm:$0xff]  }
  0x2c   : > { %1349 = vmatprep.subr.bf16.mxu0 %v5159_v26  ;;  %2823 = vmatprep.subr.bf16.mxu1 %v5159_v26  ;;  %v5203_v26 = vld [vmem:[%s5850_s1 + $0x184] ss:$8 sps:$4 sm:$0xff]  }
  0x2f   : > { %1350 = vmatpush1.bf16.msra.mxu0 %v5161_v27  ;;  %2824 = vmatpush1.bf16.msra.mxu1 %v5161_v27  ;;  %v4238_v27 = vcombine.low %v257_v9, %v259_v10  ;;  %v283_v9 = vld [vmem:[%s5301_s14 + $0x2a0] sm:$0xff]  ;;  %v2075_v10 = vld [vmem:[%s5301_s14 + $0x290] sm:$0xff] }
  0x30   : > { %1351 = vmatprep.subr.bf16.mxu0 %v5162_v28  ;;  %2825 = vmatprep.subr.bf16.mxu1 %v5162_v28  ;;  %v4430_v28 = vcombine.low %v2051_v11, %v2053_v12  ;;  %v2077_v11 = vld [vmem:[%s5301_s14 + $0x2b0] sm:$0xff]  ;;  %v4258_v12 = vcombine.low %v277_v62, %v279_v63 }
  0x33   : > { %1352 = vmatpush1.bf16.msra.mxu0 %v5164_v29  ;;  %2826 = vmatpush1.bf16.msra.mxu1 %v5164_v29  ;;  %v4243_v29 = vcombine.high %v261_v21, %v263_v22  ;;  %v4454_v21 = vcombine.low %v2075_v10, %v2077_v11 }
  0x34   : > { %1353 = vmatprep.subr.bf16.mxu0 %v5165_v30  ;;  %2827 = vmatprep.subr.bf16.mxu1 %v5165_v30  ;;  %v4435_v30 = vcombine.high %v2055_v23, %v2057_v24  ;;  %v5216_v24 = vld [vmem:[%s5850_s1 + $0x1d0] ss:$8 sps:$4 sm:$0xff]  }
  0x37   : > { %1354 = vmatpush1.bf16.msra.mxu0 %v5167_v31  ;;  %2828 = vmatpush1.bf16.msra.mxu1 %v5167_v31  ;;  %v5201_v31 = vld [vmem:[%s5850_s1 + $0x180] ss:$8 sps:$4 sm:$0xff]  }
  0x38   : > { %1355 = vmatprep.subr.bf16.mxu0 %v5168_v32  ;;  %2829 = vmatprep.subr.bf16.mxu1 %v5168_v32  ;;  %v5206_v32 = vld [vmem:[%s5850_s1 + $0x194] ss:$8 sps:$4 sm:$0xff]  }
  0x3b   : > { %1356 = vmatpush1.bf16.msra.mxu0 %v5170_v33  ;;  %2830 = vmatpush1.bf16.msra.mxu1 %v5170_v33  ;;  %v265_v33 = vld [vmem:[%s5301_s14 + $0x180] sm:$0xff] }
  0x3c   : > { %1357 = vmatprep.subr.bf16.mxu0 %v5171_v34  ;;  %2831 = vmatprep.subr.bf16.mxu1 %v5171_v34  ;;  %v267_v34 = vld [vmem:[%s5301_s14 + $0x1a0] sm:$0xff] }
  0x3d   : > { %v4247_v41 = vcombine.high %v265_v33, %v267_v34 }
  0x3f   : > { %1358 = vmatpush1.bf16.msra.mxu0 %v5173_v35  ;;  %2832 = vmatpush1.bf16.msra.mxu1 %v5173_v35  ;;  %v2059_v35 = vld [vmem:[%s5301_s14 + $0x190] sm:$0xff] }
  0x40   : > { %1359 = vmatprep.subr.bf16.mxu0 %v5174_v36  ;;  %2833 = vmatprep.subr.bf16.mxu1 %v5174_v36  ;;  %v2061_v36 = vld [vmem:[%s5301_s14 + $0x1b0] sm:$0xff] }
  0x41   : > { %v4439_v42 = vcombine.high %v2059_v35, %v2061_v36  ;;  %v4438_v49 = vcombine.low %v2059_v35, %v2061_v36  ;;  %v295_v35 = vld [vmem:[%s5301_s14 + $0x360] sm:$0xff]  ;;  %v2087_v36 = vld [vmem:[%s5301_s14 + $0x350] sm:$0xff] }
  0x43   : > { %1360 = vmatpush1.bf16.msra.mxu0 %v5176_v37  ;;  %2834 = vmatpush1.bf16.msra.mxu1 %v5176_v37  ;;  %v5204_v37 = vld [vmem:[%s5850_s1 + $0x190] ss:$8 sps:$4 sm:$0xff]  }
  0x44   : > { %1682 = vmatprep.subr.bf16.mxu0 %v5179_v38  ;;  %3156 = vmatprep.subr.bf16.mxu1 %v5179_v38  ;;  %v5209_v38 = vld [vmem:[%s5850_s1 + $0x1a4] ss:$8 sps:$4 sm:$0xff]  }
  0x46   : > { %1362 = vmatmul.mubr.bf16.vlgmr.msra.gmra.mrb[0].mxu0 %v4222_v43  ;;  %2836 = vmatmul.mubr.bf16.vlgmr.msra.gmra.mrb[0].mxu1 %v4414_v44  ;;  %v5207_v43 = vld [vmem:[%s5850_s1 + $0x1a0] ss:$8 sps:$4 sm:$0xff]  }
  0x47   : > { %1683 = vmatpush1.bf16.msra.mxu0 %v5177_v45  ;;  %3157 = vmatpush1.bf16.msra.mxu1 %v5177_v45  ;;  %v269_v44 = vld [vmem:[%s5301_s14 + $0x1c0] sm:$0xff] }
  0x48   : > { %1371 = vmatprep.mubr.bf16.mxu0 %v4227_v46  ;;  %2845 = vmatprep.mubr.bf16.mxu1 %v4419_v47  ;;  %v271_v45 = vld [vmem:[%s5301_s14 + $0x1e0] sm:$0xff]  ;;  %v2063_v46 = vld [vmem:[%s5301_s14 + $0x1d0] sm:$0xff] }
  0x49   : > { %1684 = vmatprep.subr.bf16.mxu0 %v5182_v48  ;;  %3158 = vmatprep.subr.bf16.mxu1 %v5182_v48  ;;  %v2065_v47 = vld [vmem:[%s5301_s14 + $0x1f0] sm:$0xff]  ;;  %v4246_v48 = vcombine.low %v265_v33, %v267_v34  ;;  %v4251_v50 = vcombine.high %v269_v44, %v271_v45  ;;  %v293_v34 = vld [vmem:[%s5301_s14 + $0x340] sm:$0xff] }
  0x4b   : > { %1685 = vmatpush1.bf16.msra.mxu0 %v5180_v51  ;;  %3159 = vmatpush1.bf16.msra.mxu1 %v5180_v51  ;;  %v4443_v51 = vcombine.high %v2063_v46, %v2065_v47 }
  0x4c   : > { %1686 = vmatprep.subr.bf16.mxu0 %v5185_v54  ;;  %3160 = vmatprep.subr.bf16.mxu1 %v5185_v54  ;;  %v273_v54 = vld [vmem:[%s5301_s14 + $0x200] sm:$0xff] }
  0x4e   : > { %1372 = vmatmul.mubr.bf16.gmra.mrb[4].mxu0 %v4226_v55  ;;  %2846 = vmatmul.mubr.bf16.gmra.mrb[4].mxu1 %v4418_v56  ;;  %v275_v55 = vld [vmem:[%s5301_s14 + $0x220] sm:$0xff]  ;;  %v2067_v56 = vld [vmem:[%s5301_s14 + $0x210] sm:$0xff] }
  0x4f   : > { %1381 = vmatprep.mubr.bf16.mxu0 %v4231_v57  ;;  %2855 = vmatprep.mubr.bf16.mxu1 %v4423_v58  ;;  %v2069_v57 = vld [vmem:[%s5301_s14 + $0x230] sm:$0xff]  ;;  %v4250_v58 = vcombine.low %v269_v44, %v271_v45  ;;  %v297_v44 = vld [vmem:[%s5301_s14 + $0x380] sm:$0xff] }
  0x50   : > { %1687 = vmatpush1.bf16.msra.mxu0 %v5183_v59  ;;  %3161 = vmatpush1.bf16.msra.mxu1 %v5183_v59  ;;  %v4442_v59 = vcombine.low %v2063_v46, %v2065_v47  ;;  %v4447_v61 = vcombine.high %v2067_v56, %v2069_v57  ;;  %v299_v45 = vld [vmem:[%s5301_s14 + $0x3a0] sm:$0xff]  ;;  %v2091_v46 = vld [vmem:[%s5301_s14 + $0x390] sm:$0xff] }
  0x51   : > { %1688 = vmatprep.subr.bf16.mxu0 %v5188_v60  ;;  %3162 = vmatprep.subr.bf16.mxu1 %v5188_v60  ;;  %v4255_v60 = vcombine.high %v273_v54, %v275_v55  ;;  %v2093_v47 = vld [vmem:[%s5301_s14 + $0x3b0] sm:$0xff] }
  0x54   : > { %1689 = vmatpush1.bf16.msra.mxu0 %v5186_v1  ;;  %3163 = vmatpush1.bf16.msra.mxu1 %v5186_v1  ;;  %v2073_v1 = vld [vmem:[%s5301_s14 + $0x270] sm:$0xff] }
  0x55   : > { %1690 = vmatprep.subr.bf16.mxu0 %v5191_v2  ;;  %3164 = vmatprep.subr.bf16.mxu1 %v5191_v2  ;;  %v4254_v2 = vcombine.low %v273_v54, %v275_v55  ;;  %v2095_v54 = vld [vmem:[%s5301_s14 + $0x3d0] sm:$0xff] }
  0x56   : > { %1382 = vmatmul.mubr.bf16.gmra.mrb[8].mxu0 %v4230_v3  ;;  %2856 = vmatmul.mubr.bf16.gmra.mrb[8].mxu1 %v4422_v4  ;;  %v4446_v3 = vcombine.low %v2067_v56, %v2069_v57  ;;  %v4259_v4 = vcombine.high %v277_v62, %v279_v63  ;;  %v2097_v55 = vld [vmem:[%s5301_s14 + $0x3f0] sm:$0xff]  ;;  %v4278_v56 = vcombine.low %v297_v44, %v299_v45  ;;  %v305_v62 = vld [vmem:[%s5301_s14 + $0x400] sm:$0xff] }
  0x57   : > { %1391 = vmatprep.mubr.bf16.mxu0 %v4235_v5  ;;  %2865 = vmatprep.mubr.bf16.mxu1 %v4427_v6  ;;  %v4451_v5 = vcombine.high %v2071_v0, %v2073_v1  ;;  %v5213_v6 = vld [vmem:[%s5850_s1 + $0x1c0] ss:$8 sps:$4 sm:$0xff]   ;;  %v4470_v57 = vcombine.low %v2091_v46, %v2093_v47 }
  0x58   : > { %1691 = vmatpush1.bf16.msra.mxu0 %v5189_v7  ;;  %3165 = vmatpush1.bf16.msra.mxu1 %v5189_v7  ;;  %v5215_v7 = vld [vmem:[%s5850_s1 + $0x1c4] ss:$8 sps:$4 sm:$0xff]  }
  0x59   : > { %1692 = vmatprep.subr.bf16.mxu0 %v5194_v8  ;;  %3166 = vmatprep.subr.bf16.mxu1 %v5194_v8  ;;  %v281_v8 = vld [vmem:[%s5301_s14 + $0x280] sm:$0xff] }
  0x5a   : > { %v307_v63 = vld [vmem:[%s5301_s14 + $0x420] sm:$0xff] }
  0x5c   : > { %1693 = vmatpush1.bf16.msra.mxu0 %v5192_v13  ;;  %3167 = vmatpush1.bf16.msra.mxu1 %v5192_v13  ;;  %v4450_v13 = vcombine.low %v2071_v0, %v2073_v1  ;;  %v2099_v0 = vld [vmem:[%s5301_s14 + $0x410] sm:$0xff] }
  0x5d   : > { %1694 = vmatprep.subr.bf16.mxu0 %v5197_v14  ;;  %3168 = vmatprep.subr.bf16.mxu1 %v5197_v14  ;;  %v4263_v14 = vcombine.high %v281_v8, %v283_v9  ;;  %v2101_v1 = vld [vmem:[%s5301_s14 + $0x430] sm:$0xff] }
  0x5e   : > { %1392 = vmatmul.mubr.bf16.gmra.mrb[12].mxu0 %v4234_v15  ;;  %2866 = vmatmul.mubr.bf16.gmra.mrb[12].mxu1 %v4426_v16  ;;  %v4455_v15 = vcombine.high %v2075_v10, %v2077_v11  ;;  %v285_v16 = vld [vmem:[%s5301_s14 + $0x2c0] sm:$0xff]  ;;  %v4286_v10 = vcombine.low %v305_v62, %v307_v63  ;;  %v4478_v11 = vcombine.low %v2099_v0, %v2101_v1 }
  0x5f   : > { %1401 = vmatprep.mubr.bf16.mxu0 %v4239_v17  ;;  %2875 = vmatprep.mubr.bf16.mxu1 %v4431_v18  ;;  %v287_v17 = vld [vmem:[%s5301_s14 + $0x2e0] sm:$0xff]  ;;  %v2079_v18 = vld [vmem:[%s5301_s14 + $0x2d0] sm:$0xff] }
  0x60   : > { %1695 = vmatpush1.bf16.msra.mxu0 %v5195_v19  ;;  %3169 = vmatpush1.bf16.msra.mxu1 %v5195_v19  ;;  %v2081_v19 = vld [vmem:[%s5301_s14 + $0x2f0] sm:$0xff]  ;;  %v4267_v22 = vcombine.high %v285_v16, %v287_v17 }
  0x61   : > { %1696 = vmatprep.subr.bf16.mxu0 %v5200_v20  ;;  %3170 = vmatprep.subr.bf16.mxu1 %v5200_v20  ;;  %v4262_v20 = vcombine.low %v281_v8, %v283_v9  ;;  %v4459_v23 = vcombine.high %v2079_v18, %v2081_v19  ;;  %v2103_v8 = vld [vmem:[%s5301_s14 + $0x450] sm:$0xff] }
  0x62   : > { %v2105_v9 = vld [vmem:[%s5301_s14 + $0x470] sm:$0xff] }
  0x64   : > { %1697 = vmatpush1.bf16.msra.mxu0 %v5198_v25  ;;  %3171 = vmatpush1.bf16.msra.mxu1 %v5198_v25  ;;  %v5218_v25 = vld [vmem:[%s5850_s1 + $0x1d4] ss:$8 sps:$4 sm:$0xff]  }
  0x65   : > { %1698 = vmatprep.subr.bf16.mxu0 %v5203_v26  ;;  %3172 = vmatprep.subr.bf16.mxu1 %v5203_v26  ;;  %v289_v26 = vld [vmem:[%s5301_s14 + $0x300] sm:$0xff] }
  0x66   : > { %1402 = vmatmul.mubr.bf16.gmra.mrb[16].mxu0 %v4238_v27  ;;  %2876 = vmatmul.mubr.bf16.gmra.mrb[16].mxu1 %v4430_v28  ;;  %v291_v27 = vld [vmem:[%s5301_s14 + $0x320] sm:$0xff]  ;;  %v2083_v28 = vld [vmem:[%s5301_s14 + $0x310] sm:$0xff] }
  0x67   : > { %1411 = vmatprep.mubr.bf16.mxu0 %v4243_v29  ;;  %2885 = vmatprep.mubr.bf16.mxu1 %v4435_v30  ;;  %v2085_v29 = vld [vmem:[%s5301_s14 + $0x330] sm:$0xff]  ;;  %v4266_v30 = vcombine.low %v285_v16, %v287_v17 }
  0x68   : > { %1699 = vmatpush1.bf16.msra.mxu0 %v5201_v31  ;;  %3173 = vmatpush1.bf16.msra.mxu1 %v5201_v31  ;;  %v4458_v31 = vcombine.low %v2079_v18, %v2081_v19  ;;  %v4463_v33 = vcombine.high %v2083_v28, %v2085_v29  ;;  %v2107_v16 = vld [vmem:[%s5301_s14 + $0x490] sm:$0xff]  ;;  %v4482_v19 = vcombine.low %v2103_v8, %v2105_v9 }
  0x69   : > { %1700 = vmatprep.subr.bf16.mxu0 %v5206_v32  ;;  %3174 = vmatprep.subr.bf16.mxu1 %v5206_v32  ;;  %v4271_v32 = vcombine.high %v289_v26, %v291_v27  ;;  %v2109_v17 = vld [vmem:[%s5301_s14 + $0x4b0] sm:$0xff] }
  0x6c   : > { %1701 = vmatpush1.bf16.msra.mxu0 %v5204_v37  ;;  %3175 = vmatpush1.bf16.msra.mxu1 %v5204_v37  ;;  %v2089_v37 = vld [vmem:[%s5301_s14 + $0x370] sm:$0xff] }
  0x6d   : > { %1702 = vmatprep.subr.bf16.mxu0 %v5209_v38  ;;  %3176 = vmatprep.subr.bf16.mxu1 %v5209_v38  ;;  %v4270_v38 = vcombine.low %v289_v26, %v291_v27  ;;  %v4486_v27 = vcombine.low %v2107_v16, %v2109_v17 }
  0x6e   : > { %1412 = vmatmul.mubr.bf16.gmra.mrb[20].mxu0 %v4242_v39  ;;  %2886 = vmatmul.mubr.bf16.gmra.mrb[20].mxu1 %v4434_v40  ;;  %v4462_v39 = vcombine.low %v2083_v28, %v2085_v29  ;;  %v4275_v40 = vcombine.high %v293_v34, %v295_v35 }
  0x6f   : > { %1421 = vmatprep.mubr.bf16.mxu0 %v4247_v41  ;;  %2895 = vmatprep.mubr.bf16.mxu1 %v4439_v42  ;;  %v4467_v41 = vcombine.high %v2087_v36, %v2089_v37  ;;  %v5219_v42 = vld [vmem:[%s5850_s1 + $0x1e0] ss:$8 sps:$4 sm:$0xff]  }
  0x70   : > { %1703 = vmatpush1.bf16.msra.mxu0 %v5207_v43  ;;  %3177 = vmatpush1.bf16.msra.mxu1 %v5207_v43  ;;  %v5221_v43 = vld [vmem:[%s5850_s1 + $0x1e4] ss:$8 sps:$4 sm:$0xff]  }
  0x71   : > { %1704 = vmatprep.subr.bf16.mxu0 %v5212_v53  ;;  %3178 = vmatprep.subr.bf16.mxu1 %v5212_v53  ;;  %v303_v53 = vld [vmem:[%s5301_s14 + $0x3e0] sm:$0xff] }
  0x74   : > { %1705 = vmatpush1.bf16.msra.mxu0 %v5210_v52  ;;  %3179 = vmatpush1.bf16.msra.mxu1 %v5210_v52  ;;  %v301_v52 = vld [vmem:[%s5301_s14 + $0x3c0] sm:$0xff] }
  0x75   : > { %1706 = vmatprep.subr.bf16.mxu0 %v5215_v7  ;;  %3180 = vmatprep.subr.bf16.mxu1 %v5215_v7  ;;  %v311_v7 = vld [vmem:[%s5301_s14 + $0x460] sm:$0xff] }
  0x76   : > { %1422 = vmatmul.mubr.bf16.gmra.mrb[24].mxu0 %v4246_v48  ;;  %2896 = vmatmul.mubr.bf16.gmra.mrb[24].mxu1 %v4438_v49  ;;  %v4274_v48 = vcombine.low %v293_v34, %v295_v35  ;;  %v4466_v49 = vcombine.low %v2087_v36, %v2089_v37 }
  0x77   : > { %1431 = vmatprep.mubr.bf16.mxu0 %v4251_v50  ;;  %2905 = vmatprep.mubr.bf16.mxu1 %v4443_v51  ;;  %v4279_v50 = vcombine.high %v297_v44, %v299_v45  ;;  %v4471_v51 = vcombine.high %v2091_v46, %v2093_v47  ;;  %v329_v46 = vld [vmem:[%s5301_s14 + $0x580] sm:$0xff] }
  0x78   : > { %1707 = vmatpush1.bf16.msra.mxu0 %v5213_v6  ;;  %3181 = vmatpush1.bf16.msra.mxu1 %v5213_v6  ;;  %v309_v6 = vld [vmem:[%s5301_s14 + $0x440] sm:$0xff] }
  0x79   : > { %1708 = vmatprep.subr.bf16.mxu0 %v5218_v25  ;;  %3182 = vmatprep.subr.bf16.mxu1 %v5218_v25  ;;  %v4290_v18 = vcombine.low %v309_v6, %v311_v7  ;;  %v2113_v25 = vld [vmem:[%s5301_s14 + $0x4f0] sm:$0xff]  ;;  %v331_v47 = vld [vmem:[%s5301_s14 + $0x5a0] sm:$0xff] }
  0x7c   : > { %1709 = vmatpush1.bf16.msra.mxu0 %v5216_v24  ;;  %3183 = vmatpush1.bf16.msra.mxu1 %v5216_v24  ;;  %v2111_v24 = vld [vmem:[%s5301_s14 + $0x4d0] sm:$0xff] }
  0x7d   : > { %1710 = vmatprep.subr.bf16.mxu0 %v5221_v43  ;;  %3184 = vmatprep.subr.bf16.mxu1 %v5221_v43  ;;  %v4491_v29 = vcombine.high %v2111_v24, %v2113_v25  ;;  %v4490_v35 = vcombine.low %v2111_v24, %v2113_v25  ;;  %v2143_v24 = vld [vmem:[%s5301_s14 + $0x6d0] sm:$0xff] }
  0x7e   : > { %1432 = vmatmul.mubr.bf16.gmra.mrb[28].mxu0 %v4250_v58  ;;  %2906 = vmatmul.mubr.bf16.gmra.mrb[28].mxu1 %v4442_v59  ;;  %v4283_v58 = vcombine.high %v301_v52, %v303_v53  ;;  %v4475_v59 = vcombine.high %v2095_v54, %v2097_v55  ;;  %v2145_v25 = vld [vmem:[%s5301_s14 + $0x6f0] sm:$0xff] }
  0x7f   : > { %1441 = vmatprep.mubr.bf16.mxu0 %v4255_v60  ;;  %2915 = vmatprep.mubr.bf16.mxu1 %v4447_v61  ;;  %v5222_v60 = vld [vmem:[%s5850_s1 + $0x1f0] ss:$8 sps:$4 sm:$0xff]   ;;  %v5224_v61 = vld [vmem:[%s5850_s1 + $0x1f4] ss:$8 sps:$4 sm:$0xff]  }
  0x80   : > { %1711 = vmatpush1.bf16.msra.mxu0 %v5219_v42  ;;  %3185 = vmatpush1.bf16.msra.mxu1 %v5219_v42 }
  0x81   : > { %1712 = vmatprep.subr.bf16.mxu0 %v5224_v61  ;;  %3186 = vmatprep.subr.bf16.mxu1 %v5224_v61 }
  0x84   : > { %1713 = vmatpush1.bf16.msra.mxu0 %v5222_v60  ;;  %3187 = vmatpush1.bf16.msra.mxu1 %v5222_v60 }
  0x86   : > { %1442 = vmatmul.mubr.bf16.gmra.mrb[32].mxu0 %v4254_v2  ;;  %2916 = vmatmul.mubr.bf16.gmra.mrb[32].mxu1 %v4446_v3  ;;  %v4282_v2 = vcombine.low %v301_v52, %v303_v53  ;;  %v4474_v3 = vcombine.low %v2095_v54, %v2097_v55  ;;  %v4311_v52 = vcombine.high %v329_v46, %v331_v47  ;;  %v333_v54 = vld [vmem:[%s5301_s14 + $0x5c0] sm:$0xff] }
  0x87   : > { %1451 = vmatprep.mubr.bf16.mxu0 %v4259_v4  ;;  %2925 = vmatprep.mubr.bf16.mxu1 %v4451_v5  ;;  %v4287_v4 = vcombine.high %v305_v62, %v307_v63  ;;  %v4479_v5 = vcombine.high %v2099_v0, %v2101_v1  ;;  %v335_v55 = vld [vmem:[%s5301_s14 + $0x5e0] sm:$0xff]  ;;  %v2131_v0 = vld [vmem:[%s5301_s14 + $0x610] sm:$0xff] }
  0x88   : > { %v4315_v60 = vcombine.high %v333_v54, %v335_v55  ;;  %v337_v62 = vld [vmem:[%s5301_s14 + $0x600] sm:$0xff]  ;;  %v2133_v1 = vld [vmem:[%s5301_s14 + $0x630] sm:$0xff] }
  0x89   : > { %v339_v63 = vld [vmem:[%s5301_s14 + $0x620] sm:$0xff] }
  0x8e   : > { %1452 = vmatmul.mubr.bf16.gmra.mrb[36].mxu0 %v4258_v12  ;;  %2926 = vmatmul.mubr.bf16.gmra.mrb[36].mxu1 %v4450_v13  ;;  %v4291_v12 = vcombine.high %v309_v6, %v311_v7  ;;  %v4483_v13 = vcombine.high %v2103_v8, %v2105_v9  ;;  %v341_v6 = vld [vmem:[%s5301_s14 + $0x640] sm:$0xff]  ;;  %v2135_v8 = vld [vmem:[%s5301_s14 + $0x650] sm:$0xff] }
  0x8f   : > { %1461 = vmatprep.mubr.bf16.mxu0 %v4263_v14  ;;  %2935 = vmatprep.mubr.bf16.mxu1 %v4455_v15  ;;  %v313_v14 = vld [vmem:[%s5301_s14 + $0x480] sm:$0xff]  ;;  %v2137_v9 = vld [vmem:[%s5301_s14 + $0x670] sm:$0xff] }
  0x90   : > { %v315_v15 = vld [vmem:[%s5301_s14 + $0x4a0] sm:$0xff] }
  0x91   : > { %v4294_v26 = vcombine.low %v313_v14, %v315_v15  ;;  %v343_v7 = vld [vmem:[%s5301_s14 + $0x660] sm:$0xff] }
  0x96   : > { %1462 = vmatmul.mubr.bf16.gmra.mrb[40].mxu0 %v4262_v20  ;;  %2936 = vmatmul.mubr.bf16.gmra.mrb[40].mxu1 %v4454_v21  ;;  %v4295_v20 = vcombine.high %v313_v14, %v315_v15  ;;  %v4487_v21 = vcombine.high %v2107_v16, %v2109_v17  ;;  %v345_v14 = vld [vmem:[%s5301_s14 + $0x680] sm:$0xff]  ;;  %v2139_v16 = vld [vmem:[%s5301_s14 + $0x690] sm:$0xff] }
  0x97   : > { %1471 = vmatprep.mubr.bf16.mxu0 %v4267_v22  ;;  %2945 = vmatprep.mubr.bf16.mxu1 %v4459_v23  ;;  %v317_v22 = vld [vmem:[%s5301_s14 + $0x4c0] sm:$0xff]  ;;  %v2141_v17 = vld [vmem:[%s5301_s14 + $0x6b0] sm:$0xff] }
  0x98   : > { %v319_v23 = vld [vmem:[%s5301_s14 + $0x4e0] sm:$0xff] }
  0x99   : > { %v4299_v28 = vcombine.high %v317_v22, %v319_v23  ;;  %v4298_v34 = vcombine.low %v317_v22, %v319_v23  ;;  %v347_v15 = vld [vmem:[%s5301_s14 + $0x6a0] sm:$0xff] }
  0x9a   : > { %v349_v22 = vld [vmem:[%s5301_s14 + $0x6c0] sm:$0xff] }
  0x9b   : > { %v351_v23 = vld [vmem:[%s5301_s14 + $0x6e0] sm:$0xff] }
  0x9e   : > { %1472 = vmatmul.mubr.bf16.gmra.mrb[44].mxu0 %v4266_v30  ;;  %2946 = vmatmul.mubr.bf16.gmra.mrb[44].mxu1 %v4458_v31  ;;  %v321_v30 = vld [vmem:[%s5301_s14 + $0x500] sm:$0xff] }
  0x9f   : > { %1481 = vmatprep.mubr.bf16.mxu0 %v4271_v32  ;;  %2955 = vmatprep.mubr.bf16.mxu1 %v4463_v33  ;;  %v323_v31 = vld [vmem:[%s5301_s14 + $0x520] sm:$0xff]  ;;  %v2115_v32 = vld [vmem:[%s5301_s14 + $0x510] sm:$0xff] }
  0xa0   : > { %v2117_v33 = vld [vmem:[%s5301_s14 + $0x530] sm:$0xff]  ;;  %v4303_v36 = vcombine.high %v321_v30, %v323_v31  ;;  %v4302_v42 = vcombine.low %v321_v30, %v323_v31  ;;  %v353_v30 = vld [vmem:[%s5301_s14 + $0x700] sm:$0xff] }
  0xa1   : > { %v4495_v37 = vcombine.high %v2115_v32, %v2117_v33  ;;  %v4494_v43 = vcombine.low %v2115_v32, %v2117_v33  ;;  %v355_v31 = vld [vmem:[%s5301_s14 + $0x720] sm:$0xff]  ;;  %v2147_v32 = vld [vmem:[%s5301_s14 + $0x710] sm:$0xff] }
  0xa2   : > { %v2149_v33 = vld [vmem:[%s5301_s14 + $0x730] sm:$0xff] }
  0xa6   : > { %1482 = vmatmul.mubr.bf16.gmra.mrb[48].mxu0 %v4270_v38  ;;  %2956 = vmatmul.mubr.bf16.gmra.mrb[48].mxu1 %v4462_v39  ;;  %v325_v38 = vld [vmem:[%s5301_s14 + $0x540] sm:$0xff] }
  0xa7   : > { %1491 = vmatprep.mubr.bf16.mxu0 %v4275_v40  ;;  %2965 = vmatprep.mubr.bf16.mxu1 %v4467_v41  ;;  %v327_v39 = vld [vmem:[%s5301_s14 + $0x560] sm:$0xff]  ;;  %v2119_v40 = vld [vmem:[%s5301_s14 + $0x550] sm:$0xff] }
  0xa8   : > { %v2121_v41 = vld [vmem:[%s5301_s14 + $0x570] sm:$0xff]  ;;  %v4307_v44 = vcombine.high %v325_v38, %v327_v39 }
  0xa9   : > { %v4499_v45 = vcombine.high %v2119_v40, %v2121_v41 }
  0xae   : > { %1492 = vmatmul.mubr.bf16.gmra.mrb[52].mxu0 %v4274_v48  ;;  %2966 = vmatmul.mubr.bf16.gmra.mrb[52].mxu1 %v4466_v49  ;;  %v2123_v48 = vld [vmem:[%s5301_s14 + $0x590] sm:$0xff] }
  0xaf   : > { %1501 = vmatprep.mubr.bf16.mxu0 %v4279_v50  ;;  %2975 = vmatprep.mubr.bf16.mxu1 %v4471_v51  ;;  %v2125_v49 = vld [vmem:[%s5301_s14 + $0x5b0] sm:$0xff]  ;;  %v4306_v50 = vcombine.low %v325_v38, %v327_v39  ;;  %v4498_v51 = vcombine.low %v2119_v40, %v2121_v41  ;;  %v357_v38 = vld [vmem:[%s5301_s14 + $0x740] sm:$0xff] }
  0xb0   : > { %v4503_v53 = vcombine.high %v2123_v48, %v2125_v49  ;;  %v359_v39 = vld [vmem:[%s5301_s14 + $0x760] sm:$0xff]  ;;  %v2151_v40 = vld [vmem:[%s5301_s14 + $0x750] sm:$0xff] }
  0xb1   : > { %v2153_v41 = vld [vmem:[%s5301_s14 + $0x770] sm:$0xff] }
  0xb6   : > { %1502 = vmatmul.mubr.bf16.gmra.mrb[56].mxu0 %v4278_v56  ;;  %2976 = vmatmul.mubr.bf16.gmra.mrb[56].mxu1 %v4470_v57  ;;  %v2127_v56 = vld [vmem:[%s5301_s14 + $0x5d0] sm:$0xff] }
  0xb7   : > { %1511 = vmatprep.mubr.bf16.mxu0 %v4283_v58  ;;  %2985 = vmatprep.mubr.bf16.mxu1 %v4475_v59  ;;  %v2129_v57 = vld [vmem:[%s5301_s14 + $0x5f0] sm:$0xff]  ;;  %v4310_v58 = vcombine.low %v329_v46, %v331_v47  ;;  %v4502_v59 = vcombine.low %v2123_v48, %v2125_v49  ;;  %v361_v46 = vld [vmem:[%s5301_s14 + $0x780] sm:$0xff] }
  0xb8   : > { %v4507_v61 = vcombine.high %v2127_v56, %v2129_v57  ;;  %v363_v47 = vld [vmem:[%s5301_s14 + $0x7a0] sm:$0xff]  ;;  %v2155_v48 = vld [vmem:[%s5301_s14 + $0x790] sm:$0xff] }
  0xb9   : > { %v2157_v49 = vld [vmem:[%s5301_s14 + $0x7b0] sm:$0xff] }
  0xbe   : > { %1512 = vmatmul.mubr.bf16.gmra.mrb[60].mxu0 %v4282_v2  ;;  %2986 = vmatmul.mubr.bf16.gmra.mrb[60].mxu1 %v4474_v3  ;;  %v4314_v2 = vcombine.low %v333_v54, %v335_v55  ;;  %v4506_v3 = vcombine.low %v2127_v56, %v2129_v57  ;;  %v365_v54 = vld [vmem:[%s5301_s14 + $0x7c0] sm:$0xff]  ;;  %v2159_v56 = vld [vmem:[%s5301_s14 + $0x7d0] sm:$0xff] }
  0xbf   : > { %1521 = vmatprep.mubr.bf16.mxu0 %v4287_v4  ;;  %2995 = vmatprep.mubr.bf16.mxu1 %v4479_v5  ;;  %v4319_v4 = vcombine.high %v337_v62, %v339_v63  ;;  %v4511_v5 = vcombine.high %v2131_v0, %v2133_v1  ;;  %v367_v55 = vld [vmem:[%s5301_s14 + $0x7e0] sm:$0xff]  ;;  %v2161_v57 = vld [vmem:[%s5301_s14 + $0x7f0] sm:$0xff] }
  0xc6   : > { %1522 = vmatmul.mubr.bf16.gmra.mrb[64].mxu0 %v4286_v10  ;;  %2996 = vmatmul.mubr.bf16.gmra.mrb[64].mxu1 %v4478_v11  ;;  %v4318_v10 = vcombine.low %v337_v62, %v339_v63  ;;  %v4510_v11 = vcombine.low %v2131_v0, %v2133_v1  ;;  %v242_v62 = vld [vmem:[%s5301_s14 + $0x8] sm:$0xff]  ;;  %v2036_v0 = vld [vmem:[%s5301_s14 + $0x18] sm:$0xff] }
  0xc7   : > { %1531 = vmatprep.mubr.bf16.mxu0 %v4291_v12  ;;  %3005 = vmatprep.mubr.bf16.mxu1 %v4483_v13  ;;  %v4323_v12 = vcombine.high %v341_v6, %v343_v7  ;;  %v4515_v13 = vcombine.high %v2135_v8, %v2137_v9  ;;  %v244_v63 = vld [vmem:[%s5301_s14 + $0x28] sm:$0xff]  ;;  %v2038_v1 = vld [vmem:[%s5301_s14 + $0x38] sm:$0xff] }
  0xce   : > { %1532 = vmatmul.mubr.bf16.gmra.mrb[68].mxu0 %v4290_v18  ;;  %3006 = vmatmul.mubr.bf16.gmra.mrb[68].mxu1 %v4482_v19  ;;  %v4322_v18 = vcombine.low %v341_v6, %v343_v7  ;;  %v4514_v19 = vcombine.low %v2135_v8, %v2137_v9  ;;  %v246_v6 = vld [vmem:[%s5301_s14 + $0x48] sm:$0xff]  ;;  %v2040_v8 = vld [vmem:[%s5301_s14 + $0x58] sm:$0xff] }
  0xcf   : > { %1541 = vmatprep.mubr.bf16.mxu0 %v4295_v20  ;;  %3015 = vmatprep.mubr.bf16.mxu1 %v4487_v21  ;;  %v4327_v20 = vcombine.high %v345_v14, %v347_v15  ;;  %v4519_v21 = vcombine.high %v2139_v16, %v2141_v17  ;;  %v248_v7 = vld [vmem:[%s5301_s14 + $0x68] sm:$0xff]  ;;  %v2042_v9 = vld [vmem:[%s5301_s14 + $0x78] sm:$0xff] }
  0xd6   : > { %1542 = vmatmul.mubr.bf16.gmra.mrb[72].mxu0 %v4294_v26  ;;  %3016 = vmatmul.mubr.bf16.gmra.mrb[72].mxu1 %v4486_v27  ;;  %v4326_v26 = vcombine.low %v345_v14, %v347_v15  ;;  %v4518_v27 = vcombine.low %v2139_v16, %v2141_v17  ;;  %v250_v14 = vld [vmem:[%s5301_s14 + $0x88] sm:$0xff]  ;;  %v2044_v16 = vld [vmem:[%s5301_s14 + $0x98] sm:$0xff] }
  0xd7   : > { %1551 = vmatprep.mubr.bf16.mxu0 %v4299_v28  ;;  %3025 = vmatprep.mubr.bf16.mxu1 %v4491_v29  ;;  %v4331_v28 = vcombine.high %v349_v22, %v351_v23  ;;  %v4523_v29 = vcombine.high %v2143_v24, %v2145_v25  ;;  %v252_v15 = vld [vmem:[%s5301_s14 + $0xa8] sm:$0xff]  ;;  %v2046_v17 = vld [vmem:[%s5301_s14 + $0xb8] sm:$0xff] }
  0xde   : > { %1552 = vmatmul.mubr.bf16.gmra.mrb[76].mxu0 %v4298_v34  ;;  %3026 = vmatmul.mubr.bf16.gmra.mrb[76].mxu1 %v4490_v35  ;;  %v4330_v34 = vcombine.low %v349_v22, %v351_v23  ;;  %v4522_v35 = vcombine.low %v2143_v24, %v2145_v25  ;;  %v254_v22 = vld [vmem:[%s5301_s14 + $0xc8] sm:$0xff]  ;;  %v2048_v24 = vld [vmem:[%s5301_s14 + $0xd8] sm:$0xff] }
  0xdf   : > { %1561 = vmatprep.mubr.bf16.mxu0 %v4303_v36  ;;  %3035 = vmatprep.mubr.bf16.mxu1 %v4495_v37  ;;  %v4335_v36 = vcombine.high %v353_v30, %v355_v31  ;;  %v4527_v37 = vcombine.high %v2147_v32, %v2149_v33  ;;  %v256_v23 = vld [vmem:[%s5301_s14 + $0xe8] sm:$0xff]  ;;  %v2050_v25 = vld [vmem:[%s5301_s14 + $0xf8] sm:$0xff] }
  0xe6   : > { %1562 = vmatmul.mubr.bf16.gmra.mrb[80].mxu0 %v4302_v42  ;;  %3036 = vmatmul.mubr.bf16.gmra.mrb[80].mxu1 %v4494_v43  ;;  %v4334_v42 = vcombine.low %v353_v30, %v355_v31  ;;  %v4526_v43 = vcombine.low %v2147_v32, %v2149_v33  ;;  %v258_v30 = vld [vmem:[%s5301_s14 + $0x108] sm:$0xff]  ;;  %v2052_v32 = vld [vmem:[%s5301_s14 + $0x118] sm:$0xff] }
  0xe7   : > { %1571 = vmatprep.mubr.bf16.mxu0 %v4307_v44  ;;  %3045 = vmatprep.mubr.bf16.mxu1 %v4499_v45  ;;  %v4339_v44 = vcombine.high %v357_v38, %v359_v39  ;;  %v4531_v45 = vcombine.high %v2151_v40, %v2153_v41  ;;  %v260_v31 = vld [vmem:[%s5301_s14 + $0x128] sm:$0xff]  ;;  %v2054_v33 = vld [vmem:[%s5301_s14 + $0x138] sm:$0xff] }
  0xee   : > { %1572 = vmatmul.mubr.bf16.gmra.mrb[84].mxu0 %v4306_v50  ;;  %3046 = vmatmul.mubr.bf16.gmra.mrb[84].mxu1 %v4498_v51  ;;  %v4338_v50 = vcombine.low %v357_v38, %v359_v39  ;;  %v4530_v51 = vcombine.low %v2151_v40, %v2153_v41  ;;  %v262_v38 = vld [vmem:[%s5301_s14 + $0x148] sm:$0xff]  ;;  %v2056_v40 = vld [vmem:[%s5301_s14 + $0x158] sm:$0xff] }
  0xef   : > { %1581 = vmatprep.mubr.bf16.mxu0 %v4311_v52  ;;  %3055 = vmatprep.mubr.bf16.mxu1 %v4503_v53  ;;  %v4343_v52 = vcombine.high %v361_v46, %v363_v47  ;;  %v4535_v53 = vcombine.high %v2155_v48, %v2157_v49  ;;  %v264_v39 = vld [vmem:[%s5301_s14 + $0x168] sm:$0xff]  ;;  %v2058_v41 = vld [vmem:[%s5301_s14 + $0x178] sm:$0xff] }
  0xf6   : > { %1582 = vmatmul.mubr.bf16.gmra.mrb[88].mxu0 %v4310_v58  ;;  %3056 = vmatmul.mubr.bf16.gmra.mrb[88].mxu1 %v4502_v59  ;;  %v4342_v58 = vcombine.low %v361_v46, %v363_v47  ;;  %v4534_v59 = vcombine.low %v2155_v48, %v2157_v49  ;;  %v266_v46 = vld [vmem:[%s5301_s14 + $0x188] sm:$0xff]  ;;  %v2060_v48 = vld [vmem:[%s5301_s14 + $0x198] sm:$0xff] }
  0xf7   : > { %1591 = vmatprep.mubr.bf16.mxu0 %v4315_v60  ;;  %3065 = vmatprep.mubr.bf16.mxu1 %v4507_v61  ;;  %v4347_v60 = vcombine.high %v365_v54, %v367_v55  ;;  %v4539_v61 = vcombine.high %v2159_v56, %v2161_v57  ;;  %v268_v47 = vld [vmem:[%s5301_s14 + $0x1a8] sm:$0xff]  ;;  %v2062_v49 = vld [vmem:[%s5301_s14 + $0x1b8] sm:$0xff] }
  0xfe   : > { %1592 = vmatmul.mubr.bf16.gmra.mrb[92].mxu0 %v4314_v2  ;;  %3066 = vmatmul.mubr.bf16.gmra.mrb[92].mxu1 %v4506_v3  ;;  %v4346_v2 = vcombine.low %v365_v54, %v367_v55  ;;  %v4538_v3 = vcombine.low %v2159_v56, %v2161_v57  ;;  %v270_v54 = vld [vmem:[%s5301_s14 + $0x1c8] sm:$0xff]  ;;  %v2064_v56 = vld [vmem:[%s5301_s14 + $0x1d8] sm:$0xff] }
  0xff   : > { %1601 = vmatprep.mubr.bf16.mxu0 %v4319_v4  ;;  %3075 = vmatprep.mubr.bf16.mxu1 %v4511_v5  ;;  %v4225_v4 = vcombine.high %v242_v62, %v244_v63  ;;  %v4417_v5 = vcombine.high %v2036_v0, %v2038_v1  ;;  %v272_v55 = vld [vmem:[%s5301_s14 + $0x1e8] sm:$0xff]  ;;  %v2066_v57 = vld [vmem:[%s5301_s14 + $0x1f8] sm:$0xff] }
 0x106   : > { %1602 = vmatmul.mubr.bf16.gmra.mrb[96].mxu0 %v4318_v10  ;;  %3076 = vmatmul.mubr.bf16.gmra.mrb[96].mxu1 %v4510_v11  ;;  %v4224_v10 = vcombine.low %v242_v62, %v244_v63  ;;  %v4416_v11 = vcombine.low %v2036_v0, %v2038_v1  ;;  %v274_v62 = vld [vmem:[%s5301_s14 + $0x208] sm:$0xff]  ;;  %v2068_v0 = vld [vmem:[%s5301_s14 + $0x218] sm:$0xff] }
 0x107   : > { %1611 = vmatprep.mubr.bf16.mxu0 %v4323_v12  ;;  %3085 = vmatprep.mubr.bf16.mxu1 %v4515_v13  ;;  %v4229_v12 = vcombine.high %v246_v6, %v248_v7  ;;  %v4421_v13 = vcombine.high %v2040_v8, %v2042_v9  ;;  %v276_v63 = vld [vmem:[%s5301_s14 + $0x228] sm:$0xff]  ;;  %v2070_v1 = vld [vmem:[%s5301_s14 + $0x238] sm:$0xff] }
 0x10e   : > { %1612 = vmatmul.mubr.bf16.gmra.mrb[100].mxu0 %v4322_v18  ;;  %3086 = vmatmul.mubr.bf16.gmra.mrb[100].mxu1 %v4514_v19  ;;  %v4228_v18 = vcombine.low %v246_v6, %v248_v7  ;;  %v4420_v19 = vcombine.low %v2040_v8, %v2042_v9  ;;  %v278_v6 = vld [vmem:[%s5301_s14 + $0x248] sm:$0xff]  ;;  %v2072_v8 = vld [vmem:[%s5301_s14 + $0x258] sm:$0xff] }
 0x10f   : > { %1621 = vmatprep.mubr.bf16.mxu0 %v4327_v20  ;;  %3095 = vmatprep.mubr.bf16.mxu1 %v4519_v21  ;;  %v4233_v20 = vcombine.high %v250_v14, %v252_v15  ;;  %v4425_v21 = vcombine.high %v2044_v16, %v2046_v17  ;;  %v280_v7 = vld [vmem:[%s5301_s14 + $0x268] sm:$0xff]  ;;  %v2074_v9 = vld [vmem:[%s5301_s14 + $0x278] sm:$0xff] }
 0x116   : > { %1622 = vmatmul.mubr.bf16.gmra.mrb[104].mxu0 %v4326_v26  ;;  %3096 = vmatmul.mubr.bf16.gmra.mrb[104].mxu1 %v4518_v27  ;;  %v4232_v26 = vcombine.low %v250_v14, %v252_v15  ;;  %v4424_v27 = vcombine.low %v2044_v16, %v2046_v17  ;;  %v282_v14 = vld [vmem:[%s5301_s14 + $0x288] sm:$0xff]  ;;  %v2076_v16 = vld [vmem:[%s5301_s14 + $0x298] sm:$0xff] }
 0x117   : > { %1631 = vmatprep.mubr.bf16.mxu0 %v4331_v28  ;;  %3105 = vmatprep.mubr.bf16.mxu1 %v4523_v29  ;;  %v4237_v28 = vcombine.high %v254_v22, %v256_v23  ;;  %v4429_v29 = vcombine.high %v2048_v24, %v2050_v25  ;;  %v284_v15 = vld [vmem:[%s5301_s14 + $0x2a8] sm:$0xff]  ;;  %v2078_v17 = vld [vmem:[%s5301_s14 + $0x2b8] sm:$0xff] }
 0x11e   : > { %1632 = vmatmul.mubr.bf16.gmra.mrb[108].mxu0 %v4330_v34  ;;  %3106 = vmatmul.mubr.bf16.gmra.mrb[108].mxu1 %v4522_v35  ;;  %v4236_v34 = vcombine.low %v254_v22, %v256_v23  ;;  %v4428_v35 = vcombine.low %v2048_v24, %v2050_v25  ;;  %v286_v22 = vld [vmem:[%s5301_s14 + $0x2c8] sm:$0xff]  ;;  %v2080_v24 = vld [vmem:[%s5301_s14 + $0x2d8] sm:$0xff] }
 0x11f   : > { %1641 = vmatprep.mubr.bf16.mxu0 %v4335_v36  ;;  %3115 = vmatprep.mubr.bf16.mxu1 %v4527_v37  ;;  %v4241_v36 = vcombine.high %v258_v30, %v260_v31  ;;  %v4433_v37 = vcombine.high %v2052_v32, %v2054_v33  ;;  %v288_v23 = vld [vmem:[%s5301_s14 + $0x2e8] sm:$0xff]  ;;  %v2082_v25 = vld [vmem:[%s5301_s14 + $0x2f8] sm:$0xff] }
 0x126   : > { %1642 = vmatmul.mubr.bf16.gmra.mrb[112].mxu0 %v4334_v42  ;;  %3116 = vmatmul.mubr.bf16.gmra.mrb[112].mxu1 %v4526_v43  ;;  %v4240_v42 = vcombine.low %v258_v30, %v260_v31  ;;  %v4432_v43 = vcombine.low %v2052_v32, %v2054_v33  ;;  %v290_v30 = vld [vmem:[%s5301_s14 + $0x308] sm:$0xff]  ;;  %v2084_v32 = vld [vmem:[%s5301_s14 + $0x318] sm:$0xff] }
 0x127   : > { %1651 = vmatprep.mubr.bf16.mxu0 %v4339_v44  ;;  %3125 = vmatprep.mubr.bf16.mxu1 %v4531_v45  ;;  %v4245_v44 = vcombine.high %v262_v38, %v264_v39  ;;  %v4437_v45 = vcombine.high %v2056_v40, %v2058_v41  ;;  %v292_v31 = vld [vmem:[%s5301_s14 + $0x328] sm:$0xff]  ;;  %v2086_v33 = vld [vmem:[%s5301_s14 + $0x338] sm:$0xff] }
 0x12e   : > { %1652 = vmatmul.mubr.bf16.gmra.mrb[116].mxu0 %v4338_v50  ;;  %3126 = vmatmul.mubr.bf16.gmra.mrb[116].mxu1 %v4530_v51  ;;  %v4244_v50 = vcombine.low %v262_v38, %v264_v39  ;;  %v4436_v51 = vcombine.low %v2056_v40, %v2058_v41  ;;  %v294_v38 = vld [vmem:[%s5301_s14 + $0x348] sm:$0xff]  ;;  %v2088_v40 = vld [vmem:[%s5301_s14 + $0x358] sm:$0xff] }
 0x12f   : > { %1661 = vmatprep.mubr.bf16.mxu0 %v4343_v52  ;;  %3135 = vmatprep.mubr.bf16.mxu1 %v4535_v53  ;;  %v4249_v52 = vcombine.high %v266_v46, %v268_v47  ;;  %v4441_v53 = vcombine.high %v2060_v48, %v2062_v49  ;;  %v296_v39 = vld [vmem:[%s5301_s14 + $0x368] sm:$0xff]  ;;  %v2090_v41 = vld [vmem:[%s5301_s14 + $0x378] sm:$0xff] }
 0x136   : > { %1662 = vmatmul.mubr.bf16.gmra.mrb[120].mxu0 %v4342_v58  ;;  %3136 = vmatmul.mubr.bf16.gmra.mrb[120].mxu1 %v4534_v59  ;;  %v4248_v58 = vcombine.low %v266_v46, %v268_v47  ;;  %v4440_v59 = vcombine.low %v2060_v48, %v2062_v49  ;;  %v298_v46 = vld [vmem:[%s5301_s14 + $0x388] sm:$0xff]  ;;  %v2092_v48 = vld [vmem:[%s5301_s14 + $0x398] sm:$0xff] }
 0x137   : > { %1671 = vmatprep.mubr.bf16.mxu0 %v4347_v60  ;;  %3145 = vmatprep.mubr.bf16.mxu1 %v4539_v61  ;;  %v4253_v60 = vcombine.high %v270_v54, %v272_v55  ;;  %v4445_v61 = vcombine.high %v2064_v56, %v2066_v57  ;;  %v300_v47 = vld [vmem:[%s5301_s14 + $0x3a8] sm:$0xff]  ;;  %v2094_v49 = vld [vmem:[%s5301_s14 + $0x3b8] sm:$0xff] }
 0x13e   : > { %1672 = vmatmul.mubr.bf16.gmra.mrb[124].mxu0 %v4346_v2  ;;  %3146 = vmatmul.mubr.bf16.gmra.mrb[124].mxu1 %v4538_v3  ;;  %v4252_v2 = vcombine.low %v270_v54, %v272_v55  ;;  %v4444_v3 = vcombine.low %v2064_v56, %v2066_v57  ;;  %v302_v54 = vld [vmem:[%s5301_s14 + $0x3c8] sm:$0xff]  ;;  %v2096_v56 = vld [vmem:[%s5301_s14 + $0x3d8] sm:$0xff] }
 0x13f   : > { %1714 = vmatprep.mubr.bf16.mxu0 %v4225_v4  ;;  %3188 = vmatprep.mubr.bf16.mxu1 %v4417_v5  ;;  %v4257_v4 = vcombine.high %v274_v62, %v276_v63  ;;  %v4449_v5 = vcombine.high %v2068_v0, %v2070_v1  ;;  %v304_v55 = vld [vmem:[%s5301_s14 + $0x3e8] sm:$0xff]  ;;  %v2098_v57 = vld [vmem:[%s5301_s14 + $0x3f8] sm:$0xff] }
 0x146   : > { %1715 = vmatmul.mubr.bf16.vlgmr.msra.gmra.mrb[0].mxu0 %v4224_v10  ;;  %3189 = vmatmul.mubr.bf16.vlgmr.msra.gmra.mrb[0].mxu1 %v4416_v11  ;;  %v4256_v10 = vcombine.low %v274_v62, %v276_v63  ;;  %v4448_v11 = vcombine.low %v2068_v0, %v2070_v1  ;;  %v306_v62 = vld [vmem:[%s5301_s14 + $0x408] sm:$0xff]  ;;  %v2100_v0 = vld [vmem:[%s5301_s14 + $0x418] sm:$0xff] }
 0x147   : > { %1724 = vmatprep.mubr.bf16.mxu0 %v4229_v12  ;;  %3198 = vmatprep.mubr.bf16.mxu1 %v4421_v13  ;;  %v4261_v12 = vcombine.high %v278_v6, %v280_v7  ;;  %v4453_v13 = vcombine.high %v2072_v8, %v2074_v9  ;;  %v308_v63 = vld [vmem:[%s5301_s14 + $0x428] sm:$0xff]  ;;  %v2102_v1 = vld [vmem:[%s5301_s14 + $0x438] sm:$0xff] }
 0x14e   : > { %1725 = vmatmul.mubr.bf16.gmra.mrb[4].mxu0 %v4228_v18  ;;  %3199 = vmatmul.mubr.bf16.gmra.mrb[4].mxu1 %v4420_v19  ;;  %v4260_v18 = vcombine.low %v278_v6, %v280_v7  ;;  %v4452_v19 = vcombine.low %v2072_v8, %v2074_v9  ;;  %v310_v6 = vld [vmem:[%s5301_s14 + $0x448] sm:$0xff]  ;;  %v2104_v8 = vld [vmem:[%s5301_s14 + $0x458] sm:$0xff] }
 0x14f   : > { %1734 = vmatprep.mubr.bf16.mxu0 %v4233_v20  ;;  %3208 = vmatprep.mubr.bf16.mxu1 %v4425_v21  ;;  %v4265_v20 = vcombine.high %v282_v14, %v284_v15  ;;  %v4457_v21 = vcombine.high %v2076_v16, %v2078_v17  ;;  %v312_v7 = vld [vmem:[%s5301_s14 + $0x468] sm:$0xff]  ;;  %v2106_v9 = vld [vmem:[%s5301_s14 + $0x478] sm:$0xff] }
 0x156   : > { %1735 = vmatmul.mubr.bf16.gmra.mrb[8].mxu0 %v4232_v26  ;;  %3209 = vmatmul.mubr.bf16.gmra.mrb[8].mxu1 %v4424_v27  ;;  %v4264_v26 = vcombine.low %v282_v14, %v284_v15  ;;  %v4456_v27 = vcombine.low %v2076_v16, %v2078_v17  ;;  %v314_v14 = vld [vmem:[%s5301_s14 + $0x488] sm:$0xff]  ;;  %v2108_v16 = vld [vmem:[%s5301_s14 + $0x498] sm:$0xff] }
 0x157   : > { %1744 = vmatprep.mubr.bf16.mxu0 %v4237_v28  ;;  %3218 = vmatprep.mubr.bf16.mxu1 %v4429_v29  ;;  %v4269_v28 = vcombine.high %v286_v22, %v288_v23  ;;  %v4461_v29 = vcombine.high %v2080_v24, %v2082_v25  ;;  %v316_v15 = vld [vmem:[%s5301_s14 + $0x4a8] sm:$0xff]  ;;  %v2110_v17 = vld [vmem:[%s5301_s14 + $0x4b8] sm:$0xff] }
 0x15e   : > { %1745 = vmatmul.mubr.bf16.gmra.mrb[12].mxu0 %v4236_v34  ;;  %3219 = vmatmul.mubr.bf16.gmra.mrb[12].mxu1 %v4428_v35  ;;  %v4268_v34 = vcombine.low %v286_v22, %v288_v23  ;;  %v4460_v35 = vcombine.low %v2080_v24, %v2082_v25  ;;  %v318_v22 = vld [vmem:[%s5301_s14 + $0x4c8] sm:$0xff]  ;;  %v2112_v24 = vld [vmem:[%s5301_s14 + $0x4d8] sm:$0xff] }
 0x15f   : > { %1754 = vmatprep.mubr.bf16.mxu0 %v4241_v36  ;;  %3228 = vmatprep.mubr.bf16.mxu1 %v4433_v37  ;;  %v4273_v36 = vcombine.high %v290_v30, %v292_v31  ;;  %v4465_v37 = vcombine.high %v2084_v32, %v2086_v33  ;;  %v320_v23 = vld [vmem:[%s5301_s14 + $0x4e8] sm:$0xff]  ;;  %v2114_v25 = vld [vmem:[%s5301_s14 + $0x4f8] sm:$0xff] }
 0x166   : > { %1755 = vmatmul.mubr.bf16.gmra.mrb[16].mxu0 %v4240_v42  ;;  %3229 = vmatmul.mubr.bf16.gmra.mrb[16].mxu1 %v4432_v43  ;;  %v4272_v42 = vcombine.low %v290_v30, %v292_v31  ;;  %v4464_v43 = vcombine.low %v2084_v32, %v2086_v33  ;;  %v322_v30 = vld [vmem:[%s5301_s14 + $0x508] sm:$0xff]  ;;  %v2116_v32 = vld [vmem:[%s5301_s14 + $0x518] sm:$0xff] }
 0x167   : > { %1764 = vmatprep.mubr.bf16.mxu0 %v4245_v44  ;;  %3238 = vmatprep.mubr.bf16.mxu1 %v4437_v45  ;;  %v4277_v44 = vcombine.high %v294_v38, %v296_v39  ;;  %v4469_v45 = vcombine.high %v2088_v40, %v2090_v41  ;;  %v324_v31 = vld [vmem:[%s5301_s14 + $0x528] sm:$0xff]  ;;  %v2118_v33 = vld [vmem:[%s5301_s14 + $0x538] sm:$0xff] }
 0x16e   : > { %1765 = vmatmul.mubr.bf16.gmra.mrb[20].mxu0 %v4244_v50  ;;  %3239 = vmatmul.mubr.bf16.gmra.mrb[20].mxu1 %v4436_v51  ;;  %v4276_v50 = vcombine.low %v294_v38, %v296_v39  ;;  %v4468_v51 = vcombine.low %v2088_v40, %v2090_v41  ;;  %v326_v38 = vld [vmem:[%s5301_s14 + $0x548] sm:$0xff]  ;;  %v2120_v40 = vld [vmem:[%s5301_s14 + $0x558] sm:$0xff] }
 0x16f   : > { %1774 = vmatprep.mubr.bf16.mxu0 %v4249_v52  ;;  %3248 = vmatprep.mubr.bf16.mxu1 %v4441_v53  ;;  %v4281_v52 = vcombine.high %v298_v46, %v300_v47  ;;  %v4473_v53 = vcombine.high %v2092_v48, %v2094_v49  ;;  %v328_v39 = vld [vmem:[%s5301_s14 + $0x568] sm:$0xff]  ;;  %v2122_v41 = vld [vmem:[%s5301_s14 + $0x578] sm:$0xff] }
 0x176   : > { %1775 = vmatmul.mubr.bf16.gmra.mrb[24].mxu0 %v4248_v58  ;;  %3249 = vmatmul.mubr.bf16.gmra.mrb[24].mxu1 %v4440_v59  ;;  %v4280_v58 = vcombine.low %v298_v46, %v300_v47  ;;  %v4472_v59 = vcombine.low %v2092_v48, %v2094_v49  ;;  %v330_v46 = vld [vmem:[%s5301_s14 + $0x588] sm:$0xff]  ;;  %v2124_v48 = vld [vmem:[%s5301_s14 + $0x598] sm:$0xff] }
 0x177   : > { %1784 = vmatprep.mubr.bf16.mxu0 %v4253_v60  ;;  %3258 = vmatprep.mubr.bf16.mxu1 %v4445_v61  ;;  %v4285_v60 = vcombine.high %v302_v54, %v304_v55  ;;  %v4477_v61 = vcombine.high %v2096_v56, %v2098_v57  ;;  %v332_v47 = vld [vmem:[%s5301_s14 + $0x5a8] sm:$0xff]  ;;  %v2126_v49 = vld [vmem:[%s5301_s14 + $0x5b8] sm:$0xff] }
 0x17e   : > { %1785 = vmatmul.mubr.bf16.gmra.mrb[28].mxu0 %v4252_v2  ;;  %3259 = vmatmul.mubr.bf16.gmra.mrb[28].mxu1 %v4444_v3  ;;  %v4284_v2 = vcombine.low %v302_v54, %v304_v55  ;;  %v4476_v3 = vcombine.low %v2096_v56, %v2098_v57  ;;  %v334_v54 = vld [vmem:[%s5301_s14 + $0x5c8] sm:$0xff]  ;;  %v2128_v56 = vld [vmem:[%s5301_s14 + $0x5d8] sm:$0xff] }
 0x17f   : > { %1794 = vmatprep.mubr.bf16.mxu0 %v4257_v4  ;;  %3268 = vmatprep.mubr.bf16.mxu1 %v4449_v5  ;;  %v4289_v4 = vcombine.high %v306_v62, %v308_v63  ;;  %v4481_v5 = vcombine.high %v2100_v0, %v2102_v1  ;;  %v336_v55 = vld [vmem:[%s5301_s14 + $0x5e8] sm:$0xff]  ;;  %v2130_v57 = vld [vmem:[%s5301_s14 + $0x5f8] sm:$0xff] }
 0x186   : > { %1795 = vmatmul.mubr.bf16.gmra.mrb[32].mxu0 %v4256_v10  ;;  %3269 = vmatmul.mubr.bf16.gmra.mrb[32].mxu1 %v4448_v11  ;;  %v4288_v10 = vcombine.low %v306_v62, %v308_v63  ;;  %v4480_v11 = vcombine.low %v2100_v0, %v2102_v1  ;;  %v338_v62 = vld [vmem:[%s5301_s14 + $0x608] sm:$0xff]  ;;  %v2132_v0 = vld [vmem:[%s5301_s14 + $0x618] sm:$0xff] }
 0x187   : > { %1804 = vmatprep.mubr.bf16.mxu0 %v4261_v12  ;;  %3278 = vmatprep.mubr.bf16.mxu1 %v4453_v13  ;;  %v4293_v12 = vcombine.high %v310_v6, %v312_v7  ;;  %v4485_v13 = vcombine.high %v2104_v8, %v2106_v9  ;;  %v340_v63 = vld [vmem:[%s5301_s14 + $0x628] sm:$0xff]  ;;  %v2134_v1 = vld [vmem:[%s5301_s14 + $0x638] sm:$0xff] }
 0x18e   : > { %1805 = vmatmul.mubr.bf16.gmra.mrb[36].mxu0 %v4260_v18  ;;  %3279 = vmatmul.mubr.bf16.gmra.mrb[36].mxu1 %v4452_v19  ;;  %v4292_v18 = vcombine.low %v310_v6, %v312_v7  ;;  %v4484_v19 = vcombine.low %v2104_v8, %v2106_v9  ;;  %v342_v6 = vld [vmem:[%s5301_s14 + $0x648] sm:$0xff]  ;;  %v2136_v8 = vld [vmem:[%s5301_s14 + $0x658] sm:$0xff] }
 0x18f   : > { %1814 = vmatprep.mubr.bf16.mxu0 %v4265_v20  ;;  %3288 = vmatprep.mubr.bf16.mxu1 %v4457_v21  ;;  %v4297_v20 = vcombine.high %v314_v14, %v316_v15  ;;  %v4489_v21 = vcombine.high %v2108_v16, %v2110_v17  ;;  %v344_v7 = vld [vmem:[%s5301_s14 + $0x668] sm:$0xff]  ;;  %v2138_v9 = vld [vmem:[%s5301_s14 + $0x678] sm:$0xff] }
 0x196   : > { %1815 = vmatmul.mubr.bf16.gmra.mrb[40].mxu0 %v4264_v26  ;;  %3289 = vmatmul.mubr.bf16.gmra.mrb[40].mxu1 %v4456_v27  ;;  %v4296_v26 = vcombine.low %v314_v14, %v316_v15  ;;  %v4488_v27 = vcombine.low %v2108_v16, %v2110_v17  ;;  %v346_v14 = vld [vmem:[%s5301_s14 + $0x688] sm:$0xff]  ;;  %v2140_v16 = vld [vmem:[%s5301_s14 + $0x698] sm:$0xff] }
 0x197   : > { %1824 = vmatprep.mubr.bf16.mxu0 %v4269_v28  ;;  %3298 = vmatprep.mubr.bf16.mxu1 %v4461_v29  ;;  %v4301_v28 = vcombine.high %v318_v22, %v320_v23  ;;  %v4493_v29 = vcombine.high %v2112_v24, %v2114_v25  ;;  %v348_v15 = vld [vmem:[%s5301_s14 + $0x6a8] sm:$0xff]  ;;  %v2142_v17 = vld [vmem:[%s5301_s14 + $0x6b8] sm:$0xff] }
 0x19e   : > { %1825 = vmatmul.mubr.bf16.gmra.mrb[44].mxu0 %v4268_v34  ;;  %3299 = vmatmul.mubr.bf16.gmra.mrb[44].mxu1 %v4460_v35  ;;  %v4300_v34 = vcombine.low %v318_v22, %v320_v23  ;;  %v4492_v35 = vcombine.low %v2112_v24, %v2114_v25  ;;  %v350_v22 = vld [vmem:[%s5301_s14 + $0x6c8] sm:$0xff]  ;;  %v2144_v24 = vld [vmem:[%s5301_s14 + $0x6d8] sm:$0xff] }
 0x19f   : > { %1834 = vmatprep.mubr.bf16.mxu0 %v4273_v36  ;;  %3308 = vmatprep.mubr.bf16.mxu1 %v4465_v37  ;;  %v4305_v36 = vcombine.high %v322_v30, %v324_v31  ;;  %v4497_v37 = vcombine.high %v2116_v32, %v2118_v33  ;;  %v352_v23 = vld [vmem:[%s5301_s14 + $0x6e8] sm:$0xff]  ;;  %v2146_v25 = vld [vmem:[%s5301_s14 + $0x6f8] sm:$0xff] }
 0x1a6   : > { %1835 = vmatmul.mubr.bf16.gmra.mrb[48].mxu0 %v4272_v42  ;;  %3309 = vmatmul.mubr.bf16.gmra.mrb[48].mxu1 %v4464_v43  ;;  %v4304_v42 = vcombine.low %v322_v30, %v324_v31  ;;  %v4496_v43 = vcombine.low %v2116_v32, %v2118_v33  ;;  %v354_v30 = vld [vmem:[%s5301_s14 + $0x708] sm:$0xff]  ;;  %v2148_v32 = vld [vmem:[%s5301_s14 + $0x718] sm:$0xff] }
 0x1a7   : > { %1844 = vmatprep.mubr.bf16.mxu0 %v4277_v44  ;;  %3318 = vmatprep.mubr.bf16.mxu1 %v4469_v45  ;;  %v4309_v44 = vcombine.high %v326_v38, %v328_v39  ;;  %v4501_v45 = vcombine.high %v2120_v40, %v2122_v41  ;;  %v356_v31 = vld [vmem:[%s5301_s14 + $0x728] sm:$0xff]  ;;  %v2150_v33 = vld [vmem:[%s5301_s14 + $0x738] sm:$0xff] }
 0x1ae   : > { %1845 = vmatmul.mubr.bf16.gmra.mrb[52].mxu0 %v4276_v50  ;;  %3319 = vmatmul.mubr.bf16.gmra.mrb[52].mxu1 %v4468_v51  ;;  %v4308_v50 = vcombine.low %v326_v38, %v328_v39  ;;  %v4500_v51 = vcombine.low %v2120_v40, %v2122_v41  ;;  %v4332_v39 = vcombine.low %v350_v22, %v352_v23 }
 0x1af   : > { %1854 = vmatprep.mubr.bf16.mxu0 %v4281_v52  ;;  %3328 = vmatprep.mubr.bf16.mxu1 %v4473_v53  ;;  %v4313_v52 = vcombine.high %v330_v46, %v332_v47  ;;  %v4505_v53 = vcombine.high %v2124_v48, %v2126_v49  ;;  %v4524_v40 = vcombine.low %v2144_v24, %v2146_v25 }
 0x1b6   : > { %1855 = vmatmul.mubr.bf16.gmra.mrb[56].mxu0 %v4280_v58  ;;  %3329 = vmatmul.mubr.bf16.gmra.mrb[56].mxu1 %v4472_v59  ;;  %v4312_v58 = vcombine.low %v330_v46, %v332_v47  ;;  %v4504_v59 = vcombine.low %v2124_v48, %v2126_v49  ;;  %v5725_v46 = vld [vmem:[%s5851_s2] ss:$0 sm:$0xff] }
 0x1b7   : > { %1864 = vmatprep.mubr.bf16.mxu0 %v4285_v60  ;;  %3338 = vmatprep.mubr.bf16.mxu1 %v4477_v61  ;;  %v4317_v60 = vcombine.high %v334_v54, %v336_v55  ;;  %v4509_v61 = vcombine.high %v2128_v56, %v2130_v57 }
 0x1be   : > { %1865 = vmatmul.mubr.bf16.gmra.mrb[60].mxu0 %v4284_v2  ;;  %3339 = vmatmul.mubr.bf16.gmra.mrb[60].mxu1 %v4476_v3  ;;  %v4316_v2 = vcombine.low %v334_v54, %v336_v55  ;;  %v4508_v3 = vcombine.low %v2128_v56, %v2130_v57  ;;  %v358_v54 = vld [vmem:[%s5301_s14 + $0x748] sm:$0xff]  ;;  %v2152_v56 = vld [vmem:[%s5301_s14 + $0x758] sm:$0xff] }
 0x1bf   : > { %1874 = vmatprep.mubr.bf16.mxu0 %v4289_v4  ;;  %3348 = vmatprep.mubr.bf16.mxu1 %v4481_v5  ;;  %v4321_v4 = vcombine.high %v338_v62, %v340_v63  ;;  %v4513_v5 = vcombine.high %v2132_v0, %v2134_v1  ;;  %v360_v55 = vld [vmem:[%s5301_s14 + $0x768] sm:$0xff]  ;;  %v2154_v57 = vld [vmem:[%s5301_s14 + $0x778] sm:$0xff] }
 0x1c6   : > { %1875 = vmatmul.mubr.bf16.gmra.mrb[64].mxu0 %v4288_v10  ;;  %3349 = vmatmul.mubr.bf16.gmra.mrb[64].mxu1 %v4480_v11  ;;  %v4320_v10 = vcombine.low %v338_v62, %v340_v63  ;;  %v4512_v11 = vcombine.low %v2132_v0, %v2134_v1  ;;  %v4336_v0 = vcombine.low %v354_v30, %v356_v31 }
 0x1c7   : > { %1884 = vmatprep.mubr.bf16.mxu0 %v4293_v12  ;;  %3358 = vmatprep.mubr.bf16.mxu1 %v4485_v13  ;;  %v4325_v12 = vcombine.high %v342_v6, %v344_v7  ;;  %v4517_v13 = vcombine.high %v2136_v8, %v2138_v9  ;;  %v4528_v1 = vcombine.low %v2148_v32, %v2150_v33 }
 0x1ce   : > { %1885 = vmatmul.mubr.bf16.gmra.mrb[68].mxu0 %v4292_v18  ;;  %3359 = vmatmul.mubr.bf16.gmra.mrb[68].mxu1 %v4484_v19  ;;  %v4324_v18 = vcombine.low %v342_v6, %v344_v7  ;;  %v4516_v19 = vcombine.low %v2136_v8, %v2138_v9  ;;  %v4533_v8 = vcombine.high %v2152_v56, %v2154_v57 }
 0x1cf   : > { %1894 = vmatprep.mubr.bf16.mxu0 %v4297_v20  ;;  %3368 = vmatprep.mubr.bf16.mxu1 %v4489_v21  ;;  %v4329_v20 = vcombine.high %v346_v14, %v348_v15  ;;  %v4521_v21 = vcombine.high %v2140_v16, %v2142_v17 }
 0x1d6   : > { %1895 = vmatmul.mubr.bf16.gmra.mrb[72].mxu0 %v4296_v26  ;;  %3369 = vmatmul.mubr.bf16.gmra.mrb[72].mxu1 %v4488_v27  ;;  %v4328_v26 = vcombine.low %v346_v14, %v348_v15  ;;  %v4520_v27 = vcombine.low %v2140_v16, %v2142_v17  ;;  %v362_v17 = vld [vmem:[%s5301_s14 + $0x788] sm:$0xff] }
 0x1d7   : > { %1904 = vmatprep.mubr.bf16.mxu0 %v4301_v28  ;;  %3378 = vmatprep.mubr.bf16.mxu1 %v4493_v29  ;;  %v4333_v28 = vcombine.high %v350_v22, %v352_v23  ;;  %v4525_v29 = vcombine.high %v2144_v24, %v2146_v25 }
 0x1de   : > { %1905 = vmatmul.mubr.bf16.gmra.mrb[76].mxu0 %v4300_v34  ;;  %3379 = vmatmul.mubr.bf16.gmra.mrb[76].mxu1 %v4492_v35 }
 0x1df   : > { %1914 = vmatprep.mubr.bf16.mxu0 %v4305_v36  ;;  %3388 = vmatprep.mubr.bf16.mxu1 %v4497_v37 }
 0x1e6   : > { %1915 = vmatmul.mubr.bf16.gmra.mrb[80].mxu0 %v4304_v42  ;;  %3389 = vmatmul.mubr.bf16.gmra.mrb[80].mxu1 %v4496_v43 }
 0x1e7   : > { %1924 = vmatprep.mubr.bf16.mxu0 %v4309_v44  ;;  %3398 = vmatprep.mubr.bf16.mxu1 %v4501_v45  ;;  %v4337_v44 = vcombine.high %v354_v30, %v356_v31  ;;  %v4529_v45 = vcombine.high %v2148_v32, %v2150_v33 }
 0x1ee   : > { %1925 = vmatmul.mubr.bf16.gmra.mrb[84].mxu0 %v4308_v50  ;;  %3399 = vmatmul.mubr.bf16.gmra.mrb[84].mxu1 %v4500_v51 }
 0x1ef   : > { %1934 = vmatprep.mubr.bf16.mxu0 %v4313_v52  ;;  %3408 = vmatprep.mubr.bf16.mxu1 %v4505_v53 }
 0x1f6   : > { %1935 = vmatmul.mubr.bf16.gmra.mrb[88].mxu0 %v4312_v58  ;;  %3409 = vmatmul.mubr.bf16.gmra.mrb[88].mxu1 %v4504_v59 }
 0x1f7   : > { %1944 = vmatprep.mubr.bf16.mxu0 %v4317_v60  ;;  %3418 = vmatprep.mubr.bf16.mxu1 %v4509_v61 }
 0x1fe   : > { %1945 = vmatmul.mubr.bf16.gmra.mrb[92].mxu0 %v4316_v2  ;;  %3419 = vmatmul.mubr.bf16.gmra.mrb[92].mxu1 %v4508_v3  ;;  %v4341_v2 = vcombine.high %v358_v54, %v360_v55 }
 0x1ff   : > { %1954 = vmatprep.mubr.bf16.mxu0 %v4321_v4  ;;  %3428 = vmatprep.mubr.bf16.mxu1 %v4513_v5 }
 0x206   : > { %1955 = vmatmul.mubr.bf16.gmra.mrb[96].mxu0 %v4320_v10  ;;  %3429 = vmatmul.mubr.bf16.gmra.mrb[96].mxu1 %v4512_v11 }
 0x207   : > { %1964 = vmatprep.mubr.bf16.mxu0 %v4325_v12  ;;  %3438 = vmatprep.mubr.bf16.mxu1 %v4517_v13 }
 0x20e   : > { %1965 = vmatmul.mubr.bf16.gmra.mrb[100].mxu0 %v4324_v18  ;;  %3439 = vmatmul.mubr.bf16.gmra.mrb[100].mxu1 %v4516_v19  ;;  %v364_v18 = vld [vmem:[%s5301_s14 + $0x7a8] sm:$0xff]  ;;  %v2156_v19 = vld [vmem:[%s5301_s14 + $0x798] sm:$0xff] }
 0x20f   : > { %1974 = vmatprep.mubr.bf16.mxu0 %v4329_v20  ;;  %3448 = vmatprep.mubr.bf16.mxu1 %v4521_v21  ;;  %v2158_v20 = vld [vmem:[%s5301_s14 + $0x7b8] sm:$0xff] }
 0x216   : > { %1975 = vmatmul.mubr.bf16.gmra.mrb[104].mxu0 %v4328_v26  ;;  %3449 = vmatmul.mubr.bf16.gmra.mrb[104].mxu1 %v4520_v27  ;;  %v4340_v27 = vcombine.low %v358_v54, %v360_v55  ;;  %v4344_v55 = vcombine.low %v362_v17, %v364_v18 }
 0x217   : > { %1984 = vmatprep.mubr.bf16.mxu0 %v4333_v28  ;;  %3458 = vmatprep.mubr.bf16.mxu1 %v4525_v29  ;;  %v4532_v28 = vcombine.low %v2152_v56, %v2154_v57  ;;  %v4345_v29 = vcombine.high %v362_v17, %v364_v18  ;;  %v4536_v56 = vcombine.low %v2156_v19, %v2158_v20 }
 0x219   : > { %v1716_v34 = vpop.f32.mrb[0].mxu0  ;;  %v3190_v35 = vpop.f32.mrb[0].mxu1 }
 0x21a   : > { %v3509_v36 = vmax.f32 %v1716_v34, %v3190_v35  ;;  %v1718_v37 = vpop.f32.mrb[1].mxu0  ;;  %v3192_v38 = vpop.f32.mrb[1].mxu1  ;;  %v4537_v35 = vcombine.high %v2156_v19, %v2158_v20 }
 0x21b   : > { %v3510_v41 = vmax.f32 %v1718_v37, %v3192_v38  ;;  %v1720_v42 = vpop.f32.mrb[2].mxu0  ;;  %v3194_v43 = vpop.f32.mrb[2].mxu1 }
 0x21c   : > { %v3511_v47 = vmax.f32 %v1720_v42, %v3194_v43  ;;  %v1722_v48 = vpop.f32.mrb[3].mxu0  ;;  %v3196_v49 = vpop.f32.mrb[3].mxu1 }
 0x21d   : > { %v3637_v50 = vmax.f32 %v3509_v36, %v3510_v41  ;;  %v3512_v51 = vmax.f32 %v1722_v48, %v3196_v49  ;;  %v2162_v48 = vld [vmem:[%s5301_s14 + $0x7f8] sm:$0xff] }
 0x21e   : > { %1985 = vmatmul.mubr.bf16.gmra.mrb[108].mxu0 %v4332_v39  ;;  %3459 = vmatmul.mubr.bf16.gmra.mrb[108].mxu1 %v4524_v40 }
 0x21f   : > { %v3708_v52 = vadd.f32 %v5725_v46, %v3637_v50  ;;  %v3638_v53 = vmax.f32 %v3511_v47, %v3512_v51  ;;  %1994 = vmatprep.mubr.bf16.mxu0 %v4337_v44  ;;  %3468 = vmatprep.mubr.bf16.mxu1 %v4529_v45  ;;  %v366_v44 = vld [vmem:[%s5301_s14 + $0x7c8] sm:$0xff]  ;;  %v2160_v47 = vld [vmem:[%s5301_s14 + $0x7d8] sm:$0xff] }
 0x220   : > { %v368_v45 = vld [vmem:[%s5301_s14 + $0x7e8] sm:$0xff] }
 0x221   : > { %v3709_v58 = vadd.f32 %v5725_v46, %v3638_v53  ;;  %v1726_v59 = vpop.f32.mrb[4].mxu0  ;;  %v3200_v60 = vpop.f32.mrb[4].mxu1  ;;  %v3772_v3 = vmax.f32 %v3708_v52, 0.0  ;;  %v4349_v57 = vcombine.high %v366_v44, %v368_v45 }
 0x222   : > { %v3513_v61 = vmax.f32 %v1726_v59, %v3200_v60  ;;  %v1728_v62 = vpop.f32.mrb[5].mxu0  ;;  %v3202_v63 = vpop.f32.mrb[5].mxu1 }
 0x223   : > { %v3773_v4 = vmax.f32 %v3709_v58, 0.0  ;;  %v3514_v5 = vmax.f32 %v1728_v62, %v3202_v63  ;;  %v1730_v6 = vpop.f32.mrb[6].mxu0  ;;  %v3204_v7 = vpop.f32.mrb[6].mxu1  ;;  %v4541_v63 = vcombine.high %v2160_v47, %v2162_v48 }
 0x224   : > { %v3515_v9 = vmax.f32 %v1730_v6, %v3204_v7  ;;  %v1732_v10 = vpop.f32.mrb[7].mxu0  ;;  %v3206_v11 = vpop.f32.mrb[7].mxu1 }
 0x225   : > { %v4677_v12 = vpack.c.bf16 %v3773_v4, %v3772_v3  ;;  %v3639_v13 = vmax.f32 %v3513_v61, %v3514_v5  ;;  %v3516_v14 = vmax.f32 %v1732_v10, %v3206_v11 }
 0x226   : > { %1995 = vmatmul.mubr.bf16.gmra.mrb[112].mxu0 %v4336_v0  ;;  %3469 = vmatmul.mubr.bf16.gmra.mrb[112].mxu1 %v4528_v1 }
 0x227   : > { %4678 = vst [vmem:[%s5737_s24] sm:$0xff] %v4677_v12   ;;  %v3710_v15 = vadd.f32 %v5725_v46, %v3639_v13  ;;  %v3640_v16 = vmax.f32 %v3515_v9, %v3516_v14  ;;  %2004 = vmatprep.mubr.bf16.mxu0 %v4341_v2  ;;  %3478 = vmatprep.mubr.bf16.mxu1 %v4533_v8 }
 0x228   : > { %v4348_v14 = vcombine.low %v366_v44, %v368_v45 }
 0x229   : > { %v3711_v21 = vadd.f32 %v5725_v46, %v3640_v16  ;;  %v1736_v22 = vpop.f32.mrb[8].mxu0  ;;  %v3210_v23 = vpop.f32.mrb[8].mxu1  ;;  %v3774_v30 = vmax.f32 %v3710_v15, 0.0  ;;  %v4540_v15 = vcombine.low %v2160_v47, %v2162_v48 }
 0x22a   : > { %v3517_v24 = vmax.f32 %v1736_v22, %v3210_v23  ;;  %v1738_v25 = vpop.f32.mrb[9].mxu0  ;;  %v3212_v26 = vpop.f32.mrb[9].mxu1 }
 0x22b   : > { %v3775_v31 = vmax.f32 %v3711_v21, 0.0  ;;  %v3518_v32 = vmax.f32 %v1738_v25, %v3212_v26  ;;  %v1740_v33 = vpop.f32.mrb[10].mxu0  ;;  %v3214_v34 = vpop.f32.mrb[10].mxu1 }
 0x22c   : > { %v3519_v36 = vmax.f32 %v1740_v33, %v3214_v34  ;;  %v1742_v37 = vpop.f32.mrb[11].mxu0  ;;  %v3216_v38 = vpop.f32.mrb[11].mxu1 }
 0x22d   : > { %v4682_v39 = vpack.c.bf16 %v3775_v31, %v3774_v30  ;;  %v3641_v40 = vmax.f32 %v3517_v24, %v3518_v32  ;;  %v3520_v41 = vmax.f32 %v1742_v37, %v3216_v38 }
 0x22e   : > { %2005 = vmatmul.mubr.bf16.gmra.mrb[116].mxu0 %v4340_v27  ;;  %3479 = vmatmul.mubr.bf16.gmra.mrb[116].mxu1 %v4532_v28 }
 0x22f   : > { %4834 = vst [vmem:[%s5737_s24 + $0x8] sm:$0xff] %v4682_v39   ;;  %v3712_v42 = vadd.f32 %v5725_v46, %v3641_v40  ;;  %v3642_v43 = vmax.f32 %v3519_v36, %v3520_v41  ;;  %2014 = vmatprep.mubr.bf16.mxu0 %v4345_v29  ;;  %3488 = vmatprep.mubr.bf16.mxu1 %v4537_v35 }
 0x231   : > { %v3713_v49 = vadd.f32 %v5725_v46, %v3642_v43  ;;  %v1746_v50 = vpop.f32.mrb[12].mxu0  ;;  %v3220_v51 = vpop.f32.mrb[12].mxu1  ;;  %v3776_v58 = vmax.f32 %v3712_v42, 0.0 }
 0x232   : > { %v3521_v52 = vmax.f32 %v1746_v50, %v3220_v51  ;;  %v1748_v53 = vpop.f32.mrb[13].mxu0  ;;  %v3222_v54 = vpop.f32.mrb[13].mxu1 }
 0x233   : > { %v3777_v59 = vmax.f32 %v3713_v49, 0.0  ;;  %v3522_v60 = vmax.f32 %v1748_v53, %v3222_v54  ;;  %v1750_v61 = vpop.f32.mrb[14].mxu0  ;;  %v3224_v62 = vpop.f32.mrb[14].mxu1 }
 0x234   : > { %v3523_v0 = vmax.f32 %v1750_v61, %v3224_v62  ;;  %v1752_v1 = vpop.f32.mrb[15].mxu0  ;;  %v3226_v2 = vpop.f32.mrb[15].mxu1 }
 0x235   : > { %v4687_v3 = vpack.c.bf16 %v3777_v59, %v3776_v58  ;;  %v3643_v4 = vmax.f32 %v3521_v52, %v3522_v60  ;;  %v3524_v5 = vmax.f32 %v1752_v1, %v3226_v2 }
 0x236   : > { %2015 = vmatmul.mubr.bf16.gmra.mrb[120].mxu0 %v4344_v55  ;;  %3489 = vmatmul.mubr.bf16.gmra.mrb[120].mxu1 %v4536_v56 }
 0x237   : > { %4835 = vst [vmem:[%s5737_s24 + $0x10] sm:$0xff] %v4687_v3   ;;  %v3714_v6 = vadd.f32 %v5725_v46, %v3643_v4  ;;  %v3644_v7 = vmax.f32 %v3523_v0, %v3524_v5  ;;  %2024 = vmatprep.mubr.bf16.mxu0 %v4349_v57  ;;  %3498 = vmatprep.mubr.bf16.mxu1 %v4541_v63 }
 0x239   : > { %v3715_v8 = vadd.f32 %v5725_v46, %v3644_v7  ;;  %v1756_v9 = vpop.f32.mrb[16].mxu0  ;;  %v3230_v10 = vpop.f32.mrb[16].mxu1  ;;  %v3778_v16 = vmax.f32 %v3714_v6, 0.0 }
 0x23a   : > { %v3525_v11 = vmax.f32 %v1756_v9, %v3230_v10  ;;  %v1758_v12 = vpop.f32.mrb[17].mxu0  ;;  %v3232_v13 = vpop.f32.mrb[17].mxu1 }
 0x23b   : > { %v3779_v17 = vmax.f32 %v3715_v8, 0.0  ;;  %v3526_v18 = vmax.f32 %v1758_v12, %v3232_v13  ;;  %v1760_v19 = vpop.f32.mrb[18].mxu0  ;;  %v3234_v20 = vpop.f32.mrb[18].mxu1 }
 0x23c   : > { %v3527_v21 = vmax.f32 %v1760_v19, %v3234_v20  ;;  %v1762_v22 = vpop.f32.mrb[19].mxu0  ;;  %v3236_v23 = vpop.f32.mrb[19].mxu1 }
 0x23d   : > { %v4692_v24 = vpack.c.bf16 %v3779_v17, %v3778_v16  ;;  %v3645_v25 = vmax.f32 %v3525_v11, %v3526_v18  ;;  %v3528_v26 = vmax.f32 %v1762_v22, %v3236_v23 }
 0x23e   : > { %2025 = vmatmul.mubr.bf16.gmra.mrb[124].mxu0 %v4348_v14  ;;  %3499 = vmatmul.mubr.bf16.gmra.mrb[124].mxu1 %v4540_v15 }
 0x23f   : > { %4836 = vst [vmem:[%s5737_s24 + $0x18] sm:$0xff] %v4692_v24   ;;  %v3716_v27 = vadd.f32 %v5725_v46, %v3645_v25  ;;  %v3646_v28 = vmax.f32 %v3527_v21, %v3528_v26 }
 0x241   : > { %v3717_v29 = vadd.f32 %v5725_v46, %v3646_v28  ;;  %v1766_v30 = vpop.f32.mrb[20].mxu0  ;;  %v3240_v31 = vpop.f32.mrb[20].mxu1  ;;  %v3780_v35 = vmax.f32 %v3716_v27, 0.0 }
 0x242   : > { %v3529_v32 = vmax.f32 %v1766_v30, %v3240_v31  ;;  %v1768_v33 = vpop.f32.mrb[21].mxu0  ;;  %v3242_v34 = vpop.f32.mrb[21].mxu1 }
 0x243   : > { %v3781_v36 = vmax.f32 %v3717_v29, 0.0  ;;  %v3530_v37 = vmax.f32 %v1768_v33, %v3242_v34  ;;  %v1770_v38 = vpop.f32.mrb[22].mxu0  ;;  %v3244_v39 = vpop.f32.mrb[22].mxu1 }
 0x244   : > { %v3531_v40 = vmax.f32 %v1770_v38, %v3244_v39  ;;  %v1772_v41 = vpop.f32.mrb[23].mxu0  ;;  %v3246_v42 = vpop.f32.mrb[23].mxu1 }
 0x245   : > { %v4697_v43 = vpack.c.bf16 %v3781_v36, %v3780_v35  ;;  %v3647_v44 = vmax.f32 %v3529_v32, %v3530_v37  ;;  %v3532_v45 = vmax.f32 %v1772_v41, %v3246_v42 }
 0x247   : > { %4837 = vst [vmem:[%s5737_s24 + $0x20] sm:$0xff] %v4697_v43   ;;  %v3718_v47 = vadd.f32 %v5725_v46, %v3647_v44  ;;  %v3648_v48 = vmax.f32 %v3531_v40, %v3532_v45 }
 0x249   : > { %v3719_v49 = vadd.f32 %v5725_v46, %v3648_v48  ;;  %v1776_v50 = vpop.f32.mrb[24].mxu0  ;;  %v3250_v51 = vpop.f32.mrb[24].mxu1  ;;  %v3782_v55 = vmax.f32 %v3718_v47, 0.0 }
 0x24a   : > { %v3533_v52 = vmax.f32 %v1776_v50, %v3250_v51  ;;  %v1778_v53 = vpop.f32.mrb[25].mxu0  ;;  %v3252_v54 = vpop.f32.mrb[25].mxu1 }
 0x24b   : > { %v3783_v56 = vmax.f32 %v3719_v49, 0.0  ;;  %v3534_v57 = vmax.f32 %v1778_v53, %v3252_v54  ;;  %v1780_v58 = vpop.f32.mrb[26].mxu0  ;;  %v3254_v59 = vpop.f32.mrb[26].mxu1 }
 0x24c   : > { %v3535_v60 = vmax.f32 %v1780_v58, %v3254_v59  ;;  %v1782_v61 = vpop.f32.mrb[27].mxu0  ;;  %v3256_v62 = vpop.f32.mrb[27].mxu1 }
 0x24d   : > { %v4702_v63 = vpack.c.bf16 %v3783_v56, %v3782_v55  ;;  %v3649_v0 = vmax.f32 %v3533_v52, %v3534_v57  ;;  %v3536_v1 = vmax.f32 %v1782_v61, %v3256_v62 }
 0x24f   : > { %4838 = vst [vmem:[%s5737_s24 + $0x28] sm:$0xff] %v4702_v63   ;;  %v3720_v2 = vadd.f32 %v5725_v46, %v3649_v0  ;;  %v3650_v3 = vmax.f32 %v3535_v60, %v3536_v1 }
 0x251   : > { %v3721_v4 = vadd.f32 %v5725_v46, %v3650_v3  ;;  %v1786_v5 = vpop.f32.mrb[28].mxu0  ;;  %v3260_v6 = vpop.f32.mrb[28].mxu1  ;;  %v3784_v10 = vmax.f32 %v3720_v2, 0.0 }
 0x252   : > { %v3537_v7 = vmax.f32 %v1786_v5, %v3260_v6  ;;  %v1788_v8 = vpop.f32.mrb[29].mxu0  ;;  %v3262_v9 = vpop.f32.mrb[29].mxu1 }
 0x253   : > { %v3785_v11 = vmax.f32 %v3721_v4, 0.0  ;;  %v3538_v12 = vmax.f32 %v1788_v8, %v3262_v9  ;;  %v1790_v13 = vpop.f32.mrb[30].mxu0  ;;  %v3264_v14 = vpop.f32.mrb[30].mxu1 }
 0x254   : > { %v3539_v15 = vmax.f32 %v1790_v13, %v3264_v14  ;;  %v1792_v16 = vpop.f32.mrb[31].mxu0  ;;  %v3266_v17 = vpop.f32.mrb[31].mxu1 }
 0x255   : > { %v4707_v18 = vpack.c.bf16 %v3785_v11, %v3784_v10  ;;  %v3651_v19 = vmax.f32 %v3537_v7, %v3538_v12  ;;  %v3540_v20 = vmax.f32 %v1792_v16, %v3266_v17 }
 0x257   : > { %4839 = vst [vmem:[%s5737_s24 + $0x30] sm:$0xff] %v4707_v18   ;;  %v3722_v21 = vadd.f32 %v5725_v46, %v3651_v19  ;;  %v3652_v22 = vmax.f32 %v3539_v15, %v3540_v20 }
 0x259   : > { %v3723_v23 = vadd.f32 %v5725_v46, %v3652_v22  ;;  %v1796_v24 = vpop.f32.mrb[32].mxu0  ;;  %v3270_v25 = vpop.f32.mrb[32].mxu1  ;;  %v3786_v29 = vmax.f32 %v3722_v21, 0.0 }
 0x25a   : > { %v3541_v26 = vmax.f32 %v1796_v24, %v3270_v25  ;;  %v1798_v27 = vpop.f32.mrb[33].mxu0  ;;  %v3272_v28 = vpop.f32.mrb[33].mxu1 }
 0x25b   : > { %v3787_v30 = vmax.f32 %v3723_v23, 0.0  ;;  %v3542_v31 = vmax.f32 %v1798_v27, %v3272_v28  ;;  %v1800_v32 = vpop.f32.mrb[34].mxu0  ;;  %v3274_v33 = vpop.f32.mrb[34].mxu1 }
 0x25c   : > { %v3543_v34 = vmax.f32 %v1800_v32, %v3274_v33  ;;  %v1802_v35 = vpop.f32.mrb[35].mxu0  ;;  %v3276_v36 = vpop.f32.mrb[35].mxu1 }
 0x25d   : > { %v4712_v37 = vpack.c.bf16 %v3787_v30, %v3786_v29  ;;  %v3653_v38 = vmax.f32 %v3541_v26, %v3542_v31  ;;  %v3544_v39 = vmax.f32 %v1802_v35, %v3276_v36 }
 0x25f   : > { %4840 = vst [vmem:[%s5737_s24 + $0x38] sm:$0xff] %v4712_v37   ;;  %v3724_v40 = vadd.f32 %v5725_v46, %v3653_v38  ;;  %v3654_v41 = vmax.f32 %v3543_v34, %v3544_v39 }
 0x261   : > { %v3725_v42 = vadd.f32 %v5725_v46, %v3654_v41  ;;  %v1806_v43 = vpop.f32.mrb[36].mxu0  ;;  %v3280_v44 = vpop.f32.mrb[36].mxu1  ;;  %v3788_v49 = vmax.f32 %v3724_v40, 0.0 }
 0x262   : > { %v3545_v45 = vmax.f32 %v1806_v43, %v3280_v44  ;;  %v1808_v47 = vpop.f32.mrb[37].mxu0  ;;  %v3282_v48 = vpop.f32.mrb[37].mxu1 }
 0x263   : > { %v3789_v50 = vmax.f32 %v3725_v42, 0.0  ;;  %v3546_v51 = vmax.f32 %v1808_v47, %v3282_v48  ;;  %v1810_v52 = vpop.f32.mrb[38].mxu0  ;;  %v3284_v53 = vpop.f32.mrb[38].mxu1 }
 0x264   : > { %v3547_v54 = vmax.f32 %v1810_v52, %v3284_v53  ;;  %v1812_v55 = vpop.f32.mrb[39].mxu0  ;;  %v3286_v56 = vpop.f32.mrb[39].mxu1 }
 0x265   : > { %v4717_v57 = vpack.c.bf16 %v3789_v50, %v3788_v49  ;;  %v3655_v58 = vmax.f32 %v3545_v45, %v3546_v51  ;;  %v3548_v59 = vmax.f32 %v1812_v55, %v3286_v56 }
 0x267   : > { %4841 = vst [vmem:[%s5737_s24 + $0x40] sm:$0xff] %v4717_v57   ;;  %v3726_v60 = vadd.f32 %v5725_v46, %v3655_v58  ;;  %v3656_v61 = vmax.f32 %v3547_v54, %v3548_v59 }
 0x269   : > { %v3727_v62 = vadd.f32 %v5725_v46, %v3656_v61  ;;  %v1816_v63 = vpop.f32.mrb[40].mxu0  ;;  %v3290_v0 = vpop.f32.mrb[40].mxu1  ;;  %v3790_v4 = vmax.f32 %v3726_v60, 0.0 }
 0x26a   : > { %v3549_v1 = vmax.f32 %v1816_v63, %v3290_v0  ;;  %v1818_v2 = vpop.f32.mrb[41].mxu0  ;;  %v3292_v3 = vpop.f32.mrb[41].mxu1 }
 0x26b   : > { %v3791_v5 = vmax.f32 %v3727_v62, 0.0  ;;  %v3550_v6 = vmax.f32 %v1818_v2, %v3292_v3  ;;  %v1820_v7 = vpop.f32.mrb[42].mxu0  ;;  %v3294_v8 = vpop.f32.mrb[42].mxu1 }
 0x26c   : > { %v3551_v9 = vmax.f32 %v1820_v7, %v3294_v8  ;;  %v1822_v10 = vpop.f32.mrb[43].mxu0  ;;  %v3296_v11 = vpop.f32.mrb[43].mxu1 }
 0x26d   : > { %v4722_v12 = vpack.c.bf16 %v3791_v5, %v3790_v4  ;;  %v3657_v13 = vmax.f32 %v3549_v1, %v3550_v6  ;;  %v3552_v14 = vmax.f32 %v1822_v10, %v3296_v11 }
 0x26f   : > { %4842 = vst [vmem:[%s5737_s24 + $0x48] sm:$0xff] %v4722_v12   ;;  %v3728_v15 = vadd.f32 %v5725_v46, %v3657_v13  ;;  %v3658_v16 = vmax.f32 %v3551_v9, %v3552_v14 }
 0x271   : > { %v3729_v17 = vadd.f32 %v5725_v46, %v3658_v16  ;;  %v1826_v18 = vpop.f32.mrb[44].mxu0  ;;  %v3300_v19 = vpop.f32.mrb[44].mxu1  ;;  %v3792_v23 = vmax.f32 %v3728_v15, 0.0 }
 0x272   : > { %v3553_v20 = vmax.f32 %v1826_v18, %v3300_v19  ;;  %v1828_v21 = vpop.f32.mrb[45].mxu0  ;;  %v3302_v22 = vpop.f32.mrb[45].mxu1 }
 0x273   : > { %v3793_v24 = vmax.f32 %v3729_v17, 0.0  ;;  %v3554_v25 = vmax.f32 %v1828_v21, %v3302_v22  ;;  %v1830_v26 = vpop.f32.mrb[46].mxu0  ;;  %v3304_v27 = vpop.f32.mrb[46].mxu1 }
 0x274   : > { %v3555_v28 = vmax.f32 %v1830_v26, %v3304_v27  ;;  %v1832_v29 = vpop.f32.mrb[47].mxu0  ;;  %v3306_v30 = vpop.f32.mrb[47].mxu1 }
 0x275   : > { %v4727_v31 = vpack.c.bf16 %v3793_v24, %v3792_v23  ;;  %v3659_v32 = vmax.f32 %v3553_v20, %v3554_v25  ;;  %v3556_v33 = vmax.f32 %v1832_v29, %v3306_v30 }
 0x277   : > { %4843 = vst [vmem:[%s5737_s24 + $0x50] sm:$0xff] %v4727_v31   ;;  %v3730_v34 = vadd.f32 %v5725_v46, %v3659_v32  ;;  %v3660_v35 = vmax.f32 %v3555_v28, %v3556_v33 }
 0x279   : > { %v3731_v36 = vadd.f32 %v5725_v46, %v3660_v35  ;;  %v1836_v37 = vpop.f32.mrb[48].mxu0  ;;  %v3310_v38 = vpop.f32.mrb[48].mxu1  ;;  %v3794_v42 = vmax.f32 %v3730_v34, 0.0 }
 0x27a   : > { %v3557_v39 = vmax.f32 %v1836_v37, %v3310_v38  ;;  %v1838_v40 = vpop.f32.mrb[49].mxu0  ;;  %v3312_v41 = vpop.f32.mrb[49].mxu1 }
 0x27b   : > { %v3795_v43 = vmax.f32 %v3731_v36, 0.0  ;;  %v3558_v44 = vmax.f32 %v1838_v40, %v3312_v41  ;;  %v1840_v45 = vpop.f32.mrb[50].mxu0  ;;  %v3314_v47 = vpop.f32.mrb[50].mxu1 }
 0x27c   : > { %v3559_v48 = vmax.f32 %v1840_v45, %v3314_v47  ;;  %v1842_v49 = vpop.f32.mrb[51].mxu0  ;;  %v3316_v50 = vpop.f32.mrb[51].mxu1 }
 0x27d   : > { %v4732_v51 = vpack.c.bf16 %v3795_v43, %v3794_v42  ;;  %v3661_v52 = vmax.f32 %v3557_v39, %v3558_v44  ;;  %v3560_v53 = vmax.f32 %v1842_v49, %v3316_v50 }
 0x27f   : > { %4844 = vst [vmem:[%s5737_s24 + $0x58] sm:$0xff] %v4732_v51   ;;  %v3732_v54 = vadd.f32 %v5725_v46, %v3661_v52  ;;  %v3662_v55 = vmax.f32 %v3559_v48, %v3560_v53 }
 0x281   : > { %v3733_v56 = vadd.f32 %v5725_v46, %v3662_v55  ;;  %v1846_v57 = vpop.f32.mrb[52].mxu0  ;;  %v3320_v58 = vpop.f32.mrb[52].mxu1  ;;  %v3796_v62 = vmax.f32 %v3732_v54, 0.0 }
 0x282   : > { %v3561_v59 = vmax.f32 %v1846_v57, %v3320_v58  ;;  %v1848_v60 = vpop.f32.mrb[53].mxu0  ;;  %v3322_v61 = vpop.f32.mrb[53].mxu1 }
 0x283   : > { %v3797_v63 = vmax.f32 %v3733_v56, 0.0  ;;  %v3562_v0 = vmax.f32 %v1848_v60, %v3322_v61  ;;  %v1850_v1 = vpop.f32.mrb[54].mxu0  ;;  %v3324_v2 = vpop.f32.mrb[54].mxu1 }
 0x284   : > { %v3563_v3 = vmax.f32 %v1850_v1, %v3324_v2  ;;  %v1852_v4 = vpop.f32.mrb[55].mxu0  ;;  %v3326_v5 = vpop.f32.mrb[55].mxu1 }
 0x285   : > { %v4737_v6 = vpack.c.bf16 %v3797_v63, %v3796_v62  ;;  %v3663_v7 = vmax.f32 %v3561_v59, %v3562_v0  ;;  %v3564_v8 = vmax.f32 %v1852_v4, %v3326_v5 }
 0x287   : > { %4845 = vst [vmem:[%s5737_s24 + $0x60] sm:$0xff] %v4737_v6   ;;  %v3734_v9 = vadd.f32 %v5725_v46, %v3663_v7  ;;  %v3664_v10 = vmax.f32 %v3563_v3, %v3564_v8 }
 0x289   : > { %v3735_v11 = vadd.f32 %v5725_v46, %v3664_v10  ;;  %v1856_v12 = vpop.f32.mrb[56].mxu0  ;;  %v3330_v13 = vpop.f32.mrb[56].mxu1  ;;  %v3798_v17 = vmax.f32 %v3734_v9, 0.0 }
 0x28a   : > { %v3565_v14 = vmax.f32 %v1856_v12, %v3330_v13  ;;  %v1858_v15 = vpop.f32.mrb[57].mxu0  ;;  %v3332_v16 = vpop.f32.mrb[57].mxu1 }
 0x28b   : > { %v3799_v18 = vmax.f32 %v3735_v11, 0.0  ;;  %v3566_v19 = vmax.f32 %v1858_v15, %v3332_v16  ;;  %v1860_v20 = vpop.f32.mrb[58].mxu0  ;;  %v3334_v21 = vpop.f32.mrb[58].mxu1 }
 0x28c   : > { %v3567_v22 = vmax.f32 %v1860_v20, %v3334_v21  ;;  %v1862_v23 = vpop.f32.mrb[59].mxu0  ;;  %v3336_v24 = vpop.f32.mrb[59].mxu1 }
 0x28d   : > { %v4742_v25 = vpack.c.bf16 %v3799_v18, %v3798_v17  ;;  %v3665_v26 = vmax.f32 %v3565_v14, %v3566_v19  ;;  %v3568_v27 = vmax.f32 %v1862_v23, %v3336_v24 }
 0x28f   : > { %4846 = vst [vmem:[%s5737_s24 + $0x68] sm:$0xff] %v4742_v25   ;;  %v3736_v28 = vadd.f32 %v5725_v46, %v3665_v26  ;;  %v3666_v29 = vmax.f32 %v3567_v22, %v3568_v27 }
 0x291   : > { %v3737_v30 = vadd.f32 %v5725_v46, %v3666_v29  ;;  %v1866_v31 = vpop.f32.mrb[60].mxu0  ;;  %v3340_v32 = vpop.f32.mrb[60].mxu1  ;;  %v3800_v36 = vmax.f32 %v3736_v28, 0.0 }
 0x292   : > { %v3569_v33 = vmax.f32 %v1866_v31, %v3340_v32  ;;  %v1868_v34 = vpop.f32.mrb[61].mxu0  ;;  %v3342_v35 = vpop.f32.mrb[61].mxu1 }
 0x293   : > { %v3801_v37 = vmax.f32 %v3737_v30, 0.0  ;;  %v3570_v38 = vmax.f32 %v1868_v34, %v3342_v35  ;;  %v1870_v39 = vpop.f32.mrb[62].mxu0  ;;  %v3344_v40 = vpop.f32.mrb[62].mxu1 }
 0x294   : > { %v3571_v41 = vmax.f32 %v1870_v39, %v3344_v40  ;;  %v1872_v42 = vpop.f32.mrb[63].mxu0  ;;  %v3346_v43 = vpop.f32.mrb[63].mxu1 }
 0x295   : > { %v4747_v44 = vpack.c.bf16 %v3801_v37, %v3800_v36  ;;  %v3667_v45 = vmax.f32 %v3569_v33, %v3570_v38  ;;  %v3572_v47 = vmax.f32 %v1872_v42, %v3346_v43 }
 0x297   : > { %4847 = vst [vmem:[%s5737_s24 + $0x70] sm:$0xff] %v4747_v44   ;;  %v3738_v48 = vadd.f32 %v5725_v46, %v3667_v45  ;;  %v3668_v49 = vmax.f32 %v3571_v41, %v3572_v47 }
 0x299   : > { %v3739_v50 = vadd.f32 %v5725_v46, %v3668_v49  ;;  %v1876_v51 = vpop.f32.mrb[64].mxu0  ;;  %v3350_v52 = vpop.f32.mrb[64].mxu1  ;;  %v3802_v56 = vmax.f32 %v3738_v48, 0.0 }
 0x29a   : > { %v3573_v53 = vmax.f32 %v1876_v51, %v3350_v52  ;;  %v1878_v54 = vpop.f32.mrb[65].mxu0  ;;  %v3352_v55 = vpop.f32.mrb[65].mxu1 }
 0x29b   : > { %v3803_v57 = vmax.f32 %v3739_v50, 0.0  ;;  %v3574_v58 = vmax.f32 %v1878_v54, %v3352_v55  ;;  %v1880_v59 = vpop.f32.mrb[66].mxu0  ;;  %v3354_v60 = vpop.f32.mrb[66].mxu1 }
 0x29c   : > { %v3575_v61 = vmax.f32 %v1880_v59, %v3354_v60  ;;  %v1882_v62 = vpop.f32.mrb[67].mxu0  ;;  %v3356_v63 = vpop.f32.mrb[67].mxu1 }
 0x29d   : > { %v4752_v0 = vpack.c.bf16 %v3803_v57, %v3802_v56  ;;  %v3669_v1 = vmax.f32 %v3573_v53, %v3574_v58  ;;  %v3576_v2 = vmax.f32 %v1882_v62, %v3356_v63 }
 0x29f   : > { %4848 = vst [vmem:[%s5737_s24 + $0x78] sm:$0xff] %v4752_v0   ;;  %v3740_v3 = vadd.f32 %v5725_v46, %v3669_v1  ;;  %v3670_v4 = vmax.f32 %v3575_v61, %v3576_v2 }
 0x2a1   : > { %v3741_v5 = vadd.f32 %v5725_v46, %v3670_v4  ;;  %v1886_v6 = vpop.f32.mrb[68].mxu0  ;;  %v3360_v7 = vpop.f32.mrb[68].mxu1  ;;  %v3804_v11 = vmax.f32 %v3740_v3, 0.0 }
 0x2a2   : > { %v3577_v8 = vmax.f32 %v1886_v6, %v3360_v7  ;;  %v1888_v9 = vpop.f32.mrb[69].mxu0  ;;  %v3362_v10 = vpop.f32.mrb[69].mxu1 }
 0x2a3   : > { %v3805_v12 = vmax.f32 %v3741_v5, 0.0  ;;  %v3578_v13 = vmax.f32 %v1888_v9, %v3362_v10  ;;  %v1890_v14 = vpop.f32.mrb[70].mxu0  ;;  %v3364_v15 = vpop.f32.mrb[70].mxu1 }
 0x2a4   : > { %v3579_v16 = vmax.f32 %v1890_v14, %v3364_v15  ;;  %v1892_v17 = vpop.f32.mrb[71].mxu0  ;;  %v3366_v18 = vpop.f32.mrb[71].mxu1 }
 0x2a5   : > { %v4757_v19 = vpack.c.bf16 %v3805_v12, %v3804_v11  ;;  %v3671_v20 = vmax.f32 %v3577_v8, %v3578_v13  ;;  %v3580_v21 = vmax.f32 %v1892_v17, %v3366_v18 }
 0x2a7   : > { %4849 = vst [vmem:[%s5737_s24 + $0x80] sm:$0xff] %v4757_v19   ;;  %v3742_v22 = vadd.f32 %v5725_v46, %v3671_v20  ;;  %v3672_v23 = vmax.f32 %v3579_v16, %v3580_v21 }
 0x2a9   : > { %v3743_v24 = vadd.f32 %v5725_v46, %v3672_v23  ;;  %v1896_v25 = vpop.f32.mrb[72].mxu0  ;;  %v3370_v26 = vpop.f32.mrb[72].mxu1  ;;  %v3806_v30 = vmax.f32 %v3742_v22, 0.0 }
 0x2aa   : > { %v3581_v27 = vmax.f32 %v1896_v25, %v3370_v26  ;;  %v1898_v28 = vpop.f32.mrb[73].mxu0  ;;  %v3372_v29 = vpop.f32.mrb[73].mxu1 }
 0x2ab   : > { %v3807_v31 = vmax.f32 %v3743_v24, 0.0  ;;  %v3582_v32 = vmax.f32 %v1898_v28, %v3372_v29  ;;  %v1900_v33 = vpop.f32.mrb[74].mxu0  ;;  %v3374_v34 = vpop.f32.mrb[74].mxu1 }
 0x2ac   : > { %v3583_v35 = vmax.f32 %v1900_v33, %v3374_v34  ;;  %v1902_v36 = vpop.f32.mrb[75].mxu0  ;;  %v3376_v37 = vpop.f32.mrb[75].mxu1 }
 0x2ad   : > { %v4762_v38 = vpack.c.bf16 %v3807_v31, %v3806_v30  ;;  %v3673_v39 = vmax.f32 %v3581_v27, %v3582_v32  ;;  %v3584_v40 = vmax.f32 %v1902_v36, %v3376_v37 }
 0x2af   : > { %4850 = vst [vmem:[%s5737_s24 + $0x88] sm:$0xff] %v4762_v38   ;;  %v3744_v41 = vadd.f32 %v5725_v46, %v3673_v39  ;;  %v3674_v42 = vmax.f32 %v3583_v35, %v3584_v40 }
 0x2b1   : > { %v3745_v43 = vadd.f32 %v5725_v46, %v3674_v42  ;;  %v1906_v44 = vpop.f32.mrb[76].mxu0  ;;  %v3380_v45 = vpop.f32.mrb[76].mxu1  ;;  %v3808_v50 = vmax.f32 %v3744_v41, 0.0 }
 0x2b2   : > { %v3585_v47 = vmax.f32 %v1906_v44, %v3380_v45  ;;  %v1908_v48 = vpop.f32.mrb[77].mxu0  ;;  %v3382_v49 = vpop.f32.mrb[77].mxu1 }
 0x2b3   : > { %v3809_v51 = vmax.f32 %v3745_v43, 0.0  ;;  %v3586_v52 = vmax.f32 %v1908_v48, %v3382_v49  ;;  %v1910_v53 = vpop.f32.mrb[78].mxu0  ;;  %v3384_v54 = vpop.f32.mrb[78].mxu1 }
 0x2b4   : > { %v3587_v55 = vmax.f32 %v1910_v53, %v3384_v54  ;;  %v1912_v56 = vpop.f32.mrb[79].mxu0  ;;  %v3386_v57 = vpop.f32.mrb[79].mxu1 }
 0x2b5   : > { %v4767_v58 = vpack.c.bf16 %v3809_v51, %v3808_v50  ;;  %v3675_v59 = vmax.f32 %v3585_v47, %v3586_v52  ;;  %v3588_v60 = vmax.f32 %v1912_v56, %v3386_v57 }
 0x2b7   : > { %4851 = vst [vmem:[%s5737_s24 + $0x90] sm:$0xff] %v4767_v58   ;;  %v3746_v61 = vadd.f32 %v5725_v46, %v3675_v59  ;;  %v3676_v62 = vmax.f32 %v3587_v55, %v3588_v60 }
 0x2b9   : > { %v3747_v63 = vadd.f32 %v5725_v46, %v3676_v62  ;;  %v1916_v0 = vpop.f32.mrb[80].mxu0  ;;  %v3390_v1 = vpop.f32.mrb[80].mxu1  ;;  %v3810_v5 = vmax.f32 %v3746_v61, 0.0 }
 0x2ba   : > { %v3589_v2 = vmax.f32 %v1916_v0, %v3390_v1  ;;  %v1918_v3 = vpop.f32.mrb[81].mxu0  ;;  %v3392_v4 = vpop.f32.mrb[81].mxu1 }
 0x2bb   : > { %v3811_v6 = vmax.f32 %v3747_v63, 0.0  ;;  %v3590_v7 = vmax.f32 %v1918_v3, %v3392_v4  ;;  %v1920_v8 = vpop.f32.mrb[82].mxu0  ;;  %v3394_v9 = vpop.f32.mrb[82].mxu1 }
 0x2bc   : > { %v3591_v10 = vmax.f32 %v1920_v8, %v3394_v9  ;;  %v1922_v11 = vpop.f32.mrb[83].mxu0  ;;  %v3396_v12 = vpop.f32.mrb[83].mxu1 }
 0x2bd   : > { %v4772_v13 = vpack.c.bf16 %v3811_v6, %v3810_v5  ;;  %v3677_v14 = vmax.f32 %v3589_v2, %v3590_v7  ;;  %v3592_v15 = vmax.f32 %v1922_v11, %v3396_v12 }
 0x2bf   : > { %4852 = vst [vmem:[%s5737_s24 + $0x98] sm:$0xff] %v4772_v13   ;;  %v3748_v16 = vadd.f32 %v5725_v46, %v3677_v14  ;;  %v3678_v17 = vmax.f32 %v3591_v10, %v3592_v15 }
 0x2c1   : > { %v3749_v18 = vadd.f32 %v5725_v46, %v3678_v17  ;;  %v1926_v19 = vpop.f32.mrb[84].mxu0  ;;  %v3400_v20 = vpop.f32.mrb[84].mxu1  ;;  %v3812_v24 = vmax.f32 %v3748_v16, 0.0 }
 0x2c2   : > { %v3593_v21 = vmax.f32 %v1926_v19, %v3400_v20  ;;  %v1928_v22 = vpop.f32.mrb[85].mxu0  ;;  %v3402_v23 = vpop.f32.mrb[85].mxu1 }
 0x2c3   : > { %v3813_v25 = vmax.f32 %v3749_v18, 0.0  ;;  %v3594_v26 = vmax.f32 %v1928_v22, %v3402_v23  ;;  %v1930_v27 = vpop.f32.mrb[86].mxu0  ;;  %v3404_v28 = vpop.f32.mrb[86].mxu1 }
 0x2c4   : > { %v3595_v29 = vmax.f32 %v1930_v27, %v3404_v28  ;;  %v1932_v30 = vpop.f32.mrb[87].mxu0  ;;  %v3406_v31 = vpop.f32.mrb[87].mxu1 }
 0x2c5   : > { %v4777_v32 = vpack.c.bf16 %v3813_v25, %v3812_v24  ;;  %v3679_v33 = vmax.f32 %v3593_v21, %v3594_v26  ;;  %v3596_v34 = vmax.f32 %v1932_v30, %v3406_v31 }
 0x2c7   : > { %4853 = vst [vmem:[%s5737_s24 + $0xa0] sm:$0xff] %v4777_v32   ;;  %v3750_v35 = vadd.f32 %v5725_v46, %v3679_v33  ;;  %v3680_v36 = vmax.f32 %v3595_v29, %v3596_v34 }
 0x2c9   : > { %v3751_v37 = vadd.f32 %v5725_v46, %v3680_v36  ;;  %v1936_v38 = vpop.f32.mrb[88].mxu0  ;;  %v3410_v39 = vpop.f32.mrb[88].mxu1  ;;  %v3814_v43 = vmax.f32 %v3750_v35, 0.0 }
 0x2ca   : > { %v3597_v40 = vmax.f32 %v1936_v38, %v3410_v39  ;;  %v1938_v41 = vpop.f32.mrb[89].mxu0  ;;  %v3412_v42 = vpop.f32.mrb[89].mxu1 }
 0x2cb   : > { %v3815_v44 = vmax.f32 %v3751_v37, 0.0  ;;  %v3598_v45 = vmax.f32 %v1938_v41, %v3412_v42  ;;  %v1940_v47 = vpop.f32.mrb[90].mxu0  ;;  %v3414_v48 = vpop.f32.mrb[90].mxu1 }
 0x2cc   : > { %v3599_v49 = vmax.f32 %v1940_v47, %v3414_v48  ;;  %v1942_v50 = vpop.f32.mrb[91].mxu0  ;;  %v3416_v51 = vpop.f32.mrb[91].mxu1 }
 0x2cd   : > { %v4782_v52 = vpack.c.bf16 %v3815_v44, %v3814_v43  ;;  %v3681_v53 = vmax.f32 %v3597_v40, %v3598_v45  ;;  %v3600_v54 = vmax.f32 %v1942_v50, %v3416_v51 }
 0x2cf   : > { %4854 = vst [vmem:[%s5737_s24 + $0xa8] sm:$0xff] %v4782_v52   ;;  %v3752_v55 = vadd.f32 %v5725_v46, %v3681_v53  ;;  %v3682_v56 = vmax.f32 %v3599_v49, %v3600_v54 }
 0x2d1   : > { %v3753_v57 = vadd.f32 %v5725_v46, %v3682_v56  ;;  %v1946_v58 = vpop.f32.mrb[92].mxu0  ;;  %v3420_v59 = vpop.f32.mrb[92].mxu1  ;;  %v3816_v63 = vmax.f32 %v3752_v55, 0.0  ;;  %v5817_v46 = vld [vmem:[%s5851_s2] ss:$0 sm:$0xff] }
 0x2d2   : > { %v3601_v60 = vmax.f32 %v1946_v58, %v3420_v59  ;;  %v1948_v61 = vpop.f32.mrb[93].mxu0  ;;  %v3422_v62 = vpop.f32.mrb[93].mxu1 }
 0x2d3   : > { %v3817_v0 = vmax.f32 %v3753_v57, 0.0  ;;  %v3602_v1 = vmax.f32 %v1948_v61, %v3422_v62  ;;  %v1950_v2 = vpop.f32.mrb[94].mxu0  ;;  %v3424_v3 = vpop.f32.mrb[94].mxu1 }
 0x2d4   : > { %v3603_v4 = vmax.f32 %v1950_v2, %v3424_v3  ;;  %v1952_v5 = vpop.f32.mrb[95].mxu0  ;;  %v3426_v6 = vpop.f32.mrb[95].mxu1 }
 0x2d5   : > { %v4787_v7 = vpack.c.bf16 %v3817_v0, %v3816_v63  ;;  %v3683_v8 = vmax.f32 %v3601_v60, %v3602_v1  ;;  %v3604_v9 = vmax.f32 %v1952_v5, %v3426_v6 }
 0x2d7   : > { %4855 = vst [vmem:[%s5737_s24 + $0xb0] sm:$0xff] %v4787_v7   ;;  %v3754_v10 = vadd.f32 %v5817_v46, %v3683_v8  ;;  %v3684_v11 = vmax.f32 %v3603_v4, %v3604_v9 }
 0x2d9   : > { %v3755_v12 = vadd.f32 %v5817_v46, %v3684_v11  ;;  %v1956_v13 = vpop.f32.mrb[96].mxu0  ;;  %v3430_v14 = vpop.f32.mrb[96].mxu1  ;;  %v3818_v18 = vmax.f32 %v3754_v10, 0.0 }
 0x2da   : > { %v3605_v15 = vmax.f32 %v1956_v13, %v3430_v14  ;;  %v1958_v16 = vpop.f32.mrb[97].mxu0  ;;  %v3432_v17 = vpop.f32.mrb[97].mxu1 }
 0x2db   : > { %v3819_v19 = vmax.f32 %v3755_v12, 0.0  ;;  %v3606_v20 = vmax.f32 %v1958_v16, %v3432_v17  ;;  %v1960_v21 = vpop.f32.mrb[98].mxu0  ;;  %v3434_v22 = vpop.f32.mrb[98].mxu1 }
 0x2dc   : > { %v3607_v23 = vmax.f32 %v1960_v21, %v3434_v22  ;;  %v1962_v24 = vpop.f32.mrb[99].mxu0  ;;  %v3436_v25 = vpop.f32.mrb[99].mxu1 }
 0x2dd   : > { %v4792_v26 = vpack.c.bf16 %v3819_v19, %v3818_v18  ;;  %v3685_v27 = vmax.f32 %v3605_v15, %v3606_v20  ;;  %v3608_v28 = vmax.f32 %v1962_v24, %v3436_v25 }
 0x2df   : > { %4856 = vst [vmem:[%s5737_s24 + $0xb8] sm:$0xff] %v4792_v26   ;;  %v3756_v29 = vadd.f32 %v5817_v46, %v3685_v27  ;;  %v3686_v30 = vmax.f32 %v3607_v23, %v3608_v28 }
 0x2e1   : > { %v3757_v31 = vadd.f32 %v5817_v46, %v3686_v30  ;;  %v1966_v32 = vpop.f32.mrb[100].mxu0  ;;  %v3440_v33 = vpop.f32.mrb[100].mxu1  ;;  %v3820_v37 = vmax.f32 %v3756_v29, 0.0 }
 0x2e2   : > { %v3609_v34 = vmax.f32 %v1966_v32, %v3440_v33  ;;  %v1968_v35 = vpop.f32.mrb[101].mxu0  ;;  %v3442_v36 = vpop.f32.mrb[101].mxu1 }
 0x2e3   : > { %v3821_v38 = vmax.f32 %v3757_v31, 0.0  ;;  %v3610_v39 = vmax.f32 %v1968_v35, %v3442_v36  ;;  %v1970_v40 = vpop.f32.mrb[102].mxu0  ;;  %v3444_v41 = vpop.f32.mrb[102].mxu1 }
 0x2e4   : > { %v3611_v42 = vmax.f32 %v1970_v40, %v3444_v41  ;;  %v1972_v43 = vpop.f32.mrb[103].mxu0  ;;  %v3446_v44 = vpop.f32.mrb[103].mxu1 }
 0x2e5   : > { %v4797_v45 = vpack.c.bf16 %v3821_v38, %v3820_v37  ;;  %v3687_v47 = vmax.f32 %v3609_v34, %v3610_v39  ;;  %v3612_v48 = vmax.f32 %v1972_v43, %v3446_v44 }
 0x2e7   : > { %4857 = vst [vmem:[%s5737_s24 + $0xc0] sm:$0xff] %v4797_v45   ;;  %v3758_v49 = vadd.f32 %v5817_v46, %v3687_v47  ;;  %v3688_v50 = vmax.f32 %v3611_v42, %v3612_v48 }
 0x2e9   : > { %v3759_v51 = vadd.f32 %v5817_v46, %v3688_v50  ;;  %v1976_v52 = vpop.f32.mrb[104].mxu0  ;;  %v3450_v53 = vpop.f32.mrb[104].mxu1  ;;  %v3822_v57 = vmax.f32 %v3758_v49, 0.0 }
 0x2ea   : > { %v3613_v54 = vmax.f32 %v1976_v52, %v3450_v53  ;;  %v1978_v55 = vpop.f32.mrb[105].mxu0  ;;  %v3452_v56 = vpop.f32.mrb[105].mxu1 }
 0x2eb   : > { %v3823_v58 = vmax.f32 %v3759_v51, 0.0  ;;  %v3614_v59 = vmax.f32 %v1978_v55, %v3452_v56  ;;  %v1980_v60 = vpop.f32.mrb[106].mxu0  ;;  %v3454_v61 = vpop.f32.mrb[106].mxu1 }
 0x2ec   : > { %v3615_v62 = vmax.f32 %v1980_v60, %v3454_v61  ;;  %v1982_v63 = vpop.f32.mrb[107].mxu0  ;;  %v3456_v0 = vpop.f32.mrb[107].mxu1 }
 0x2ed   : > { %v4802_v1 = vpack.c.bf16 %v3823_v58, %v3822_v57  ;;  %v3689_v2 = vmax.f32 %v3613_v54, %v3614_v59  ;;  %v3616_v3 = vmax.f32 %v1982_v63, %v3456_v0 }
 0x2ef   : > { %4858 = vst [vmem:[%s5737_s24 + $0xc8] sm:$0xff] %v4802_v1   ;;  %v3760_v4 = vadd.f32 %v5817_v46, %v3689_v2  ;;  %v3690_v5 = vmax.f32 %v3615_v62, %v3616_v3 }
 0x2f1   : > { %v3761_v6 = vadd.f32 %v5817_v46, %v3690_v5  ;;  %v1986_v7 = vpop.f32.mrb[108].mxu0  ;;  %v3460_v8 = vpop.f32.mrb[108].mxu1  ;;  %v3824_v12 = vmax.f32 %v3760_v4, 0.0 }
 0x2f2   : > { %v3617_v9 = vmax.f32 %v1986_v7, %v3460_v8  ;;  %v1988_v10 = vpop.f32.mrb[109].mxu0  ;;  %v3462_v11 = vpop.f32.mrb[109].mxu1 }
 0x2f3   : > { %v3825_v13 = vmax.f32 %v3761_v6, 0.0  ;;  %v3618_v14 = vmax.f32 %v1988_v10, %v3462_v11  ;;  %v1990_v15 = vpop.f32.mrb[110].mxu0  ;;  %v3464_v16 = vpop.f32.mrb[110].mxu1 }
 0x2f4   : > { %v3619_v17 = vmax.f32 %v1990_v15, %v3464_v16  ;;  %v1992_v18 = vpop.f32.mrb[111].mxu0  ;;  %v3466_v19 = vpop.f32.mrb[111].mxu1 }
 0x2f5   : > { %v4807_v20 = vpack.c.bf16 %v3825_v13, %v3824_v12  ;;  %v3691_v21 = vmax.f32 %v3617_v9, %v3618_v14  ;;  %v3620_v22 = vmax.f32 %v1992_v18, %v3466_v19 }
 0x2f7   : > { %4859 = vst [vmem:[%s5737_s24 + $0xd0] sm:$0xff] %v4807_v20   ;;  %v3762_v23 = vadd.f32 %v5817_v46, %v3691_v21  ;;  %v3692_v24 = vmax.f32 %v3619_v17, %v3620_v22 }
 0x2f9   : > { %v3763_v25 = vadd.f32 %v5817_v46, %v3692_v24  ;;  %v1996_v26 = vpop.f32.mrb[112].mxu0  ;;  %v3470_v27 = vpop.f32.mrb[112].mxu1  ;;  %v3826_v31 = vmax.f32 %v3762_v23, 0.0 }
 0x2fa   : > { %v3621_v28 = vmax.f32 %v1996_v26, %v3470_v27  ;;  %v1998_v29 = vpop.f32.mrb[113].mxu0  ;;  %v3472_v30 = vpop.f32.mrb[113].mxu1 }
 0x2fb   : > { %v3827_v32 = vmax.f32 %v3763_v25, 0.0  ;;  %v3622_v33 = vmax.f32 %v1998_v29, %v3472_v30  ;;  %v2000_v34 = vpop.f32.mrb[114].mxu0  ;;  %v3474_v35 = vpop.f32.mrb[114].mxu1 }
 0x2fc   : > { %v3623_v36 = vmax.f32 %v2000_v34, %v3474_v35  ;;  %v2002_v37 = vpop.f32.mrb[115].mxu0  ;;  %v3476_v38 = vpop.f32.mrb[115].mxu1 }
 0x2fd   : > { %v4812_v39 = vpack.c.bf16 %v3827_v32, %v3826_v31  ;;  %v3693_v40 = vmax.f32 %v3621_v28, %v3622_v33  ;;  %v3624_v41 = vmax.f32 %v2002_v37, %v3476_v38 }
 0x2ff   : > { %4860 = vst [vmem:[%s5737_s24 + $0xd8] sm:$0xff] %v4812_v39   ;;  %v3764_v42 = vadd.f32 %v5817_v46, %v3693_v40  ;;  %v3694_v43 = vmax.f32 %v3623_v36, %v3624_v41 }
 0x301   : > { %v3765_v44 = vadd.f32 %v5817_v46, %v3694_v43  ;;  %v2006_v45 = vpop.f32.mrb[116].mxu0  ;;  %v3480_v47 = vpop.f32.mrb[116].mxu1  ;;  %v3828_v51 = vmax.f32 %v3764_v42, 0.0 }
 0x302   : > { %v3625_v48 = vmax.f32 %v2006_v45, %v3480_v47  ;;  %v2008_v49 = vpop.f32.mrb[117].mxu0  ;;  %v3482_v50 = vpop.f32.mrb[117].mxu1 }
 0x303   : > { %v3829_v52 = vmax.f32 %v3765_v44, 0.0  ;;  %v3626_v53 = vmax.f32 %v2008_v49, %v3482_v50  ;;  %v2010_v54 = vpop.f32.mrb[118].mxu0  ;;  %v3484_v55 = vpop.f32.mrb[118].mxu1 }
 0x304   : > { %v3627_v56 = vmax.f32 %v2010_v54, %v3484_v55  ;;  %v2012_v57 = vpop.f32.mrb[119].mxu0  ;;  %v3486_v58 = vpop.f32.mrb[119].mxu1 }
 0x305   : > { %v4817_v59 = vpack.c.bf16 %v3829_v52, %v3828_v51  ;;  %v3695_v60 = vmax.f32 %v3625_v48, %v3626_v53  ;;  %v3628_v61 = vmax.f32 %v2012_v57, %v3486_v58 }
 0x307   : > { %4861 = vst [vmem:[%s5737_s24 + $0xe0] sm:$0xff] %v4817_v59   ;;  %v3766_v62 = vadd.f32 %v5817_v46, %v3695_v60  ;;  %v3696_v63 = vmax.f32 %v3627_v56, %v3628_v61 }
 0x309   : > { %v3767_v0 = vadd.f32 %v5817_v46, %v3696_v63  ;;  %v2016_v1 = vpop.f32.mrb[120].mxu0  ;;  %v3490_v2 = vpop.f32.mrb[120].mxu1  ;;  %v3830_v6 = vmax.f32 %v3766_v62, 0.0 }
 0x30a   : > { %v3629_v3 = vmax.f32 %v2016_v1, %v3490_v2  ;;  %v2018_v4 = vpop.f32.mrb[121].mxu0  ;;  %v3492_v5 = vpop.f32.mrb[121].mxu1 }
 0x30b   : > { %v3831_v7 = vmax.f32 %v3767_v0, 0.0  ;;  %v3630_v8 = vmax.f32 %v2018_v4, %v3492_v5  ;;  %v2020_v9 = vpop.f32.mrb[122].mxu0  ;;  %v3494_v10 = vpop.f32.mrb[122].mxu1 }
 0x30c   : > { %v3631_v11 = vmax.f32 %v2020_v9, %v3494_v10  ;;  %v2022_v12 = vpop.f32.mrb[123].mxu0  ;;  %v3496_v13 = vpop.f32.mrb[123].mxu1 }
 0x30d   : > { %v4822_v14 = vpack.c.bf16 %v3831_v7, %v3830_v6  ;;  %v3697_v15 = vmax.f32 %v3629_v3, %v3630_v8  ;;  %v3632_v16 = vmax.f32 %v2022_v12, %v3496_v13 }
 0x30f   : > { %4862 = vst [vmem:[%s5737_s24 + $0xe8] sm:$0xff] %v4822_v14   ;;  %v3768_v17 = vadd.f32 %v5817_v46, %v3697_v15  ;;  %v3698_v18 = vmax.f32 %v3631_v11, %v3632_v16 }
 0x311   : > { %v3769_v19 = vadd.f32 %v5817_v46, %v3698_v18  ;;  %v2026_v20 = vpop.f32.mrb[124].mxu0  ;;  %v3500_v21 = vpop.f32.mrb[124].mxu1  ;;  %v3832_v25 = vmax.f32 %v3768_v17, 0.0 }
 0x312   : > { %v3633_v22 = vmax.f32 %v2026_v20, %v3500_v21  ;;  %v2028_v23 = vpop.f32.mrb[125].mxu0  ;;  %v3502_v24 = vpop.f32.mrb[125].mxu1 }
 0x313   : > { %v3833_v26 = vmax.f32 %v3769_v19, 0.0  ;;  %v3634_v27 = vmax.f32 %v2028_v23, %v3502_v24  ;;  %v2030_v28 = vpop.f32.mrb[126].mxu0  ;;  %v3504_v29 = vpop.f32.mrb[126].mxu1 }
 0x314   : > { %v3635_v30 = vmax.f32 %v2030_v28, %v3504_v29  ;;  %v2032_v31 = vpop.f32.mrb[127].mxu0  ;;  %v3506_v32 = vpop.f32.mrb[127].mxu1 }
 0x315   : > { %v4827_v33 = vpack.c.bf16 %v3833_v26, %v3832_v25  ;;  %v3699_v34 = vmax.f32 %v3633_v22, %v3634_v27  ;;  %v3636_v35 = vmax.f32 %v2032_v31, %v3506_v32 }
 0x317   : > { %4863 = vst [vmem:[%s5737_s24 + $0xf0] sm:$0xff] %v4827_v33   ;;  %v3770_v36 = vadd.f32 %v5817_v46, %v3699_v34  ;;  %v3700_v37 = vmax.f32 %v3635_v30, %v3636_v35 }
 0x319   : > { %v3771_v38 = vadd.f32 %v5817_v46, %v3700_v37  ;;  %v3834_v39 = vmax.f32 %v3770_v36, 0.0 }
 0x31b   : > { %v3835_v40 = vmax.f32 %v3771_v38, 0.0 }
 0x31d   : > { %v4832_v41 = vpack.c.bf16 %v3835_v40, %v3834_v39 }
 0x31f   : > { %4864 = vst [vmem:[%s5737_s24 + $0xf8] sm:$0xff] %v4832_v41  }
 0x320 PF: > { %s13_s12 = sadd.s32 1, %s5232_s12  }
 0x321   : > { %p10_p4 = scmp.ge.s32.totalorder %s13_s12, 4  }
 0x323   :  { %12 = sbr.rel (!%p10_p4) target bundleno = 1 (0x1), region = 62 }

// kernel: mycnn_forward.4
= control target key start
LH: loop header
LB: loop body
LE: loop exit
PB: predicated region body
PF: predicated region fallthrough
CT: control target
= control target key end

     0   :  { %s3117_s12 = smov 0   ;;  %s3663_s0 = inlined_call_operand.vmem [shape: bf16[128,2304], index: 0, kind: input, shape index: {}]   ;;  %s3664_s1 = inlined_call_operand.vmem [shape: bf16[1152,256], index: 1, kind: input, shape index: {}]   ;;  %s3665_s2 = inlined_call_operand.vmem [shape: f32[1,128], index: 2, kind: input, shape index: {}]   ;;  %s3666_s3 = inlined_call_operand.vmem [shape: bf16[128,128], index: 3, kind: output, shape index: {}]  }
   0x1 LB: > { %s2363_s13 = sadd.s32 4294967295, %s3094_s12   ;;  %p2367_p0 = scmp.ge.s32.totalorder %s3094_s12, 1  ;;  %s3094_s12 = sphi %s3117_s12, %s13_s12  }
   0x2   : > { %p139_p1 = scmp.lt.s32.totalorder %s3094_s12, 3 }
   0x4   : > { %p140_p2 = pnand %p2367_p0, %p139_p1 }
   0x5   : > { %v2768_v0 = vld [vmem:[%s3664_s1 + $0x4] ss:$8 sps:$4 sm:$0xff] (!%p140_p2)   ;;  %v2770_v1 = vld [vmem:[%s3664_s1] ss:$8 sps:$4 sm:$0xff] (!%p140_p2)   ;;  %v2771_v2 = vld [vmem:[%s3664_s1 + $0x14] ss:$8 sps:$4 sm:$0xff] (!%p140_p2)  }
   0x6   : > { %143 = sbr.rel (%p140_p2) target bundleno = 544 (0x220), region = 32  ;;  %1266 = vmatprep.subr.bf16.mxu0 (!%p140_p2), %v2768_v0  ;;  %1855 = vmatprep.subr.bf16.mxu1 (!%p140_p2), %v2768_v0  ;;  %v2773_v3 = vld [vmem:[%s3664_s1 + $0x10] ss:$8 sps:$4 sm:$0xff] (!%p140_p2)   ;;  %v2774_v4 = vld [vmem:[%s3664_s1 + $0x24] ss:$8 sps:$4 sm:$0xff] (!%p140_p2)   ;;  %s2368_s24 = sshll.u32 (!%p140_p2), %s2363_s13, 3 }
   0x7   : > { %1267 = vmatpush1.bf16.msra.mxu0 (!%p140_p2), %v2770_v1  ;;  %1856 = vmatpush1.bf16.msra.mxu1 (!%p140_p2), %v2770_v1  ;;  %v2776_v5 = vld [vmem:[%s3664_s1 + $0x20] ss:$8 sps:$4 sm:$0xff] (!%p140_p2)   ;;  %p165_p3 = scmp.lt.s32.totalorder (!%p140_p2), %s2368_s24, 15  ;;  %v2777_v6 = vld [vmem:[%s3664_s1 + $0x34] ss:$8 sps:$4 sm:$0xff] (!%p140_p2)  }
   0x8   : > { %1268 = vmatprep.subr.bf16.mxu0 (!%p140_p2), %v2771_v2  ;;  %1857 = vmatprep.subr.bf16.mxu1 (!%p140_p2), %v2771_v2  ;;  %v2779_v7 = vld [vmem:[%s3664_s1 + $0x30] ss:$8 sps:$4 sm:$0xff] (!%p140_p2)   ;;  %v2780_v8 = vld [vmem:[%s3664_s1 + $0x44] ss:$8 sps:$4 sm:$0xff] (!%p140_p2)   ;;  %v2782_v9 = vld [vmem:[%s3664_s1 + $0x40] ss:$8 sps:$4 sm:$0xff] (!%p140_p2)  }
   0x9   : > { %v2783_v10 = vld [vmem:[%s3664_s1 + $0x54] ss:$8 sps:$4 sm:$0xff] (!%p140_p2)   ;;  %v2785_v11 = vld [vmem:[%s3664_s1 + $0x50] ss:$8 sps:$4 sm:$0xff] (!%p140_p2)   ;;  %v2786_v12 = vld [vmem:[%s3664_s1 + $0x64] ss:$8 sps:$4 sm:$0xff] (!%p140_p2)  }
   0xa   : > { %v2788_v14 = vld [vmem:[%s3664_s1 + $0x60] ss:$8 sps:$4 sm:$0xff] (!%p140_p2)   ;;  %v2789_v15 = vld [vmem:[%s3664_s1 + $0x74] ss:$8 sps:$4 sm:$0xff] (!%p140_p2)   ;;  %v2791_v17 = vld [vmem:[%s3664_s1 + $0x70] ss:$8 sps:$4 sm:$0xff] (!%p140_p2)  }
   0xb   : > { %1269 = vmatpush1.bf16.msra.mxu0 (!%p140_p2), %v2773_v3  ;;  %1858 = vmatpush1.bf16.msra.mxu1 (!%p140_p2), %v2773_v3  ;;  %v2792_v18 = vld [vmem:[%s3664_s1 + $0x84] ss:$8 sps:$4 sm:$0xff] (!%p140_p2)   ;;  %v2794_v19 = vld [vmem:[%s3664_s1 + $0x80] ss:$8 sps:$4 sm:$0xff] (!%p140_p2)   ;;  %v2795_v20 = vld [vmem:[%s3664_s1 + $0x94] ss:$8 sps:$4 sm:$0xff] (!%p140_p2)  }
   0xc   : > { %1270 = vmatprep.subr.bf16.mxu0 (!%p140_p2), %v2774_v4  ;;  %1859 = vmatprep.subr.bf16.mxu1 (!%p140_p2), %v2774_v4  ;;  %v2797_v21 = vld [vmem:[%s3664_s1 + $0x90] ss:$8 sps:$4 sm:$0xff] (!%p140_p2)   ;;  %v2798_v22 = vld [vmem:[%s3664_s1 + $0xa4] ss:$8 sps:$4 sm:$0xff] (!%p140_p2)   ;;  %v2800_v23 = vld [vmem:[%s3664_s1 + $0xa0] ss:$8 sps:$4 sm:$0xff] (!%p140_p2)  }
   0xd   : > { %s3668_s24 = smov (!%p165_p3, %s2368_s24), 15  ;;  %v2801_v24 = vld [vmem:[%s3664_s1 + $0xb4] ss:$8 sps:$4 sm:$0xff]   ;;  %v2803_v25 = vld [vmem:[%s3664_s1 + $0xb0] ss:$8 sps:$4 sm:$0xff]  }
   0xe   : > { %s2758_s8 = smul.u32 72, %s3668_s24  ;;  %v2804_v26 = vld [vmem:[%s3664_s1 + $0xc4] ss:$8 sps:$4 sm:$0xff]   ;;  %v2806_v27 = vld [vmem:[%s3664_s1 + $0xc0] ss:$8 sps:$4 sm:$0xff]  }
   0xf   : > { %1271 = vmatpush1.bf16.msra.mxu0 %v2776_v5  ;;  %1860 = vmatpush1.bf16.msra.mxu1 %v2776_v5  ;;  %v2807_v28 = vld [vmem:[%s3664_s1 + $0xd4] ss:$8 sps:$4 sm:$0xff]   ;;  %v2809_v29 = vld [vmem:[%s3664_s1 + $0xd0] ss:$8 sps:$4 sm:$0xff]   ;;  %v2810_v30 = vld [vmem:[%s3664_s1 + $0xe4] ss:$8 sps:$4 sm:$0xff]  }
  0x10   : > { %1272 = vmatprep.subr.bf16.mxu0 %v2777_v6  ;;  %1861 = vmatprep.subr.bf16.mxu1 %v2777_v6  ;;  %s3167_s16 = scalar_lea.vmem %s3663_s0, %s2758_s8  ;;  %v2812_v31 = vld [vmem:[%s3664_s1 + $0xe0] ss:$8 sps:$4 sm:$0xff]   ;;  %v2813_v32 = vld [vmem:[%s3664_s1 + $0xf4] ss:$8 sps:$4 sm:$0xff]   ;;  %v2815_v33 = vld [vmem:[%s3664_s1 + $0xf0] ss:$8 sps:$4 sm:$0xff]  }
  0x11   : > { %v2818_v13 = vld [vmem:[%s3167_s16 + $0x4] ss:$72 sps:$4 sm:$0xff]   ;;  %v2824_v16 = vld [vmem:[%s3167_s16 + $0x28] ss:$72 sps:$4 sm:$0xff]   ;;  %v2827_v38 = vld [vmem:[%s3664_s1 + $0x114] ss:$8 sps:$4 sm:$0xff]  }
  0x12   : > { %1298 = vmatprep.mubr.bf16.mxu0 %v2818_v13  ;;  %1887 = vmatprep.mubr.bf16.mxu1 %v2824_v16  ;;  %v2821_v34 = vld [vmem:[%s3664_s1 + $0x104] ss:$8 sps:$4 sm:$0xff]   ;;  %v2816_v35 = vld [vmem:[%s3167_s16] ss:$72 sps:$4 sm:$0xff]   ;;  %v2852_v39 = vld [vmem:[%s3167_s16 + $0x94] ss:$72 sps:$4 sm:$0xff]  }
  0x13   : > { %1273 = vmatpush1.bf16.msra.mxu0 %v2779_v7  ;;  %1862 = vmatpush1.bf16.msra.mxu1 %v2779_v7  ;;  %v2822_v36 = vld [vmem:[%s3167_s16 + $0x24] ss:$72 sps:$4 sm:$0xff]   ;;  %v2819_v37 = vld [vmem:[%s3664_s1 + $0x100] ss:$8 sps:$4 sm:$0xff]   ;;  %v2825_v41 = vld [vmem:[%s3664_s1 + $0x110] ss:$8 sps:$4 sm:$0xff]  }
  0x14   : > { %1274 = vmatprep.subr.bf16.mxu0 %v2780_v8  ;;  %1863 = vmatprep.subr.bf16.mxu1 %v2780_v8  ;;  %v2857_v40 = vld [vmem:[%s3167_s16 + $0xb8] ss:$72 sps:$4 sm:$0xff]   ;;  %v2830_v42 = vld [vmem:[%s3664_s1 + $0x124] ss:$8 sps:$4 sm:$0xff]   ;;  %v2860_v44 = vld [vmem:[%s3167_s16 + $0xb4] ss:$72 sps:$4 sm:$0xff]  }
  0x15   : > { %v2859_v43 = vld [vmem:[%s3167_s16 + $0x90] ss:$72 sps:$4 sm:$0xff]   ;;  %v2828_v45 = vld [vmem:[%s3664_s1 + $0x120] ss:$8 sps:$4 sm:$0xff]   ;;  %v2833_v46 = vld [vmem:[%s3664_s1 + $0x134] ss:$8 sps:$4 sm:$0xff]  }
  0x16   : > { %v2864_v47 = vld [vmem:[%s3167_s16 + $0x124] ss:$72 sps:$4 sm:$0xff]   ;;  %v2869_v48 = vld [vmem:[%s3167_s16 + $0x148] ss:$72 sps:$4 sm:$0xff]   ;;  %v2839_v54 = vld [vmem:[%s3664_s1 + $0x154] ss:$8 sps:$4 sm:$0xff]  }
  0x17   : > { %1275 = vmatpush1.bf16.msra.mxu0 %v2782_v9  ;;  %1864 = vmatpush1.bf16.msra.mxu1 %v2782_v9  ;;  %v2831_v49 = vld [vmem:[%s3664_s1 + $0x130] ss:$8 sps:$4 sm:$0xff]   ;;  %v2836_v50 = vld [vmem:[%s3664_s1 + $0x144] ss:$8 sps:$4 sm:$0xff]   ;;  %v2871_v51 = vld [vmem:[%s3167_s16 + $0x120] ss:$72 sps:$4 sm:$0xff]  }
  0x18   : > { %1276 = vmatprep.subr.bf16.mxu0 %v2783_v10  ;;  %1865 = vmatprep.subr.bf16.mxu1 %v2783_v10  ;;  %v2872_v52 = vld [vmem:[%s3167_s16 + $0x144] ss:$72 sps:$4 sm:$0xff]   ;;  %v2834_v53 = vld [vmem:[%s3664_s1 + $0x140] ss:$8 sps:$4 sm:$0xff]   ;;  %v2876_v55 = vld [vmem:[%s3167_s16 + $0x1b4] ss:$72 sps:$4 sm:$0xff]  }
  0x19   : > { %v2881_v56 = vld [vmem:[%s3167_s16 + $0x1d8] ss:$72 sps:$4 sm:$0xff]   ;;  %v2842_v58 = vld [vmem:[%s3664_s1 + $0x164] ss:$8 sps:$4 sm:$0xff]   ;;  %v2884_v60 = vld [vmem:[%s3167_s16 + $0x1d4] ss:$72 sps:$4 sm:$0xff]  }
  0x1a   : > { %v2837_v57 = vld [vmem:[%s3664_s1 + $0x150] ss:$8 sps:$4 sm:$0xff]   ;;  %v2840_v61 = vld [vmem:[%s3664_s1 + $0x160] ss:$8 sps:$4 sm:$0xff]   ;;  %v2845_v62 = vld [vmem:[%s3664_s1 + $0x174] ss:$8 sps:$4 sm:$0xff]  }
  0x1b   : > { %1277 = vmatpush1.bf16.msra.mxu0 %v2785_v11  ;;  %1866 = vmatpush1.bf16.msra.mxu1 %v2785_v11  ;;  %v2883_v59 = vld [vmem:[%s3167_s16 + $0x1b0] ss:$72 sps:$4 sm:$0xff]   ;;  %v2890_v63 = vld [vmem:[%s3167_s16 + $0xc] ss:$72 sps:$4 sm:$0xff]   ;;  %v2846_v3 = vld [vmem:[%s3664_s1 + $0x180] ss:$8 sps:$4 sm:$0xff]  }
  0x1c   : > { %1278 = vmatprep.subr.bf16.mxu0 %v2786_v12  ;;  %1867 = vmatprep.subr.bf16.mxu1 %v2786_v12  ;;  %v2896_v0 = vld [vmem:[%s3167_s16 + $0x30] ss:$72 sps:$4 sm:$0xff]   ;;  %v2848_v2 = vld [vmem:[%s3664_s1 + $0x184] ss:$8 sps:$4 sm:$0xff]   ;;  %v2851_v4 = vld [vmem:[%s3664_s1 + $0x194] ss:$8 sps:$4 sm:$0xff]  }
  0x1d   : > { %v2843_v1 = vld [vmem:[%s3664_s1 + $0x170] ss:$8 sps:$4 sm:$0xff]   ;;  %v2856_v6 = vld [vmem:[%s3664_s1 + $0x1a4] ss:$8 sps:$4 sm:$0xff]   ;;  %v2854_v7 = vld [vmem:[%s3664_s1 + $0x1a0] ss:$8 sps:$4 sm:$0xff]  }
  0x1e   : > { %v2849_v5 = vld [vmem:[%s3664_s1 + $0x190] ss:$8 sps:$4 sm:$0xff]   ;;  %v2863_v8 = vld [vmem:[%s3664_s1 + $0x1b4] ss:$8 sps:$4 sm:$0xff]   ;;  %v2868_v10 = vld [vmem:[%s3664_s1 + $0x1c4] ss:$8 sps:$4 sm:$0xff]  }
  0x1f   : > { %1279 = vmatpush1.bf16.msra.mxu0 %v2788_v14  ;;  %1868 = vmatpush1.bf16.msra.mxu1 %v2788_v14  ;;  %v2861_v9 = vld [vmem:[%s3664_s1 + $0x1b0] ss:$8 sps:$4 sm:$0xff]   ;;  %v2866_v11 = vld [vmem:[%s3664_s1 + $0x1c0] ss:$8 sps:$4 sm:$0xff]   ;;  %v2875_v12 = vld [vmem:[%s3664_s1 + $0x1d4] ss:$8 sps:$4 sm:$0xff]  }
  0x20   : > { %1280 = vmatprep.subr.bf16.mxu0 %v2789_v15  ;;  %1869 = vmatprep.subr.bf16.mxu1 %v2789_v15  ;;  %v2873_v13 = vld [vmem:[%s3664_s1 + $0x1d0] ss:$8 sps:$4 sm:$0xff]   ;;  %v2880_v14 = vld [vmem:[%s3664_s1 + $0x1e4] ss:$8 sps:$4 sm:$0xff]   ;;  %v2878_v15 = vld [vmem:[%s3664_s1 + $0x1e0] ss:$8 sps:$4 sm:$0xff]  }
  0x21   : > { %v2887_v16 = vld [vmem:[%s3664_s1 + $0x1f4] ss:$8 sps:$4 sm:$0xff]  }
  0x23   : > { %1281 = vmatpush1.bf16.msra.mxu0 %v2791_v17  ;;  %1870 = vmatpush1.bf16.msra.mxu1 %v2791_v17  ;;  %v2885_v17 = vld [vmem:[%s3664_s1 + $0x1f0] ss:$8 sps:$4 sm:$0xff]  }
  0x24   : > { %1282 = vmatprep.subr.bf16.mxu0 %v2792_v18  ;;  %1871 = vmatprep.subr.bf16.mxu1 %v2792_v18  ;;  %v2893_v18 = vld [vmem:[%s3664_s1 + $0x204] ss:$8 sps:$4 sm:$0xff]  }
  0x27   : > { %1283 = vmatpush1.bf16.msra.mxu0 %v2794_v19  ;;  %1872 = vmatpush1.bf16.msra.mxu1 %v2794_v19  ;;  %v2888_v19 = vld [vmem:[%s3167_s16 + $0x8] ss:$72 sps:$4 sm:$0xff]  }
  0x28   : > { %1284 = vmatprep.subr.bf16.mxu0 %v2795_v20  ;;  %1873 = vmatprep.subr.bf16.mxu1 %v2795_v20  ;;  %v2894_v20 = vld [vmem:[%s3167_s16 + $0x2c] ss:$72 sps:$4 sm:$0xff]  }
  0x2b   : > { %1285 = vmatpush1.bf16.msra.mxu0 %v2797_v21  ;;  %1874 = vmatpush1.bf16.msra.mxu1 %v2797_v21  ;;  %v2891_v21 = vld [vmem:[%s3664_s1 + $0x200] ss:$8 sps:$4 sm:$0xff]  }
  0x2c   : > { %1286 = vmatprep.subr.bf16.mxu0 %v2798_v22  ;;  %1875 = vmatprep.subr.bf16.mxu1 %v2798_v22  ;;  %v2899_v22 = vld [vmem:[%s3664_s1 + $0x214] ss:$8 sps:$4 sm:$0xff]  }
  0x2f   : > { %1287 = vmatpush1.bf16.msra.mxu0 %v2800_v23  ;;  %1876 = vmatpush1.bf16.msra.mxu1 %v2800_v23  ;;  %v2924_v23 = vld [vmem:[%s3167_s16 + $0x9c] ss:$72 sps:$4 sm:$0xff]  }
  0x30   : > { %1288 = vmatprep.subr.bf16.mxu0 %v2801_v24  ;;  %1877 = vmatprep.subr.bf16.mxu1 %v2801_v24  ;;  %v2929_v24 = vld [vmem:[%s3167_s16 + $0xc0] ss:$72 sps:$4 sm:$0xff]  }
  0x33   : > { %1289 = vmatpush1.bf16.msra.mxu0 %v2803_v25  ;;  %1878 = vmatpush1.bf16.msra.mxu1 %v2803_v25  ;;  %v2897_v25 = vld [vmem:[%s3664_s1 + $0x210] ss:$8 sps:$4 sm:$0xff]  }
  0x34   : > { %1290 = vmatprep.subr.bf16.mxu0 %v2804_v26  ;;  %1879 = vmatprep.subr.bf16.mxu1 %v2804_v26  ;;  %v2902_v26 = vld [vmem:[%s3664_s1 + $0x224] ss:$8 sps:$4 sm:$0xff]  }
  0x37   : > { %1291 = vmatpush1.bf16.msra.mxu0 %v2806_v27  ;;  %1880 = vmatpush1.bf16.msra.mxu1 %v2806_v27  ;;  %v2931_v27 = vld [vmem:[%s3167_s16 + $0x98] ss:$72 sps:$4 sm:$0xff]  }
  0x38   : > { %1292 = vmatprep.subr.bf16.mxu0 %v2807_v28  ;;  %1881 = vmatprep.subr.bf16.mxu1 %v2807_v28  ;;  %v2932_v28 = vld [vmem:[%s3167_s16 + $0xbc] ss:$72 sps:$4 sm:$0xff]  }
  0x3b   : > { %1293 = vmatpush1.bf16.msra.mxu0 %v2809_v29  ;;  %1882 = vmatpush1.bf16.msra.mxu1 %v2809_v29  ;;  %v2900_v29 = vld [vmem:[%s3664_s1 + $0x220] ss:$8 sps:$4 sm:$0xff]  }
  0x3c   : > { %1294 = vmatprep.subr.bf16.mxu0 %v2810_v30  ;;  %1883 = vmatprep.subr.bf16.mxu1 %v2810_v30  ;;  %v2905_v30 = vld [vmem:[%s3664_s1 + $0x234] ss:$8 sps:$4 sm:$0xff]  }
  0x3f   : > { %1295 = vmatpush1.bf16.msra.mxu0 %v2812_v31  ;;  %1884 = vmatpush1.bf16.msra.mxu1 %v2812_v31  ;;  %v2936_v31 = vld [vmem:[%s3167_s16 + $0x12c] ss:$72 sps:$4 sm:$0xff]  }
  0x40   : > { %1296 = vmatprep.subr.bf16.mxu0 %v2813_v32  ;;  %1885 = vmatprep.subr.bf16.mxu1 %v2813_v32  ;;  %v2941_v32 = vld [vmem:[%s3167_s16 + $0x150] ss:$72 sps:$4 sm:$0xff]  }
  0x43   : > { %1297 = vmatpush1.bf16.msra.mxu0 %v2815_v33  ;;  %1886 = vmatpush1.bf16.msra.mxu1 %v2815_v33  ;;  %v2903_v33 = vld [vmem:[%s3664_s1 + $0x230] ss:$8 sps:$4 sm:$0xff]  }
  0x44   : > { %1339 = vmatprep.subr.bf16.mxu0 %v2821_v34  ;;  %1928 = vmatprep.subr.bf16.mxu1 %v2821_v34  ;;  %v2908_v34 = vld [vmem:[%s3664_s1 + $0x244] ss:$8 sps:$4 sm:$0xff]  }
  0x46   : > { %1299 = vmatmul.mubr.bf16.vlgmr.msra.gmra.mrb[0].mxu0 %v2816_v35  ;;  %1888 = vmatmul.mubr.bf16.vlgmr.msra.gmra.mrb[0].mxu1 %v2822_v36  ;;  %v2943_v35 = vld [vmem:[%s3167_s16 + $0x128] ss:$72 sps:$4 sm:$0xff]   ;;  %v2944_v36 = vld [vmem:[%s3167_s16 + $0x14c] ss:$72 sps:$4 sm:$0xff]  }
  0x47   : > { %1340 = vmatpush1.bf16.msra.mxu0 %v2819_v37  ;;  %1929 = vmatpush1.bf16.msra.mxu1 %v2819_v37  ;;  %v2906_v37 = vld [vmem:[%s3664_s1 + $0x240] ss:$8 sps:$4 sm:$0xff]  }
  0x48   : > { %1341 = vmatprep.subr.bf16.mxu0 %v2827_v38  ;;  %1930 = vmatprep.subr.bf16.mxu1 %v2827_v38  ;;  %v2911_v38 = vld [vmem:[%s3664_s1 + $0x254] ss:$8 sps:$4 sm:$0xff]  }
  0x49   : > { %1308 = vmatprep.mubr.bf16.mxu0 %v2852_v39  ;;  %1897 = vmatprep.mubr.bf16.mxu1 %v2857_v40  ;;  %v2948_v39 = vld [vmem:[%s3167_s16 + $0x1bc] ss:$72 sps:$4 sm:$0xff]   ;;  %v2953_v40 = vld [vmem:[%s3167_s16 + $0x1e0] ss:$72 sps:$4 sm:$0xff]  }
  0x4b   : > { %1342 = vmatpush1.bf16.msra.mxu0 %v2825_v41  ;;  %1931 = vmatpush1.bf16.msra.mxu1 %v2825_v41  ;;  %v2909_v41 = vld [vmem:[%s3664_s1 + $0x250] ss:$8 sps:$4 sm:$0xff]  }
  0x4c   : > { %1343 = vmatprep.subr.bf16.mxu0 %v2830_v42  ;;  %1932 = vmatprep.subr.bf16.mxu1 %v2830_v42  ;;  %v2914_v42 = vld [vmem:[%s3664_s1 + $0x264] ss:$8 sps:$4 sm:$0xff]  }
  0x4e   : > { %1309 = vmatmul.mubr.bf16.gmra.mrb[4].mxu0 %v2859_v43  ;;  %1898 = vmatmul.mubr.bf16.gmra.mrb[4].mxu1 %v2860_v44  ;;  %v2955_v43 = vld [vmem:[%s3167_s16 + $0x1b8] ss:$72 sps:$4 sm:$0xff]   ;;  %v2956_v44 = vld [vmem:[%s3167_s16 + $0x1dc] ss:$72 sps:$4 sm:$0xff]  }
  0x4f   : > { %1344 = vmatpush1.bf16.msra.mxu0 %v2828_v45  ;;  %1933 = vmatpush1.bf16.msra.mxu1 %v2828_v45  ;;  %v2912_v45 = vld [vmem:[%s3664_s1 + $0x260] ss:$8 sps:$4 sm:$0xff]  }
  0x50   : > { %1345 = vmatprep.subr.bf16.mxu0 %v2833_v46  ;;  %1934 = vmatprep.subr.bf16.mxu1 %v2833_v46  ;;  %v2917_v46 = vld [vmem:[%s3664_s1 + $0x274] ss:$8 sps:$4 sm:$0xff]  }
  0x51   : > { %1318 = vmatprep.mubr.bf16.mxu0 %v2864_v47  ;;  %1907 = vmatprep.mubr.bf16.mxu1 %v2869_v48  ;;  %v2962_v47 = vld [vmem:[%s3167_s16 + $0x14] ss:$72 sps:$4 sm:$0xff]   ;;  %v2968_v48 = vld [vmem:[%s3167_s16 + $0x38] ss:$72 sps:$4 sm:$0xff]  }
  0x53   : > { %1346 = vmatpush1.bf16.msra.mxu0 %v2831_v49  ;;  %1935 = vmatpush1.bf16.msra.mxu1 %v2831_v49  ;;  %v2915_v49 = vld [vmem:[%s3664_s1 + $0x270] ss:$8 sps:$4 sm:$0xff]  }
  0x54   : > { %1347 = vmatprep.subr.bf16.mxu0 %v2836_v50  ;;  %1936 = vmatprep.subr.bf16.mxu1 %v2836_v50  ;;  %v2920_v50 = vld [vmem:[%s3664_s1 + $0x284] ss:$8 sps:$4 sm:$0xff]  }
  0x56   : > { %1319 = vmatmul.mubr.bf16.gmra.mrb[8].mxu0 %v2871_v51  ;;  %1908 = vmatmul.mubr.bf16.gmra.mrb[8].mxu1 %v2872_v52  ;;  %v2918_v51 = vld [vmem:[%s3664_s1 + $0x280] ss:$8 sps:$4 sm:$0xff]   ;;  %v2923_v52 = vld [vmem:[%s3664_s1 + $0x294] ss:$8 sps:$4 sm:$0xff]  }
  0x57   : > { %1348 = vmatpush1.bf16.msra.mxu0 %v2834_v53  ;;  %1937 = vmatpush1.bf16.msra.mxu1 %v2834_v53  ;;  %v2921_v53 = vld [vmem:[%s3664_s1 + $0x290] ss:$8 sps:$4 sm:$0xff]  }
  0x58   : > { %1349 = vmatprep.subr.bf16.mxu0 %v2839_v54  ;;  %1938 = vmatprep.subr.bf16.mxu1 %v2839_v54  ;;  %v2928_v54 = vld [vmem:[%s3664_s1 + $0x2a4] ss:$8 sps:$4 sm:$0xff]  }
  0x59   : > { %1328 = vmatprep.mubr.bf16.mxu0 %v2876_v55  ;;  %1917 = vmatprep.mubr.bf16.mxu1 %v2881_v56  ;;  %v2926_v55 = vld [vmem:[%s3664_s1 + $0x2a0] ss:$8 sps:$4 sm:$0xff]   ;;  %v2935_v56 = vld [vmem:[%s3664_s1 + $0x2b4] ss:$8 sps:$4 sm:$0xff]  }
  0x5b   : > { %1350 = vmatpush1.bf16.msra.mxu0 %v2837_v57  ;;  %1939 = vmatpush1.bf16.msra.mxu1 %v2837_v57  ;;  %v2933_v57 = vld [vmem:[%s3664_s1 + $0x2b0] ss:$8 sps:$4 sm:$0xff]  }
  0x5c   : > { %1351 = vmatprep.subr.bf16.mxu0 %v2842_v58  ;;  %1940 = vmatprep.subr.bf16.mxu1 %v2842_v58  ;;  %v2940_v58 = vld [vmem:[%s3664_s1 + $0x2c4] ss:$8 sps:$4 sm:$0xff]  }
  0x5e   : > { %1329 = vmatmul.mubr.bf16.gmra.mrb[12].mxu0 %v2883_v59  ;;  %1918 = vmatmul.mubr.bf16.gmra.mrb[12].mxu1 %v2884_v60  ;;  %v2938_v59 = vld [vmem:[%s3664_s1 + $0x2c0] ss:$8 sps:$4 sm:$0xff]   ;;  %v2947_v60 = vld [vmem:[%s3664_s1 + $0x2d4] ss:$8 sps:$4 sm:$0xff]  }
  0x5f   : > { %1352 = vmatpush1.bf16.msra.mxu0 %v2840_v61  ;;  %1941 = vmatpush1.bf16.msra.mxu1 %v2840_v61  ;;  %v2945_v61 = vld [vmem:[%s3664_s1 + $0x2d0] ss:$8 sps:$4 sm:$0xff]  }
  0x60   : > { %1353 = vmatprep.subr.bf16.mxu0 %v2845_v62  ;;  %1942 = vmatprep.subr.bf16.mxu1 %v2845_v62  ;;  %v2952_v62 = vld [vmem:[%s3664_s1 + $0x2e4] ss:$8 sps:$4 sm:$0xff]  }
  0x61   : > { %1371 = vmatprep.mubr.bf16.mxu0 %v2890_v63  ;;  %1960 = vmatprep.mubr.bf16.mxu1 %v2896_v0  ;;  %v2950_v63 = vld [vmem:[%s3664_s1 + $0x2e0] ss:$8 sps:$4 sm:$0xff]   ;;  %v2959_v0 = vld [vmem:[%s3664_s1 + $0x2f4] ss:$8 sps:$4 sm:$0xff]  }
  0x63   : > { %1354 = vmatpush1.bf16.msra.mxu0 %v2843_v1  ;;  %1943 = vmatpush1.bf16.msra.mxu1 %v2843_v1  ;;  %v2957_v1 = vld [vmem:[%s3664_s1 + $0x2f0] ss:$8 sps:$4 sm:$0xff]  }
  0x64   : > { %1355 = vmatprep.subr.bf16.mxu0 %v2848_v2  ;;  %1944 = vmatprep.subr.bf16.mxu1 %v2848_v2  ;;  %v2965_v2 = vld [vmem:[%s3664_s1 + $0x304] ss:$8 sps:$4 sm:$0xff]  }
  0x67   : > { %1356 = vmatpush1.bf16.msra.mxu0 %v2846_v3  ;;  %1945 = vmatpush1.bf16.msra.mxu1 %v2846_v3  ;;  %v2960_v3 = vld [vmem:[%s3167_s16 + $0x10] ss:$72 sps:$4 sm:$0xff]  }
  0x68   : > { %1357 = vmatprep.subr.bf16.mxu0 %v2851_v4  ;;  %1946 = vmatprep.subr.bf16.mxu1 %v2851_v4  ;;  %v2966_v4 = vld [vmem:[%s3167_s16 + $0x34] ss:$72 sps:$4 sm:$0xff]  }
  0x6b   : > { %1358 = vmatpush1.bf16.msra.mxu0 %v2849_v5  ;;  %1947 = vmatpush1.bf16.msra.mxu1 %v2849_v5  ;;  %v2963_v5 = vld [vmem:[%s3664_s1 + $0x300] ss:$8 sps:$4 sm:$0xff]  }
  0x6c   : > { %1359 = vmatprep.subr.bf16.mxu0 %v2856_v6  ;;  %1948 = vmatprep.subr.bf16.mxu1 %v2856_v6  ;;  %v2971_v6 = vld [vmem:[%s3664_s1 + $0x314] ss:$8 sps:$4 sm:$0xff]  }
  0x6f   : > { %1360 = vmatpush1.bf16.msra.mxu0 %v2854_v7  ;;  %1949 = vmatpush1.bf16.msra.mxu1 %v2854_v7  ;;  %v2996_v7 = vld [vmem:[%s3167_s16 + $0xa4] ss:$72 sps:$4 sm:$0xff]  }
  0x70   : > { %1361 = vmatprep.subr.bf16.mxu0 %v2863_v8  ;;  %1950 = vmatprep.subr.bf16.mxu1 %v2863_v8  ;;  %v2998_v8 = vld [vmem:[%s3167_s16 + $0xc8] ss:$72 sps:$4 sm:$0xff]  }
  0x73   : > { %1362 = vmatpush1.bf16.msra.mxu0 %v2861_v9  ;;  %1951 = vmatpush1.bf16.msra.mxu1 %v2861_v9  ;;  %v2969_v9 = vld [vmem:[%s3664_s1 + $0x310] ss:$8 sps:$4 sm:$0xff]  }
  0x74   : > { %1363 = vmatprep.subr.bf16.mxu0 %v2868_v10  ;;  %1952 = vmatprep.subr.bf16.mxu1 %v2868_v10  ;;  %v2974_v10 = vld [vmem:[%s3664_s1 + $0x324] ss:$8 sps:$4 sm:$0xff]  }
  0x77   : > { %1364 = vmatpush1.bf16.msra.mxu0 %v2866_v11  ;;  %1953 = vmatpush1.bf16.msra.mxu1 %v2866_v11  ;;  %v3000_v11 = vld [vmem:[%s3167_s16 + $0xa0] ss:$72 sps:$4 sm:$0xff]  }
  0x78   : > { %1365 = vmatprep.subr.bf16.mxu0 %v2875_v12  ;;  %1954 = vmatprep.subr.bf16.mxu1 %v2875_v12  ;;  %v3004_v12 = vld [vmem:[%s3167_s16 + $0xc4] ss:$72 sps:$4 sm:$0xff]  }
  0x7b   : > { %1366 = vmatpush1.bf16.msra.mxu0 %v2873_v13  ;;  %1955 = vmatpush1.bf16.msra.mxu1 %v2873_v13  ;;  %v2972_v13 = vld [vmem:[%s3664_s1 + $0x320] ss:$8 sps:$4 sm:$0xff]  }
  0x7c   : > { %1367 = vmatprep.subr.bf16.mxu0 %v2880_v14  ;;  %1956 = vmatprep.subr.bf16.mxu1 %v2880_v14  ;;  %v2977_v14 = vld [vmem:[%s3664_s1 + $0x334] ss:$8 sps:$4 sm:$0xff]  }
  0x7f   : > { %1368 = vmatpush1.bf16.msra.mxu0 %v2878_v15  ;;  %1957 = vmatpush1.bf16.msra.mxu1 %v2878_v15  ;;  %v3008_v15 = vld [vmem:[%s3167_s16 + $0x134] ss:$72 sps:$4 sm:$0xff]  }
  0x80   : > { %1369 = vmatprep.subr.bf16.mxu0 %v2887_v16  ;;  %1958 = vmatprep.subr.bf16.mxu1 %v2887_v16  ;;  %v3010_v16 = vld [vmem:[%s3167_s16 + $0x158] ss:$72 sps:$4 sm:$0xff]  }
  0x83   : > { %1370 = vmatpush1.bf16.msra.mxu0 %v2885_v17  ;;  %1959 = vmatpush1.bf16.msra.mxu1 %v2885_v17  ;;  %v2975_v17 = vld [vmem:[%s3664_s1 + $0x330] ss:$8 sps:$4 sm:$0xff]  }
  0x84   : > { %1412 = vmatprep.subr.bf16.mxu0 %v2893_v18  ;;  %2001 = vmatprep.subr.bf16.mxu1 %v2893_v18  ;;  %v2980_v18 = vld [vmem:[%s3664_s1 + $0x344] ss:$8 sps:$4 sm:$0xff]  }
  0x86   : > { %1372 = vmatmul.mubr.bf16.vlgmr.msra.gmra.mrb[0].mxu0 %v2888_v19  ;;  %1961 = vmatmul.mubr.bf16.vlgmr.msra.gmra.mrb[0].mxu1 %v2894_v20  ;;  %v3012_v19 = vld [vmem:[%s3167_s16 + $0x130] ss:$72 sps:$4 sm:$0xff]   ;;  %v3016_v20 = vld [vmem:[%s3167_s16 + $0x154] ss:$72 sps:$4 sm:$0xff]  }
  0x87   : > { %1413 = vmatpush1.bf16.msra.mxu0 %v2891_v21  ;;  %2002 = vmatpush1.bf16.msra.mxu1 %v2891_v21  ;;  %v2978_v21 = vld [vmem:[%s3664_s1 + $0x340] ss:$8 sps:$4 sm:$0xff]  }
  0x88   : > { %1414 = vmatprep.subr.bf16.mxu0 %v2899_v22  ;;  %2003 = vmatprep.subr.bf16.mxu1 %v2899_v22  ;;  %v2983_v22 = vld [vmem:[%s3664_s1 + $0x354] ss:$8 sps:$4 sm:$0xff]  }
  0x89   : > { %1381 = vmatprep.mubr.bf16.mxu0 %v2924_v23  ;;  %1970 = vmatprep.mubr.bf16.mxu1 %v2929_v24  ;;  %v3020_v23 = vld [vmem:[%s3167_s16 + $0x1c4] ss:$72 sps:$4 sm:$0xff]   ;;  %v3022_v24 = vld [vmem:[%s3167_s16 + $0x1e8] ss:$72 sps:$4 sm:$0xff]  }
  0x8b   : > { %1415 = vmatpush1.bf16.msra.mxu0 %v2897_v25  ;;  %2004 = vmatpush1.bf16.msra.mxu1 %v2897_v25  ;;  %v2981_v25 = vld [vmem:[%s3664_s1 + $0x350] ss:$8 sps:$4 sm:$0xff]  }
  0x8c   : > { %1416 = vmatprep.subr.bf16.mxu0 %v2902_v26  ;;  %2005 = vmatprep.subr.bf16.mxu1 %v2902_v26  ;;  %v2986_v26 = vld [vmem:[%s3664_s1 + $0x364] ss:$8 sps:$4 sm:$0xff]  }
  0x8e   : > { %1382 = vmatmul.mubr.bf16.gmra.mrb[4].mxu0 %v2931_v27  ;;  %1971 = vmatmul.mubr.bf16.gmra.mrb[4].mxu1 %v2932_v28  ;;  %v3024_v27 = vld [vmem:[%s3167_s16 + $0x1c0] ss:$72 sps:$4 sm:$0xff]   ;;  %v3028_v28 = vld [vmem:[%s3167_s16 + $0x1e4] ss:$72 sps:$4 sm:$0xff]  }
  0x8f   : > { %1417 = vmatpush1.bf16.msra.mxu0 %v2900_v29  ;;  %2006 = vmatpush1.bf16.msra.mxu1 %v2900_v29  ;;  %v2984_v29 = vld [vmem:[%s3664_s1 + $0x360] ss:$8 sps:$4 sm:$0xff]  }
  0x90   : > { %1418 = vmatprep.subr.bf16.mxu0 %v2905_v30  ;;  %2007 = vmatprep.subr.bf16.mxu1 %v2905_v30  ;;  %v2989_v30 = vld [vmem:[%s3664_s1 + $0x374] ss:$8 sps:$4 sm:$0xff]  }
  0x91   : > { %1391 = vmatprep.mubr.bf16.mxu0 %v2936_v31  ;;  %1980 = vmatprep.mubr.bf16.mxu1 %v2941_v32  ;;  %v3034_v31 = vld [vmem:[%s3167_s16 + $0x1c] ss:$72 sps:$4 sm:$0xff]   ;;  %v3037_v32 = vld [vmem:[%s3167_s16 + $0x40] ss:$72 sps:$4 sm:$0xff]  }
  0x93   : > { %1419 = vmatpush1.bf16.msra.mxu0 %v2903_v33  ;;  %2008 = vmatpush1.bf16.msra.mxu1 %v2903_v33  ;;  %v2987_v33 = vld [vmem:[%s3664_s1 + $0x370] ss:$8 sps:$4 sm:$0xff]  }
  0x94   : > { %1420 = vmatprep.subr.bf16.mxu0 %v2908_v34  ;;  %2009 = vmatprep.subr.bf16.mxu1 %v2908_v34  ;;  %v2992_v34 = vld [vmem:[%s3664_s1 + $0x384] ss:$8 sps:$4 sm:$0xff]  }
  0x96   : > { %1392 = vmatmul.mubr.bf16.gmra.mrb[8].mxu0 %v2943_v35  ;;  %1981 = vmatmul.mubr.bf16.gmra.mrb[8].mxu1 %v2944_v36  ;;  %v2990_v35 = vld [vmem:[%s3664_s1 + $0x380] ss:$8 sps:$4 sm:$0xff]   ;;  %v2995_v36 = vld [vmem:[%s3664_s1 + $0x394] ss:$8 sps:$4 sm:$0xff]  }
  0x97   : > { %1421 = vmatpush1.bf16.msra.mxu0 %v2906_v37  ;;  %2010 = vmatpush1.bf16.msra.mxu1 %v2906_v37  ;;  %v2993_v37 = vld [vmem:[%s3664_s1 + $0x390] ss:$8 sps:$4 sm:$0xff]  }
  0x98   : > { %1422 = vmatprep.subr.bf16.mxu0 %v2911_v38  ;;  %2011 = vmatprep.subr.bf16.mxu1 %v2911_v38  ;;  %v3003_v38 = vld [vmem:[%s3664_s1 + $0x3a4] ss:$8 sps:$4 sm:$0xff]  }
  0x99   : > { %1401 = vmatprep.mubr.bf16.mxu0 %v2948_v39  ;;  %1990 = vmatprep.mubr.bf16.mxu1 %v2953_v40  ;;  %v3001_v39 = vld [vmem:[%s3664_s1 + $0x3a0] ss:$8 sps:$4 sm:$0xff]   ;;  %v3007_v40 = vld [vmem:[%s3664_s1 + $0x3b4] ss:$8 sps:$4 sm:$0xff]  }
  0x9b   : > { %1423 = vmatpush1.bf16.msra.mxu0 %v2909_v41  ;;  %2012 = vmatpush1.bf16.msra.mxu1 %v2909_v41  ;;  %v3005_v41 = vld [vmem:[%s3664_s1 + $0x3b0] ss:$8 sps:$4 sm:$0xff]  }
  0x9c   : > { %1424 = vmatprep.subr.bf16.mxu0 %v2914_v42  ;;  %2013 = vmatprep.subr.bf16.mxu1 %v2914_v42  ;;  %v3015_v42 = vld [vmem:[%s3664_s1 + $0x3c4] ss:$8 sps:$4 sm:$0xff]  }
  0x9e   : > { %1402 = vmatmul.mubr.bf16.gmra.mrb[12].mxu0 %v2955_v43  ;;  %1991 = vmatmul.mubr.bf16.gmra.mrb[12].mxu1 %v2956_v44  ;;  %v3013_v43 = vld [vmem:[%s3664_s1 + $0x3c0] ss:$8 sps:$4 sm:$0xff]   ;;  %v3019_v44 = vld [vmem:[%s3664_s1 + $0x3d4] ss:$8 sps:$4 sm:$0xff]  }
  0x9f   : > { %1425 = vmatpush1.bf16.msra.mxu0 %v2912_v45  ;;  %2014 = vmatpush1.bf16.msra.mxu1 %v2912_v45  ;;  %v3017_v45 = vld [vmem:[%s3664_s1 + $0x3d0] ss:$8 sps:$4 sm:$0xff]  }
  0xa0   : > { %1426 = vmatprep.subr.bf16.mxu0 %v2917_v46  ;;  %2015 = vmatprep.subr.bf16.mxu1 %v2917_v46  ;;  %v3027_v46 = vld [vmem:[%s3664_s1 + $0x3e4] ss:$8 sps:$4 sm:$0xff]  }
  0xa1   : > { %1444 = vmatprep.mubr.bf16.mxu0 %v2962_v47  ;;  %2033 = vmatprep.mubr.bf16.mxu1 %v2968_v48  ;;  %v3025_v47 = vld [vmem:[%s3664_s1 + $0x3e0] ss:$8 sps:$4 sm:$0xff]   ;;  %v3031_v48 = vld [vmem:[%s3664_s1 + $0x3f4] ss:$8 sps:$4 sm:$0xff]  }
  0xa3   : > { %1427 = vmatpush1.bf16.msra.mxu0 %v2915_v49  ;;  %2016 = vmatpush1.bf16.msra.mxu1 %v2915_v49  ;;  %v3029_v49 = vld [vmem:[%s3664_s1 + $0x3f0] ss:$8 sps:$4 sm:$0xff]  }
  0xa4   : > { %1428 = vmatprep.subr.bf16.mxu0 %v2920_v50  ;;  %2017 = vmatprep.subr.bf16.mxu1 %v2920_v50  ;;  %v3040_v50 = vld [vmem:[%s3664_s1 + $0x404] ss:$8 sps:$4 sm:$0xff]  }
  0xa7   : > { %1429 = vmatpush1.bf16.msra.mxu0 %v2918_v51  ;;  %2018 = vmatpush1.bf16.msra.mxu1 %v2918_v51  ;;  %v3032_v51 = vld [vmem:[%s3167_s16 + $0x18] ss:$72 sps:$4 sm:$0xff]  }
  0xa8   : > { %1430 = vmatprep.subr.bf16.mxu0 %v2923_v52  ;;  %2019 = vmatprep.subr.bf16.mxu1 %v2923_v52  ;;  %v3035_v52 = vld [vmem:[%s3167_s16 + $0x3c] ss:$72 sps:$4 sm:$0xff]  }
  0xab   : > { %1431 = vmatpush1.bf16.msra.mxu0 %v2921_v53  ;;  %2020 = vmatpush1.bf16.msra.mxu1 %v2921_v53  ;;  %v3038_v53 = vld [vmem:[%s3664_s1 + $0x400] ss:$8 sps:$4 sm:$0xff]  }
  0xac   : > { %1432 = vmatprep.subr.bf16.mxu0 %v2928_v54  ;;  %2021 = vmatprep.subr.bf16.mxu1 %v2928_v54  ;;  %v3043_v54 = vld [vmem:[%s3664_s1 + $0x414] ss:$8 sps:$4 sm:$0xff]  }
  0xaf   : > { %1433 = vmatpush1.bf16.msra.mxu0 %v2926_v55  ;;  %2022 = vmatpush1.bf16.msra.mxu1 %v2926_v55  ;;  %v3044_v55 = vld [vmem:[%s3167_s16 + $0xac] ss:$72 sps:$4 sm:$0xff]  }
  0xb0   : > { %1434 = vmatprep.subr.bf16.mxu0 %v2935_v56  ;;  %2023 = vmatprep.subr.bf16.mxu1 %v2935_v56  ;;  %v3046_v56 = vld [vmem:[%s3167_s16 + $0xd0] ss:$72 sps:$4 sm:$0xff]  }
  0xb3   : > { %1435 = vmatpush1.bf16.msra.mxu0 %v2933_v57  ;;  %2024 = vmatpush1.bf16.msra.mxu1 %v2933_v57  ;;  %v3041_v57 = vld [vmem:[%s3664_s1 + $0x410] ss:$8 sps:$4 sm:$0xff]  }
  0xb4   : > { %1436 = vmatprep.subr.bf16.mxu0 %v2940_v58  ;;  %2025 = vmatprep.subr.bf16.mxu1 %v2940_v58  ;;  %v3051_v58 = vld [vmem:[%s3664_s1 + $0x424] ss:$8 sps:$4 sm:$0xff]  }
  0xb7   : > { %1437 = vmatpush1.bf16.msra.mxu0 %v2938_v59  ;;  %2026 = vmatpush1.bf16.msra.mxu1 %v2938_v59  ;;  %v3048_v59 = vld [vmem:[%s3167_s16 + $0xa8] ss:$72 sps:$4 sm:$0xff]  }
  0xb8   : > { %1438 = vmatprep.subr.bf16.mxu0 %v2947_v60  ;;  %2027 = vmatprep.subr.bf16.mxu1 %v2947_v60  ;;  %v3052_v60 = vld [vmem:[%s3167_s16 + $0xcc] ss:$72 sps:$4 sm:$0xff]  }
  0xbb   : > { %1439 = vmatpush1.bf16.msra.mxu0 %v2945_v61  ;;  %2028 = vmatpush1.bf16.msra.mxu1 %v2945_v61  ;;  %v3049_v61 = vld [vmem:[%s3664_s1 + $0x420] ss:$8 sps:$4 sm:$0xff]  }
  0xbc   : > { %1440 = vmatprep.subr.bf16.mxu0 %v2952_v62  ;;  %2029 = vmatprep.subr.bf16.mxu1 %v2952_v62  ;;  %v3055_v62 = vld [vmem:[%s3664_s1 + $0x434] ss:$8 sps:$4 sm:$0xff]  }
  0xbf   : > { %1441 = vmatpush1.bf16.msra.mxu0 %v2950_v63  ;;  %2030 = vmatpush1.bf16.msra.mxu1 %v2950_v63  ;;  %v3056_v63 = vld [vmem:[%s3167_s16 + $0x13c] ss:$72 sps:$4 sm:$0xff]  }
  0xc0   : > { %1442 = vmatprep.subr.bf16.mxu0 %v2959_v0  ;;  %2031 = vmatprep.subr.bf16.mxu1 %v2959_v0  ;;  %v3058_v0 = vld [vmem:[%s3167_s16 + $0x160] ss:$72 sps:$4 sm:$0xff]  }
  0xc3   : > { %1443 = vmatpush1.bf16.msra.mxu0 %v2957_v1  ;;  %2032 = vmatpush1.bf16.msra.mxu1 %v2957_v1  ;;  %v3053_v1 = vld [vmem:[%s3664_s1 + $0x430] ss:$8 sps:$4 sm:$0xff]  }
  0xc4   : > { %1485 = vmatprep.subr.bf16.mxu0 %v2965_v2  ;;  %2074 = vmatprep.subr.bf16.mxu1 %v2965_v2  ;;  %v3063_v2 = vld [vmem:[%s3664_s1 + $0x444] ss:$8 sps:$4 sm:$0xff]  }
  0xc6   : > { %1445 = vmatmul.mubr.bf16.vlgmr.msra.gmra.mrb[0].mxu0 %v2960_v3  ;;  %2034 = vmatmul.mubr.bf16.vlgmr.msra.gmra.mrb[0].mxu1 %v2966_v4  ;;  %v3060_v3 = vld [vmem:[%s3167_s16 + $0x138] ss:$72 sps:$4 sm:$0xff]   ;;  %v3064_v4 = vld [vmem:[%s3167_s16 + $0x15c] ss:$72 sps:$4 sm:$0xff]  }
  0xc7   : > { %1486 = vmatpush1.bf16.msra.mxu0 %v2963_v5  ;;  %2075 = vmatpush1.bf16.msra.mxu1 %v2963_v5  ;;  %v3061_v5 = vld [vmem:[%s3664_s1 + $0x440] ss:$8 sps:$4 sm:$0xff]  }
  0xc8   : > { %1487 = vmatprep.subr.bf16.mxu0 %v2971_v6  ;;  %2076 = vmatprep.subr.bf16.mxu1 %v2971_v6  ;;  %v3067_v6 = vld [vmem:[%s3664_s1 + $0x454] ss:$8 sps:$4 sm:$0xff]  }
  0xc9   : > { %1454 = vmatprep.mubr.bf16.mxu0 %v2996_v7  ;;  %2043 = vmatprep.mubr.bf16.mxu1 %v2998_v8  ;;  %v3068_v7 = vld [vmem:[%s3167_s16 + $0x1cc] ss:$72 sps:$4 sm:$0xff]   ;;  %v3070_v8 = vld [vmem:[%s3167_s16 + $0x1f0] ss:$72 sps:$4 sm:$0xff]  }
  0xcb   : > { %1488 = vmatpush1.bf16.msra.mxu0 %v2969_v9  ;;  %2077 = vmatpush1.bf16.msra.mxu1 %v2969_v9  ;;  %v3065_v9 = vld [vmem:[%s3664_s1 + $0x450] ss:$8 sps:$4 sm:$0xff]  }
  0xcc   : > { %1489 = vmatprep.subr.bf16.mxu0 %v2974_v10  ;;  %2078 = vmatprep.subr.bf16.mxu1 %v2974_v10  ;;  %v3075_v10 = vld [vmem:[%s3664_s1 + $0x464] ss:$8 sps:$4 sm:$0xff]  }
  0xce   : > { %1455 = vmatmul.mubr.bf16.gmra.mrb[4].mxu0 %v3000_v11  ;;  %2044 = vmatmul.mubr.bf16.gmra.mrb[4].mxu1 %v3004_v12  ;;  %v3072_v11 = vld [vmem:[%s3167_s16 + $0x1c8] ss:$72 sps:$4 sm:$0xff]   ;;  %v3076_v12 = vld [vmem:[%s3167_s16 + $0x1ec] ss:$72 sps:$4 sm:$0xff]  }
  0xcf   : > { %1490 = vmatpush1.bf16.msra.mxu0 %v2972_v13  ;;  %2079 = vmatpush1.bf16.msra.mxu1 %v2972_v13  ;;  %v3073_v13 = vld [vmem:[%s3664_s1 + $0x460] ss:$8 sps:$4 sm:$0xff]  }
  0xd0   : > { %1491 = vmatprep.subr.bf16.mxu0 %v2977_v14  ;;  %2080 = vmatprep.subr.bf16.mxu1 %v2977_v14  ;;  %v3079_v14 = vld [vmem:[%s3664_s1 + $0x474] ss:$8 sps:$4 sm:$0xff]  }
  0xd1   : > { %1464 = vmatprep.mubr.bf16.mxu0 %v3008_v15  ;;  %2053 = vmatprep.mubr.bf16.mxu1 %v3010_v16  ;;  %v3077_v15 = vld [vmem:[%s3664_s1 + $0x470] ss:$8 sps:$4 sm:$0xff]   ;;  %v3096_v16 = vmov 0  }
  0xd3   : > { %1492 = vmatpush1.bf16.msra.mxu0 %v2975_v17  ;;  %2081 = vmatpush1.bf16.msra.mxu1 %v2975_v17  ;;  %v3080_v17 = vld [vmem:[%s3167_s16 + $0x20] ss:$72 sps:$4 sm:$0xff]  }
  0xd4   : > { %1493 = vmatprep.subr.bf16.mxu0 %v2980_v18  ;;  %2082 = vmatprep.subr.bf16.mxu1 %v2980_v18  ;;  %v3081_v18 = vld [vmem:[%s3167_s16 + $0x44] ss:$72 sps:$4 sm:$0xff]  }
  0xd6   : > { %1465 = vmatmul.mubr.bf16.gmra.mrb[8].mxu0 %v3012_v19  ;;  %2054 = vmatmul.mubr.bf16.gmra.mrb[8].mxu1 %v3016_v20  ;;  %v3082_v19 = vld [vmem:[%s3167_s16 + $0xb0] ss:$72 sps:$4 sm:$0xff]   ;;  %v3083_v20 = vld [vmem:[%s3167_s16 + $0xd4] ss:$72 sps:$4 sm:$0xff]  }
  0xd7   : > { %1494 = vmatpush1.bf16.msra.mxu0 %v2978_v21  ;;  %2083 = vmatpush1.bf16.msra.mxu1 %v2978_v21  ;;  %v3084_v21 = vld [vmem:[%s3167_s16 + $0x140] ss:$72 sps:$4 sm:$0xff]  }
  0xd8   : > { %1495 = vmatprep.subr.bf16.mxu0 %v2983_v22  ;;  %2084 = vmatprep.subr.bf16.mxu1 %v2983_v22  ;;  %v3085_v22 = vld [vmem:[%s3167_s16 + $0x164] ss:$72 sps:$4 sm:$0xff]  }
  0xd9   : > { %1474 = vmatprep.mubr.bf16.mxu0 %v3020_v23  ;;  %2063 = vmatprep.mubr.bf16.mxu1 %v3022_v24  ;;  %v3086_v23 = vld [vmem:[%s3167_s16 + $0x1d0] ss:$72 sps:$4 sm:$0xff]   ;;  %v3087_v24 = vld [vmem:[%s3167_s16 + $0x1f4] ss:$72 sps:$4 sm:$0xff]   ;;  %s2371_s16 = sshll.u32 %s3668_s24, 2 }
  0xda   : > { %s3648_s21 = scalar_lea.vmem %s3666_s3, %s2371_s16 }
  0xdb   : > { %1496 = vmatpush1.bf16.msra.mxu0 %v2981_v25  ;;  %2085 = vmatpush1.bf16.msra.mxu1 %v2981_v25 }
  0xdc   : > { %1497 = vmatprep.subr.bf16.mxu0 %v2986_v26  ;;  %2086 = vmatprep.subr.bf16.mxu1 %v2986_v26 }
  0xde   : > { %1475 = vmatmul.mubr.bf16.gmra.mrb[12].mxu0 %v3024_v27  ;;  %2064 = vmatmul.mubr.bf16.gmra.mrb[12].mxu1 %v3028_v28 }
  0xdf   : > { %1498 = vmatpush1.bf16.msra.mxu0 %v2984_v29  ;;  %2087 = vmatpush1.bf16.msra.mxu1 %v2984_v29 }
  0xe0   : > { %1499 = vmatprep.subr.bf16.mxu0 %v2989_v30  ;;  %2088 = vmatprep.subr.bf16.mxu1 %v2989_v30 }
  0xe1   : > { %1517 = vmatprep.mubr.bf16.mxu0 %v3034_v31  ;;  %2106 = vmatprep.mubr.bf16.mxu1 %v3037_v32 }
  0xe3   : > { %1500 = vmatpush1.bf16.msra.mxu0 %v2987_v33  ;;  %2089 = vmatpush1.bf16.msra.mxu1 %v2987_v33  ;;  %v3640_v33 = vld [vmem:[%s3665_s2] ss:$0 sm:$0xff] }
  0xe4   : > { %1501 = vmatprep.subr.bf16.mxu0 %v2992_v34  ;;  %2090 = vmatprep.subr.bf16.mxu1 %v2992_v34 }
  0xe7   : > { %1502 = vmatpush1.bf16.msra.mxu0 %v2990_v35  ;;  %2091 = vmatpush1.bf16.msra.mxu1 %v2990_v35 }
  0xe8   : > { %1503 = vmatprep.subr.bf16.mxu0 %v2995_v36  ;;  %2092 = vmatprep.subr.bf16.mxu1 %v2995_v36 }
  0xeb   : > { %1504 = vmatpush1.bf16.msra.mxu0 %v2993_v37  ;;  %2093 = vmatpush1.bf16.msra.mxu1 %v2993_v37 }
  0xec   : > { %1505 = vmatprep.subr.bf16.mxu0 %v3003_v38  ;;  %2094 = vmatprep.subr.bf16.mxu1 %v3003_v38 }
  0xef   : > { %1506 = vmatpush1.bf16.msra.mxu0 %v3001_v39  ;;  %2095 = vmatpush1.bf16.msra.mxu1 %v3001_v39 }
  0xf0   : > { %1507 = vmatprep.subr.bf16.mxu0 %v3007_v40  ;;  %2096 = vmatprep.subr.bf16.mxu1 %v3007_v40 }
  0xf3   : > { %1508 = vmatpush1.bf16.msra.mxu0 %v3005_v41  ;;  %2097 = vmatpush1.bf16.msra.mxu1 %v3005_v41 }
  0xf4   : > { %1509 = vmatprep.subr.bf16.mxu0 %v3015_v42  ;;  %2098 = vmatprep.subr.bf16.mxu1 %v3015_v42 }
  0xf7   : > { %1510 = vmatpush1.bf16.msra.mxu0 %v3013_v43  ;;  %2099 = vmatpush1.bf16.msra.mxu1 %v3013_v43 }
  0xf8   : > { %1511 = vmatprep.subr.bf16.mxu0 %v3019_v44  ;;  %2100 = vmatprep.subr.bf16.mxu1 %v3019_v44 }
  0xfb   : > { %1512 = vmatpush1.bf16.msra.mxu0 %v3017_v45  ;;  %2101 = vmatpush1.bf16.msra.mxu1 %v3017_v45 }
  0xfc   : > { %1513 = vmatprep.subr.bf16.mxu0 %v3027_v46  ;;  %2102 = vmatprep.subr.bf16.mxu1 %v3027_v46 }
  0xff   : > { %1514 = vmatpush1.bf16.msra.mxu0 %v3025_v47  ;;  %2103 = vmatpush1.bf16.msra.mxu1 %v3025_v47 }
 0x100   : > { %1515 = vmatprep.subr.bf16.mxu0 %v3031_v48  ;;  %2104 = vmatprep.subr.bf16.mxu1 %v3031_v48 }
 0x103   : > { %1516 = vmatpush1.bf16.msra.mxu0 %v3029_v49  ;;  %2105 = vmatpush1.bf16.msra.mxu1 %v3029_v49 }
 0x104   : > { %1558 = vmatprep.subr.bf16.mxu0 %v3040_v50  ;;  %2147 = vmatprep.subr.bf16.mxu1 %v3040_v50 }
 0x106   : > { %1518 = vmatmul.mubr.bf16.vlgmr.msra.gmra.mrb[0].mxu0 %v3032_v51  ;;  %2107 = vmatmul.mubr.bf16.vlgmr.msra.gmra.mrb[0].mxu1 %v3035_v52 }
 0x107   : > { %1559 = vmatpush1.bf16.msra.mxu0 %v3038_v53  ;;  %2148 = vmatpush1.bf16.msra.mxu1 %v3038_v53 }
 0x108   : > { %1560 = vmatprep.subr.bf16.mxu0 %v3043_v54  ;;  %2149 = vmatprep.subr.bf16.mxu1 %v3043_v54 }
 0x109   : > { %1527 = vmatprep.mubr.bf16.mxu0 %v3044_v55  ;;  %2116 = vmatprep.mubr.bf16.mxu1 %v3046_v56 }
 0x10b   : > { %1561 = vmatpush1.bf16.msra.mxu0 %v3041_v57  ;;  %2150 = vmatpush1.bf16.msra.mxu1 %v3041_v57 }
 0x10c   : > { %1562 = vmatprep.subr.bf16.mxu0 %v3051_v58  ;;  %2151 = vmatprep.subr.bf16.mxu1 %v3051_v58 }
 0x10e   : > { %1528 = vmatmul.mubr.bf16.gmra.mrb[4].mxu0 %v3048_v59  ;;  %2117 = vmatmul.mubr.bf16.gmra.mrb[4].mxu1 %v3052_v60 }
 0x10f   : > { %1563 = vmatpush1.bf16.msra.mxu0 %v3049_v61  ;;  %2152 = vmatpush1.bf16.msra.mxu1 %v3049_v61 }
 0x110   : > { %1564 = vmatprep.subr.bf16.mxu0 %v3055_v62  ;;  %2153 = vmatprep.subr.bf16.mxu1 %v3055_v62 }
 0x111   : > { %1537 = vmatprep.mubr.bf16.mxu0 %v3056_v63  ;;  %2126 = vmatprep.mubr.bf16.mxu1 %v3058_v0 }
 0x113   : > { %1565 = vmatpush1.bf16.msra.mxu0 %v3053_v1  ;;  %2154 = vmatpush1.bf16.msra.mxu1 %v3053_v1 }
 0x114   : > { %1566 = vmatprep.subr.bf16.mxu0 %v3063_v2  ;;  %2155 = vmatprep.subr.bf16.mxu1 %v3063_v2 }
 0x116   : > { %1538 = vmatmul.mubr.bf16.gmra.mrb[8].mxu0 %v3060_v3  ;;  %2127 = vmatmul.mubr.bf16.gmra.mrb[8].mxu1 %v3064_v4 }
 0x117   : > { %1567 = vmatpush1.bf16.msra.mxu0 %v3061_v5  ;;  %2156 = vmatpush1.bf16.msra.mxu1 %v3061_v5 }
 0x118   : > { %1568 = vmatprep.subr.bf16.mxu0 %v3067_v6  ;;  %2157 = vmatprep.subr.bf16.mxu1 %v3067_v6 }
 0x119   : > { %1547 = vmatprep.mubr.bf16.mxu0 %v3068_v7  ;;  %2136 = vmatprep.mubr.bf16.mxu1 %v3070_v8 }
 0x11b   : > { %1569 = vmatpush1.bf16.msra.mxu0 %v3065_v9  ;;  %2158 = vmatpush1.bf16.msra.mxu1 %v3065_v9 }
 0x11c   : > { %1570 = vmatprep.subr.bf16.mxu0 %v3075_v10  ;;  %2159 = vmatprep.subr.bf16.mxu1 %v3075_v10 }
 0x11e   : > { %1548 = vmatmul.mubr.bf16.gmra.mrb[12].mxu0 %v3072_v11  ;;  %2137 = vmatmul.mubr.bf16.gmra.mrb[12].mxu1 %v3076_v12 }
 0x11f   : > { %1571 = vmatpush1.bf16.msra.mxu0 %v3073_v13  ;;  %2160 = vmatpush1.bf16.msra.mxu1 %v3073_v13 }
 0x120   : > { %1572 = vmatprep.subr.bf16.mxu0 %v3079_v14  ;;  %2161 = vmatprep.subr.bf16.mxu1 %v3079_v14 }
 0x121   : > { %1590 = vmatprep.mubr.bf16.mxu0 %v3096_v16  ;;  %2179 = vmatprep.mubr.bf16.mxu1 %v3096_v16 }
 0x123   : > { %1573 = vmatpush1.bf16.msra.mxu0 %v3077_v15  ;;  %2162 = vmatpush1.bf16.msra.mxu1 %v3077_v15 }
 0x126   : > { %1591 = vmatmul.mubr.bf16.vlgmr.msra.gmra.mrb[0].mxu0 %v3080_v17  ;;  %2180 = vmatmul.mubr.bf16.vlgmr.msra.gmra.mrb[0].mxu1 %v3081_v18 }
 0x127   : > { %1600 = vmatprep.mubr.bf16.mxu0 %v3096_v16  ;;  %2189 = vmatprep.mubr.bf16.mxu1 %v3096_v16 }
 0x12e   : > { %1601 = vmatmul.mubr.bf16.gmra.mrb[4].mxu0 %v3082_v19  ;;  %2190 = vmatmul.mubr.bf16.gmra.mrb[4].mxu1 %v3083_v20 }
 0x12f   : > { %1610 = vmatprep.mubr.bf16.mxu0 %v3096_v16  ;;  %2199 = vmatprep.mubr.bf16.mxu1 %v3096_v16 }
 0x136   : > { %1611 = vmatmul.mubr.bf16.gmra.mrb[8].mxu0 %v3084_v21  ;;  %2200 = vmatmul.mubr.bf16.gmra.mrb[8].mxu1 %v3085_v22 }
 0x137   : > { %1620 = vmatprep.mubr.bf16.mxu0 %v3096_v16  ;;  %2209 = vmatprep.mubr.bf16.mxu1 %v3096_v16 }
 0x13e   : > { %1621 = vmatmul.mubr.bf16.gmra.mrb[12].mxu0 %v3086_v23  ;;  %2210 = vmatmul.mubr.bf16.gmra.mrb[12].mxu1 %v3087_v24 }
 0x1f9   : > { %v1592_v25 = vpop.f32.mrb[0].mxu0  ;;  %v2181_v26 = vpop.f32.mrb[0].mxu1 }
 0x1fa   : > { %v2220_v27 = vmax.f32 %v1592_v25, %v2181_v26  ;;  %v1594_v28 = vpop.f32.mrb[1].mxu0  ;;  %v2183_v29 = vpop.f32.mrb[1].mxu1 }
 0x1fb   : > { %v2221_v30 = vmax.f32 %v1594_v28, %v2183_v29  ;;  %v1596_v31 = vpop.f32.mrb[2].mxu0  ;;  %v2185_v32 = vpop.f32.mrb[2].mxu1 }
 0x1fc   : > { %v2222_v34 = vmax.f32 %v1596_v31, %v2185_v32  ;;  %v1598_v35 = vpop.f32.mrb[3].mxu0  ;;  %v2187_v36 = vpop.f32.mrb[3].mxu1 }
 0x1fd   : > { %v2236_v37 = vmax.f32 %v2220_v27, %v2221_v30  ;;  %v2223_v38 = vmax.f32 %v1598_v35, %v2187_v36 }
 0x1ff   : > { %v2251_v39 = vadd.f32 %v3640_v33, %v2236_v37  ;;  %v2237_v40 = vmax.f32 %v2222_v34, %v2223_v38 }
 0x201   : > { %v2252_v41 = vadd.f32 %v3640_v33, %v2237_v40  ;;  %v1602_v42 = vpop.f32.mrb[4].mxu0  ;;  %v2191_v43 = vpop.f32.mrb[4].mxu1  ;;  %v2259_v47 = vmax.f32 %v2251_v39, 0.0 }
 0x202   : > { %v2224_v44 = vmax.f32 %v1602_v42, %v2191_v43  ;;  %v1604_v45 = vpop.f32.mrb[5].mxu0  ;;  %v2193_v46 = vpop.f32.mrb[5].mxu1 }
 0x203   : > { %v2260_v48 = vmax.f32 %v2252_v41, 0.0  ;;  %v2225_v49 = vmax.f32 %v1604_v45, %v2193_v46  ;;  %v1606_v50 = vpop.f32.mrb[6].mxu0  ;;  %v2195_v51 = vpop.f32.mrb[6].mxu1 }
 0x204   : > { %v2226_v52 = vmax.f32 %v1606_v50, %v2195_v51  ;;  %v1608_v53 = vpop.f32.mrb[7].mxu0  ;;  %v2197_v54 = vpop.f32.mrb[7].mxu1 }
 0x205   : > { %v2610_v55 = vpack.c.bf16 %v2260_v48, %v2259_v47  ;;  %v2238_v56 = vmax.f32 %v2224_v44, %v2225_v49  ;;  %v2227_v57 = vmax.f32 %v1608_v53, %v2197_v54 }
 0x207   : > { %2611 = vst [vmem:[%s3648_s21] sm:$0xff] %v2610_v55   ;;  %v2253_v58 = vadd.f32 %v3640_v33, %v2238_v56  ;;  %v2239_v59 = vmax.f32 %v2226_v52, %v2227_v57 }
 0x209   : > { %v2254_v60 = vadd.f32 %v3640_v33, %v2239_v59  ;;  %v1612_v61 = vpop.f32.mrb[8].mxu0  ;;  %v2201_v62 = vpop.f32.mrb[8].mxu1  ;;  %v2261_v2 = vmax.f32 %v2253_v58, 0.0 }
 0x20a   : > { %v2228_v63 = vmax.f32 %v1612_v61, %v2201_v62  ;;  %v1614_v0 = vpop.f32.mrb[9].mxu0  ;;  %v2203_v1 = vpop.f32.mrb[9].mxu1 }
 0x20b   : > { %v2262_v3 = vmax.f32 %v2254_v60, 0.0  ;;  %v2229_v4 = vmax.f32 %v1614_v0, %v2203_v1  ;;  %v1616_v5 = vpop.f32.mrb[10].mxu0  ;;  %v2205_v6 = vpop.f32.mrb[10].mxu1 }
 0x20c   : > { %v2230_v7 = vmax.f32 %v1616_v5, %v2205_v6  ;;  %v1618_v8 = vpop.f32.mrb[11].mxu0  ;;  %v2207_v9 = vpop.f32.mrb[11].mxu1 }
 0x20d   : > { %v2615_v10 = vpack.c.bf16 %v2262_v3, %v2261_v2  ;;  %v2240_v11 = vmax.f32 %v2228_v63, %v2229_v4  ;;  %v2231_v12 = vmax.f32 %v1618_v8, %v2207_v9 }
 0x20f   : > { %2627 = vst [vmem:[%s3648_s21 + $0x8] sm:$0xff] %v2615_v10   ;;  %v2255_v13 = vadd.f32 %v3640_v33, %v2240_v11  ;;  %v2241_v14 = vmax.f32 %v2230_v7, %v2231_v12 }
 0x211   : > { %v2256_v15 = vadd.f32 %v3640_v33, %v2241_v14  ;;  %v1622_v16 = vpop.f32.mrb[12].mxu0  ;;  %v2211_v17 = vpop.f32.mrb[12].mxu1  ;;  %v2263_v21 = vmax.f32 %v2255_v13, 0.0 }
 0x212   : > { %v2232_v18 = vmax.f32 %v1622_v16, %v2211_v17  ;;  %v1624_v19 = vpop.f32.mrb[13].mxu0  ;;  %v2213_v20 = vpop.f32.mrb[13].mxu1 }
 0x213   : > { %v2264_v22 = vmax.f32 %v2256_v15, 0.0  ;;  %v2233_v23 = vmax.f32 %v1624_v19, %v2213_v20  ;;  %v1626_v24 = vpop.f32.mrb[14].mxu0  ;;  %v2215_v25 = vpop.f32.mrb[14].mxu1 }
 0x214   : > { %v2234_v26 = vmax.f32 %v1626_v24, %v2215_v25  ;;  %v1628_v27 = vpop.f32.mrb[15].mxu0  ;;  %v2217_v28 = vpop.f32.mrb[15].mxu1 }
 0x215   : > { %v2620_v29 = vpack.c.bf16 %v2264_v22, %v2263_v21  ;;  %v2242_v30 = vmax.f32 %v2232_v18, %v2233_v23  ;;  %v2235_v31 = vmax.f32 %v1628_v27, %v2217_v28 }
 0x217   : > { %2628 = vst [vmem:[%s3648_s21 + $0x10] sm:$0xff] %v2620_v29   ;;  %v2257_v32 = vadd.f32 %v3640_v33, %v2242_v30  ;;  %v2243_v34 = vmax.f32 %v2234_v26, %v2235_v31 }
 0x219   : > { %v2258_v35 = vadd.f32 %v3640_v33, %v2243_v34  ;;  %v2265_v36 = vmax.f32 %v2257_v32, 0.0 }
 0x21b   : > { %v2266_v37 = vmax.f32 %v2258_v35, 0.0 }
 0x21d   : > { %v2625_v38 = vpack.c.bf16 %v2266_v37, %v2265_v36 }
 0x21f   : > { %2629 = vst [vmem:[%s3648_s21 + $0x18] sm:$0xff] %v2625_v38  }
 0x220 PF: > { %s13_s12 = sadd.s32 1, %s3094_s12  }
 0x221   : > { %p10_p4 = scmp.ge.s32.totalorder %s13_s12, 4  }
 0x223   :  { %12 = sbr.rel (!%p10_p4) target bundleno = 1 (0x1), region = 62 }

// kernel: mycnn_forward.5
= control target key start
LH: loop header
LB: loop body
LE: loop exit
PB: predicated region body
PF: predicated region fallthrough
CT: control target
= control target key end

     0   :  { %v1056_v36 = vlaneseq  ;;  %v10934_v37 = vmov 1966171168   ;;  %s14437_s0 = inlined_call_operand.vmem [shape: bf16[2,8192], index: 0, kind: input, shape index: {}]   ;;  %s14438_s1 = inlined_call_operand.vmem [shape: bf16[8192,256], index: 1, kind: input, shape index: {}]   ;;  %s14439_s2 = inlined_call_operand.vmem [shape: f32[1,256], index: 2, kind: input, shape index: {}]   ;;  %s14440_s3 = inlined_call_operand.vmem [shape: bf16[256,10], index: 3, kind: input, shape index: {}]   ;;  %s14441_s4 = inlined_call_operand.vmem [shape: f32[1,10], index: 4, kind: input, shape index: {}]   ;;  %s14442_s5 = inlined_call_operand.hbm [shape: f32[2,10], index: 5, kind: output, shape index: {}]  }
   0x1   :  { %v9346_v0 = vld [vmem:[%s14438_s1 + $0x4] ss:$8 sps:$4 sm:$0xff]   ;;  %v9350_v2 = vld [vmem:[%s14438_s1] ss:$8 sps:$4 sm:$0xff]   ;;  %v9352_v4 = vld [vmem:[%s14438_s1 + $0x14] ss:$8 sps:$4 sm:$0xff]   ;;  %v1076_v38 = vunpack.c.l.s4 %v10934_v37 }
   0x2   :  { %v9348_v1 = vld [vmem:[%s14438_s1 + $0x1004] ss:$8 sps:$4 sm:$0xff]   ;;  %6650 = vmatprep.subr.bf16.mxu1 %v9346_v0  ;;  %v9351_v3 = vld [vmem:[%s14438_s1 + $0x1000] ss:$8 sps:$4 sm:$0xff]   ;;  %v9354_v5 = vld [vmem:[%s14438_s1 + $0x1014] ss:$8 sps:$4 sm:$0xff]  }
   0x3   :  { %7306 = vmatprep.subr.bf16.mxu0 %v9348_v1  ;;  %6651 = vmatpush1.bf16.msra.mxu1 %v9350_v2  ;;  %v9356_v6 = vld [vmem:[%s14438_s1 + $0x10] ss:$8 sps:$4 sm:$0xff]   ;;  %v9358_v8 = vld [vmem:[%s14438_s1 + $0x24] ss:$8 sps:$4 sm:$0xff]   ;;  %v9362_v10 = vld [vmem:[%s14438_s1 + $0x20] ss:$8 sps:$4 sm:$0xff]   ;;  %v1077_v43 = vunpack.c.0.s8 %v1076_v38 }
   0x4   :  { %7307 = vmatpush1.bf16.msra.mxu0 %v9351_v3  ;;  %6652 = vmatprep.subr.bf16.mxu1 %v9352_v4  ;;  %v9357_v7 = vld [vmem:[%s14438_s1 + $0x1010] ss:$8 sps:$4 sm:$0xff]   ;;  %v9360_v9 = vld [vmem:[%s14438_s1 + $0x1024] ss:$8 sps:$4 sm:$0xff]   ;;  %v9363_v11 = vld [vmem:[%s14438_s1 + $0x1020] ss:$8 sps:$4 sm:$0xff]  }
   0x5   :  { %7308 = vmatprep.subr.bf16.mxu0 %v9354_v5  ;;  %v9364_v12 = vld [vmem:[%s14438_s1 + $0x34] ss:$8 sps:$4 sm:$0xff]   ;;  %v9368_v14 = vld [vmem:[%s14438_s1 + $0x30] ss:$8 sps:$4 sm:$0xff]   ;;  %v9370_v16 = vld [vmem:[%s14438_s1 + $0x44] ss:$8 sps:$4 sm:$0xff]  }
   0x6   :  { %v9366_v13 = vld [vmem:[%s14438_s1 + $0x1034] ss:$8 sps:$4 sm:$0xff]   ;;  %v9369_v15 = vld [vmem:[%s14438_s1 + $0x1030] ss:$8 sps:$4 sm:$0xff]   ;;  %v9372_v17 = vld [vmem:[%s14438_s1 + $0x1044] ss:$8 sps:$4 sm:$0xff]  }
   0x7   :  { %6653 = vmatpush1.bf16.msra.mxu1 %v9356_v6  ;;  %v9374_v18 = vld [vmem:[%s14438_s1 + $0x40] ss:$8 sps:$4 sm:$0xff]   ;;  %v9376_v20 = vld [vmem:[%s14438_s1 + $0x54] ss:$8 sps:$4 sm:$0xff]   ;;  %v9380_v22 = vld [vmem:[%s14438_s1 + $0x50] ss:$8 sps:$4 sm:$0xff]  }
   0x8   :  { %7309 = vmatpush1.bf16.msra.mxu0 %v9357_v7  ;;  %6654 = vmatprep.subr.bf16.mxu1 %v9358_v8  ;;  %v9375_v19 = vld [vmem:[%s14438_s1 + $0x1040] ss:$8 sps:$4 sm:$0xff]   ;;  %v9378_v21 = vld [vmem:[%s14438_s1 + $0x1054] ss:$8 sps:$4 sm:$0xff]   ;;  %v9381_v23 = vld [vmem:[%s14438_s1 + $0x1050] ss:$8 sps:$4 sm:$0xff]  }
   0x9   :  { %7310 = vmatprep.subr.bf16.mxu0 %v9360_v9  ;;  %v9382_v24 = vld [vmem:[%s14438_s1 + $0x64] ss:$8 sps:$4 sm:$0xff]   ;;  %v9386_v26 = vld [vmem:[%s14438_s1 + $0x60] ss:$8 sps:$4 sm:$0xff]   ;;  %v9388_v28 = vld [vmem:[%s14438_s1 + $0x74] ss:$8 sps:$4 sm:$0xff]  }
   0xa   :  { %v9384_v25 = vld [vmem:[%s14438_s1 + $0x1064] ss:$8 sps:$4 sm:$0xff]   ;;  %v9387_v27 = vld [vmem:[%s14438_s1 + $0x1060] ss:$8 sps:$4 sm:$0xff]   ;;  %v9390_v29 = vld [vmem:[%s14438_s1 + $0x1074] ss:$8 sps:$4 sm:$0xff]  }
   0xb   :  { %6655 = vmatpush1.bf16.msra.mxu1 %v9362_v10  ;;  %v9392_v30 = vld [vmem:[%s14438_s1 + $0x70] ss:$8 sps:$4 sm:$0xff]   ;;  %v9394_v32 = vld [vmem:[%s14438_s1 + $0x84] ss:$8 sps:$4 sm:$0xff]   ;;  %v9398_v34 = vld [vmem:[%s14438_s1 + $0x80] ss:$8 sps:$4 sm:$0xff]  }
   0xc   :  { %7311 = vmatpush1.bf16.msra.mxu0 %v9363_v11  ;;  %6656 = vmatprep.subr.bf16.mxu1 %v9364_v12  ;;  %v9393_v31 = vld [vmem:[%s14438_s1 + $0x1070] ss:$8 sps:$4 sm:$0xff]   ;;  %v9396_v33 = vld [vmem:[%s14438_s1 + $0x1084] ss:$8 sps:$4 sm:$0xff]   ;;  %v9399_v35 = vld [vmem:[%s14438_s1 + $0x1080] ss:$8 sps:$4 sm:$0xff]  }
   0xd   :  { %7312 = vmatprep.subr.bf16.mxu0 %v9366_v13  ;;  %v9400_v39 = vld [vmem:[%s14438_s1 + $0x94] ss:$8 sps:$4 sm:$0xff]   ;;  %v9404_v41 = vld [vmem:[%s14438_s1 + $0x90] ss:$8 sps:$4 sm:$0xff]   ;;  %v11083_v42 = vshrl.u32 %v1056_v36, 7  ;;  %v11112_v52 = vld [vmem:[%s14437_s0] sm:$0xff] }
   0xe   :  { %v9402_v40 = vld [vmem:[%s14438_s1 + $0x1094] ss:$8 sps:$4 sm:$0xff]   ;;  %v9405_v44 = vld [vmem:[%s14438_s1 + $0x1090] ss:$8 sps:$4 sm:$0xff]   ;;  %v9406_v45 = vld [vmem:[%s14438_s1 + $0xa4] ss:$8 sps:$4 sm:$0xff]  }
   0xf   :  { %6657 = vmatpush1.bf16.msra.mxu1 %v9368_v14  ;;  %v9408_v46 = vld [vmem:[%s14438_s1 + $0x10a4] ss:$8 sps:$4 sm:$0xff]   ;;  %v9410_v47 = vld [vmem:[%s14438_s1 + $0xa0] ss:$8 sps:$4 sm:$0xff]   ;;  %v11101_v49 = vsub.s32 %v1077_v43, %v11083_v42  ;;  %v9412_v50 = vld [vmem:[%s14438_s1 + $0xb4] ss:$8 sps:$4 sm:$0xff]  }
  0x10   :  { %7313 = vmatpush1.bf16.msra.mxu0 %v9369_v15  ;;  %6658 = vmatprep.subr.bf16.mxu1 %v9370_v16  ;;  %v9411_v48 = vld [vmem:[%s14438_s1 + $0x10a0] ss:$8 sps:$4 sm:$0xff]   ;;  %v9414_v51 = vld [vmem:[%s14438_s1 + $0x10b4] ss:$8 sps:$4 sm:$0xff]   ;;  %v9416_v53 = vld [vmem:[%s14438_s1 + $0xb0] ss:$8 sps:$4 sm:$0xff]  }
  0x11   :  { %7314 = vmatprep.subr.bf16.mxu0 %v9372_v17  ;;  %v1081_v54 = vrot.slane %v11112_v52, %v11101_v49  ;;  %v9417_v55 = vld [vmem:[%s14438_s1 + $0x10b0] ss:$8 sps:$4 sm:$0xff]   ;;  %v11125_v56 = vld [vmem:[%s14437_s0 + $0x20] sm:$0xff]  ;;  %v9424_v1 = vld [vmem:[%s14438_s1 + $0xd4] ss:$8 sps:$4 sm:$0xff]  }
  0x12   :  { %v9418_v57 = vld [vmem:[%s14438_s1 + $0xc4] ss:$8 sps:$4 sm:$0xff]   ;;  %v1277_v60 = vrot.slane %v11125_v56, %v11101_v49  ;;  %v9422_v63 = vld [vmem:[%s14438_s1 + $0xc0] ss:$8 sps:$4 sm:$0xff]   ;;  %v9426_v2 = vld [vmem:[%s14438_s1 + $0x10d4] ss:$8 sps:$4 sm:$0xff]  }
  0x13   :  { %6659 = vmatpush1.bf16.msra.mxu1 %v9374_v18  ;;  %v9420_v58 = vld [vmem:[%s14438_s1 + $0x10c4] ss:$8 sps:$4 sm:$0xff]   ;;  %v1089_v59 = vcombine.high %v1081_v54, %v1081_v54  ;;  %v9423_v0 = vld [vmem:[%s14438_s1 + $0x10c0] ss:$8 sps:$4 sm:$0xff]   ;;  %v9428_v4 = vld [vmem:[%s14438_s1 + $0xd0] ss:$8 sps:$4 sm:$0xff]   ;;  %v11186_v16 = vrot.slane %v1081_v54, %v11101_v49 }
  0x14   :  { %7315 = vmatpush1.bf16.msra.mxu0 %v9375_v19  ;;  %6660 = vmatprep.subr.bf16.mxu1 %v9376_v20  ;;  %v1285_v62 = vcombine.high %v1277_v60, %v1277_v60  ;;  %v9429_v5 = vld [vmem:[%s14438_s1 + $0x10d0] ss:$8 sps:$4 sm:$0xff]   ;;  %v9430_v6 = vld [vmem:[%s14438_s1 + $0xe4] ss:$8 sps:$4 sm:$0xff]   ;;  %v9434_v8 = vld [vmem:[%s14438_s1 + $0xe0] ss:$8 sps:$4 sm:$0xff]   ;;  %v11189_v17 = vrot.slane %v1277_v60, %v11101_v49 }
  0x15   :  { %7316 = vmatprep.subr.bf16.mxu0 %v9378_v21  ;;  %v1111_v61 = vrot.slane %v1089_v59, %v11101_v49  ;;  %v9432_v7 = vld [vmem:[%s14438_s1 + $0x10e4] ss:$8 sps:$4 sm:$0xff]   ;;  %v9435_v9 = vld [vmem:[%s14438_s1 + $0x10e0] ss:$8 sps:$4 sm:$0xff]   ;;  %v9436_v10 = vld [vmem:[%s14438_s1 + $0xf4] ss:$8 sps:$4 sm:$0xff]  }
  0x16   :  { %v1307_v3 = vrot.slane %v1285_v62, %v11101_v49  ;;  %v9438_v11 = vld [vmem:[%s14438_s1 + $0x10f4] ss:$8 sps:$4 sm:$0xff]   ;;  %v9440_v12 = vld [vmem:[%s14438_s1 + $0xf0] ss:$8 sps:$4 sm:$0xff]   ;;  %v9445_v14 = vld [vmem:[%s14438_s1 + $0x104] ss:$8 sps:$4 sm:$0xff]  }
  0x17   :  { %6661 = vmatpush1.bf16.msra.mxu1 %v9380_v22  ;;  %6682 = vmatprep.mubr.bf16.mxu1 %v1111_v61  ;;  %v9441_v13 = vld [vmem:[%s14438_s1 + $0x10f0] ss:$8 sps:$4 sm:$0xff]   ;;  %v9449_v15 = vld [vmem:[%s14438_s1 + $0x1104] ss:$8 sps:$4 sm:$0xff]   ;;  %v9443_v18 = vld [vmem:[%s14438_s1 + $0x100] ss:$8 sps:$4 sm:$0xff]   ;;  %v1121_v22 = vcombine.high %v1111_v61, %v1111_v61 }
  0x18   :  { %7317 = vmatpush1.bf16.msra.mxu0 %v9381_v23  ;;  %6662 = vmatprep.subr.bf16.mxu1 %v9382_v24  ;;  %v9447_v19 = vld [vmem:[%s14438_s1 + $0x1100] ss:$8 sps:$4 sm:$0xff]   ;;  %v9452_v20 = vld [vmem:[%s14438_s1 + $0x114] ss:$8 sps:$4 sm:$0xff]   ;;  %v1317_v23 = vcombine.high %v1307_v3, %v1307_v3  ;;  %v9450_v24 = vld [vmem:[%s14438_s1 + $0x110] ss:$8 sps:$4 sm:$0xff]  }
  0x19   :  { %7318 = vmatprep.subr.bf16.mxu0 %v9384_v25  ;;  %7338 = vmatprep.mubr.bf16.mxu0 %v1307_v3  ;;  %v9455_v21 = vld [vmem:[%s14438_s1 + $0x1114] ss:$8 sps:$4 sm:$0xff]   ;;  %v9453_v25 = vld [vmem:[%s14438_s1 + $0x1110] ss:$8 sps:$4 sm:$0xff]   ;;  %v9468_v36 = vld [vmem:[%s14438_s1 + $0x140] ss:$8 sps:$4 sm:$0xff]  }
  0x1a   :  { %v9471_v37 = vld [vmem:[%s14438_s1 + $0x1140] ss:$8 sps:$4 sm:$0xff]   ;;  %v9476_v38 = vld [vmem:[%s14438_s1 + $0x154] ss:$8 sps:$4 sm:$0xff]   ;;  %v9482_v43 = vld [vmem:[%s14438_s1 + $0x164] ss:$8 sps:$4 sm:$0xff]  }
  0x1b   :  { %6663 = vmatpush1.bf16.msra.mxu1 %v9386_v26  ;;  %v9458_v26 = vld [vmem:[%s14438_s1 + $0x124] ss:$8 sps:$4 sm:$0xff]   ;;  %v9503_v59 = vld [vmem:[%s14438_s1 + $0x1194] ss:$8 sps:$4 sm:$0xff]   ;;  %v9498_v60 = vld [vmem:[%s14438_s1 + $0x190] ss:$8 sps:$4 sm:$0xff]  }
  0x1c   :  { %7319 = vmatpush1.bf16.msra.mxu0 %v9387_v27  ;;  %6664 = vmatprep.subr.bf16.mxu1 %v9388_v28  ;;  %v9461_v27 = vld [vmem:[%s14438_s1 + $0x1124] ss:$8 sps:$4 sm:$0xff]   ;;  %v9456_v28 = vld [vmem:[%s14438_s1 + $0x120] ss:$8 sps:$4 sm:$0xff]   ;;  %v9501_v61 = vld [vmem:[%s14438_s1 + $0x1190] ss:$8 sps:$4 sm:$0xff]  }
  0x1d   :  { %7320 = vmatprep.subr.bf16.mxu0 %v9390_v29  ;;  %v9459_v29 = vld [vmem:[%s14438_s1 + $0x1120] ss:$8 sps:$4 sm:$0xff]   ;;  %v9497_v54 = vld [vmem:[%s14438_s1 + $0x1184] ss:$8 sps:$4 sm:$0xff]   ;;  %v9515_v3 = vld [vmem:[%s14438_s1 + $0x11b4] ss:$8 sps:$4 sm:$0xff]  }
  0x1e   :  { %v9506_v62 = vld [vmem:[%s14438_s1 + $0x1a4] ss:$8 sps:$4 sm:$0xff]  }
  0x1f   :  { %6665 = vmatpush1.bf16.msra.mxu1 %v9392_v30  ;;  %v9464_v30 = vld [vmem:[%s14438_s1 + $0x134] ss:$8 sps:$4 sm:$0xff]  }
  0x20   :  { %7321 = vmatpush1.bf16.msra.mxu0 %v9393_v31  ;;  %6666 = vmatprep.subr.bf16.mxu1 %v9394_v32  ;;  %v9467_v31 = vld [vmem:[%s14438_s1 + $0x1134] ss:$8 sps:$4 sm:$0xff]   ;;  %v9462_v32 = vld [vmem:[%s14438_s1 + $0x130] ss:$8 sps:$4 sm:$0xff]  }
  0x21   :  { %7322 = vmatprep.subr.bf16.mxu0 %v9396_v33  ;;  %v9465_v33 = vld [vmem:[%s14438_s1 + $0x1130] ss:$8 sps:$4 sm:$0xff]  }
  0x23   :  { %6667 = vmatpush1.bf16.msra.mxu1 %v9398_v34  ;;  %v9470_v34 = vld [vmem:[%s14438_s1 + $0x144] ss:$8 sps:$4 sm:$0xff]  }
  0x24   :  { %7323 = vmatpush1.bf16.msra.mxu0 %v9399_v35  ;;  %6668 = vmatprep.subr.bf16.mxu1 %v9400_v39  ;;  %v9473_v35 = vld [vmem:[%s14438_s1 + $0x1144] ss:$8 sps:$4 sm:$0xff]   ;;  %v9479_v39 = vld [vmem:[%s14438_s1 + $0x1154] ss:$8 sps:$4 sm:$0xff]  }
  0x25   :  { %7324 = vmatprep.subr.bf16.mxu0 %v9402_v40  ;;  %v9474_v40 = vld [vmem:[%s14438_s1 + $0x150] ss:$8 sps:$4 sm:$0xff]  }
  0x27   :  { %6669 = vmatpush1.bf16.msra.mxu1 %v9404_v41  ;;  %v9477_v41 = vld [vmem:[%s14438_s1 + $0x1150] ss:$8 sps:$4 sm:$0xff]  }
  0x28   :  { %7325 = vmatpush1.bf16.msra.mxu0 %v9405_v44  ;;  %6670 = vmatprep.subr.bf16.mxu1 %v9406_v45  ;;  %v9485_v44 = vld [vmem:[%s14438_s1 + $0x1164] ss:$8 sps:$4 sm:$0xff]   ;;  %v9480_v45 = vld [vmem:[%s14438_s1 + $0x160] ss:$8 sps:$4 sm:$0xff]  }
  0x29   :  { %7326 = vmatprep.subr.bf16.mxu0 %v9408_v46  ;;  %v9483_v46 = vld [vmem:[%s14438_s1 + $0x1160] ss:$8 sps:$4 sm:$0xff]  }
  0x2b   :  { %6671 = vmatpush1.bf16.msra.mxu1 %v9410_v47  ;;  %v9488_v47 = vld [vmem:[%s14438_s1 + $0x174] ss:$8 sps:$4 sm:$0xff]  }
  0x2c   :  { %7327 = vmatpush1.bf16.msra.mxu0 %v9411_v48  ;;  %6672 = vmatprep.subr.bf16.mxu1 %v9412_v50  ;;  %v9491_v48 = vld [vmem:[%s14438_s1 + $0x1174] ss:$8 sps:$4 sm:$0xff]   ;;  %v9486_v50 = vld [vmem:[%s14438_s1 + $0x170] ss:$8 sps:$4 sm:$0xff]  }
  0x2d   :  { %7328 = vmatprep.subr.bf16.mxu0 %v9414_v51  ;;  %v9489_v51 = vld [vmem:[%s14438_s1 + $0x1170] ss:$8 sps:$4 sm:$0xff]  }
  0x2f   :  { %6673 = vmatpush1.bf16.msra.mxu1 %v9416_v53  ;;  %v9494_v53 = vld [vmem:[%s14438_s1 + $0x184] ss:$8 sps:$4 sm:$0xff]  }
  0x30   :  { %7329 = vmatpush1.bf16.msra.mxu0 %v9417_v55  ;;  %6674 = vmatprep.subr.bf16.mxu1 %v9418_v57  ;;  %v9492_v55 = vld [vmem:[%s14438_s1 + $0x180] ss:$8 sps:$4 sm:$0xff]  }
  0x31   :  { %7330 = vmatprep.subr.bf16.mxu0 %v9420_v58  ;;  %v9495_v57 = vld [vmem:[%s14438_s1 + $0x1180] ss:$8 sps:$4 sm:$0xff]   ;;  %v9500_v58 = vld [vmem:[%s14438_s1 + $0x194] ss:$8 sps:$4 sm:$0xff]  }
  0x33   :  { %6675 = vmatpush1.bf16.msra.mxu1 %v9422_v63  ;;  %v9509_v63 = vld [vmem:[%s14438_s1 + $0x11a4] ss:$8 sps:$4 sm:$0xff]  }
  0x34   :  { %7331 = vmatpush1.bf16.msra.mxu0 %v9423_v0  ;;  %6676 = vmatprep.subr.bf16.mxu1 %v9424_v1  ;;  %v9504_v0 = vld [vmem:[%s14438_s1 + $0x1a0] ss:$8 sps:$4 sm:$0xff]  }
  0x35   :  { %7332 = vmatprep.subr.bf16.mxu0 %v9426_v2  ;;  %v9507_v1 = vld [vmem:[%s14438_s1 + $0x11a0] ss:$8 sps:$4 sm:$0xff]   ;;  %v9512_v2 = vld [vmem:[%s14438_s1 + $0x1b4] ss:$8 sps:$4 sm:$0xff]  }
  0x37   :  { %6677 = vmatpush1.bf16.msra.mxu1 %v9428_v4  ;;  %v9510_v4 = vld [vmem:[%s14438_s1 + $0x1b0] ss:$8 sps:$4 sm:$0xff]  }
  0x38   :  { %7333 = vmatpush1.bf16.msra.mxu0 %v9429_v5  ;;  %6678 = vmatprep.subr.bf16.mxu1 %v9430_v6  ;;  %v9513_v5 = vld [vmem:[%s14438_s1 + $0x11b0] ss:$8 sps:$4 sm:$0xff]   ;;  %v9518_v6 = vld [vmem:[%s14438_s1 + $0x1c4] ss:$8 sps:$4 sm:$0xff]  }
  0x39   :  { %7334 = vmatprep.subr.bf16.mxu0 %v9432_v7  ;;  %v9521_v7 = vld [vmem:[%s14438_s1 + $0x11c4] ss:$8 sps:$4 sm:$0xff]  }
  0x3b   :  { %6679 = vmatpush1.bf16.msra.mxu1 %v9434_v8  ;;  %v9516_v8 = vld [vmem:[%s14438_s1 + $0x1c0] ss:$8 sps:$4 sm:$0xff]  }
  0x3c   :  { %7335 = vmatpush1.bf16.msra.mxu0 %v9435_v9  ;;  %6680 = vmatprep.subr.bf16.mxu1 %v9436_v10  ;;  %v9519_v9 = vld [vmem:[%s14438_s1 + $0x11c0] ss:$8 sps:$4 sm:$0xff]   ;;  %v9524_v10 = vld [vmem:[%s14438_s1 + $0x1d4] ss:$8 sps:$4 sm:$0xff]  }
  0x3d   :  { %7336 = vmatprep.subr.bf16.mxu0 %v9438_v11  ;;  %v9527_v11 = vld [vmem:[%s14438_s1 + $0x11d4] ss:$8 sps:$4 sm:$0xff]  }
  0x3f   :  { %6681 = vmatpush1.bf16.msra.mxu1 %v9440_v12  ;;  %v9522_v12 = vld [vmem:[%s14438_s1 + $0x1d0] ss:$8 sps:$4 sm:$0xff]  }
  0x40   :  { %7337 = vmatpush1.bf16.msra.mxu0 %v9441_v13  ;;  %6691 = vmatprep.subr.bf16.mxu1 %v9445_v14  ;;  %v9525_v13 = vld [vmem:[%s14438_s1 + $0x11d0] ss:$8 sps:$4 sm:$0xff]   ;;  %v9530_v14 = vld [vmem:[%s14438_s1 + $0x1e4] ss:$8 sps:$4 sm:$0xff]  }
  0x41   :  { %7347 = vmatprep.subr.bf16.mxu0 %v9449_v15  ;;  %v9533_v15 = vld [vmem:[%s14438_s1 + $0x11e4] ss:$8 sps:$4 sm:$0xff]  }
  0x42   :  { %6683 = vmatmul.mubr.bf16.vlgmr.msra.gmra.mrb[0].mxu1 %v11186_v16 }
  0x43   :  { %7339 = vmatmul.mubr.bf16.vlgmr.msra.gmra.mrb[0].mxu0 %v11189_v17  ;;  %6692 = vmatpush1.bf16.msra.mxu1 %v9443_v18  ;;  %v1074_v18 = vcombine.high %v11112_v52, %v11112_v52  ;;  %v9539_v52 = vld [vmem:[%s14438_s1 + $0x11f4] ss:$8 sps:$4 sm:$0xff]  }
  0x44   :  { %7348 = vmatpush1.bf16.msra.mxu0 %v9447_v19  ;;  %6693 = vmatprep.subr.bf16.mxu1 %v9452_v20  ;;  %v1270_v19 = vcombine.high %v11125_v56, %v11125_v56  ;;  %v9528_v20 = vld [vmem:[%s14438_s1 + $0x1e0] ss:$8 sps:$4 sm:$0xff]  }
  0x45   :  { %7349 = vmatprep.subr.bf16.mxu0 %v9455_v21  ;;  %6723 = vmatprep.mubr.bf16.mxu1 %v1121_v22  ;;  %v9531_v21 = vld [vmem:[%s14438_s1 + $0x11e0] ss:$8 sps:$4 sm:$0xff]   ;;  %v9536_v22 = vld [vmem:[%s14438_s1 + $0x1f4] ss:$8 sps:$4 sm:$0xff]   ;;  %v11378_v56 = vrot.slane %v1074_v18, %v11101_v49  ;;  %v9606_v18 = vld [vmem:[%s14438_s1 + $0x2b0] ss:$8 sps:$4 sm:$0xff]  }
  0x46   :  { %7379 = vmatprep.mubr.bf16.mxu0 %v1317_v23  ;;  %v11381_v23 = vrot.slane %v1270_v19, %v11101_v49  ;;  %v9609_v19 = vld [vmem:[%s14438_s1 + $0x12b0] ss:$8 sps:$4 sm:$0xff]  }
  0x47   :  { %6694 = vmatpush1.bf16.msra.mxu1 %v9450_v24  ;;  %v9534_v24 = vld [vmem:[%s14438_s1 + $0x1f0] ss:$8 sps:$4 sm:$0xff]  }
  0x48   :  { %7350 = vmatpush1.bf16.msra.mxu0 %v9453_v25  ;;  %6695 = vmatprep.subr.bf16.mxu1 %v9458_v26  ;;  %v9537_v25 = vld [vmem:[%s14438_s1 + $0x11f0] ss:$8 sps:$4 sm:$0xff]   ;;  %v9542_v26 = vld [vmem:[%s14438_s1 + $0x204] ss:$8 sps:$4 sm:$0xff]  }
  0x49   :  { %7351 = vmatprep.subr.bf16.mxu0 %v9461_v27  ;;  %v9545_v27 = vld [vmem:[%s14438_s1 + $0x1204] ss:$8 sps:$4 sm:$0xff]  }
  0x4b   :  { %6696 = vmatpush1.bf16.msra.mxu1 %v9456_v28  ;;  %v1090_v28 = vcombine.high %v11378_v56, %v11378_v56 }
  0x4c   :  { %7352 = vmatpush1.bf16.msra.mxu0 %v9459_v29  ;;  %6697 = vmatprep.subr.bf16.mxu1 %v9464_v30  ;;  %v1286_v29 = vcombine.high %v11381_v23, %v11381_v23  ;;  %v1119_v30 = vcombine.high %v11186_v16, %v11186_v16  ;;  %v9551_v16 = vld [vmem:[%s14438_s1 + $0x1214] ss:$8 sps:$4 sm:$0xff]  }
  0x4d   :  { %7353 = vmatprep.subr.bf16.mxu0 %v9467_v31  ;;  %v1315_v31 = vcombine.high %v11189_v17, %v11189_v17  ;;  %v11416_v17 = vrot.slane %v1090_v28, %v11101_v49  ;;  %v9626_v28 = vld [vmem:[%s14438_s1 + $0x2e4] ss:$8 sps:$4 sm:$0xff]  }
  0x4f   :  { %6698 = vmatpush1.bf16.msra.mxu1 %v9462_v32  ;;  %v9540_v32 = vld [vmem:[%s14438_s1 + $0x200] ss:$8 sps:$4 sm:$0xff]  }
  0x50   :  { %7354 = vmatpush1.bf16.msra.mxu0 %v9465_v33  ;;  %6699 = vmatprep.subr.bf16.mxu1 %v9470_v34  ;;  %v9543_v33 = vld [vmem:[%s14438_s1 + $0x1200] ss:$8 sps:$4 sm:$0xff]   ;;  %v9548_v34 = vld [vmem:[%s14438_s1 + $0x214] ss:$8 sps:$4 sm:$0xff]  }
  0x51   :  { %7355 = vmatprep.subr.bf16.mxu0 %v9473_v35  ;;  %v11419_v35 = vrot.slane %v1286_v29, %v11101_v49  ;;  %v9629_v29 = vld [vmem:[%s14438_s1 + $0x12e4] ss:$8 sps:$4 sm:$0xff]  }
  0x53   :  { %6700 = vmatpush1.bf16.msra.mxu1 %v9468_v36  ;;  %v9546_v36 = vld [vmem:[%s14438_s1 + $0x210] ss:$8 sps:$4 sm:$0xff]  }
  0x54   :  { %7356 = vmatpush1.bf16.msra.mxu0 %v9471_v37  ;;  %6701 = vmatprep.subr.bf16.mxu1 %v9476_v38  ;;  %v9549_v37 = vld [vmem:[%s14438_s1 + $0x1210] ss:$8 sps:$4 sm:$0xff]   ;;  %v9554_v38 = vld [vmem:[%s14438_s1 + $0x224] ss:$8 sps:$4 sm:$0xff]  }
  0x55   :  { %7357 = vmatprep.subr.bf16.mxu0 %v9479_v39  ;;  %v9557_v39 = vld [vmem:[%s14438_s1 + $0x1224] ss:$8 sps:$4 sm:$0xff]  }
  0x57   :  { %6702 = vmatpush1.bf16.msra.mxu1 %v9474_v40  ;;  %v9552_v40 = vld [vmem:[%s14438_s1 + $0x220] ss:$8 sps:$4 sm:$0xff]  }
  0x58   :  { %7358 = vmatpush1.bf16.msra.mxu0 %v9477_v41  ;;  %6703 = vmatprep.subr.bf16.mxu1 %v9482_v43  ;;  %v9555_v41 = vld [vmem:[%s14438_s1 + $0x1220] ss:$8 sps:$4 sm:$0xff]   ;;  %v9560_v43 = vld [vmem:[%s14438_s1 + $0x234] ss:$8 sps:$4 sm:$0xff]  }
  0x59   :  { %7359 = vmatprep.subr.bf16.mxu0 %v9485_v44  ;;  %v9563_v44 = vld [vmem:[%s14438_s1 + $0x1234] ss:$8 sps:$4 sm:$0xff]  }
  0x5b   :  { %6704 = vmatpush1.bf16.msra.mxu1 %v9480_v45  ;;  %v9558_v45 = vld [vmem:[%s14438_s1 + $0x230] ss:$8 sps:$4 sm:$0xff]  }
  0x5c   :  { %7360 = vmatpush1.bf16.msra.mxu0 %v9483_v46  ;;  %6705 = vmatprep.subr.bf16.mxu1 %v9488_v47  ;;  %v9561_v46 = vld [vmem:[%s14438_s1 + $0x1230] ss:$8 sps:$4 sm:$0xff]   ;;  %v9566_v47 = vld [vmem:[%s14438_s1 + $0x244] ss:$8 sps:$4 sm:$0xff]  }
  0x5d   :  { %7361 = vmatprep.subr.bf16.mxu0 %v9491_v48  ;;  %v9569_v48 = vld [vmem:[%s14438_s1 + $0x1244] ss:$8 sps:$4 sm:$0xff]  }
  0x5f   :  { %6706 = vmatpush1.bf16.msra.mxu1 %v9486_v50  ;;  %v9564_v50 = vld [vmem:[%s14438_s1 + $0x240] ss:$8 sps:$4 sm:$0xff]  }
  0x60   :  { %7362 = vmatpush1.bf16.msra.mxu0 %v9489_v51  ;;  %6707 = vmatprep.subr.bf16.mxu1 %v9494_v53  ;;  %v9567_v51 = vld [vmem:[%s14438_s1 + $0x1240] ss:$8 sps:$4 sm:$0xff]   ;;  %v9572_v53 = vld [vmem:[%s14438_s1 + $0x254] ss:$8 sps:$4 sm:$0xff]  }
  0x61   :  { %7363 = vmatprep.subr.bf16.mxu0 %v9497_v54  ;;  %v9575_v54 = vld [vmem:[%s14438_s1 + $0x1254] ss:$8 sps:$4 sm:$0xff]  }
  0x63   :  { %6708 = vmatpush1.bf16.msra.mxu1 %v9492_v55  ;;  %v9570_v55 = vld [vmem:[%s14438_s1 + $0x250] ss:$8 sps:$4 sm:$0xff]  }
  0x64   :  { %7364 = vmatpush1.bf16.msra.mxu0 %v9495_v57  ;;  %6709 = vmatprep.subr.bf16.mxu1 %v9500_v58  ;;  %v9573_v57 = vld [vmem:[%s14438_s1 + $0x1250] ss:$8 sps:$4 sm:$0xff]   ;;  %v9578_v58 = vld [vmem:[%s14438_s1 + $0x264] ss:$8 sps:$4 sm:$0xff]  }
  0x65   :  { %7365 = vmatprep.subr.bf16.mxu0 %v9503_v59  ;;  %v9581_v59 = vld [vmem:[%s14438_s1 + $0x1264] ss:$8 sps:$4 sm:$0xff]  }
  0x67   :  { %6710 = vmatpush1.bf16.msra.mxu1 %v9498_v60  ;;  %v9576_v60 = vld [vmem:[%s14438_s1 + $0x260] ss:$8 sps:$4 sm:$0xff]  }
  0x68   :  { %7366 = vmatpush1.bf16.msra.mxu0 %v9501_v61  ;;  %6711 = vmatprep.subr.bf16.mxu1 %v9506_v62  ;;  %v9579_v61 = vld [vmem:[%s14438_s1 + $0x1260] ss:$8 sps:$4 sm:$0xff]   ;;  %v9584_v62 = vld [vmem:[%s14438_s1 + $0x274] ss:$8 sps:$4 sm:$0xff]  }
  0x69   :  { %7367 = vmatprep.subr.bf16.mxu0 %v9509_v63  ;;  %v9587_v63 = vld [vmem:[%s14438_s1 + $0x1274] ss:$8 sps:$4 sm:$0xff]  }
  0x6b   :  { %6712 = vmatpush1.bf16.msra.mxu1 %v9504_v0  ;;  %v9582_v0 = vld [vmem:[%s14438_s1 + $0x270] ss:$8 sps:$4 sm:$0xff]  }
  0x6c   :  { %7368 = vmatpush1.bf16.msra.mxu0 %v9507_v1  ;;  %6713 = vmatprep.subr.bf16.mxu1 %v9512_v2  ;;  %v9585_v1 = vld [vmem:[%s14438_s1 + $0x1270] ss:$8 sps:$4 sm:$0xff]   ;;  %v9590_v2 = vld [vmem:[%s14438_s1 + $0x284] ss:$8 sps:$4 sm:$0xff]  }
  0x6d   :  { %7369 = vmatprep.subr.bf16.mxu0 %v9515_v3  ;;  %v9593_v3 = vld [vmem:[%s14438_s1 + $0x1284] ss:$8 sps:$4 sm:$0xff]  }
  0x6f   :  { %6714 = vmatpush1.bf16.msra.mxu1 %v9510_v4  ;;  %v9588_v4 = vld [vmem:[%s14438_s1 + $0x280] ss:$8 sps:$4 sm:$0xff]  }
  0x70   :  { %7370 = vmatpush1.bf16.msra.mxu0 %v9513_v5  ;;  %6715 = vmatprep.subr.bf16.mxu1 %v9518_v6  ;;  %v9591_v5 = vld [vmem:[%s14438_s1 + $0x1280] ss:$8 sps:$4 sm:$0xff]   ;;  %v9596_v6 = vld [vmem:[%s14438_s1 + $0x294] ss:$8 sps:$4 sm:$0xff]  }
  0x71   :  { %7371 = vmatprep.subr.bf16.mxu0 %v9521_v7  ;;  %v9599_v7 = vld [vmem:[%s14438_s1 + $0x1294] ss:$8 sps:$4 sm:$0xff]  }
  0x73   :  { %6716 = vmatpush1.bf16.msra.mxu1 %v9516_v8  ;;  %v9594_v8 = vld [vmem:[%s14438_s1 + $0x290] ss:$8 sps:$4 sm:$0xff]  }
  0x74   :  { %7372 = vmatpush1.bf16.msra.mxu0 %v9519_v9  ;;  %6717 = vmatprep.subr.bf16.mxu1 %v9524_v10  ;;  %v9597_v9 = vld [vmem:[%s14438_s1 + $0x1290] ss:$8 sps:$4 sm:$0xff]   ;;  %v9602_v10 = vld [vmem:[%s14438_s1 + $0x2a4] ss:$8 sps:$4 sm:$0xff]  }
  0x75   :  { %7373 = vmatprep.subr.bf16.mxu0 %v9527_v11  ;;  %v9605_v11 = vld [vmem:[%s14438_s1 + $0x12a4] ss:$8 sps:$4 sm:$0xff]  }
  0x77   :  { %6718 = vmatpush1.bf16.msra.mxu1 %v9522_v12  ;;  %v9600_v12 = vld [vmem:[%s14438_s1 + $0x2a0] ss:$8 sps:$4 sm:$0xff]  }
  0x78   :  { %7374 = vmatpush1.bf16.msra.mxu0 %v9525_v13  ;;  %6719 = vmatprep.subr.bf16.mxu1 %v9530_v14  ;;  %v9603_v13 = vld [vmem:[%s14438_s1 + $0x12a0] ss:$8 sps:$4 sm:$0xff]   ;;  %v9608_v14 = vld [vmem:[%s14438_s1 + $0x2b4] ss:$8 sps:$4 sm:$0xff]  }
  0x79   :  { %7375 = vmatprep.subr.bf16.mxu0 %v9533_v15  ;;  %v9611_v15 = vld [vmem:[%s14438_s1 + $0x12b4] ss:$8 sps:$4 sm:$0xff]  }
  0x7b   :  { %6720 = vmatpush1.bf16.msra.mxu1 %v9528_v20  ;;  %v9614_v20 = vld [vmem:[%s14438_s1 + $0x2c4] ss:$8 sps:$4 sm:$0xff]  }
  0x7c   :  { %7376 = vmatpush1.bf16.msra.mxu0 %v9531_v21  ;;  %6721 = vmatprep.subr.bf16.mxu1 %v9536_v22  ;;  %v9617_v21 = vld [vmem:[%s14438_s1 + $0x12c4] ss:$8 sps:$4 sm:$0xff]   ;;  %v9612_v22 = vld [vmem:[%s14438_s1 + $0x2c0] ss:$8 sps:$4 sm:$0xff]  }
  0x7d   :  { %7377 = vmatprep.subr.bf16.mxu0 %v9539_v52  ;;  %v9615_v52 = vld [vmem:[%s14438_s1 + $0x12c0] ss:$8 sps:$4 sm:$0xff]  }
  0x7f   :  { %6722 = vmatpush1.bf16.msra.mxu1 %v9534_v24  ;;  %v9620_v24 = vld [vmem:[%s14438_s1 + $0x2d4] ss:$8 sps:$4 sm:$0xff]  }
  0x80   :  { %7378 = vmatpush1.bf16.msra.mxu0 %v9537_v25  ;;  %6732 = vmatprep.subr.bf16.mxu1 %v9542_v26  ;;  %v9623_v25 = vld [vmem:[%s14438_s1 + $0x12d4] ss:$8 sps:$4 sm:$0xff]   ;;  %v9618_v26 = vld [vmem:[%s14438_s1 + $0x2d0] ss:$8 sps:$4 sm:$0xff]  }
  0x81   :  { %7388 = vmatprep.subr.bf16.mxu0 %v9545_v27  ;;  %v9621_v27 = vld [vmem:[%s14438_s1 + $0x12d0] ss:$8 sps:$4 sm:$0xff]  }
  0x82   :  { %6724 = vmatmul.mubr.bf16.vlgmr.msra.gmra.mrb[0].mxu1 %v1119_v30  ;;  %v9624_v30 = vld [vmem:[%s14438_s1 + $0x2e0] ss:$8 sps:$4 sm:$0xff]  }
  0x83   :  { %7380 = vmatmul.mubr.bf16.vlgmr.msra.gmra.mrb[0].mxu0 %v1315_v31  ;;  %6733 = vmatpush1.bf16.msra.mxu1 %v9540_v32  ;;  %v9627_v31 = vld [vmem:[%s14438_s1 + $0x12e0] ss:$8 sps:$4 sm:$0xff]   ;;  %v9632_v32 = vld [vmem:[%s14438_s1 + $0x2f4] ss:$8 sps:$4 sm:$0xff]  }
  0x84   :  { %7389 = vmatpush1.bf16.msra.mxu0 %v9543_v33  ;;  %6734 = vmatprep.subr.bf16.mxu1 %v9548_v34  ;;  %v9635_v33 = vld [vmem:[%s14438_s1 + $0x12f4] ss:$8 sps:$4 sm:$0xff]   ;;  %v9630_v34 = vld [vmem:[%s14438_s1 + $0x2f0] ss:$8 sps:$4 sm:$0xff]  }
  0x85   :  { %7390 = vmatprep.subr.bf16.mxu0 %v9551_v16  ;;  %6764 = vmatprep.mubr.bf16.mxu1 %v11416_v17  ;;  %v9633_v16 = vld [vmem:[%s14438_s1 + $0x12f0] ss:$8 sps:$4 sm:$0xff]  }
  0x86   :  { %7420 = vmatprep.mubr.bf16.mxu0 %v11419_v35 }
  0x87   :  { %6735 = vmatpush1.bf16.msra.mxu1 %v9546_v36  ;;  %v9638_v36 = vld [vmem:[%s14438_s1 + $0x304] ss:$8 sps:$4 sm:$0xff]  }
  0x88   :  { %7391 = vmatpush1.bf16.msra.mxu0 %v9549_v37  ;;  %6736 = vmatprep.subr.bf16.mxu1 %v9554_v38  ;;  %v9641_v37 = vld [vmem:[%s14438_s1 + $0x1304] ss:$8 sps:$4 sm:$0xff]   ;;  %v11605_v38 = vrot.slane %v11378_v56, %v11101_v49  ;;  %v9644_v56 = vld [vmem:[%s14438_s1 + $0x314] ss:$8 sps:$4 sm:$0xff]  }
  0x89   :  { %7392 = vmatprep.subr.bf16.mxu0 %v9557_v39  ;;  %v11609_v39 = vrot.slane %v11381_v23, %v11101_v49  ;;  %v9647_v23 = vld [vmem:[%s14438_s1 + $0x1314] ss:$8 sps:$4 sm:$0xff]  }
  0x8b   :  { %6737 = vmatpush1.bf16.msra.mxu1 %v9552_v40  ;;  %v9636_v40 = vld [vmem:[%s14438_s1 + $0x300] ss:$8 sps:$4 sm:$0xff]  }
  0x8c   :  { %7393 = vmatpush1.bf16.msra.mxu0 %v9555_v41  ;;  %6738 = vmatprep.subr.bf16.mxu1 %v9560_v43  ;;  %v9639_v41 = vld [vmem:[%s14438_s1 + $0x1300] ss:$8 sps:$4 sm:$0xff]   ;;  %v1122_v43 = vcombine.high %v11416_v17, %v11416_v17  ;;  %v9650_v17 = vld [vmem:[%s14438_s1 + $0x324] ss:$8 sps:$4 sm:$0xff]  }
  0x8d   :  { %7394 = vmatprep.subr.bf16.mxu0 %v9563_v44  ;;  %v1318_v44 = vcombine.high %v11419_v35, %v11419_v35  ;;  %v9653_v35 = vld [vmem:[%s14438_s1 + $0x1324] ss:$8 sps:$4 sm:$0xff]  }
  0x8f   :  { %6739 = vmatpush1.bf16.msra.mxu1 %v9558_v45  ;;  %v9642_v45 = vld [vmem:[%s14438_s1 + $0x310] ss:$8 sps:$4 sm:$0xff]  }
  0x90   :  { %7395 = vmatpush1.bf16.msra.mxu0 %v9561_v46  ;;  %6740 = vmatprep.subr.bf16.mxu1 %v9566_v47  ;;  %v9645_v46 = vld [vmem:[%s14438_s1 + $0x1310] ss:$8 sps:$4 sm:$0xff]   ;;  %v9648_v47 = vld [vmem:[%s14438_s1 + $0x320] ss:$8 sps:$4 sm:$0xff]  }
  0x91   :  { %7396 = vmatprep.subr.bf16.mxu0 %v9569_v48  ;;  %v9651_v48 = vld [vmem:[%s14438_s1 + $0x1320] ss:$8 sps:$4 sm:$0xff]  }
  0x93   :  { %6741 = vmatpush1.bf16.msra.mxu1 %v9564_v50  ;;  %v9656_v50 = vld [vmem:[%s14438_s1 + $0x334] ss:$8 sps:$4 sm:$0xff]  }
  0x94   :  { %7397 = vmatpush1.bf16.msra.mxu0 %v9567_v51  ;;  %6742 = vmatprep.subr.bf16.mxu1 %v9572_v53  ;;  %v9659_v51 = vld [vmem:[%s14438_s1 + $0x1334] ss:$8 sps:$4 sm:$0xff]   ;;  %v9654_v53 = vld [vmem:[%s14438_s1 + $0x330] ss:$8 sps:$4 sm:$0xff]  }
  0x95   :  { %7398 = vmatprep.subr.bf16.mxu0 %v9575_v54  ;;  %v9657_v54 = vld [vmem:[%s14438_s1 + $0x1330] ss:$8 sps:$4 sm:$0xff]  }
  0x97   :  { %6743 = vmatpush1.bf16.msra.mxu1 %v9570_v55  ;;  %v9662_v55 = vld [vmem:[%s14438_s1 + $0x344] ss:$8 sps:$4 sm:$0xff]  }
  0x98   :  { %7399 = vmatpush1.bf16.msra.mxu0 %v9573_v57  ;;  %6744 = vmatprep.subr.bf16.mxu1 %v9578_v58  ;;  %v9665_v57 = vld [vmem:[%s14438_s1 + $0x1344] ss:$8 sps:$4 sm:$0xff]   ;;  %v9660_v58 = vld [vmem:[%s14438_s1 + $0x340] ss:$8 sps:$4 sm:$0xff]  }
  0x99   :  { %7400 = vmatprep.subr.bf16.mxu0 %v9581_v59  ;;  %v9663_v59 = vld [vmem:[%s14438_s1 + $0x1340] ss:$8 sps:$4 sm:$0xff]  }
  0x9b   :  { %6745 = vmatpush1.bf16.msra.mxu1 %v9576_v60  ;;  %v9668_v60 = vld [vmem:[%s14438_s1 + $0x354] ss:$8 sps:$4 sm:$0xff]  }
  0x9c   :  { %7401 = vmatpush1.bf16.msra.mxu0 %v9579_v61  ;;  %6746 = vmatprep.subr.bf16.mxu1 %v9584_v62  ;;  %v9671_v61 = vld [vmem:[%s14438_s1 + $0x1354] ss:$8 sps:$4 sm:$0xff]   ;;  %v9666_v62 = vld [vmem:[%s14438_s1 + $0x350] ss:$8 sps:$4 sm:$0xff]  }
  0x9d   :  { %7402 = vmatprep.subr.bf16.mxu0 %v9587_v63  ;;  %v9669_v63 = vld [vmem:[%s14438_s1 + $0x1350] ss:$8 sps:$4 sm:$0xff]  }
  0x9f   :  { %6747 = vmatpush1.bf16.msra.mxu1 %v9582_v0  ;;  %v9674_v0 = vld [vmem:[%s14438_s1 + $0x364] ss:$8 sps:$4 sm:$0xff]  }
  0xa0   :  { %7403 = vmatpush1.bf16.msra.mxu0 %v9585_v1  ;;  %6748 = vmatprep.subr.bf16.mxu1 %v9590_v2  ;;  %v9677_v1 = vld [vmem:[%s14438_s1 + $0x1364] ss:$8 sps:$4 sm:$0xff]   ;;  %v9672_v2 = vld [vmem:[%s14438_s1 + $0x360] ss:$8 sps:$4 sm:$0xff]  }
  0xa1   :  { %7404 = vmatprep.subr.bf16.mxu0 %v9593_v3  ;;  %v9675_v3 = vld [vmem:[%s14438_s1 + $0x1360] ss:$8 sps:$4 sm:$0xff]  }
  0xa3   :  { %6749 = vmatpush1.bf16.msra.mxu1 %v9588_v4  ;;  %v9680_v4 = vld [vmem:[%s14438_s1 + $0x374] ss:$8 sps:$4 sm:$0xff]  }
  0xa4   :  { %7405 = vmatpush1.bf16.msra.mxu0 %v9591_v5  ;;  %6750 = vmatprep.subr.bf16.mxu1 %v9596_v6  ;;  %v9683_v5 = vld [vmem:[%s14438_s1 + $0x1374] ss:$8 sps:$4 sm:$0xff]   ;;  %v9678_v6 = vld [vmem:[%s14438_s1 + $0x370] ss:$8 sps:$4 sm:$0xff]  }
  0xa5   :  { %7406 = vmatprep.subr.bf16.mxu0 %v9599_v7  ;;  %v9681_v7 = vld [vmem:[%s14438_s1 + $0x1370] ss:$8 sps:$4 sm:$0xff]  }
  0xa7   :  { %6751 = vmatpush1.bf16.msra.mxu1 %v9594_v8  ;;  %v9686_v8 = vld [vmem:[%s14438_s1 + $0x384] ss:$8 sps:$4 sm:$0xff]  }
  0xa8   :  { %7407 = vmatpush1.bf16.msra.mxu0 %v9597_v9  ;;  %6752 = vmatprep.subr.bf16.mxu1 %v9602_v10  ;;  %v9689_v9 = vld [vmem:[%s14438_s1 + $0x1384] ss:$8 sps:$4 sm:$0xff]   ;;  %v9684_v10 = vld [vmem:[%s14438_s1 + $0x380] ss:$8 sps:$4 sm:$0xff]  }
  0xa9   :  { %7408 = vmatprep.subr.bf16.mxu0 %v9605_v11  ;;  %v9687_v11 = vld [vmem:[%s14438_s1 + $0x1380] ss:$8 sps:$4 sm:$0xff]  }
  0xab   :  { %6753 = vmatpush1.bf16.msra.mxu1 %v9600_v12  ;;  %v9692_v12 = vld [vmem:[%s14438_s1 + $0x394] ss:$8 sps:$4 sm:$0xff]  }
  0xac   :  { %7409 = vmatpush1.bf16.msra.mxu0 %v9603_v13  ;;  %6754 = vmatprep.subr.bf16.mxu1 %v9608_v14  ;;  %v9695_v13 = vld [vmem:[%s14438_s1 + $0x1394] ss:$8 sps:$4 sm:$0xff]   ;;  %v9690_v14 = vld [vmem:[%s14438_s1 + $0x390] ss:$8 sps:$4 sm:$0xff]  }
  0xad   :  { %7410 = vmatprep.subr.bf16.mxu0 %v9611_v15  ;;  %v9693_v15 = vld [vmem:[%s14438_s1 + $0x1390] ss:$8 sps:$4 sm:$0xff]  }
  0xaf   :  { %6755 = vmatpush1.bf16.msra.mxu1 %v9606_v18  ;;  %v9698_v18 = vld [vmem:[%s14438_s1 + $0x3a4] ss:$8 sps:$4 sm:$0xff]  }
  0xb0   :  { %7411 = vmatpush1.bf16.msra.mxu0 %v9609_v19  ;;  %6756 = vmatprep.subr.bf16.mxu1 %v9614_v20  ;;  %v9701_v19 = vld [vmem:[%s14438_s1 + $0x13a4] ss:$8 sps:$4 sm:$0xff]   ;;  %v9696_v20 = vld [vmem:[%s14438_s1 + $0x3a0] ss:$8 sps:$4 sm:$0xff]  }
  0xb1   :  { %7412 = vmatprep.subr.bf16.mxu0 %v9617_v21  ;;  %v9699_v21 = vld [vmem:[%s14438_s1 + $0x13a0] ss:$8 sps:$4 sm:$0xff]  }
  0xb3   :  { %6757 = vmatpush1.bf16.msra.mxu1 %v9612_v22  ;;  %v9704_v22 = vld [vmem:[%s14438_s1 + $0x3b4] ss:$8 sps:$4 sm:$0xff]  }
  0xb4   :  { %7413 = vmatpush1.bf16.msra.mxu0 %v9615_v52  ;;  %6758 = vmatprep.subr.bf16.mxu1 %v9620_v24  ;;  %v9707_v52 = vld [vmem:[%s14438_s1 + $0x13b4] ss:$8 sps:$4 sm:$0xff]   ;;  %v9702_v24 = vld [vmem:[%s14438_s1 + $0x3b0] ss:$8 sps:$4 sm:$0xff]  }
  0xb5   :  { %7414 = vmatprep.subr.bf16.mxu0 %v9623_v25  ;;  %v9705_v25 = vld [vmem:[%s14438_s1 + $0x13b0] ss:$8 sps:$4 sm:$0xff]  }
  0xb7   :  { %6759 = vmatpush1.bf16.msra.mxu1 %v9618_v26  ;;  %v9710_v26 = vld [vmem:[%s14438_s1 + $0x3c4] ss:$8 sps:$4 sm:$0xff]  }
  0xb8   :  { %7415 = vmatpush1.bf16.msra.mxu0 %v9621_v27  ;;  %6760 = vmatprep.subr.bf16.mxu1 %v9626_v28  ;;  %v9713_v27 = vld [vmem:[%s14438_s1 + $0x13c4] ss:$8 sps:$4 sm:$0xff]   ;;  %v9708_v28 = vld [vmem:[%s14438_s1 + $0x3c0] ss:$8 sps:$4 sm:$0xff]  }
  0xb9   :  { %7416 = vmatprep.subr.bf16.mxu0 %v9629_v29  ;;  %v9711_v29 = vld [vmem:[%s14438_s1 + $0x13c0] ss:$8 sps:$4 sm:$0xff]  }
  0xbb   :  { %6761 = vmatpush1.bf16.msra.mxu1 %v9624_v30  ;;  %v9716_v30 = vld [vmem:[%s14438_s1 + $0x3d4] ss:$8 sps:$4 sm:$0xff]  }
  0xbc   :  { %7417 = vmatpush1.bf16.msra.mxu0 %v9627_v31  ;;  %6762 = vmatprep.subr.bf16.mxu1 %v9632_v32  ;;  %v9719_v31 = vld [vmem:[%s14438_s1 + $0x13d4] ss:$8 sps:$4 sm:$0xff]   ;;  %v9714_v32 = vld [vmem:[%s14438_s1 + $0x3d0] ss:$8 sps:$4 sm:$0xff]  }
  0xbd   :  { %7418 = vmatprep.subr.bf16.mxu0 %v9635_v33  ;;  %v9717_v33 = vld [vmem:[%s14438_s1 + $0x13d0] ss:$8 sps:$4 sm:$0xff]  }
  0xbf   :  { %6763 = vmatpush1.bf16.msra.mxu1 %v9630_v34  ;;  %v9722_v34 = vld [vmem:[%s14438_s1 + $0x3e4] ss:$8 sps:$4 sm:$0xff]  }
  0xc0   :  { %7419 = vmatpush1.bf16.msra.mxu0 %v9633_v16  ;;  %6773 = vmatprep.subr.bf16.mxu1 %v9638_v36  ;;  %v9725_v16 = vld [vmem:[%s14438_s1 + $0x13e4] ss:$8 sps:$4 sm:$0xff]   ;;  %v9720_v36 = vld [vmem:[%s14438_s1 + $0x3e0] ss:$8 sps:$4 sm:$0xff]  }
  0xc1   :  { %7429 = vmatprep.subr.bf16.mxu0 %v9641_v37  ;;  %v9723_v37 = vld [vmem:[%s14438_s1 + $0x13e0] ss:$8 sps:$4 sm:$0xff]  }
  0xc2   :  { %6765 = vmatmul.mubr.bf16.vlgmr.msra.gmra.mrb[0].mxu1 %v11605_v38 }
  0xc3   :  { %7421 = vmatmul.mubr.bf16.vlgmr.msra.gmra.mrb[0].mxu0 %v11609_v39  ;;  %6774 = vmatpush1.bf16.msra.mxu1 %v9636_v40  ;;  %v11794_v40 = vld.sshfl [vmem:[%s14437_s0 + $0x8] sm:$0xff pattern:$0x75316420] }
  0xc4   :  { %7430 = vmatpush1.bf16.msra.mxu0 %v9639_v41  ;;  %6775 = vmatprep.subr.bf16.mxu1 %v9644_v56  ;;  %v11799_v41 = vld.sshfl [vmem:[%s14437_s0 + $0x28] sm:$0xff pattern:$0x75316420]  ;;  %v9728_v56 = vld [vmem:[%s14438_s1 + $0x3f4] ss:$8 sps:$4 sm:$0xff]  }
  0xc5   :  { %7431 = vmatprep.subr.bf16.mxu0 %v9647_v23  ;;  %6805 = vmatprep.mubr.bf16.mxu1 %v1122_v43  ;;  %v9731_v23 = vld [vmem:[%s14438_s1 + $0x13f4] ss:$8 sps:$4 sm:$0xff]   ;;  %v9726_v43 = vld [vmem:[%s14438_s1 + $0x3f0] ss:$8 sps:$4 sm:$0xff]  }
  0xc6   :  { %7461 = vmatprep.mubr.bf16.mxu0 %v1318_v44  ;;  %v9729_v44 = vld [vmem:[%s14438_s1 + $0x13f0] ss:$8 sps:$4 sm:$0xff]  }
  0xc7   :  { %6776 = vmatpush1.bf16.msra.mxu1 %v9642_v45  ;;  %v9734_v45 = vld [vmem:[%s14438_s1 + $0x404] ss:$8 sps:$4 sm:$0xff]  }
  0xc8   :  { %7432 = vmatpush1.bf16.msra.mxu0 %v9645_v46  ;;  %6777 = vmatprep.subr.bf16.mxu1 %v9650_v17  ;;  %v9737_v46 = vld [vmem:[%s14438_s1 + $0x1404] ss:$8 sps:$4 sm:$0xff]   ;;  %v1138_v17 = vcombine.high %v11794_v40, %v11794_v40 }
  0xc9   :  { %7433 = vmatprep.subr.bf16.mxu0 %v9653_v35  ;;  %v1334_v35 = vcombine.high %v11799_v41, %v11799_v41 }
  0xcb   :  { %6778 = vmatpush1.bf16.msra.mxu1 %v9648_v47  ;;  %v9732_v47 = vld [vmem:[%s14438_s1 + $0x400] ss:$8 sps:$4 sm:$0xff]  }
  0xcc   :  { %7434 = vmatpush1.bf16.msra.mxu0 %v9651_v48  ;;  %6779 = vmatprep.subr.bf16.mxu1 %v9656_v50  ;;  %v9735_v48 = vld [vmem:[%s14438_s1 + $0x1400] ss:$8 sps:$4 sm:$0xff]   ;;  %v1120_v50 = vcombine.high %v11605_v38, %v11605_v38  ;;  %v11843_v38 = vrot.slane %v1334_v35, %v11101_v49  ;;  %v9821_v35 = vld [vmem:[%s14438_s1 + $0x14e4] ss:$8 sps:$4 sm:$0xff]  }
  0xcd   :  { %7435 = vmatprep.subr.bf16.mxu0 %v9659_v51  ;;  %v1316_v51 = vcombine.high %v11609_v39, %v11609_v39  ;;  %v9738_v39 = vld [vmem:[%s14438_s1 + $0x410] ss:$8 sps:$4 sm:$0xff]  }
  0xcf   :  { %6780 = vmatpush1.bf16.msra.mxu1 %v9654_v53  ;;  %v9740_v53 = vld [vmem:[%s14438_s1 + $0x414] ss:$8 sps:$4 sm:$0xff]  }
  0xd0   :  { %7436 = vmatpush1.bf16.msra.mxu0 %v9657_v54  ;;  %6781 = vmatprep.subr.bf16.mxu1 %v9662_v55  ;;  %v9743_v54 = vld [vmem:[%s14438_s1 + $0x1414] ss:$8 sps:$4 sm:$0xff]   ;;  %v11840_v55 = vrot.slane %v1138_v17, %v11101_v49  ;;  %v9818_v17 = vld [vmem:[%s14438_s1 + $0x4e4] ss:$8 sps:$4 sm:$0xff]  }
  0xd1   :  { %7437 = vmatprep.subr.bf16.mxu0 %v9665_v57  ;;  %v9741_v57 = vld [vmem:[%s14438_s1 + $0x1410] ss:$8 sps:$4 sm:$0xff]  }
  0xd3   :  { %6782 = vmatpush1.bf16.msra.mxu1 %v9660_v58  ;;  %v9746_v58 = vld [vmem:[%s14438_s1 + $0x424] ss:$8 sps:$4 sm:$0xff]  }
  0xd4   :  { %7438 = vmatpush1.bf16.msra.mxu0 %v9663_v59  ;;  %6783 = vmatprep.subr.bf16.mxu1 %v9668_v60  ;;  %v9749_v59 = vld [vmem:[%s14438_s1 + $0x1424] ss:$8 sps:$4 sm:$0xff]   ;;  %v9744_v60 = vld [vmem:[%s14438_s1 + $0x420] ss:$8 sps:$4 sm:$0xff]  }
  0xd5   :  { %7439 = vmatprep.subr.bf16.mxu0 %v9671_v61  ;;  %v9747_v61 = vld [vmem:[%s14438_s1 + $0x1420] ss:$8 sps:$4 sm:$0xff]  }
  0xd7   :  { %6784 = vmatpush1.bf16.msra.mxu1 %v9666_v62  ;;  %v9752_v62 = vld [vmem:[%s14438_s1 + $0x434] ss:$8 sps:$4 sm:$0xff]  }
  0xd8   :  { %7440 = vmatpush1.bf16.msra.mxu0 %v9669_v63  ;;  %6785 = vmatprep.subr.bf16.mxu1 %v9674_v0  ;;  %v9755_v63 = vld [vmem:[%s14438_s1 + $0x1434] ss:$8 sps:$4 sm:$0xff]   ;;  %v9750_v0 = vld [vmem:[%s14438_s1 + $0x430] ss:$8 sps:$4 sm:$0xff]  }
  0xd9   :  { %7441 = vmatprep.subr.bf16.mxu0 %v9677_v1  ;;  %v9753_v1 = vld [vmem:[%s14438_s1 + $0x1430] ss:$8 sps:$4 sm:$0xff]  }
  0xdb   :  { %6786 = vmatpush1.bf16.msra.mxu1 %v9672_v2  ;;  %v9758_v2 = vld [vmem:[%s14438_s1 + $0x444] ss:$8 sps:$4 sm:$0xff]  }
  0xdc   :  { %7442 = vmatpush1.bf16.msra.mxu0 %v9675_v3  ;;  %6787 = vmatprep.subr.bf16.mxu1 %v9680_v4  ;;  %v9761_v3 = vld [vmem:[%s14438_s1 + $0x1444] ss:$8 sps:$4 sm:$0xff]   ;;  %v9756_v4 = vld [vmem:[%s14438_s1 + $0x440] ss:$8 sps:$4 sm:$0xff]  }
  0xdd   :  { %7443 = vmatprep.subr.bf16.mxu0 %v9683_v5  ;;  %v9759_v5 = vld [vmem:[%s14438_s1 + $0x1440] ss:$8 sps:$4 sm:$0xff]  }
  0xdf   :  { %6788 = vmatpush1.bf16.msra.mxu1 %v9678_v6  ;;  %v9764_v6 = vld [vmem:[%s14438_s1 + $0x454] ss:$8 sps:$4 sm:$0xff]  }
  0xe0   :  { %7444 = vmatpush1.bf16.msra.mxu0 %v9681_v7  ;;  %6789 = vmatprep.subr.bf16.mxu1 %v9686_v8  ;;  %v9767_v7 = vld [vmem:[%s14438_s1 + $0x1454] ss:$8 sps:$4 sm:$0xff]   ;;  %v9762_v8 = vld [vmem:[%s14438_s1 + $0x450] ss:$8 sps:$4 sm:$0xff]  }
  0xe1   :  { %7445 = vmatprep.subr.bf16.mxu0 %v9689_v9  ;;  %v9765_v9 = vld [vmem:[%s14438_s1 + $0x1450] ss:$8 sps:$4 sm:$0xff]  }
  0xe3   :  { %6790 = vmatpush1.bf16.msra.mxu1 %v9684_v10  ;;  %v9770_v10 = vld [vmem:[%s14438_s1 + $0x464] ss:$8 sps:$4 sm:$0xff]  }
  0xe4   :  { %7446 = vmatpush1.bf16.msra.mxu0 %v9687_v11  ;;  %6791 = vmatprep.subr.bf16.mxu1 %v9692_v12  ;;  %v9773_v11 = vld [vmem:[%s14438_s1 + $0x1464] ss:$8 sps:$4 sm:$0xff]   ;;  %v9768_v12 = vld [vmem:[%s14438_s1 + $0x460] ss:$8 sps:$4 sm:$0xff]  }
  0xe5   :  { %7447 = vmatprep.subr.bf16.mxu0 %v9695_v13  ;;  %v9771_v13 = vld [vmem:[%s14438_s1 + $0x1460] ss:$8 sps:$4 sm:$0xff]  }
  0xe7   :  { %6792 = vmatpush1.bf16.msra.mxu1 %v9690_v14  ;;  %v9776_v14 = vld [vmem:[%s14438_s1 + $0x474] ss:$8 sps:$4 sm:$0xff]  }
  0xe8   :  { %7448 = vmatpush1.bf16.msra.mxu0 %v9693_v15  ;;  %6793 = vmatprep.subr.bf16.mxu1 %v9698_v18  ;;  %v9779_v15 = vld [vmem:[%s14438_s1 + $0x1474] ss:$8 sps:$4 sm:$0xff]   ;;  %v9774_v18 = vld [vmem:[%s14438_s1 + $0x470] ss:$8 sps:$4 sm:$0xff]  }
  0xe9   :  { %7449 = vmatprep.subr.bf16.mxu0 %v9701_v19  ;;  %v9777_v19 = vld [vmem:[%s14438_s1 + $0x1470] ss:$8 sps:$4 sm:$0xff]  }
  0xeb   :  { %6794 = vmatpush1.bf16.msra.mxu1 %v9696_v20  ;;  %v9782_v20 = vld [vmem:[%s14438_s1 + $0x484] ss:$8 sps:$4 sm:$0xff]  }
  0xec   :  { %7450 = vmatpush1.bf16.msra.mxu0 %v9699_v21  ;;  %6795 = vmatprep.subr.bf16.mxu1 %v9704_v22  ;;  %v9785_v21 = vld [vmem:[%s14438_s1 + $0x1484] ss:$8 sps:$4 sm:$0xff]   ;;  %v9780_v22 = vld [vmem:[%s14438_s1 + $0x480] ss:$8 sps:$4 sm:$0xff]  }
  0xed   :  { %7451 = vmatprep.subr.bf16.mxu0 %v9707_v52  ;;  %v9783_v52 = vld [vmem:[%s14438_s1 + $0x1480] ss:$8 sps:$4 sm:$0xff]  }
  0xef   :  { %6796 = vmatpush1.bf16.msra.mxu1 %v9702_v24  ;;  %v9788_v24 = vld [vmem:[%s14438_s1 + $0x494] ss:$8 sps:$4 sm:$0xff]  }
  0xf0   :  { %7452 = vmatpush1.bf16.msra.mxu0 %v9705_v25  ;;  %6797 = vmatprep.subr.bf16.mxu1 %v9710_v26  ;;  %v9791_v25 = vld [vmem:[%s14438_s1 + $0x1494] ss:$8 sps:$4 sm:$0xff]   ;;  %v9786_v26 = vld [vmem:[%s14438_s1 + $0x490] ss:$8 sps:$4 sm:$0xff]  }
  0xf1   :  { %7453 = vmatprep.subr.bf16.mxu0 %v9713_v27  ;;  %v9789_v27 = vld [vmem:[%s14438_s1 + $0x1490] ss:$8 sps:$4 sm:$0xff]  }
  0xf3   :  { %6798 = vmatpush1.bf16.msra.mxu1 %v9708_v28  ;;  %v9794_v28 = vld [vmem:[%s14438_s1 + $0x4a4] ss:$8 sps:$4 sm:$0xff]  }
  0xf4   :  { %7454 = vmatpush1.bf16.msra.mxu0 %v9711_v29  ;;  %6799 = vmatprep.subr.bf16.mxu1 %v9716_v30  ;;  %v9797_v29 = vld [vmem:[%s14438_s1 + $0x14a4] ss:$8 sps:$4 sm:$0xff]   ;;  %v9792_v30 = vld [vmem:[%s14438_s1 + $0x4a0] ss:$8 sps:$4 sm:$0xff]  }
  0xf5   :  { %7455 = vmatprep.subr.bf16.mxu0 %v9719_v31  ;;  %v9795_v31 = vld [vmem:[%s14438_s1 + $0x14a0] ss:$8 sps:$4 sm:$0xff]  }
  0xf7   :  { %6800 = vmatpush1.bf16.msra.mxu1 %v9714_v32  ;;  %v9800_v32 = vld [vmem:[%s14438_s1 + $0x4b4] ss:$8 sps:$4 sm:$0xff]  }
  0xf8   :  { %7456 = vmatpush1.bf16.msra.mxu0 %v9717_v33  ;;  %6801 = vmatprep.subr.bf16.mxu1 %v9722_v34  ;;  %v9803_v33 = vld [vmem:[%s14438_s1 + $0x14b4] ss:$8 sps:$4 sm:$0xff]   ;;  %v9798_v34 = vld [vmem:[%s14438_s1 + $0x4b0] ss:$8 sps:$4 sm:$0xff]  }
  0xf9   :  { %7457 = vmatprep.subr.bf16.mxu0 %v9725_v16  ;;  %v9801_v16 = vld [vmem:[%s14438_s1 + $0x14b0] ss:$8 sps:$4 sm:$0xff]  }
  0xfb   :  { %6802 = vmatpush1.bf16.msra.mxu1 %v9720_v36  ;;  %v9806_v36 = vld [vmem:[%s14438_s1 + $0x4c4] ss:$8 sps:$4 sm:$0xff]  }
  0xfc   :  { %7458 = vmatpush1.bf16.msra.mxu0 %v9723_v37  ;;  %6803 = vmatprep.subr.bf16.mxu1 %v9728_v56  ;;  %v9809_v37 = vld [vmem:[%s14438_s1 + $0x14c4] ss:$8 sps:$4 sm:$0xff]   ;;  %v9804_v56 = vld [vmem:[%s14438_s1 + $0x4c0] ss:$8 sps:$4 sm:$0xff]  }
  0xfd   :  { %7459 = vmatprep.subr.bf16.mxu0 %v9731_v23  ;;  %v9807_v23 = vld [vmem:[%s14438_s1 + $0x14c0] ss:$8 sps:$4 sm:$0xff]  }
  0xff   :  { %6804 = vmatpush1.bf16.msra.mxu1 %v9726_v43  ;;  %v9812_v43 = vld [vmem:[%s14438_s1 + $0x4d4] ss:$8 sps:$4 sm:$0xff]  }
 0x100   :  { %7460 = vmatpush1.bf16.msra.mxu0 %v9729_v44  ;;  %6814 = vmatprep.subr.bf16.mxu1 %v9734_v45  ;;  %v9815_v44 = vld [vmem:[%s14438_s1 + $0x14d4] ss:$8 sps:$4 sm:$0xff]   ;;  %v9810_v45 = vld [vmem:[%s14438_s1 + $0x4d0] ss:$8 sps:$4 sm:$0xff]  }
 0x101   :  { %7470 = vmatprep.subr.bf16.mxu0 %v9737_v46  ;;  %v9813_v46 = vld [vmem:[%s14438_s1 + $0x14d0] ss:$8 sps:$4 sm:$0xff]  }
 0x102   :  { %6806 = vmatmul.mubr.bf16.vlgmr.msra.gmra.mrb[0].mxu1 %v1120_v50  ;;  %v9824_v50 = vld [vmem:[%s14438_s1 + $0x4f4] ss:$8 sps:$4 sm:$0xff]  }
 0x103   :  { %7462 = vmatmul.mubr.bf16.vlgmr.msra.gmra.mrb[0].mxu0 %v1316_v51  ;;  %6815 = vmatpush1.bf16.msra.mxu1 %v9732_v47  ;;  %v9816_v47 = vld [vmem:[%s14438_s1 + $0x4e0] ss:$8 sps:$4 sm:$0xff]   ;;  %v9827_v51 = vld [vmem:[%s14438_s1 + $0x14f4] ss:$8 sps:$4 sm:$0xff]  }
 0x104   :  { %7471 = vmatpush1.bf16.msra.mxu0 %v9735_v48  ;;  %6816 = vmatprep.subr.bf16.mxu1 %v9740_v53  ;;  %v9819_v48 = vld [vmem:[%s14438_s1 + $0x14e0] ss:$8 sps:$4 sm:$0xff]   ;;  %v9822_v53 = vld [vmem:[%s14438_s1 + $0x4f0] ss:$8 sps:$4 sm:$0xff]  }
 0x105   :  { %7472 = vmatprep.subr.bf16.mxu0 %v9743_v54  ;;  %6846 = vmatprep.mubr.bf16.mxu1 %v11840_v55  ;;  %v9825_v54 = vld [vmem:[%s14438_s1 + $0x14f0] ss:$8 sps:$4 sm:$0xff]  }
 0x106   :  { %7502 = vmatprep.mubr.bf16.mxu0 %v11843_v38 }
 0x107   :  { %6817 = vmatpush1.bf16.msra.mxu1 %v9738_v39  ;;  %v9830_v39 = vld [vmem:[%s14438_s1 + $0x504] ss:$8 sps:$4 sm:$0xff]  }
 0x108   :  { %7473 = vmatpush1.bf16.msra.mxu0 %v9741_v57  ;;  %6818 = vmatprep.subr.bf16.mxu1 %v9746_v58  ;;  %v9833_v57 = vld [vmem:[%s14438_s1 + $0x1504] ss:$8 sps:$4 sm:$0xff]   ;;  %v12029_v58 = vrot.slane %v11794_v40, %v11101_v49  ;;  %v9836_v40 = vld [vmem:[%s14438_s1 + $0x514] ss:$8 sps:$4 sm:$0xff]  }
 0x109   :  { %7474 = vmatprep.subr.bf16.mxu0 %v9749_v59  ;;  %v12033_v59 = vrot.slane %v11799_v41, %v11101_v49  ;;  %v9839_v41 = vld [vmem:[%s14438_s1 + $0x1514] ss:$8 sps:$4 sm:$0xff]  }
 0x10b   :  { %6819 = vmatpush1.bf16.msra.mxu1 %v9744_v60  ;;  %v9828_v60 = vld [vmem:[%s14438_s1 + $0x500] ss:$8 sps:$4 sm:$0xff]  }
 0x10c   :  { %7475 = vmatpush1.bf16.msra.mxu0 %v9747_v61  ;;  %6820 = vmatprep.subr.bf16.mxu1 %v9752_v62  ;;  %v9831_v61 = vld [vmem:[%s14438_s1 + $0x1500] ss:$8 sps:$4 sm:$0xff]   ;;  %v1170_v62 = vcombine.high %v11840_v55, %v11840_v55  ;;  %v9842_v55 = vld [vmem:[%s14438_s1 + $0x524] ss:$8 sps:$4 sm:$0xff]  }
 0x10d   :  { %7476 = vmatprep.subr.bf16.mxu0 %v9755_v63  ;;  %v1366_v63 = vcombine.high %v11843_v38, %v11843_v38  ;;  %v9845_v38 = vld [vmem:[%s14438_s1 + $0x1524] ss:$8 sps:$4 sm:$0xff]  }
 0x10f   :  { %6821 = vmatpush1.bf16.msra.mxu1 %v9750_v0  ;;  %v9834_v0 = vld [vmem:[%s14438_s1 + $0x510] ss:$8 sps:$4 sm:$0xff]  }
 0x110   :  { %7477 = vmatpush1.bf16.msra.mxu0 %v9753_v1  ;;  %6822 = vmatprep.subr.bf16.mxu1 %v9758_v2  ;;  %v9837_v1 = vld [vmem:[%s14438_s1 + $0x1510] ss:$8 sps:$4 sm:$0xff]   ;;  %v9840_v2 = vld [vmem:[%s14438_s1 + $0x520] ss:$8 sps:$4 sm:$0xff]  }
 0x111   :  { %7478 = vmatprep.subr.bf16.mxu0 %v9761_v3  ;;  %v9843_v3 = vld [vmem:[%s14438_s1 + $0x1520] ss:$8 sps:$4 sm:$0xff]  }
 0x113   :  { %6823 = vmatpush1.bf16.msra.mxu1 %v9756_v4  ;;  %v9848_v4 = vld [vmem:[%s14438_s1 + $0x534] ss:$8 sps:$4 sm:$0xff]  }
 0x114   :  { %7479 = vmatpush1.bf16.msra.mxu0 %v9759_v5  ;;  %6824 = vmatprep.subr.bf16.mxu1 %v9764_v6  ;;  %v9851_v5 = vld [vmem:[%s14438_s1 + $0x1534] ss:$8 sps:$4 sm:$0xff]   ;;  %v9846_v6 = vld [vmem:[%s14438_s1 + $0x530] ss:$8 sps:$4 sm:$0xff]  }
 0x115   :  { %7480 = vmatprep.subr.bf16.mxu0 %v9767_v7  ;;  %v9849_v7 = vld [vmem:[%s14438_s1 + $0x1530] ss:$8 sps:$4 sm:$0xff]  }
 0x117   :  { %6825 = vmatpush1.bf16.msra.mxu1 %v9762_v8  ;;  %v9854_v8 = vld [vmem:[%s14438_s1 + $0x544] ss:$8 sps:$4 sm:$0xff]  }
 0x118   :  { %7481 = vmatpush1.bf16.msra.mxu0 %v9765_v9  ;;  %6826 = vmatprep.subr.bf16.mxu1 %v9770_v10  ;;  %v9857_v9 = vld [vmem:[%s14438_s1 + $0x1544] ss:$8 sps:$4 sm:$0xff]   ;;  %v9852_v10 = vld [vmem:[%s14438_s1 + $0x540] ss:$8 sps:$4 sm:$0xff]  }
 0x119   :  { %7482 = vmatprep.subr.bf16.mxu0 %v9773_v11  ;;  %v9855_v11 = vld [vmem:[%s14438_s1 + $0x1540] ss:$8 sps:$4 sm:$0xff]  }
 0x11b   :  { %6827 = vmatpush1.bf16.msra.mxu1 %v9768_v12  ;;  %v9860_v12 = vld [vmem:[%s14438_s1 + $0x554] ss:$8 sps:$4 sm:$0xff]  }
 0x11c   :  { %7483 = vmatpush1.bf16.msra.mxu0 %v9771_v13  ;;  %6828 = vmatprep.subr.bf16.mxu1 %v9776_v14  ;;  %v9863_v13 = vld [vmem:[%s14438_s1 + $0x1554] ss:$8 sps:$4 sm:$0xff]   ;;  %v9858_v14 = vld [vmem:[%s14438_s1 + $0x550] ss:$8 sps:$4 sm:$0xff]  }
 0x11d   :  { %7484 = vmatprep.subr.bf16.mxu0 %v9779_v15  ;;  %v9861_v15 = vld [vmem:[%s14438_s1 + $0x1550] ss:$8 sps:$4 sm:$0xff]  }
 0x11f   :  { %6829 = vmatpush1.bf16.msra.mxu1 %v9774_v18  ;;  %v9866_v18 = vld [vmem:[%s14438_s1 + $0x564] ss:$8 sps:$4 sm:$0xff]  }
 0x120   :  { %7485 = vmatpush1.bf16.msra.mxu0 %v9777_v19  ;;  %6830 = vmatprep.subr.bf16.mxu1 %v9782_v20  ;;  %v9869_v19 = vld [vmem:[%s14438_s1 + $0x1564] ss:$8 sps:$4 sm:$0xff]   ;;  %v9864_v20 = vld [vmem:[%s14438_s1 + $0x560] ss:$8 sps:$4 sm:$0xff]  }
 0x121   :  { %7486 = vmatprep.subr.bf16.mxu0 %v9785_v21  ;;  %v9867_v21 = vld [vmem:[%s14438_s1 + $0x1560] ss:$8 sps:$4 sm:$0xff]  }
 0x123   :  { %6831 = vmatpush1.bf16.msra.mxu1 %v9780_v22  ;;  %v9872_v22 = vld [vmem:[%s14438_s1 + $0x574] ss:$8 sps:$4 sm:$0xff]  }
 0x124   :  { %7487 = vmatpush1.bf16.msra.mxu0 %v9783_v52  ;;  %6832 = vmatprep.subr.bf16.mxu1 %v9788_v24  ;;  %v9875_v52 = vld [vmem:[%s14438_s1 + $0x1574] ss:$8 sps:$4 sm:$0xff]   ;;  %v9870_v24 = vld [vmem:[%s14438_s1 + $0x570] ss:$8 sps:$4 sm:$0xff]  }
 0x125   :  { %7488 = vmatprep.subr.bf16.mxu0 %v9791_v25  ;;  %v9873_v25 = vld [vmem:[%s14438_s1 + $0x1570] ss:$8 sps:$4 sm:$0xff]  }
 0x127   :  { %6833 = vmatpush1.bf16.msra.mxu1 %v9786_v26  ;;  %v9878_v26 = vld [vmem:[%s14438_s1 + $0x584] ss:$8 sps:$4 sm:$0xff]  }
 0x128   :  { %7489 = vmatpush1.bf16.msra.mxu0 %v9789_v27  ;;  %6834 = vmatprep.subr.bf16.mxu1 %v9794_v28  ;;  %v9881_v27 = vld [vmem:[%s14438_s1 + $0x1584] ss:$8 sps:$4 sm:$0xff]   ;;  %v9876_v28 = vld [vmem:[%s14438_s1 + $0x580] ss:$8 sps:$4 sm:$0xff]  }
 0x129   :  { %7490 = vmatprep.subr.bf16.mxu0 %v9797_v29  ;;  %v9879_v29 = vld [vmem:[%s14438_s1 + $0x1580] ss:$8 sps:$4 sm:$0xff]  }
 0x12b   :  { %6835 = vmatpush1.bf16.msra.mxu1 %v9792_v30  ;;  %v9884_v30 = vld [vmem:[%s14438_s1 + $0x594] ss:$8 sps:$4 sm:$0xff]  }
 0x12c   :  { %7491 = vmatpush1.bf16.msra.mxu0 %v9795_v31  ;;  %6836 = vmatprep.subr.bf16.mxu1 %v9800_v32  ;;  %v9887_v31 = vld [vmem:[%s14438_s1 + $0x1594] ss:$8 sps:$4 sm:$0xff]   ;;  %v9882_v32 = vld [vmem:[%s14438_s1 + $0x590] ss:$8 sps:$4 sm:$0xff]  }
 0x12d   :  { %7492 = vmatprep.subr.bf16.mxu0 %v9803_v33  ;;  %v9885_v33 = vld [vmem:[%s14438_s1 + $0x1590] ss:$8 sps:$4 sm:$0xff]  }
 0x12f   :  { %6837 = vmatpush1.bf16.msra.mxu1 %v9798_v34  ;;  %v9890_v34 = vld [vmem:[%s14438_s1 + $0x5a4] ss:$8 sps:$4 sm:$0xff]  }
 0x130   :  { %7493 = vmatpush1.bf16.msra.mxu0 %v9801_v16  ;;  %6838 = vmatprep.subr.bf16.mxu1 %v9806_v36  ;;  %v9893_v16 = vld [vmem:[%s14438_s1 + $0x15a4] ss:$8 sps:$4 sm:$0xff]   ;;  %v9888_v36 = vld [vmem:[%s14438_s1 + $0x5a0] ss:$8 sps:$4 sm:$0xff]  }
 0x131   :  { %7494 = vmatprep.subr.bf16.mxu0 %v9809_v37  ;;  %v9891_v37 = vld [vmem:[%s14438_s1 + $0x15a0] ss:$8 sps:$4 sm:$0xff]  }
 0x133   :  { %6839 = vmatpush1.bf16.msra.mxu1 %v9804_v56  ;;  %v9896_v56 = vld [vmem:[%s14438_s1 + $0x5b4] ss:$8 sps:$4 sm:$0xff]  }
 0x134   :  { %7495 = vmatpush1.bf16.msra.mxu0 %v9807_v23  ;;  %6840 = vmatprep.subr.bf16.mxu1 %v9812_v43  ;;  %v9899_v23 = vld [vmem:[%s14438_s1 + $0x15b4] ss:$8 sps:$4 sm:$0xff]   ;;  %v9894_v43 = vld [vmem:[%s14438_s1 + $0x5b0] ss:$8 sps:$4 sm:$0xff]  }
 0x135   :  { %7496 = vmatprep.subr.bf16.mxu0 %v9815_v44  ;;  %v9897_v44 = vld [vmem:[%s14438_s1 + $0x15b0] ss:$8 sps:$4 sm:$0xff]  }
 0x137   :  { %6841 = vmatpush1.bf16.msra.mxu1 %v9810_v45  ;;  %v9902_v45 = vld [vmem:[%s14438_s1 + $0x5c4] ss:$8 sps:$4 sm:$0xff]  }
 0x138   :  { %7497 = vmatpush1.bf16.msra.mxu0 %v9813_v46  ;;  %6842 = vmatprep.subr.bf16.mxu1 %v9818_v17  ;;  %v9905_v46 = vld [vmem:[%s14438_s1 + $0x15c4] ss:$8 sps:$4 sm:$0xff]   ;;  %v9900_v17 = vld [vmem:[%s14438_s1 + $0x5c0] ss:$8 sps:$4 sm:$0xff]  }
 0x139   :  { %7498 = vmatprep.subr.bf16.mxu0 %v9821_v35  ;;  %v9903_v35 = vld [vmem:[%s14438_s1 + $0x15c0] ss:$8 sps:$4 sm:$0xff]  }
 0x13b   :  { %6843 = vmatpush1.bf16.msra.mxu1 %v9816_v47  ;;  %v9908_v47 = vld [vmem:[%s14438_s1 + $0x5d4] ss:$8 sps:$4 sm:$0xff]  }
 0x13c   :  { %7499 = vmatpush1.bf16.msra.mxu0 %v9819_v48  ;;  %6844 = vmatprep.subr.bf16.mxu1 %v9824_v50  ;;  %v9911_v48 = vld [vmem:[%s14438_s1 + $0x15d4] ss:$8 sps:$4 sm:$0xff]   ;;  %v9906_v50 = vld [vmem:[%s14438_s1 + $0x5d0] ss:$8 sps:$4 sm:$0xff]  }
 0x13d   :  { %7500 = vmatprep.subr.bf16.mxu0 %v9827_v51  ;;  %v9909_v51 = vld [vmem:[%s14438_s1 + $0x15d0] ss:$8 sps:$4 sm:$0xff]  }
 0x13f   :  { %6845 = vmatpush1.bf16.msra.mxu1 %v9822_v53  ;;  %v9914_v53 = vld [vmem:[%s14438_s1 + $0x5e4] ss:$8 sps:$4 sm:$0xff]  }
 0x140   :  { %7501 = vmatpush1.bf16.msra.mxu0 %v9825_v54  ;;  %6855 = vmatprep.subr.bf16.mxu1 %v9830_v39  ;;  %v9917_v54 = vld [vmem:[%s14438_s1 + $0x15e4] ss:$8 sps:$4 sm:$0xff]  }
 0x141   :  { %7511 = vmatprep.subr.bf16.mxu0 %v9833_v57  ;;  %v10906_v39 = vld [vmem:[%s14437_s0 + $0x8] sm:$0xff] }
 0x142   :  { %6847 = vmatmul.mubr.bf16.vlgmr.msra.gmra.mrb[0].mxu1 %v12029_v58  ;;  %v1123_v57 = vcombine.high %v10906_v39, %v10906_v39  ;;  %v9992_v39 = vld [vmem:[%s14438_s1 + $0x6b4] ss:$8 sps:$4 sm:$0xff]  }
 0x143   :  { %7503 = vmatmul.mubr.bf16.vlgmr.msra.gmra.mrb[0].mxu0 %v12033_v59  ;;  %6856 = vmatpush1.bf16.msra.mxu1 %v9828_v60  ;;  %v10907_v60 = vld [vmem:[%s14437_s0 + $0x28] sm:$0xff] }
 0x144   :  { %7512 = vmatpush1.bf16.msra.mxu0 %v9831_v61  ;;  %6857 = vmatprep.subr.bf16.mxu1 %v9836_v40  ;;  %v1319_v61 = vcombine.high %v10907_v60, %v10907_v60  ;;  %v9912_v40 = vld [vmem:[%s14438_s1 + $0x5e0] ss:$8 sps:$4 sm:$0xff]   ;;  %v9990_v60 = vld [vmem:[%s14438_s1 + $0x6b0] ss:$8 sps:$4 sm:$0xff]  }
 0x145   :  { %7513 = vmatprep.subr.bf16.mxu0 %v9839_v41  ;;  %6887 = vmatprep.mubr.bf16.mxu1 %v1170_v62  ;;  %v9915_v41 = vld [vmem:[%s14438_s1 + $0x15e0] ss:$8 sps:$4 sm:$0xff]   ;;  %v9920_v62 = vld [vmem:[%s14438_s1 + $0x5f4] ss:$8 sps:$4 sm:$0xff]  }
 0x146   :  { %7543 = vmatprep.mubr.bf16.mxu0 %v1366_v63  ;;  %v9923_v63 = vld [vmem:[%s14438_s1 + $0x15f4] ss:$8 sps:$4 sm:$0xff]  }
 0x147   :  { %6858 = vmatpush1.bf16.msra.mxu1 %v9834_v0  ;;  %v12228_v0 = vrot.slane %v1123_v57, %v11101_v49  ;;  %v9995_v57 = vld [vmem:[%s14438_s1 + $0x16b4] ss:$8 sps:$4 sm:$0xff]  }
 0x148   :  { %7514 = vmatpush1.bf16.msra.mxu0 %v9837_v1  ;;  %6859 = vmatprep.subr.bf16.mxu1 %v9842_v55  ;;  %v12231_v1 = vrot.slane %v1319_v61, %v11101_v49  ;;  %v9918_v55 = vld [vmem:[%s14438_s1 + $0x5f0] ss:$8 sps:$4 sm:$0xff]  }
 0x149   :  { %7515 = vmatprep.subr.bf16.mxu0 %v9845_v38  ;;  %v9921_v38 = vld [vmem:[%s14438_s1 + $0x15f0] ss:$8 sps:$4 sm:$0xff]  }
 0x14a   :  { %v9993_v61 = vld [vmem:[%s14438_s1 + $0x16b0] ss:$8 sps:$4 sm:$0xff]  }
 0x14b   :  { %6860 = vmatpush1.bf16.msra.mxu1 %v9840_v2  ;;  %v9926_v2 = vld [vmem:[%s14438_s1 + $0x604] ss:$8 sps:$4 sm:$0xff]  }
 0x14c   :  { %7516 = vmatpush1.bf16.msra.mxu0 %v9843_v3  ;;  %6861 = vmatprep.subr.bf16.mxu1 %v9848_v4  ;;  %v9929_v3 = vld [vmem:[%s14438_s1 + $0x1604] ss:$8 sps:$4 sm:$0xff]   ;;  %v1139_v4 = vcombine.high %v12228_v0, %v12228_v0 }
 0x14d   :  { %7517 = vmatprep.subr.bf16.mxu0 %v9851_v5  ;;  %v1335_v5 = vcombine.high %v12231_v1, %v12231_v1 }
 0x14f   :  { %6862 = vmatpush1.bf16.msra.mxu1 %v9846_v6  ;;  %v1168_v6 = vcombine.high %v12029_v58, %v12029_v58  ;;  %v9935_v58 = vld [vmem:[%s14438_s1 + $0x1614] ss:$8 sps:$4 sm:$0xff]  }
 0x150   :  { %7518 = vmatpush1.bf16.msra.mxu0 %v9849_v7  ;;  %6863 = vmatprep.subr.bf16.mxu1 %v9854_v8  ;;  %v1364_v7 = vcombine.high %v12033_v59, %v12033_v59  ;;  %v9924_v8 = vld [vmem:[%s14438_s1 + $0x600] ss:$8 sps:$4 sm:$0xff]   ;;  %v12266_v59 = vrot.slane %v1139_v4, %v11101_v49  ;;  %v10010_v4 = vld [vmem:[%s14438_s1 + $0x6e4] ss:$8 sps:$4 sm:$0xff]  }
 0x151   :  { %7519 = vmatprep.subr.bf16.mxu0 %v9857_v9  ;;  %v9927_v9 = vld [vmem:[%s14438_s1 + $0x1600] ss:$8 sps:$4 sm:$0xff]  }
 0x153   :  { %6864 = vmatpush1.bf16.msra.mxu1 %v9852_v10  ;;  %v9932_v10 = vld [vmem:[%s14438_s1 + $0x614] ss:$8 sps:$4 sm:$0xff]  }
 0x154   :  { %7520 = vmatpush1.bf16.msra.mxu0 %v9855_v11  ;;  %6865 = vmatprep.subr.bf16.mxu1 %v9860_v12  ;;  %v12269_v11 = vrot.slane %v1335_v5, %v11101_v49  ;;  %v9930_v12 = vld [vmem:[%s14438_s1 + $0x610] ss:$8 sps:$4 sm:$0xff]   ;;  %v10013_v5 = vld [vmem:[%s14438_s1 + $0x16e4] ss:$8 sps:$4 sm:$0xff]  }
 0x155   :  { %7521 = vmatprep.subr.bf16.mxu0 %v9863_v13  ;;  %v9933_v13 = vld [vmem:[%s14438_s1 + $0x1610] ss:$8 sps:$4 sm:$0xff]  }
 0x157   :  { %6866 = vmatpush1.bf16.msra.mxu1 %v9858_v14  ;;  %v9938_v14 = vld [vmem:[%s14438_s1 + $0x624] ss:$8 sps:$4 sm:$0xff]  }
 0x158   :  { %7522 = vmatpush1.bf16.msra.mxu0 %v9861_v15  ;;  %6867 = vmatprep.subr.bf16.mxu1 %v9866_v18  ;;  %v9941_v15 = vld [vmem:[%s14438_s1 + $0x1624] ss:$8 sps:$4 sm:$0xff]   ;;  %v9936_v18 = vld [vmem:[%s14438_s1 + $0x620] ss:$8 sps:$4 sm:$0xff]  }
 0x159   :  { %7523 = vmatprep.subr.bf16.mxu0 %v9869_v19  ;;  %v9939_v19 = vld [vmem:[%s14438_s1 + $0x1620] ss:$8 sps:$4 sm:$0xff]  }
 0x15b   :  { %6868 = vmatpush1.bf16.msra.mxu1 %v9864_v20  ;;  %v9944_v20 = vld [vmem:[%s14438_s1 + $0x634] ss:$8 sps:$4 sm:$0xff]  }
 0x15c   :  { %7524 = vmatpush1.bf16.msra.mxu0 %v9867_v21  ;;  %6869 = vmatprep.subr.bf16.mxu1 %v9872_v22  ;;  %v9947_v21 = vld [vmem:[%s14438_s1 + $0x1634] ss:$8 sps:$4 sm:$0xff]   ;;  %v9942_v22 = vld [vmem:[%s14438_s1 + $0x630] ss:$8 sps:$4 sm:$0xff]  }
 0x15d   :  { %7525 = vmatprep.subr.bf16.mxu0 %v9875_v52  ;;  %v9945_v52 = vld [vmem:[%s14438_s1 + $0x1630] ss:$8 sps:$4 sm:$0xff]  }
 0x15f   :  { %6870 = vmatpush1.bf16.msra.mxu1 %v9870_v24  ;;  %v9950_v24 = vld [vmem:[%s14438_s1 + $0x644] ss:$8 sps:$4 sm:$0xff]  }
 0x160   :  { %7526 = vmatpush1.bf16.msra.mxu0 %v9873_v25  ;;  %6871 = vmatprep.subr.bf16.mxu1 %v9878_v26  ;;  %v9953_v25 = vld [vmem:[%s14438_s1 + $0x1644] ss:$8 sps:$4 sm:$0xff]   ;;  %v9948_v26 = vld [vmem:[%s14438_s1 + $0x640] ss:$8 sps:$4 sm:$0xff]  }
 0x161   :  { %7527 = vmatprep.subr.bf16.mxu0 %v9881_v27  ;;  %v9951_v27 = vld [vmem:[%s14438_s1 + $0x1640] ss:$8 sps:$4 sm:$0xff]  }
 0x163   :  { %6872 = vmatpush1.bf16.msra.mxu1 %v9876_v28  ;;  %v9956_v28 = vld [vmem:[%s14438_s1 + $0x654] ss:$8 sps:$4 sm:$0xff]  }
 0x164   :  { %7528 = vmatpush1.bf16.msra.mxu0 %v9879_v29  ;;  %6873 = vmatprep.subr.bf16.mxu1 %v9884_v30  ;;  %v9959_v29 = vld [vmem:[%s14438_s1 + $0x1654] ss:$8 sps:$4 sm:$0xff]   ;;  %v9954_v30 = vld [vmem:[%s14438_s1 + $0x650] ss:$8 sps:$4 sm:$0xff]  }
 0x165   :  { %7529 = vmatprep.subr.bf16.mxu0 %v9887_v31  ;;  %v9957_v31 = vld [vmem:[%s14438_s1 + $0x1650] ss:$8 sps:$4 sm:$0xff]  }
 0x167   :  { %6874 = vmatpush1.bf16.msra.mxu1 %v9882_v32  ;;  %v9962_v32 = vld [vmem:[%s14438_s1 + $0x664] ss:$8 sps:$4 sm:$0xff]  }
 0x168   :  { %7530 = vmatpush1.bf16.msra.mxu0 %v9885_v33  ;;  %6875 = vmatprep.subr.bf16.mxu1 %v9890_v34  ;;  %v9965_v33 = vld [vmem:[%s14438_s1 + $0x1664] ss:$8 sps:$4 sm:$0xff]   ;;  %v9960_v34 = vld [vmem:[%s14438_s1 + $0x660] ss:$8 sps:$4 sm:$0xff]  }
 0x169   :  { %7531 = vmatprep.subr.bf16.mxu0 %v9893_v16  ;;  %v9963_v16 = vld [vmem:[%s14438_s1 + $0x1660] ss:$8 sps:$4 sm:$0xff]  }
 0x16b   :  { %6876 = vmatpush1.bf16.msra.mxu1 %v9888_v36  ;;  %v9968_v36 = vld [vmem:[%s14438_s1 + $0x674] ss:$8 sps:$4 sm:$0xff]  }
 0x16c   :  { %7532 = vmatpush1.bf16.msra.mxu0 %v9891_v37  ;;  %6877 = vmatprep.subr.bf16.mxu1 %v9896_v56  ;;  %v9971_v37 = vld [vmem:[%s14438_s1 + $0x1674] ss:$8 sps:$4 sm:$0xff]   ;;  %v9966_v56 = vld [vmem:[%s14438_s1 + $0x670] ss:$8 sps:$4 sm:$0xff]  }
 0x16d   :  { %7533 = vmatprep.subr.bf16.mxu0 %v9899_v23  ;;  %v9969_v23 = vld [vmem:[%s14438_s1 + $0x1670] ss:$8 sps:$4 sm:$0xff]  }
 0x16f   :  { %6878 = vmatpush1.bf16.msra.mxu1 %v9894_v43  ;;  %v9974_v43 = vld [vmem:[%s14438_s1 + $0x684] ss:$8 sps:$4 sm:$0xff]  }
 0x170   :  { %7534 = vmatpush1.bf16.msra.mxu0 %v9897_v44  ;;  %6879 = vmatprep.subr.bf16.mxu1 %v9902_v45  ;;  %v9977_v44 = vld [vmem:[%s14438_s1 + $0x1684] ss:$8 sps:$4 sm:$0xff]   ;;  %v9972_v45 = vld [vmem:[%s14438_s1 + $0x680] ss:$8 sps:$4 sm:$0xff]  }
 0x171   :  { %7535 = vmatprep.subr.bf16.mxu0 %v9905_v46  ;;  %v9975_v46 = vld [vmem:[%s14438_s1 + $0x1680] ss:$8 sps:$4 sm:$0xff]  }
 0x173   :  { %6880 = vmatpush1.bf16.msra.mxu1 %v9900_v17  ;;  %v9980_v17 = vld [vmem:[%s14438_s1 + $0x694] ss:$8 sps:$4 sm:$0xff]  }
 0x174   :  { %7536 = vmatpush1.bf16.msra.mxu0 %v9903_v35  ;;  %6881 = vmatprep.subr.bf16.mxu1 %v9908_v47  ;;  %v9983_v35 = vld [vmem:[%s14438_s1 + $0x1694] ss:$8 sps:$4 sm:$0xff]   ;;  %v9978_v47 = vld [vmem:[%s14438_s1 + $0x690] ss:$8 sps:$4 sm:$0xff]  }
 0x175   :  { %7537 = vmatprep.subr.bf16.mxu0 %v9911_v48  ;;  %v9981_v48 = vld [vmem:[%s14438_s1 + $0x1690] ss:$8 sps:$4 sm:$0xff]  }
 0x177   :  { %6882 = vmatpush1.bf16.msra.mxu1 %v9906_v50  ;;  %v9986_v50 = vld [vmem:[%s14438_s1 + $0x6a4] ss:$8 sps:$4 sm:$0xff]  }
 0x178   :  { %7538 = vmatpush1.bf16.msra.mxu0 %v9909_v51  ;;  %6883 = vmatprep.subr.bf16.mxu1 %v9914_v53  ;;  %v9989_v51 = vld [vmem:[%s14438_s1 + $0x16a4] ss:$8 sps:$4 sm:$0xff]   ;;  %v9984_v53 = vld [vmem:[%s14438_s1 + $0x6a0] ss:$8 sps:$4 sm:$0xff]  }
 0x179   :  { %7539 = vmatprep.subr.bf16.mxu0 %v9917_v54  ;;  %v9987_v54 = vld [vmem:[%s14438_s1 + $0x16a0] ss:$8 sps:$4 sm:$0xff]  }
 0x17b   :  { %6884 = vmatpush1.bf16.msra.mxu1 %v9912_v40  ;;  %v9998_v40 = vld [vmem:[%s14438_s1 + $0x6c4] ss:$8 sps:$4 sm:$0xff]  }
 0x17c   :  { %7540 = vmatpush1.bf16.msra.mxu0 %v9915_v41  ;;  %6885 = vmatprep.subr.bf16.mxu1 %v9920_v62  ;;  %v10001_v41 = vld [vmem:[%s14438_s1 + $0x16c4] ss:$8 sps:$4 sm:$0xff]   ;;  %v9996_v62 = vld [vmem:[%s14438_s1 + $0x6c0] ss:$8 sps:$4 sm:$0xff]  }
 0x17d   :  { %7541 = vmatprep.subr.bf16.mxu0 %v9923_v63  ;;  %v9999_v63 = vld [vmem:[%s14438_s1 + $0x16c0] ss:$8 sps:$4 sm:$0xff]  }
 0x17f   :  { %6886 = vmatpush1.bf16.msra.mxu1 %v9918_v55  ;;  %v10004_v55 = vld [vmem:[%s14438_s1 + $0x6d4] ss:$8 sps:$4 sm:$0xff]  }
 0x180   :  { %7542 = vmatpush1.bf16.msra.mxu0 %v9921_v38  ;;  %6896 = vmatprep.subr.bf16.mxu1 %v9926_v2  ;;  %v10007_v38 = vld [vmem:[%s14438_s1 + $0x16d4] ss:$8 sps:$4 sm:$0xff]   ;;  %v10002_v2 = vld [vmem:[%s14438_s1 + $0x6d0] ss:$8 sps:$4 sm:$0xff]  }
 0x181   :  { %7552 = vmatprep.subr.bf16.mxu0 %v9929_v3  ;;  %v10005_v3 = vld [vmem:[%s14438_s1 + $0x16d0] ss:$8 sps:$4 sm:$0xff]  }
 0x182   :  { %6888 = vmatmul.mubr.bf16.vlgmr.msra.gmra.mrb[0].mxu1 %v1168_v6  ;;  %v10008_v6 = vld [vmem:[%s14438_s1 + $0x6e0] ss:$8 sps:$4 sm:$0xff]  }
 0x183   :  { %7544 = vmatmul.mubr.bf16.vlgmr.msra.gmra.mrb[0].mxu0 %v1364_v7  ;;  %6897 = vmatpush1.bf16.msra.mxu1 %v9924_v8  ;;  %v10011_v7 = vld [vmem:[%s14438_s1 + $0x16e0] ss:$8 sps:$4 sm:$0xff]   ;;  %v10016_v8 = vld [vmem:[%s14438_s1 + $0x6f4] ss:$8 sps:$4 sm:$0xff]  }
 0x184   :  { %7553 = vmatpush1.bf16.msra.mxu0 %v9927_v9  ;;  %6898 = vmatprep.subr.bf16.mxu1 %v9932_v10  ;;  %v10019_v9 = vld [vmem:[%s14438_s1 + $0x16f4] ss:$8 sps:$4 sm:$0xff]   ;;  %v10014_v10 = vld [vmem:[%s14438_s1 + $0x6f0] ss:$8 sps:$4 sm:$0xff]  }
 0x185   :  { %7554 = vmatprep.subr.bf16.mxu0 %v9935_v58  ;;  %6928 = vmatprep.mubr.bf16.mxu1 %v12266_v59  ;;  %v10017_v58 = vld [vmem:[%s14438_s1 + $0x16f0] ss:$8 sps:$4 sm:$0xff]  }
 0x186   :  { %7584 = vmatprep.mubr.bf16.mxu0 %v12269_v11 }
 0x187   :  { %6899 = vmatpush1.bf16.msra.mxu1 %v9930_v12  ;;  %v10023_v12 = vld [vmem:[%s14438_s1 + $0x704] ss:$8 sps:$4 sm:$0xff]  }
 0x188   :  { %7555 = vmatpush1.bf16.msra.mxu0 %v9933_v13  ;;  %6900 = vmatprep.subr.bf16.mxu1 %v9938_v14  ;;  %v10027_v13 = vld [vmem:[%s14438_s1 + $0x1704] ss:$8 sps:$4 sm:$0xff]   ;;  %v12455_v14 = vrot.slane %v12228_v0, %v11101_v49  ;;  %v10030_v0 = vld [vmem:[%s14438_s1 + $0x714] ss:$8 sps:$4 sm:$0xff]  }
 0x189   :  { %7556 = vmatprep.subr.bf16.mxu0 %v9941_v15  ;;  %v12459_v15 = vrot.slane %v12231_v1, %v11101_v49  ;;  %v10033_v1 = vld [vmem:[%s14438_s1 + $0x1714] ss:$8 sps:$4 sm:$0xff]  }
 0x18b   :  { %6901 = vmatpush1.bf16.msra.mxu1 %v9936_v18  ;;  %v10021_v18 = vld [vmem:[%s14438_s1 + $0x700] ss:$8 sps:$4 sm:$0xff]  }
 0x18c   :  { %7557 = vmatpush1.bf16.msra.mxu0 %v9939_v19  ;;  %6902 = vmatprep.subr.bf16.mxu1 %v9944_v20  ;;  %v10025_v19 = vld [vmem:[%s14438_s1 + $0x1700] ss:$8 sps:$4 sm:$0xff]   ;;  %v1171_v20 = vcombine.high %v12266_v59, %v12266_v59  ;;  %v10036_v59 = vld [vmem:[%s14438_s1 + $0x724] ss:$8 sps:$4 sm:$0xff]  }
 0x18d   :  { %7558 = vmatprep.subr.bf16.mxu0 %v9947_v21  ;;  %v1367_v21 = vcombine.high %v12269_v11, %v12269_v11  ;;  %v10039_v11 = vld [vmem:[%s14438_s1 + $0x1724] ss:$8 sps:$4 sm:$0xff]  }
 0x18f   :  { %6903 = vmatpush1.bf16.msra.mxu1 %v9942_v22  ;;  %v10028_v22 = vld [vmem:[%s14438_s1 + $0x710] ss:$8 sps:$4 sm:$0xff]  }
 0x190   :  { %7559 = vmatpush1.bf16.msra.mxu0 %v9945_v52  ;;  %6904 = vmatprep.subr.bf16.mxu1 %v9950_v24  ;;  %v10031_v52 = vld [vmem:[%s14438_s1 + $0x1710] ss:$8 sps:$4 sm:$0xff]   ;;  %v10034_v24 = vld [vmem:[%s14438_s1 + $0x720] ss:$8 sps:$4 sm:$0xff]  }
 0x191   :  { %7560 = vmatprep.subr.bf16.mxu0 %v9953_v25  ;;  %v10037_v25 = vld [vmem:[%s14438_s1 + $0x1720] ss:$8 sps:$4 sm:$0xff]  }
 0x193   :  { %6905 = vmatpush1.bf16.msra.mxu1 %v9948_v26  ;;  %v10042_v26 = vld [vmem:[%s14438_s1 + $0x734] ss:$8 sps:$4 sm:$0xff]  }
 0x194   :  { %7561 = vmatpush1.bf16.msra.mxu0 %v9951_v27  ;;  %6906 = vmatprep.subr.bf16.mxu1 %v9956_v28  ;;  %v10045_v27 = vld [vmem:[%s14438_s1 + $0x1734] ss:$8 sps:$4 sm:$0xff]   ;;  %v10040_v28 = vld [vmem:[%s14438_s1 + $0x730] ss:$8 sps:$4 sm:$0xff]  }
 0x195   :  { %7562 = vmatprep.subr.bf16.mxu0 %v9959_v29  ;;  %v10043_v29 = vld [vmem:[%s14438_s1 + $0x1730] ss:$8 sps:$4 sm:$0xff]  }
 0x197   :  { %6907 = vmatpush1.bf16.msra.mxu1 %v9954_v30  ;;  %v10048_v30 = vld [vmem:[%s14438_s1 + $0x744] ss:$8 sps:$4 sm:$0xff]  }
 0x198   :  { %7563 = vmatpush1.bf16.msra.mxu0 %v9957_v31  ;;  %6908 = vmatprep.subr.bf16.mxu1 %v9962_v32  ;;  %v10051_v31 = vld [vmem:[%s14438_s1 + $0x1744] ss:$8 sps:$4 sm:$0xff]   ;;  %v10046_v32 = vld [vmem:[%s14438_s1 + $0x740] ss:$8 sps:$4 sm:$0xff]  }
 0x199   :  { %7564 = vmatprep.subr.bf16.mxu0 %v9965_v33  ;;  %v10049_v33 = vld [vmem:[%s14438_s1 + $0x1740] ss:$8 sps:$4 sm:$0xff]  }
 0x19b   :  { %6909 = vmatpush1.bf16.msra.mxu1 %v9960_v34  ;;  %v10054_v34 = vld [vmem:[%s14438_s1 + $0x754] ss:$8 sps:$4 sm:$0xff]  }
 0x19c   :  { %7565 = vmatpush1.bf16.msra.mxu0 %v9963_v16  ;;  %6910 = vmatprep.subr.bf16.mxu1 %v9968_v36  ;;  %v10057_v16 = vld [vmem:[%s14438_s1 + $0x1754] ss:$8 sps:$4 sm:$0xff]   ;;  %v10052_v36 = vld [vmem:[%s14438_s1 + $0x750] ss:$8 sps:$4 sm:$0xff]  }
 0x19d   :  { %7566 = vmatprep.subr.bf16.mxu0 %v9971_v37  ;;  %v10055_v37 = vld [vmem:[%s14438_s1 + $0x1750] ss:$8 sps:$4 sm:$0xff]  }
 0x19f   :  { %6911 = vmatpush1.bf16.msra.mxu1 %v9966_v56  ;;  %v10060_v56 = vld [vmem:[%s14438_s1 + $0x764] ss:$8 sps:$4 sm:$0xff]  }
 0x1a0   :  { %7567 = vmatpush1.bf16.msra.mxu0 %v9969_v23  ;;  %6912 = vmatprep.subr.bf16.mxu1 %v9974_v43  ;;  %v10063_v23 = vld [vmem:[%s14438_s1 + $0x1764] ss:$8 sps:$4 sm:$0xff]   ;;  %v10058_v43 = vld [vmem:[%s14438_s1 + $0x760] ss:$8 sps:$4 sm:$0xff]  }
 0x1a1   :  { %7568 = vmatprep.subr.bf16.mxu0 %v9977_v44  ;;  %v10061_v44 = vld [vmem:[%s14438_s1 + $0x1760] ss:$8 sps:$4 sm:$0xff]  }
 0x1a3   :  { %6913 = vmatpush1.bf16.msra.mxu1 %v9972_v45  ;;  %v10066_v45 = vld [vmem:[%s14438_s1 + $0x774] ss:$8 sps:$4 sm:$0xff]  }
 0x1a4   :  { %7569 = vmatpush1.bf16.msra.mxu0 %v9975_v46  ;;  %6914 = vmatprep.subr.bf16.mxu1 %v9980_v17  ;;  %v10069_v46 = vld [vmem:[%s14438_s1 + $0x1774] ss:$8 sps:$4 sm:$0xff]   ;;  %v10064_v17 = vld [vmem:[%s14438_s1 + $0x770] ss:$8 sps:$4 sm:$0xff]  }
 0x1a5   :  { %7570 = vmatprep.subr.bf16.mxu0 %v9983_v35  ;;  %v10067_v35 = vld [vmem:[%s14438_s1 + $0x1770] ss:$8 sps:$4 sm:$0xff]  }
 0x1a7   :  { %6915 = vmatpush1.bf16.msra.mxu1 %v9978_v47  ;;  %v10072_v47 = vld [vmem:[%s14438_s1 + $0x784] ss:$8 sps:$4 sm:$0xff]  }
 0x1a8   :  { %7571 = vmatpush1.bf16.msra.mxu0 %v9981_v48  ;;  %6916 = vmatprep.subr.bf16.mxu1 %v9986_v50  ;;  %v10075_v48 = vld [vmem:[%s14438_s1 + $0x1784] ss:$8 sps:$4 sm:$0xff]   ;;  %v10070_v50 = vld [vmem:[%s14438_s1 + $0x780] ss:$8 sps:$4 sm:$0xff]  }
 0x1a9   :  { %7572 = vmatprep.subr.bf16.mxu0 %v9989_v51  ;;  %v10073_v51 = vld [vmem:[%s14438_s1 + $0x1780] ss:$8 sps:$4 sm:$0xff]  }
 0x1ab   :  { %6917 = vmatpush1.bf16.msra.mxu1 %v9984_v53  ;;  %v10078_v53 = vld [vmem:[%s14438_s1 + $0x794] ss:$8 sps:$4 sm:$0xff]  }
 0x1ac   :  { %7573 = vmatpush1.bf16.msra.mxu0 %v9987_v54  ;;  %6918 = vmatprep.subr.bf16.mxu1 %v9992_v39  ;;  %v10081_v54 = vld [vmem:[%s14438_s1 + $0x1794] ss:$8 sps:$4 sm:$0xff]   ;;  %v10076_v39 = vld [vmem:[%s14438_s1 + $0x790] ss:$8 sps:$4 sm:$0xff]  }
 0x1ad   :  { %7574 = vmatprep.subr.bf16.mxu0 %v9995_v57  ;;  %v10079_v57 = vld [vmem:[%s14438_s1 + $0x1790] ss:$8 sps:$4 sm:$0xff]  }
 0x1af   :  { %6919 = vmatpush1.bf16.msra.mxu1 %v9990_v60  ;;  %v10084_v60 = vld [vmem:[%s14438_s1 + $0x7a4] ss:$8 sps:$4 sm:$0xff]  }
 0x1b0   :  { %7575 = vmatpush1.bf16.msra.mxu0 %v9993_v61  ;;  %6920 = vmatprep.subr.bf16.mxu1 %v9998_v40  ;;  %v10087_v61 = vld [vmem:[%s14438_s1 + $0x17a4] ss:$8 sps:$4 sm:$0xff]   ;;  %v10082_v40 = vld [vmem:[%s14438_s1 + $0x7a0] ss:$8 sps:$4 sm:$0xff]  }
 0x1b1   :  { %7576 = vmatprep.subr.bf16.mxu0 %v10001_v41  ;;  %v10085_v41 = vld [vmem:[%s14438_s1 + $0x17a0] ss:$8 sps:$4 sm:$0xff]  }
 0x1b3   :  { %6921 = vmatpush1.bf16.msra.mxu1 %v9996_v62  ;;  %v10090_v62 = vld [vmem:[%s14438_s1 + $0x7b4] ss:$8 sps:$4 sm:$0xff]  }
 0x1b4   :  { %7577 = vmatpush1.bf16.msra.mxu0 %v9999_v63  ;;  %6922 = vmatprep.subr.bf16.mxu1 %v10004_v55  ;;  %v10093_v63 = vld [vmem:[%s14438_s1 + $0x17b4] ss:$8 sps:$4 sm:$0xff]   ;;  %v10088_v55 = vld [vmem:[%s14438_s1 + $0x7b0] ss:$8 sps:$4 sm:$0xff]  }
 0x1b5   :  { %7578 = vmatprep.subr.bf16.mxu0 %v10007_v38  ;;  %v10091_v38 = vld [vmem:[%s14438_s1 + $0x17b0] ss:$8 sps:$4 sm:$0xff]  }
 0x1b7   :  { %6923 = vmatpush1.bf16.msra.mxu1 %v10002_v2  ;;  %v10096_v2 = vld [vmem:[%s14438_s1 + $0x7c4] ss:$8 sps:$4 sm:$0xff]  }
 0x1b8   :  { %7579 = vmatpush1.bf16.msra.mxu0 %v10005_v3  ;;  %6924 = vmatprep.subr.bf16.mxu1 %v10010_v4  ;;  %v10099_v3 = vld [vmem:[%s14438_s1 + $0x17c4] ss:$8 sps:$4 sm:$0xff]   ;;  %v10094_v4 = vld [vmem:[%s14438_s1 + $0x7c0] ss:$8 sps:$4 sm:$0xff]  }
 0x1b9   :  { %7580 = vmatprep.subr.bf16.mxu0 %v10013_v5  ;;  %v10097_v5 = vld [vmem:[%s14438_s1 + $0x17c0] ss:$8 sps:$4 sm:$0xff]  }
 0x1bb   :  { %6925 = vmatpush1.bf16.msra.mxu1 %v10008_v6  ;;  %v10102_v6 = vld [vmem:[%s14438_s1 + $0x7d4] ss:$8 sps:$4 sm:$0xff]  }
 0x1bc   :  { %7581 = vmatpush1.bf16.msra.mxu0 %v10011_v7  ;;  %6926 = vmatprep.subr.bf16.mxu1 %v10016_v8  ;;  %v10105_v7 = vld [vmem:[%s14438_s1 + $0x17d4] ss:$8 sps:$4 sm:$0xff]   ;;  %v10100_v8 = vld [vmem:[%s14438_s1 + $0x7d0] ss:$8 sps:$4 sm:$0xff]  }
 0x1bd   :  { %7582 = vmatprep.subr.bf16.mxu0 %v10019_v9  ;;  %v10103_v9 = vld [vmem:[%s14438_s1 + $0x17d0] ss:$8 sps:$4 sm:$0xff]  }
 0x1bf   :  { %6927 = vmatpush1.bf16.msra.mxu1 %v10014_v10  ;;  %v10108_v10 = vld [vmem:[%s14438_s1 + $0x7e4] ss:$8 sps:$4 sm:$0xff]  }
 0x1c0   :  { %7583 = vmatpush1.bf16.msra.mxu0 %v10017_v58  ;;  %6937 = vmatprep.subr.bf16.mxu1 %v10023_v12  ;;  %v10111_v58 = vld [vmem:[%s14438_s1 + $0x17e4] ss:$8 sps:$4 sm:$0xff]   ;;  %v12638_v12 = vld [vmem:[%s14437_s0 + $0x10] sm:$0xff] }
 0x1c1   :  { %7593 = vmatprep.subr.bf16.mxu0 %v10027_v13  ;;  %v12643_v13 = vld [vmem:[%s14437_s0 + $0x30] sm:$0xff] }
 0x1c2   :  { %6929 = vmatmul.mubr.bf16.vlgmr.msra.gmra.mrb[0].mxu1 %v12455_v14 }
 0x1c3   :  { %7585 = vmatmul.mubr.bf16.vlgmr.msra.gmra.mrb[0].mxu0 %v12459_v15  ;;  %6938 = vmatpush1.bf16.msra.mxu1 %v10021_v18  ;;  %v10106_v18 = vld [vmem:[%s14438_s1 + $0x7e0] ss:$8 sps:$4 sm:$0xff]  }
 0x1c4   :  { %7594 = vmatpush1.bf16.msra.mxu0 %v10025_v19  ;;  %6939 = vmatprep.subr.bf16.mxu1 %v10030_v0  ;;  %v10109_v19 = vld [vmem:[%s14438_s1 + $0x17e0] ss:$8 sps:$4 sm:$0xff]   ;;  %v10114_v0 = vld [vmem:[%s14438_s1 + $0x7f4] ss:$8 sps:$4 sm:$0xff]  }
 0x1c5   :  { %7595 = vmatprep.subr.bf16.mxu0 %v10033_v1  ;;  %6969 = vmatprep.mubr.bf16.mxu1 %v1171_v20  ;;  %v10117_v1 = vld [vmem:[%s14438_s1 + $0x17f4] ss:$8 sps:$4 sm:$0xff]   ;;  %v12659_v20 = vrot.slane %v12638_v12, %v11101_v49 }
 0x1c6   :  { %7625 = vmatprep.mubr.bf16.mxu0 %v1367_v21  ;;  %v12663_v21 = vrot.slane %v12643_v13, %v11101_v49 }
 0x1c7   :  { %6940 = vmatpush1.bf16.msra.mxu1 %v10028_v22  ;;  %v10112_v22 = vld [vmem:[%s14438_s1 + $0x7f0] ss:$8 sps:$4 sm:$0xff]  }
 0x1c8   :  { %7596 = vmatpush1.bf16.msra.mxu0 %v10031_v52  ;;  %6941 = vmatprep.subr.bf16.mxu1 %v10036_v59  ;;  %v10115_v52 = vld [vmem:[%s14438_s1 + $0x17f0] ss:$8 sps:$4 sm:$0xff]   ;;  %v10120_v59 = vld [vmem:[%s14438_s1 + $0x804] ss:$8 sps:$4 sm:$0xff]  }
 0x1c9   :  { %7597 = vmatprep.subr.bf16.mxu0 %v10039_v11  ;;  %v10123_v11 = vld [vmem:[%s14438_s1 + $0x1804] ss:$8 sps:$4 sm:$0xff]  }
 0x1cb   :  { %6942 = vmatpush1.bf16.msra.mxu1 %v10034_v24  ;;  %v1187_v24 = vcombine.high %v12659_v20, %v12659_v20 }
 0x1cc   :  { %7598 = vmatpush1.bf16.msra.mxu0 %v10037_v25  ;;  %6943 = vmatprep.subr.bf16.mxu1 %v10042_v26  ;;  %v1383_v25 = vcombine.high %v12663_v21, %v12663_v21  ;;  %v1169_v26 = vcombine.high %v12455_v14, %v12455_v14  ;;  %v10129_v14 = vld [vmem:[%s14438_s1 + $0x1814] ss:$8 sps:$4 sm:$0xff]  }
 0x1cd   :  { %7599 = vmatprep.subr.bf16.mxu0 %v10045_v27  ;;  %v1365_v27 = vcombine.high %v12459_v15, %v12459_v15  ;;  %v12698_v15 = vrot.slane %v1187_v24, %v11101_v49  ;;  %v10196_v24 = vld [vmem:[%s14438_s1 + $0x8d0] ss:$8 sps:$4 sm:$0xff]  }
 0x1cf   :  { %6944 = vmatpush1.bf16.msra.mxu1 %v10040_v28  ;;  %v10118_v28 = vld [vmem:[%s14438_s1 + $0x800] ss:$8 sps:$4 sm:$0xff]  }
 0x1d0   :  { %7600 = vmatpush1.bf16.msra.mxu0 %v10043_v29  ;;  %6945 = vmatprep.subr.bf16.mxu1 %v10048_v30  ;;  %v10121_v29 = vld [vmem:[%s14438_s1 + $0x1800] ss:$8 sps:$4 sm:$0xff]   ;;  %v10126_v30 = vld [vmem:[%s14438_s1 + $0x814] ss:$8 sps:$4 sm:$0xff]  }
 0x1d1   :  { %7601 = vmatprep.subr.bf16.mxu0 %v10051_v31  ;;  %v12701_v31 = vrot.slane %v1383_v25, %v11101_v49  ;;  %v10199_v25 = vld [vmem:[%s14438_s1 + $0x18d0] ss:$8 sps:$4 sm:$0xff]  }
 0x1d3   :  { %6946 = vmatpush1.bf16.msra.mxu1 %v10046_v32  ;;  %v10124_v32 = vld [vmem:[%s14438_s1 + $0x810] ss:$8 sps:$4 sm:$0xff]  }
 0x1d4   :  { %7602 = vmatpush1.bf16.msra.mxu0 %v10049_v33  ;;  %6947 = vmatprep.subr.bf16.mxu1 %v10054_v34  ;;  %v10127_v33 = vld [vmem:[%s14438_s1 + $0x1810] ss:$8 sps:$4 sm:$0xff]   ;;  %v10132_v34 = vld [vmem:[%s14438_s1 + $0x824] ss:$8 sps:$4 sm:$0xff]  }
 0x1d5   :  { %7603 = vmatprep.subr.bf16.mxu0 %v10057_v16  ;;  %v10135_v16 = vld [vmem:[%s14438_s1 + $0x1824] ss:$8 sps:$4 sm:$0xff]  }
 0x1d7   :  { %6948 = vmatpush1.bf16.msra.mxu1 %v10052_v36  ;;  %v10130_v36 = vld [vmem:[%s14438_s1 + $0x820] ss:$8 sps:$4 sm:$0xff]  }
 0x1d8   :  { %7604 = vmatpush1.bf16.msra.mxu0 %v10055_v37  ;;  %6949 = vmatprep.subr.bf16.mxu1 %v10060_v56  ;;  %v10133_v37 = vld [vmem:[%s14438_s1 + $0x1820] ss:$8 sps:$4 sm:$0xff]   ;;  %v10138_v56 = vld [vmem:[%s14438_s1 + $0x834] ss:$8 sps:$4 sm:$0xff]  }
 0x1d9   :  { %7605 = vmatprep.subr.bf16.mxu0 %v10063_v23  ;;  %v10141_v23 = vld [vmem:[%s14438_s1 + $0x1834] ss:$8 sps:$4 sm:$0xff]  }
 0x1db   :  { %6950 = vmatpush1.bf16.msra.mxu1 %v10058_v43  ;;  %v10136_v43 = vld [vmem:[%s14438_s1 + $0x830] ss:$8 sps:$4 sm:$0xff]  }
 0x1dc   :  { %7606 = vmatpush1.bf16.msra.mxu0 %v10061_v44  ;;  %6951 = vmatprep.subr.bf16.mxu1 %v10066_v45  ;;  %v10139_v44 = vld [vmem:[%s14438_s1 + $0x1830] ss:$8 sps:$4 sm:$0xff]   ;;  %v10144_v45 = vld [vmem:[%s14438_s1 + $0x844] ss:$8 sps:$4 sm:$0xff]  }
 0x1dd   :  { %7607 = vmatprep.subr.bf16.mxu0 %v10069_v46  ;;  %v10147_v46 = vld [vmem:[%s14438_s1 + $0x1844] ss:$8 sps:$4 sm:$0xff]  }
 0x1df   :  { %6952 = vmatpush1.bf16.msra.mxu1 %v10064_v17  ;;  %v10142_v17 = vld [vmem:[%s14438_s1 + $0x840] ss:$8 sps:$4 sm:$0xff]  }
 0x1e0   :  { %7608 = vmatpush1.bf16.msra.mxu0 %v10067_v35  ;;  %6953 = vmatprep.subr.bf16.mxu1 %v10072_v47  ;;  %v10145_v35 = vld [vmem:[%s14438_s1 + $0x1840] ss:$8 sps:$4 sm:$0xff]   ;;  %v10150_v47 = vld [vmem:[%s14438_s1 + $0x854] ss:$8 sps:$4 sm:$0xff]  }
 0x1e1   :  { %7609 = vmatprep.subr.bf16.mxu0 %v10075_v48  ;;  %v10153_v48 = vld [vmem:[%s14438_s1 + $0x1854] ss:$8 sps:$4 sm:$0xff]  }
 0x1e3   :  { %6954 = vmatpush1.bf16.msra.mxu1 %v10070_v50  ;;  %v10148_v50 = vld [vmem:[%s14438_s1 + $0x850] ss:$8 sps:$4 sm:$0xff]  }
 0x1e4   :  { %7610 = vmatpush1.bf16.msra.mxu0 %v10073_v51  ;;  %6955 = vmatprep.subr.bf16.mxu1 %v10078_v53  ;;  %v10151_v51 = vld [vmem:[%s14438_s1 + $0x1850] ss:$8 sps:$4 sm:$0xff]   ;;  %v10156_v53 = vld [vmem:[%s14438_s1 + $0x864] ss:$8 sps:$4 sm:$0xff]  }
 0x1e5   :  { %7611 = vmatprep.subr.bf16.mxu0 %v10081_v54  ;;  %v10159_v54 = vld [vmem:[%s14438_s1 + $0x1864] ss:$8 sps:$4 sm:$0xff]  }
 0x1e7   :  { %6956 = vmatpush1.bf16.msra.mxu1 %v10076_v39  ;;  %v10154_v39 = vld [vmem:[%s14438_s1 + $0x860] ss:$8 sps:$4 sm:$0xff]  }
 0x1e8   :  { %7612 = vmatpush1.bf16.msra.mxu0 %v10079_v57  ;;  %6957 = vmatprep.subr.bf16.mxu1 %v10084_v60  ;;  %v10157_v57 = vld [vmem:[%s14438_s1 + $0x1860] ss:$8 sps:$4 sm:$0xff]   ;;  %v10162_v60 = vld [vmem:[%s14438_s1 + $0x874] ss:$8 sps:$4 sm:$0xff]  }
 0x1e9   :  { %7613 = vmatprep.subr.bf16.mxu0 %v10087_v61  ;;  %v10165_v61 = vld [vmem:[%s14438_s1 + $0x1874] ss:$8 sps:$4 sm:$0xff]  }
 0x1eb   :  { %6958 = vmatpush1.bf16.msra.mxu1 %v10082_v40  ;;  %v10160_v40 = vld [vmem:[%s14438_s1 + $0x870] ss:$8 sps:$4 sm:$0xff]  }
 0x1ec   :  { %7614 = vmatpush1.bf16.msra.mxu0 %v10085_v41  ;;  %6959 = vmatprep.subr.bf16.mxu1 %v10090_v62  ;;  %v10163_v41 = vld [vmem:[%s14438_s1 + $0x1870] ss:$8 sps:$4 sm:$0xff]   ;;  %v10168_v62 = vld [vmem:[%s14438_s1 + $0x884] ss:$8 sps:$4 sm:$0xff]  }
 0x1ed   :  { %7615 = vmatprep.subr.bf16.mxu0 %v10093_v63  ;;  %v10171_v63 = vld [vmem:[%s14438_s1 + $0x1884] ss:$8 sps:$4 sm:$0xff]  }
 0x1ef   :  { %6960 = vmatpush1.bf16.msra.mxu1 %v10088_v55  ;;  %v10166_v55 = vld [vmem:[%s14438_s1 + $0x880] ss:$8 sps:$4 sm:$0xff]  }
 0x1f0   :  { %7616 = vmatpush1.bf16.msra.mxu0 %v10091_v38  ;;  %6961 = vmatprep.subr.bf16.mxu1 %v10096_v2  ;;  %v10169_v38 = vld [vmem:[%s14438_s1 + $0x1880] ss:$8 sps:$4 sm:$0xff]   ;;  %v10174_v2 = vld [vmem:[%s14438_s1 + $0x894] ss:$8 sps:$4 sm:$0xff]  }
 0x1f1   :  { %7617 = vmatprep.subr.bf16.mxu0 %v10099_v3  ;;  %v10177_v3 = vld [vmem:[%s14438_s1 + $0x1894] ss:$8 sps:$4 sm:$0xff]  }
 0x1f3   :  { %6962 = vmatpush1.bf16.msra.mxu1 %v10094_v4  ;;  %v10172_v4 = vld [vmem:[%s14438_s1 + $0x890] ss:$8 sps:$4 sm:$0xff]  }
 0x1f4   :  { %7618 = vmatpush1.bf16.msra.mxu0 %v10097_v5  ;;  %6963 = vmatprep.subr.bf16.mxu1 %v10102_v6  ;;  %v10175_v5 = vld [vmem:[%s14438_s1 + $0x1890] ss:$8 sps:$4 sm:$0xff]   ;;  %v10180_v6 = vld [vmem:[%s14438_s1 + $0x8a4] ss:$8 sps:$4 sm:$0xff]  }
 0x1f5   :  { %7619 = vmatprep.subr.bf16.mxu0 %v10105_v7  ;;  %v10183_v7 = vld [vmem:[%s14438_s1 + $0x18a4] ss:$8 sps:$4 sm:$0xff]  }
 0x1f7   :  { %6964 = vmatpush1.bf16.msra.mxu1 %v10100_v8  ;;  %v10178_v8 = vld [vmem:[%s14438_s1 + $0x8a0] ss:$8 sps:$4 sm:$0xff]  }
 0x1f8   :  { %7620 = vmatpush1.bf16.msra.mxu0 %v10103_v9  ;;  %6965 = vmatprep.subr.bf16.mxu1 %v10108_v10  ;;  %v10181_v9 = vld [vmem:[%s14438_s1 + $0x18a0] ss:$8 sps:$4 sm:$0xff]   ;;  %v10186_v10 = vld [vmem:[%s14438_s1 + $0x8b4] ss:$8 sps:$4 sm:$0xff]  }
 0x1f9   :  { %7621 = vmatprep.subr.bf16.mxu0 %v10111_v58  ;;  %v10189_v58 = vld [vmem:[%s14438_s1 + $0x18b4] ss:$8 sps:$4 sm:$0xff]  }
 0x1fb   :  { %6966 = vmatpush1.bf16.msra.mxu1 %v10106_v18  ;;  %v10184_v18 = vld [vmem:[%s14438_s1 + $0x8b0] ss:$8 sps:$4 sm:$0xff]  }
 0x1fc   :  { %7622 = vmatpush1.bf16.msra.mxu0 %v10109_v19  ;;  %6967 = vmatprep.subr.bf16.mxu1 %v10114_v0  ;;  %v10187_v19 = vld [vmem:[%s14438_s1 + $0x18b0] ss:$8 sps:$4 sm:$0xff]   ;;  %v10192_v0 = vld [vmem:[%s14438_s1 + $0x8c4] ss:$8 sps:$4 sm:$0xff]  }
 0x1fd   :  { %7623 = vmatprep.subr.bf16.mxu0 %v10117_v1  ;;  %v10195_v1 = vld [vmem:[%s14438_s1 + $0x18c4] ss:$8 sps:$4 sm:$0xff]  }
 0x1ff   :  { %6968 = vmatpush1.bf16.msra.mxu1 %v10112_v22  ;;  %v10190_v22 = vld [vmem:[%s14438_s1 + $0x8c0] ss:$8 sps:$4 sm:$0xff]  }
 0x200   :  { %7624 = vmatpush1.bf16.msra.mxu0 %v10115_v52  ;;  %6978 = vmatprep.subr.bf16.mxu1 %v10120_v59  ;;  %v10193_v52 = vld [vmem:[%s14438_s1 + $0x18c0] ss:$8 sps:$4 sm:$0xff]   ;;  %v10198_v59 = vld [vmem:[%s14438_s1 + $0x8d4] ss:$8 sps:$4 sm:$0xff]  }
 0x201   :  { %7634 = vmatprep.subr.bf16.mxu0 %v10123_v11  ;;  %v10201_v11 = vld [vmem:[%s14438_s1 + $0x18d4] ss:$8 sps:$4 sm:$0xff]  }
 0x202   :  { %6970 = vmatmul.mubr.bf16.vlgmr.msra.gmra.mrb[0].mxu1 %v1169_v26  ;;  %v10204_v26 = vld [vmem:[%s14438_s1 + $0x8e4] ss:$8 sps:$4 sm:$0xff]  }
 0x203   :  { %7626 = vmatmul.mubr.bf16.vlgmr.msra.gmra.mrb[0].mxu0 %v1365_v27  ;;  %6979 = vmatpush1.bf16.msra.mxu1 %v10118_v28  ;;  %v10207_v27 = vld [vmem:[%s14438_s1 + $0x18e4] ss:$8 sps:$4 sm:$0xff]   ;;  %v10202_v28 = vld [vmem:[%s14438_s1 + $0x8e0] ss:$8 sps:$4 sm:$0xff]  }
 0x204   :  { %7635 = vmatpush1.bf16.msra.mxu0 %v10121_v29  ;;  %6980 = vmatprep.subr.bf16.mxu1 %v10126_v30  ;;  %v10205_v29 = vld [vmem:[%s14438_s1 + $0x18e0] ss:$8 sps:$4 sm:$0xff]   ;;  %v10210_v30 = vld [vmem:[%s14438_s1 + $0x8f4] ss:$8 sps:$4 sm:$0xff]  }
 0x205   :  { %7636 = vmatprep.subr.bf16.mxu0 %v10129_v14  ;;  %7010 = vmatprep.mubr.bf16.mxu1 %v12698_v15  ;;  %v10213_v14 = vld [vmem:[%s14438_s1 + $0x18f4] ss:$8 sps:$4 sm:$0xff]  }
 0x206   :  { %7666 = vmatprep.mubr.bf16.mxu0 %v12701_v31 }
 0x207   :  { %6981 = vmatpush1.bf16.msra.mxu1 %v10124_v32  ;;  %v10208_v32 = vld [vmem:[%s14438_s1 + $0x8f0] ss:$8 sps:$4 sm:$0xff]  }
 0x208   :  { %7637 = vmatpush1.bf16.msra.mxu0 %v10127_v33  ;;  %6982 = vmatprep.subr.bf16.mxu1 %v10132_v34  ;;  %v10211_v33 = vld [vmem:[%s14438_s1 + $0x18f0] ss:$8 sps:$4 sm:$0xff]   ;;  %v10216_v34 = vld [vmem:[%s14438_s1 + $0x904] ss:$8 sps:$4 sm:$0xff]  }
 0x209   :  { %7638 = vmatprep.subr.bf16.mxu0 %v10135_v16  ;;  %v10219_v16 = vld [vmem:[%s14438_s1 + $0x1904] ss:$8 sps:$4 sm:$0xff]  }
 0x20b   :  { %6983 = vmatpush1.bf16.msra.mxu1 %v10130_v36  ;;  %v12887_v36 = vrot.slane %v12659_v20, %v11101_v49  ;;  %v10222_v20 = vld [vmem:[%s14438_s1 + $0x914] ss:$8 sps:$4 sm:$0xff]  }
 0x20c   :  { %7639 = vmatpush1.bf16.msra.mxu0 %v10133_v37  ;;  %6984 = vmatprep.subr.bf16.mxu1 %v10138_v56  ;;  %v12891_v37 = vrot.slane %v12663_v21, %v11101_v49  ;;  %v10214_v56 = vld [vmem:[%s14438_s1 + $0x900] ss:$8 sps:$4 sm:$0xff]   ;;  %v10225_v21 = vld [vmem:[%s14438_s1 + $0x1914] ss:$8 sps:$4 sm:$0xff]  }
 0x20d   :  { %7640 = vmatprep.subr.bf16.mxu0 %v10141_v23  ;;  %v10217_v23 = vld [vmem:[%s14438_s1 + $0x1900] ss:$8 sps:$4 sm:$0xff]  }
 0x20f   :  { %6985 = vmatpush1.bf16.msra.mxu1 %v10136_v43  ;;  %v1219_v43 = vcombine.high %v12698_v15, %v12698_v15  ;;  %v10228_v15 = vld [vmem:[%s14438_s1 + $0x924] ss:$8 sps:$4 sm:$0xff]  }
 0x210   :  { %7641 = vmatpush1.bf16.msra.mxu0 %v10139_v44  ;;  %6986 = vmatprep.subr.bf16.mxu1 %v10144_v45  ;;  %v1415_v44 = vcombine.high %v12701_v31, %v12701_v31  ;;  %v10220_v45 = vld [vmem:[%s14438_s1 + $0x910] ss:$8 sps:$4 sm:$0xff]   ;;  %v10231_v31 = vld [vmem:[%s14438_s1 + $0x1924] ss:$8 sps:$4 sm:$0xff]  }
 0x211   :  { %7642 = vmatprep.subr.bf16.mxu0 %v10147_v46  ;;  %v10223_v46 = vld [vmem:[%s14438_s1 + $0x1910] ss:$8 sps:$4 sm:$0xff]  }
 0x213   :  { %6987 = vmatpush1.bf16.msra.mxu1 %v10142_v17  ;;  %v10226_v17 = vld [vmem:[%s14438_s1 + $0x920] ss:$8 sps:$4 sm:$0xff]  }
 0x214   :  { %7643 = vmatpush1.bf16.msra.mxu0 %v10145_v35  ;;  %6988 = vmatprep.subr.bf16.mxu1 %v10150_v47  ;;  %v10229_v35 = vld [vmem:[%s14438_s1 + $0x1920] ss:$8 sps:$4 sm:$0xff]   ;;  %v10234_v47 = vld [vmem:[%s14438_s1 + $0x934] ss:$8 sps:$4 sm:$0xff]  }
 0x215   :  { %7644 = vmatprep.subr.bf16.mxu0 %v10153_v48  ;;  %v10237_v48 = vld [vmem:[%s14438_s1 + $0x1934] ss:$8 sps:$4 sm:$0xff]  }
 0x217   :  { %6989 = vmatpush1.bf16.msra.mxu1 %v10148_v50  ;;  %v10232_v50 = vld [vmem:[%s14438_s1 + $0x930] ss:$8 sps:$4 sm:$0xff]  }
 0x218   :  { %7645 = vmatpush1.bf16.msra.mxu0 %v10151_v51  ;;  %6990 = vmatprep.subr.bf16.mxu1 %v10156_v53  ;;  %v10235_v51 = vld [vmem:[%s14438_s1 + $0x1930] ss:$8 sps:$4 sm:$0xff]   ;;  %v10240_v53 = vld [vmem:[%s14438_s1 + $0x944] ss:$8 sps:$4 sm:$0xff]  }
 0x219   :  { %7646 = vmatprep.subr.bf16.mxu0 %v10159_v54  ;;  %v10243_v54 = vld [vmem:[%s14438_s1 + $0x1944] ss:$8 sps:$4 sm:$0xff]  }
 0x21b   :  { %6991 = vmatpush1.bf16.msra.mxu1 %v10154_v39  ;;  %v10238_v39 = vld [vmem:[%s14438_s1 + $0x940] ss:$8 sps:$4 sm:$0xff]  }
 0x21c   :  { %7647 = vmatpush1.bf16.msra.mxu0 %v10157_v57  ;;  %6992 = vmatprep.subr.bf16.mxu1 %v10162_v60  ;;  %v10241_v57 = vld [vmem:[%s14438_s1 + $0x1940] ss:$8 sps:$4 sm:$0xff]   ;;  %v10246_v60 = vld [vmem:[%s14438_s1 + $0x954] ss:$8 sps:$4 sm:$0xff]  }
 0x21d   :  { %7648 = vmatprep.subr.bf16.mxu0 %v10165_v61  ;;  %v10249_v61 = vld [vmem:[%s14438_s1 + $0x1954] ss:$8 sps:$4 sm:$0xff]  }
 0x21f   :  { %6993 = vmatpush1.bf16.msra.mxu1 %v10160_v40 }
 0x220   :  { %7649 = vmatpush1.bf16.msra.mxu0 %v10163_v41  ;;  %6994 = vmatprep.subr.bf16.mxu1 %v10168_v62 }
 0x221   :  { %7650 = vmatprep.subr.bf16.mxu0 %v10171_v63 }
 0x223   :  { %6995 = vmatpush1.bf16.msra.mxu1 %v10166_v55 }
 0x224   :  { %7651 = vmatpush1.bf16.msra.mxu0 %v10169_v38  ;;  %6996 = vmatprep.subr.bf16.mxu1 %v10174_v2 }
 0x225   :  { %7652 = vmatprep.subr.bf16.mxu0 %v10177_v3 }
 0x227   :  { %6997 = vmatpush1.bf16.msra.mxu1 %v10172_v4 }
 0x228   :  { %7653 = vmatpush1.bf16.msra.mxu0 %v10175_v5  ;;  %6998 = vmatprep.subr.bf16.mxu1 %v10180_v6 }
 0x229   :  { %7654 = vmatprep.subr.bf16.mxu0 %v10183_v7 }
 0x22b   :  { %6999 = vmatpush1.bf16.msra.mxu1 %v10178_v8 }
 0x22c   :  { %7655 = vmatpush1.bf16.msra.mxu0 %v10181_v9  ;;  %7000 = vmatprep.subr.bf16.mxu1 %v10186_v10 }
 0x22d   :  { %7656 = vmatprep.subr.bf16.mxu0 %v10189_v58 }
 0x22f   :  { %7001 = vmatpush1.bf16.msra.mxu1 %v10184_v18 }
 0x230   :  { %7657 = vmatpush1.bf16.msra.mxu0 %v10187_v19  ;;  %7002 = vmatprep.subr.bf16.mxu1 %v10192_v0 }
 0x231   :  { %7658 = vmatprep.subr.bf16.mxu0 %v10195_v1 }
 0x233   :  { %7003 = vmatpush1.bf16.msra.mxu1 %v10190_v22 }
 0x234   :  { %7659 = vmatpush1.bf16.msra.mxu0 %v10193_v52  ;;  %7004 = vmatprep.subr.bf16.mxu1 %v10198_v59 }
 0x235   :  { %7660 = vmatprep.subr.bf16.mxu0 %v10201_v11 }
 0x237   :  { %7005 = vmatpush1.bf16.msra.mxu1 %v10196_v24 }
 0x238   :  { %7661 = vmatpush1.bf16.msra.mxu0 %v10199_v25  ;;  %7006 = vmatprep.subr.bf16.mxu1 %v10204_v26 }
 0x239   :  { %7662 = vmatprep.subr.bf16.mxu0 %v10207_v27 }
 0x23b   :  { %7007 = vmatpush1.bf16.msra.mxu1 %v10202_v28 }
 0x23c   :  { %7663 = vmatpush1.bf16.msra.mxu0 %v10205_v29  ;;  %7008 = vmatprep.subr.bf16.mxu1 %v10210_v30 }
 0x23d   :  { %7664 = vmatprep.subr.bf16.mxu0 %v10213_v14 }
 0x23f   :  { %7009 = vmatpush1.bf16.msra.mxu1 %v10208_v32 }
 0x240   :  { %7665 = vmatpush1.bf16.msra.mxu0 %v10211_v33  ;;  %7019 = vmatprep.subr.bf16.mxu1 %v10216_v34 }
 0x241   :  { %7675 = vmatprep.subr.bf16.mxu0 %v10219_v16 }
 0x242   :  { %7011 = vmatmul.mubr.bf16.vlgmr.msra.gmra.mrb[0].mxu1 %v12887_v36 }
 0x243   :  { %7667 = vmatmul.mubr.bf16.vlgmr.msra.gmra.mrb[0].mxu0 %v12891_v37  ;;  %7020 = vmatpush1.bf16.msra.mxu1 %v10214_v56 }
 0x244   :  { %7676 = vmatpush1.bf16.msra.mxu0 %v10217_v23  ;;  %7021 = vmatprep.subr.bf16.mxu1 %v10222_v20 }
 0x245   :  { %7677 = vmatprep.subr.bf16.mxu0 %v10225_v21  ;;  %7051 = vmatprep.mubr.bf16.mxu1 %v1219_v43 }
 0x246   :  { %7707 = vmatprep.mubr.bf16.mxu0 %v1415_v44 }
 0x247   :  { %7022 = vmatpush1.bf16.msra.mxu1 %v10220_v45 }
 0x248   :  { %7678 = vmatpush1.bf16.msra.mxu0 %v10223_v46  ;;  %7023 = vmatprep.subr.bf16.mxu1 %v10228_v15 }
 0x249   :  { %7679 = vmatprep.subr.bf16.mxu0 %v10231_v31 }
 0x24b   :  { %7024 = vmatpush1.bf16.msra.mxu1 %v10226_v17 }
 0x24c   :  { %7680 = vmatpush1.bf16.msra.mxu0 %v10229_v35  ;;  %7025 = vmatprep.subr.bf16.mxu1 %v10234_v47 }
 0x24d   :  { %7681 = vmatprep.subr.bf16.mxu0 %v10237_v48 }
 0x24f   :  { %7026 = vmatpush1.bf16.msra.mxu1 %v10232_v50 }
 0x250   :  { %7682 = vmatpush1.bf16.msra.mxu0 %v10235_v51  ;;  %7027 = vmatprep.subr.bf16.mxu1 %v10240_v53 }
 0x251   :  { %7683 = vmatprep.subr.bf16.mxu0 %v10243_v54 }
 0x252   :  { %10 = vsyncpa [#allocation3], 0  ;;  %v10244_v40 = vld [vmem:[%s14438_s1 + $0x950] ss:$8 sps:$4 sm:$0xff]   ;;  %v10252_v62 = vld [vmem:[%s14438_s1 + $0x964] ss:$8 sps:$4 sm:$0xff]   ;;  %v1172_v56 = vcombine.high %v12638_v12, %v12638_v12  ;;  %v1368_v23 = vcombine.high %v12643_v13, %v12643_v13  ;;  %v1217_v47 = vcombine.high %v12887_v36, %v12887_v36  ;;  %v1413_v48 = vcombine.high %v12891_v37, %v12891_v37 }
 0x253   :  { %7028 = vmatpush1.bf16.msra.mxu1 %v10238_v39  ;;  %v10247_v41 = vld [vmem:[%s14438_s1 + $0x1950] ss:$8 sps:$4 sm:$0xff]   ;;  %v10255_v63 = vld [vmem:[%s14438_s1 + $0x1964] ss:$8 sps:$4 sm:$0xff]   ;;  %v10250_v55 = vld [vmem:[%s14438_s1 + $0x960] ss:$8 sps:$4 sm:$0xff]  }
 0x254   :  { %7684 = vmatpush1.bf16.msra.mxu0 %v10241_v57  ;;  %7029 = vmatprep.subr.bf16.mxu1 %v10246_v60  ;;  %v10253_v38 = vld [vmem:[%s14438_s1 + $0x1960] ss:$8 sps:$4 sm:$0xff]   ;;  %v10258_v2 = vld [vmem:[%s14438_s1 + $0x974] ss:$8 sps:$4 sm:$0xff]   ;;  %v10256_v4 = vld [vmem:[%s14438_s1 + $0x970] ss:$8 sps:$4 sm:$0xff]   ;;  %v13084_v13 = vrot.slane %v1172_v56, %v11101_v49  ;;  %v13087_v44 = vrot.slane %v1368_v23, %v11101_v49 }
 0x255   :  { %7685 = vmatprep.subr.bf16.mxu0 %v10249_v61  ;;  %v10261_v3 = vld [vmem:[%s14438_s1 + $0x1974] ss:$8 sps:$4 sm:$0xff]   ;;  %v10259_v5 = vld [vmem:[%s14438_s1 + $0x1970] ss:$8 sps:$4 sm:$0xff]   ;;  %v10264_v6 = vld [vmem:[%s14438_s1 + $0x984] ss:$8 sps:$4 sm:$0xff]  }
 0x256   :  { %v10267_v7 = vld [vmem:[%s14438_s1 + $0x1984] ss:$8 sps:$4 sm:$0xff]   ;;  %v10262_v8 = vld [vmem:[%s14438_s1 + $0x980] ss:$8 sps:$4 sm:$0xff]   ;;  %v10270_v10 = vld [vmem:[%s14438_s1 + $0x994] ss:$8 sps:$4 sm:$0xff]   ;;  %v1188_v17 = vcombine.high %v13084_v13, %v13084_v13  ;;  %v1384_v35 = vcombine.high %v13087_v44, %v13087_v44 }
 0x257   :  { %7030 = vmatpush1.bf16.msra.mxu1 %v10244_v40  ;;  %v10265_v9 = vld [vmem:[%s14438_s1 + $0x1980] ss:$8 sps:$4 sm:$0xff]   ;;  %v10273_v58 = vld [vmem:[%s14438_s1 + $0x1994] ss:$8 sps:$4 sm:$0xff]   ;;  %v10268_v18 = vld [vmem:[%s14438_s1 + $0x990] ss:$8 sps:$4 sm:$0xff]  }
 0x258   :  { %7686 = vmatpush1.bf16.msra.mxu0 %v10247_v41  ;;  %7031 = vmatprep.subr.bf16.mxu1 %v10252_v62  ;;  %v10271_v19 = vld [vmem:[%s14438_s1 + $0x1990] ss:$8 sps:$4 sm:$0xff]   ;;  %v10276_v0 = vld [vmem:[%s14438_s1 + $0x9a4] ss:$8 sps:$4 sm:$0xff]   ;;  %v10274_v22 = vld [vmem:[%s14438_s1 + $0x9a0] ss:$8 sps:$4 sm:$0xff]   ;;  %v13122_v37 = vrot.slane %v1188_v17, %v11101_v49  ;;  %v13125_v54 = vrot.slane %v1384_v35, %v11101_v49 }
 0x259   :  { %7687 = vmatprep.subr.bf16.mxu0 %v10255_v63  ;;  %v10279_v1 = vld [vmem:[%s14438_s1 + $0x19a4] ss:$8 sps:$4 sm:$0xff]   ;;  %v10277_v52 = vld [vmem:[%s14438_s1 + $0x19a0] ss:$8 sps:$4 sm:$0xff]   ;;  %v10282_v59 = vld [vmem:[%s14438_s1 + $0x9b4] ss:$8 sps:$4 sm:$0xff]  }
 0x25a   :  { %v10285_v11 = vld [vmem:[%s14438_s1 + $0x19b4] ss:$8 sps:$4 sm:$0xff]   ;;  %v10280_v24 = vld [vmem:[%s14438_s1 + $0x9b0] ss:$8 sps:$4 sm:$0xff]   ;;  %v10288_v26 = vld [vmem:[%s14438_s1 + $0x9c4] ss:$8 sps:$4 sm:$0xff]  }
 0x25b   :  { %7032 = vmatpush1.bf16.msra.mxu1 %v10250_v55  ;;  %v10283_v25 = vld [vmem:[%s14438_s1 + $0x19b0] ss:$8 sps:$4 sm:$0xff]   ;;  %v10291_v27 = vld [vmem:[%s14438_s1 + $0x19c4] ss:$8 sps:$4 sm:$0xff]   ;;  %v10286_v28 = vld [vmem:[%s14438_s1 + $0x9c0] ss:$8 sps:$4 sm:$0xff]  }
 0x25c   :  { %7688 = vmatpush1.bf16.msra.mxu0 %v10253_v38  ;;  %7033 = vmatprep.subr.bf16.mxu1 %v10258_v2  ;;  %v10289_v29 = vld [vmem:[%s14438_s1 + $0x19c0] ss:$8 sps:$4 sm:$0xff]   ;;  %v10294_v30 = vld [vmem:[%s14438_s1 + $0x9d4] ss:$8 sps:$4 sm:$0xff]   ;;  %v10292_v32 = vld [vmem:[%s14438_s1 + $0x9d0] ss:$8 sps:$4 sm:$0xff]  }
 0x25d   :  { %7689 = vmatprep.subr.bf16.mxu0 %v10261_v3  ;;  %v10297_v14 = vld [vmem:[%s14438_s1 + $0x19d4] ss:$8 sps:$4 sm:$0xff]   ;;  %v10295_v33 = vld [vmem:[%s14438_s1 + $0x19d0] ss:$8 sps:$4 sm:$0xff]   ;;  %v10300_v34 = vld [vmem:[%s14438_s1 + $0x9e4] ss:$8 sps:$4 sm:$0xff]  }
 0x25e   :  { %v10303_v16 = vld [vmem:[%s14438_s1 + $0x19e4] ss:$8 sps:$4 sm:$0xff]   ;;  %v10298_v20 = vld [vmem:[%s14438_s1 + $0x9e0] ss:$8 sps:$4 sm:$0xff]   ;;  %v10306_v43 = vld [vmem:[%s14438_s1 + $0x9f4] ss:$8 sps:$4 sm:$0xff]  }
 0x25f   :  { %7034 = vmatpush1.bf16.msra.mxu1 %v10256_v4  ;;  %v10301_v21 = vld [vmem:[%s14438_s1 + $0x19e0] ss:$8 sps:$4 sm:$0xff]   ;;  %v10309_v12 = vld [vmem:[%s14438_s1 + $0x19f4] ss:$8 sps:$4 sm:$0xff]   ;;  %v10304_v45 = vld [vmem:[%s14438_s1 + $0x9f0] ss:$8 sps:$4 sm:$0xff]  }
 0x260   :  { %7690 = vmatpush1.bf16.msra.mxu0 %v10259_v5  ;;  %7035 = vmatprep.subr.bf16.mxu1 %v10264_v6  ;;  %v10307_v46 = vld [vmem:[%s14438_s1 + $0x19f0] ss:$8 sps:$4 sm:$0xff]   ;;  %v10312_v15 = vld [vmem:[%s14438_s1 + $0xa04] ss:$8 sps:$4 sm:$0xff]   ;;  %v10310_v50 = vld [vmem:[%s14438_s1 + $0xa00] ss:$8 sps:$4 sm:$0xff]  }
 0x261   :  { %7691 = vmatprep.subr.bf16.mxu0 %v10267_v7  ;;  %v10315_v31 = vld [vmem:[%s14438_s1 + $0x1a04] ss:$8 sps:$4 sm:$0xff]   ;;  %v10313_v51 = vld [vmem:[%s14438_s1 + $0x1a00] ss:$8 sps:$4 sm:$0xff]   ;;  %v10318_v53 = vld [vmem:[%s14438_s1 + $0xa14] ss:$8 sps:$4 sm:$0xff]  }
 0x262   :  { %v10321_v36 = vld [vmem:[%s14438_s1 + $0x1a14] ss:$8 sps:$4 sm:$0xff]   ;;  %v10316_v39 = vld [vmem:[%s14438_s1 + $0xa10] ss:$8 sps:$4 sm:$0xff]   ;;  %v10324_v60 = vld [vmem:[%s14438_s1 + $0xa24] ss:$8 sps:$4 sm:$0xff]  }
 0x263   :  { %7036 = vmatpush1.bf16.msra.mxu1 %v10262_v8  ;;  %v10319_v57 = vld [vmem:[%s14438_s1 + $0x1a10] ss:$8 sps:$4 sm:$0xff]   ;;  %v10327_v61 = vld [vmem:[%s14438_s1 + $0x1a24] ss:$8 sps:$4 sm:$0xff]   ;;  %v10322_v40 = vld [vmem:[%s14438_s1 + $0xa20] ss:$8 sps:$4 sm:$0xff]  }
 0x264   :  { %7692 = vmatpush1.bf16.msra.mxu0 %v10265_v9  ;;  %7037 = vmatprep.subr.bf16.mxu1 %v10270_v10  ;;  %v10325_v41 = vld [vmem:[%s14438_s1 + $0x1a20] ss:$8 sps:$4 sm:$0xff]   ;;  %v10330_v62 = vld [vmem:[%s14438_s1 + $0xa34] ss:$8 sps:$4 sm:$0xff]   ;;  %v10328_v55 = vld [vmem:[%s14438_s1 + $0xa30] ss:$8 sps:$4 sm:$0xff]  }
 0x265   :  { %7693 = vmatprep.subr.bf16.mxu0 %v10273_v58  ;;  %v10333_v63 = vld [vmem:[%s14438_s1 + $0x1a34] ss:$8 sps:$4 sm:$0xff]   ;;  %v10331_v38 = vld [vmem:[%s14438_s1 + $0x1a30] ss:$8 sps:$4 sm:$0xff]   ;;  %v10336_v2 = vld [vmem:[%s14438_s1 + $0xa44] ss:$8 sps:$4 sm:$0xff]  }
 0x266   :  { %v10339_v3 = vld [vmem:[%s14438_s1 + $0x1a44] ss:$8 sps:$4 sm:$0xff]   ;;  %v10334_v4 = vld [vmem:[%s14438_s1 + $0xa40] ss:$8 sps:$4 sm:$0xff]   ;;  %v10342_v6 = vld [vmem:[%s14438_s1 + $0xa54] ss:$8 sps:$4 sm:$0xff]  }
 0x267   :  { %7038 = vmatpush1.bf16.msra.mxu1 %v10268_v18  ;;  %v10337_v5 = vld [vmem:[%s14438_s1 + $0x1a40] ss:$8 sps:$4 sm:$0xff]   ;;  %v10345_v7 = vld [vmem:[%s14438_s1 + $0x1a54] ss:$8 sps:$4 sm:$0xff]   ;;  %v10340_v8 = vld [vmem:[%s14438_s1 + $0xa50] ss:$8 sps:$4 sm:$0xff]  }
 0x268   :  { %7694 = vmatpush1.bf16.msra.mxu0 %v10271_v19  ;;  %7039 = vmatprep.subr.bf16.mxu1 %v10276_v0  ;;  %v10343_v9 = vld [vmem:[%s14438_s1 + $0x1a50] ss:$8 sps:$4 sm:$0xff]   ;;  %v10348_v10 = vld [vmem:[%s14438_s1 + $0xa64] ss:$8 sps:$4 sm:$0xff]   ;;  %v10346_v18 = vld [vmem:[%s14438_s1 + $0xa60] ss:$8 sps:$4 sm:$0xff]  }
 0x269   :  { %7695 = vmatprep.subr.bf16.mxu0 %v10279_v1  ;;  %v10351_v58 = vld [vmem:[%s14438_s1 + $0x1a64] ss:$8 sps:$4 sm:$0xff]   ;;  %v10349_v19 = vld [vmem:[%s14438_s1 + $0x1a60] ss:$8 sps:$4 sm:$0xff]   ;;  %v10354_v0 = vld [vmem:[%s14438_s1 + $0xa74] ss:$8 sps:$4 sm:$0xff]  }
 0x26a   :  { %v10357_v1 = vld [vmem:[%s14438_s1 + $0x1a74] ss:$8 sps:$4 sm:$0xff]   ;;  %v10376_v56 = vld [vmem:[%s14438_s1 + $0xab0] ss:$8 sps:$4 sm:$0xff]   ;;  %v10396_v17 = vld [vmem:[%s14438_s1 + $0xae4] ss:$8 sps:$4 sm:$0xff]  }
 0x26b   :  { %7040 = vmatpush1.bf16.msra.mxu1 %v10274_v22  ;;  %v10352_v22 = vld [vmem:[%s14438_s1 + $0xa70] ss:$8 sps:$4 sm:$0xff]   ;;  %v10399_v35 = vld [vmem:[%s14438_s1 + $0x1ae4] ss:$8 sps:$4 sm:$0xff]   ;;  %s10935_s21 = smov [#allocation2]   ;;  %vm8141_vm0 = vcmask 74752  }
 0x26c   :  { %7696 = vmatpush1.bf16.msra.mxu0 %v10277_v52  ;;  %7041 = vmatprep.subr.bf16.mxu1 %v10282_v59  ;;  %v10355_v52 = vld [vmem:[%s14438_s1 + $0x1a70] ss:$8 sps:$4 sm:$0xff]   ;;  %v10360_v59 = vld [vmem:[%s14438_s1 + $0xa84] ss:$8 sps:$4 sm:$0xff]   ;;  %s8149_s22 = sshll.u32 %s10935_s21, 4  ;;  %s8150_s22 = int_to_ptr.vmem [resolvable:$true] %s8149_s22 }
 0x26d   :  { %7697 = vmatprep.subr.bf16.mxu0 %v10285_v11  ;;  %v10363_v11 = vld [vmem:[%s14438_s1 + $0x1a84] ss:$8 sps:$4 sm:$0xff]   ;;  %v10379_v23 = vld [vmem:[%s14438_s1 + $0x1ab0] ss:$8 sps:$4 sm:$0xff]   ;;  %s10910_s23 = scalar_lea.vmem %s8150_s22, 32  ;;  %p10915_p1 = scmp.lt.s32.totalorder %s8150_s22, %s8150_s22 }
 0x26e   :  { %p10911_p0 = scmp.ne.s32.totalorder %s8150_s22, %s10910_s23  ;;  %p10916_p2 = scmp.lt.s32.totalorder %s10910_s23, %s10910_s23 }
 0x26f   :  { %7042 = vmatpush1.bf16.msra.mxu1 %v10280_v24  ;;  %v10358_v24 = vld [vmem:[%s14438_s1 + $0xa80] ss:$8 sps:$4 sm:$0xff]  }
 0x270   :  { %7698 = vmatpush1.bf16.msra.mxu0 %v10283_v25  ;;  %7043 = vmatprep.subr.bf16.mxu1 %v10288_v26  ;;  %v10361_v25 = vld [vmem:[%s14438_s1 + $0x1a80] ss:$8 sps:$4 sm:$0xff]   ;;  %v10366_v26 = vld [vmem:[%s14438_s1 + $0xa94] ss:$8 sps:$4 sm:$0xff]   ;;  %p10917_p3 = por %p10916_p2, %p10915_p1 }
 0x271   :  { %7699 = vmatprep.subr.bf16.mxu0 %v10291_v27  ;;  %v10369_v27 = vld [vmem:[%s14438_s1 + $0x1a94] ss:$8 sps:$4 sm:$0xff]  }
 0x272   :  { %p10918_p4 = pnand %p10917_p3, %p10911_p0 }
 0x273   :  { %7044 = vmatpush1.bf16.msra.mxu1 %v10286_v28  ;;  %v10364_v28 = vld [vmem:[%s14438_s1 + $0xa90] ss:$8 sps:$4 sm:$0xff]  }
 0x274   :  { %7700 = vmatpush1.bf16.msra.mxu0 %v10289_v29  ;;  %7045 = vmatprep.subr.bf16.mxu1 %v10294_v30  ;;  %v10367_v29 = vld [vmem:[%s14438_s1 + $0x1a90] ss:$8 sps:$4 sm:$0xff]   ;;  %v10372_v30 = vld [vmem:[%s14438_s1 + $0xaa4] ss:$8 sps:$4 sm:$0xff]  }
 0x275   :  { %7701 = vmatprep.subr.bf16.mxu0 %v10297_v14  ;;  %v10375_v14 = vld [vmem:[%s14438_s1 + $0x1aa4] ss:$8 sps:$4 sm:$0xff]  }
 0x277   :  { %7046 = vmatpush1.bf16.msra.mxu1 %v10292_v32  ;;  %v10370_v32 = vld [vmem:[%s14438_s1 + $0xaa0] ss:$8 sps:$4 sm:$0xff]  }
 0x278   :  { %7702 = vmatpush1.bf16.msra.mxu0 %v10295_v33  ;;  %7047 = vmatprep.subr.bf16.mxu1 %v10300_v34  ;;  %v10373_v33 = vld [vmem:[%s14438_s1 + $0x1aa0] ss:$8 sps:$4 sm:$0xff]   ;;  %v10378_v34 = vld [vmem:[%s14438_s1 + $0xab4] ss:$8 sps:$4 sm:$0xff]  }
 0x279   :  { %7703 = vmatprep.subr.bf16.mxu0 %v10303_v16  ;;  %v10381_v16 = vld [vmem:[%s14438_s1 + $0x1ab4] ss:$8 sps:$4 sm:$0xff]  }
 0x27b   :  { %7048 = vmatpush1.bf16.msra.mxu1 %v10298_v20  ;;  %v10384_v20 = vld [vmem:[%s14438_s1 + $0xac4] ss:$8 sps:$4 sm:$0xff]  }
 0x27c   :  { %7704 = vmatpush1.bf16.msra.mxu0 %v10301_v21  ;;  %7049 = vmatprep.subr.bf16.mxu1 %v10306_v43  ;;  %v10387_v21 = vld [vmem:[%s14438_s1 + $0x1ac4] ss:$8 sps:$4 sm:$0xff]   ;;  %v10382_v43 = vld [vmem:[%s14438_s1 + $0xac0] ss:$8 sps:$4 sm:$0xff]  }
 0x27d   :  { %7705 = vmatprep.subr.bf16.mxu0 %v10309_v12  ;;  %v10385_v12 = vld [vmem:[%s14438_s1 + $0x1ac0] ss:$8 sps:$4 sm:$0xff]  }
 0x27f   :  { %7050 = vmatpush1.bf16.msra.mxu1 %v10304_v45  ;;  %v10390_v45 = vld [vmem:[%s14438_s1 + $0xad4] ss:$8 sps:$4 sm:$0xff]  }
 0x280   :  { %7706 = vmatpush1.bf16.msra.mxu0 %v10307_v46  ;;  %7060 = vmatprep.subr.bf16.mxu1 %v10312_v15  ;;  %v10393_v46 = vld [vmem:[%s14438_s1 + $0x1ad4] ss:$8 sps:$4 sm:$0xff]   ;;  %v10388_v15 = vld [vmem:[%s14438_s1 + $0xad0] ss:$8 sps:$4 sm:$0xff]  }
 0x281   :  { %7716 = vmatprep.subr.bf16.mxu0 %v10315_v31  ;;  %v10391_v31 = vld [vmem:[%s14438_s1 + $0x1ad0] ss:$8 sps:$4 sm:$0xff]  }
 0x282   :  { %7052 = vmatmul.mubr.bf16.vlgmr.msra.gmra.mrb[0].mxu1 %v1217_v47  ;;  %v10394_v47 = vld [vmem:[%s14438_s1 + $0xae0] ss:$8 sps:$4 sm:$0xff]  }
 0x283   :  { %7708 = vmatmul.mubr.bf16.vlgmr.msra.gmra.mrb[0].mxu0 %v1413_v48  ;;  %7061 = vmatpush1.bf16.msra.mxu1 %v10310_v50  ;;  %v10397_v48 = vld [vmem:[%s14438_s1 + $0x1ae0] ss:$8 sps:$4 sm:$0xff]   ;;  %v10402_v50 = vld [vmem:[%s14438_s1 + $0xaf4] ss:$8 sps:$4 sm:$0xff]  }
 0x284   :  { %7717 = vmatpush1.bf16.msra.mxu0 %v10313_v51  ;;  %7062 = vmatprep.subr.bf16.mxu1 %v10318_v53  ;;  %v10405_v51 = vld [vmem:[%s14438_s1 + $0x1af4] ss:$8 sps:$4 sm:$0xff]   ;;  %v10400_v53 = vld [vmem:[%s14438_s1 + $0xaf0] ss:$8 sps:$4 sm:$0xff]  }
 0x285   :  { %7718 = vmatprep.subr.bf16.mxu0 %v10321_v36  ;;  %7092 = vmatprep.mubr.bf16.mxu1 %v13122_v37  ;;  %v10403_v36 = vld [vmem:[%s14438_s1 + $0x1af0] ss:$8 sps:$4 sm:$0xff]  }
 0x286   :  { %7748 = vmatprep.mubr.bf16.mxu0 %v13125_v54 }
 0x287   :  { %7063 = vmatpush1.bf16.msra.mxu1 %v10316_v39  ;;  %v10409_v39 = vld [vmem:[%s14438_s1 + $0xb04] ss:$8 sps:$4 sm:$0xff]  }
 0x288   :  { %7719 = vmatpush1.bf16.msra.mxu0 %v10319_v57  ;;  %7064 = vmatprep.subr.bf16.mxu1 %v10324_v60  ;;  %v10413_v57 = vld [vmem:[%s14438_s1 + $0x1b04] ss:$8 sps:$4 sm:$0xff]   ;;  %v13311_v60 = vrot.slane %v13084_v13, %v11101_v49  ;;  %v10416_v13 = vld [vmem:[%s14438_s1 + $0xb14] ss:$8 sps:$4 sm:$0xff]  }
 0x289   :  { %7720 = vmatprep.subr.bf16.mxu0 %v10327_v61  ;;  %v13315_v61 = vrot.slane %v13087_v44, %v11101_v49  ;;  %v10419_v44 = vld [vmem:[%s14438_s1 + $0x1b14] ss:$8 sps:$4 sm:$0xff]  }
 0x28b   :  { %7065 = vmatpush1.bf16.msra.mxu1 %v10322_v40  ;;  %v10407_v40 = vld [vmem:[%s14438_s1 + $0xb00] ss:$8 sps:$4 sm:$0xff]  }
 0x28c   :  { %7721 = vmatpush1.bf16.msra.mxu0 %v10325_v41  ;;  %7066 = vmatprep.subr.bf16.mxu1 %v10330_v62  ;;  %v10411_v41 = vld [vmem:[%s14438_s1 + $0x1b00] ss:$8 sps:$4 sm:$0xff]   ;;  %v1220_v62 = vcombine.high %v13122_v37, %v13122_v37  ;;  %v10422_v37 = vld [vmem:[%s14438_s1 + $0xb24] ss:$8 sps:$4 sm:$0xff]  }
 0x28d   :  { %7722 = vmatprep.subr.bf16.mxu0 %v10333_v63  ;;  %v1416_v63 = vcombine.high %v13125_v54, %v13125_v54  ;;  %v10425_v54 = vld [vmem:[%s14438_s1 + $0x1b24] ss:$8 sps:$4 sm:$0xff]  }
 0x28f   :  { %7067 = vmatpush1.bf16.msra.mxu1 %v10328_v55  ;;  %v10414_v55 = vld [vmem:[%s14438_s1 + $0xb10] ss:$8 sps:$4 sm:$0xff]  }
 0x290   :  { %7723 = vmatpush1.bf16.msra.mxu0 %v10331_v38  ;;  %7068 = vmatprep.subr.bf16.mxu1 %v10336_v2  ;;  %v10417_v38 = vld [vmem:[%s14438_s1 + $0x1b10] ss:$8 sps:$4 sm:$0xff]   ;;  %v10420_v2 = vld [vmem:[%s14438_s1 + $0xb20] ss:$8 sps:$4 sm:$0xff]  }
 0x291   :  { %7724 = vmatprep.subr.bf16.mxu0 %v10339_v3  ;;  %v10423_v3 = vld [vmem:[%s14438_s1 + $0x1b20] ss:$8 sps:$4 sm:$0xff]  }
 0x293   :  { %7069 = vmatpush1.bf16.msra.mxu1 %v10334_v4  ;;  %v10428_v4 = vld [vmem:[%s14438_s1 + $0xb34] ss:$8 sps:$4 sm:$0xff]  }
 0x294   :  { %7725 = vmatpush1.bf16.msra.mxu0 %v10337_v5  ;;  %7070 = vmatprep.subr.bf16.mxu1 %v10342_v6  ;;  %v10431_v5 = vld [vmem:[%s14438_s1 + $0x1b34] ss:$8 sps:$4 sm:$0xff]   ;;  %v10426_v6 = vld [vmem:[%s14438_s1 + $0xb30] ss:$8 sps:$4 sm:$0xff]  }
 0x295   :  { %7726 = vmatprep.subr.bf16.mxu0 %v10345_v7  ;;  %v10429_v7 = vld [vmem:[%s14438_s1 + $0x1b30] ss:$8 sps:$4 sm:$0xff]  }
 0x297   :  { %7071 = vmatpush1.bf16.msra.mxu1 %v10340_v8  ;;  %v10434_v8 = vld [vmem:[%s14438_s1 + $0xb44] ss:$8 sps:$4 sm:$0xff]  }
 0x298   :  { %7727 = vmatpush1.bf16.msra.mxu0 %v10343_v9  ;;  %7072 = vmatprep.subr.bf16.mxu1 %v10348_v10  ;;  %v10437_v9 = vld [vmem:[%s14438_s1 + $0x1b44] ss:$8 sps:$4 sm:$0xff]   ;;  %v10432_v10 = vld [vmem:[%s14438_s1 + $0xb40] ss:$8 sps:$4 sm:$0xff]  }
 0x299   :  { %7728 = vmatprep.subr.bf16.mxu0 %v10351_v58  ;;  %v10435_v58 = vld [vmem:[%s14438_s1 + $0x1b40] ss:$8 sps:$4 sm:$0xff]  }
 0x29b   :  { %7073 = vmatpush1.bf16.msra.mxu1 %v10346_v18  ;;  %v10440_v18 = vld [vmem:[%s14438_s1 + $0xb54] ss:$8 sps:$4 sm:$0xff]  }
 0x29c   :  { %7729 = vmatpush1.bf16.msra.mxu0 %v10349_v19  ;;  %7074 = vmatprep.subr.bf16.mxu1 %v10354_v0  ;;  %v10443_v19 = vld [vmem:[%s14438_s1 + $0x1b54] ss:$8 sps:$4 sm:$0xff]   ;;  %v10438_v0 = vld [vmem:[%s14438_s1 + $0xb50] ss:$8 sps:$4 sm:$0xff]  }
 0x29d   :  { %7730 = vmatprep.subr.bf16.mxu0 %v10357_v1  ;;  %v10441_v1 = vld [vmem:[%s14438_s1 + $0x1b50] ss:$8 sps:$4 sm:$0xff]  }
 0x29f   :  { %7075 = vmatpush1.bf16.msra.mxu1 %v10352_v22  ;;  %v10446_v22 = vld [vmem:[%s14438_s1 + $0xb64] ss:$8 sps:$4 sm:$0xff]  }
 0x2a0   :  { %7731 = vmatpush1.bf16.msra.mxu0 %v10355_v52  ;;  %7076 = vmatprep.subr.bf16.mxu1 %v10360_v59  ;;  %v10449_v52 = vld [vmem:[%s14438_s1 + $0x1b64] ss:$8 sps:$4 sm:$0xff]   ;;  %v10444_v59 = vld [vmem:[%s14438_s1 + $0xb60] ss:$8 sps:$4 sm:$0xff]  }
 0x2a1   :  { %7732 = vmatprep.subr.bf16.mxu0 %v10363_v11  ;;  %v10447_v11 = vld [vmem:[%s14438_s1 + $0x1b60] ss:$8 sps:$4 sm:$0xff]  }
 0x2a3   :  { %7077 = vmatpush1.bf16.msra.mxu1 %v10358_v24  ;;  %v10452_v24 = vld [vmem:[%s14438_s1 + $0xb74] ss:$8 sps:$4 sm:$0xff]  }
 0x2a4   :  { %7733 = vmatpush1.bf16.msra.mxu0 %v10361_v25  ;;  %7078 = vmatprep.subr.bf16.mxu1 %v10366_v26  ;;  %v10455_v25 = vld [vmem:[%s14438_s1 + $0x1b74] ss:$8 sps:$4 sm:$0xff]   ;;  %v10450_v26 = vld [vmem:[%s14438_s1 + $0xb70] ss:$8 sps:$4 sm:$0xff]  }
 0x2a5   :  { %7734 = vmatprep.subr.bf16.mxu0 %v10369_v27  ;;  %v10453_v27 = vld [vmem:[%s14438_s1 + $0x1b70] ss:$8 sps:$4 sm:$0xff]  }
 0x2a7   :  { %7079 = vmatpush1.bf16.msra.mxu1 %v10364_v28  ;;  %v10458_v28 = vld [vmem:[%s14438_s1 + $0xb84] ss:$8 sps:$4 sm:$0xff]  }
 0x2a8   :  { %7735 = vmatpush1.bf16.msra.mxu0 %v10367_v29  ;;  %7080 = vmatprep.subr.bf16.mxu1 %v10372_v30  ;;  %v10461_v29 = vld [vmem:[%s14438_s1 + $0x1b84] ss:$8 sps:$4 sm:$0xff]   ;;  %v10456_v30 = vld [vmem:[%s14438_s1 + $0xb80] ss:$8 sps:$4 sm:$0xff]  }
 0x2a9   :  { %7736 = vmatprep.subr.bf16.mxu0 %v10375_v14  ;;  %v10459_v14 = vld [vmem:[%s14438_s1 + $0x1b80] ss:$8 sps:$4 sm:$0xff]  }
 0x2ab   :  { %7081 = vmatpush1.bf16.msra.mxu1 %v10370_v32  ;;  %v10464_v32 = vld [vmem:[%s14438_s1 + $0xb94] ss:$8 sps:$4 sm:$0xff]  }
 0x2ac   :  { %7737 = vmatpush1.bf16.msra.mxu0 %v10373_v33  ;;  %7082 = vmatprep.subr.bf16.mxu1 %v10378_v34  ;;  %v10467_v33 = vld [vmem:[%s14438_s1 + $0x1b94] ss:$8 sps:$4 sm:$0xff]   ;;  %v10462_v34 = vld [vmem:[%s14438_s1 + $0xb90] ss:$8 sps:$4 sm:$0xff]  }
 0x2ad   :  { %7738 = vmatprep.subr.bf16.mxu0 %v10381_v16  ;;  %v10465_v16 = vld [vmem:[%s14438_s1 + $0x1b90] ss:$8 sps:$4 sm:$0xff]  }
 0x2af   :  { %7083 = vmatpush1.bf16.msra.mxu1 %v10376_v56  ;;  %v10470_v56 = vld [vmem:[%s14438_s1 + $0xba4] ss:$8 sps:$4 sm:$0xff]  }
 0x2b0   :  { %7739 = vmatpush1.bf16.msra.mxu0 %v10379_v23  ;;  %7084 = vmatprep.subr.bf16.mxu1 %v10384_v20  ;;  %v10473_v23 = vld [vmem:[%s14438_s1 + $0x1ba4] ss:$8 sps:$4 sm:$0xff]   ;;  %v10468_v20 = vld [vmem:[%s14438_s1 + $0xba0] ss:$8 sps:$4 sm:$0xff]  }
 0x2b1   :  { %7740 = vmatprep.subr.bf16.mxu0 %v10387_v21  ;;  %v10471_v21 = vld [vmem:[%s14438_s1 + $0x1ba0] ss:$8 sps:$4 sm:$0xff]  }
 0x2b3   :  { %7085 = vmatpush1.bf16.msra.mxu1 %v10382_v43  ;;  %v10476_v43 = vld [vmem:[%s14438_s1 + $0xbb4] ss:$8 sps:$4 sm:$0xff]  }
 0x2b4   :  { %7741 = vmatpush1.bf16.msra.mxu0 %v10385_v12  ;;  %7086 = vmatprep.subr.bf16.mxu1 %v10390_v45  ;;  %v10479_v12 = vld [vmem:[%s14438_s1 + $0x1bb4] ss:$8 sps:$4 sm:$0xff]   ;;  %v10474_v45 = vld [vmem:[%s14438_s1 + $0xbb0] ss:$8 sps:$4 sm:$0xff]  }
 0x2b5   :  { %7742 = vmatprep.subr.bf16.mxu0 %v10393_v46  ;;  %v10477_v46 = vld [vmem:[%s14438_s1 + $0x1bb0] ss:$8 sps:$4 sm:$0xff]  }
 0x2b7   :  { %7087 = vmatpush1.bf16.msra.mxu1 %v10388_v15  ;;  %v10482_v15 = vld [vmem:[%s14438_s1 + $0xbc4] ss:$8 sps:$4 sm:$0xff]  }
 0x2b8   :  { %7743 = vmatpush1.bf16.msra.mxu0 %v10391_v31  ;;  %7088 = vmatprep.subr.bf16.mxu1 %v10396_v17  ;;  %v10485_v31 = vld [vmem:[%s14438_s1 + $0x1bc4] ss:$8 sps:$4 sm:$0xff]   ;;  %v10480_v17 = vld [vmem:[%s14438_s1 + $0xbc0] ss:$8 sps:$4 sm:$0xff]  }
 0x2b9   :  { %7744 = vmatprep.subr.bf16.mxu0 %v10399_v35  ;;  %v10483_v35 = vld [vmem:[%s14438_s1 + $0x1bc0] ss:$8 sps:$4 sm:$0xff]  }
 0x2bb   :  { %7089 = vmatpush1.bf16.msra.mxu1 %v10394_v47  ;;  %v10488_v47 = vld [vmem:[%s14438_s1 + $0xbd4] ss:$8 sps:$4 sm:$0xff]  }
 0x2bc   :  { %7745 = vmatpush1.bf16.msra.mxu0 %v10397_v48  ;;  %7090 = vmatprep.subr.bf16.mxu1 %v10402_v50  ;;  %v10491_v48 = vld [vmem:[%s14438_s1 + $0x1bd4] ss:$8 sps:$4 sm:$0xff]   ;;  %v10486_v50 = vld [vmem:[%s14438_s1 + $0xbd0] ss:$8 sps:$4 sm:$0xff]  }
 0x2bd   :  { %7746 = vmatprep.subr.bf16.mxu0 %v10405_v51  ;;  %v10489_v51 = vld [vmem:[%s14438_s1 + $0x1bd0] ss:$8 sps:$4 sm:$0xff]  }
 0x2bf   :  { %7091 = vmatpush1.bf16.msra.mxu1 %v10400_v53  ;;  %v10494_v53 = vld [vmem:[%s14438_s1 + $0xbe4] ss:$8 sps:$4 sm:$0xff]  }
 0x2c0   :  { %7747 = vmatpush1.bf16.msra.mxu0 %v10403_v36  ;;  %7101 = vmatprep.subr.bf16.mxu1 %v10409_v39  ;;  %v10497_v36 = vld [vmem:[%s14438_s1 + $0x1be4] ss:$8 sps:$4 sm:$0xff]   ;;  %v13494_v39 = vld [vmem:[%s14437_s0 + $0x18] sm:$0xff] }
 0x2c1   :  { %7757 = vmatprep.subr.bf16.mxu0 %v10413_v57  ;;  %v13499_v57 = vld [vmem:[%s14437_s0 + $0x38] sm:$0xff] }
 0x2c2   :  { %7093 = vmatmul.mubr.bf16.vlgmr.msra.gmra.mrb[0].mxu1 %v13311_v60 }
 0x2c3   :  { %7749 = vmatmul.mubr.bf16.vlgmr.msra.gmra.mrb[0].mxu0 %v13315_v61  ;;  %7102 = vmatpush1.bf16.msra.mxu1 %v10407_v40  ;;  %v10492_v40 = vld [vmem:[%s14438_s1 + $0xbe0] ss:$8 sps:$4 sm:$0xff]  }
 0x2c4   :  { %7758 = vmatpush1.bf16.msra.mxu0 %v10411_v41  ;;  %7103 = vmatprep.subr.bf16.mxu1 %v10416_v13  ;;  %v10495_v41 = vld [vmem:[%s14438_s1 + $0x1be0] ss:$8 sps:$4 sm:$0xff]   ;;  %v10500_v13 = vld [vmem:[%s14438_s1 + $0xbf4] ss:$8 sps:$4 sm:$0xff]  }
 0x2c5   :  { %7759 = vmatprep.subr.bf16.mxu0 %v10419_v44  ;;  %7133 = vmatprep.mubr.bf16.mxu1 %v1220_v62  ;;  %v10503_v44 = vld [vmem:[%s14438_s1 + $0x1bf4] ss:$8 sps:$4 sm:$0xff]   ;;  %v13515_v62 = vrot.slane %v13494_v39, %v11101_v49 }
 0x2c6   :  { %7789 = vmatprep.mubr.bf16.mxu0 %v1416_v63  ;;  %v13519_v63 = vrot.slane %v13499_v57, %v11101_v49 }
 0x2c7   :  { %7104 = vmatpush1.bf16.msra.mxu1 %v10414_v55  ;;  %v10498_v55 = vld [vmem:[%s14438_s1 + $0xbf0] ss:$8 sps:$4 sm:$0xff]  }
 0x2c8   :  { %7760 = vmatpush1.bf16.msra.mxu0 %v10417_v38  ;;  %7105 = vmatprep.subr.bf16.mxu1 %v10422_v37  ;;  %v10501_v38 = vld [vmem:[%s14438_s1 + $0x1bf0] ss:$8 sps:$4 sm:$0xff]   ;;  %v10506_v37 = vld [vmem:[%s14438_s1 + $0xc04] ss:$8 sps:$4 sm:$0xff]  }
 0x2c9   :  { %7761 = vmatprep.subr.bf16.mxu0 %v10425_v54  ;;  %v10509_v54 = vld [vmem:[%s14438_s1 + $0x1c04] ss:$8 sps:$4 sm:$0xff]  }
 0x2cb   :  { %7106 = vmatpush1.bf16.msra.mxu1 %v10420_v2  ;;  %v1236_v2 = vcombine.high %v13515_v62, %v13515_v62 }
 0x2cc   :  { %7762 = vmatpush1.bf16.msra.mxu0 %v10423_v3  ;;  %7107 = vmatprep.subr.bf16.mxu1 %v10428_v4  ;;  %v1432_v3 = vcombine.high %v13519_v63, %v13519_v63  ;;  %v1218_v4 = vcombine.high %v13311_v60, %v13311_v60  ;;  %v10515_v60 = vld [vmem:[%s14438_s1 + $0x1c14] ss:$8 sps:$4 sm:$0xff]  }
 0x2cd   :  { %7763 = vmatprep.subr.bf16.mxu0 %v10431_v5  ;;  %v1414_v5 = vcombine.high %v13315_v61, %v13315_v61  ;;  %v13554_v61 = vrot.slane %v1236_v2, %v11101_v49  ;;  %v10582_v2 = vld [vmem:[%s14438_s1 + $0xcd0] ss:$8 sps:$4 sm:$0xff]  }
 0x2cf   :  { %7108 = vmatpush1.bf16.msra.mxu1 %v10426_v6  ;;  %v10504_v6 = vld [vmem:[%s14438_s1 + $0xc00] ss:$8 sps:$4 sm:$0xff]  }
 0x2d0   :  { %7764 = vmatpush1.bf16.msra.mxu0 %v10429_v7  ;;  %7109 = vmatprep.subr.bf16.mxu1 %v10434_v8  ;;  %v10507_v7 = vld [vmem:[%s14438_s1 + $0x1c00] ss:$8 sps:$4 sm:$0xff]   ;;  %v10512_v8 = vld [vmem:[%s14438_s1 + $0xc14] ss:$8 sps:$4 sm:$0xff]  }
 0x2d1   :  { %7765 = vmatprep.subr.bf16.mxu0 %v10437_v9  ;;  %v13557_v9 = vrot.slane %v1432_v3, %v11101_v49  ;;  %v10585_v3 = vld [vmem:[%s14438_s1 + $0x1cd0] ss:$8 sps:$4 sm:$0xff]  }
 0x2d3   :  { %7110 = vmatpush1.bf16.msra.mxu1 %v10432_v10  ;;  %v10510_v10 = vld [vmem:[%s14438_s1 + $0xc10] ss:$8 sps:$4 sm:$0xff]  }
 0x2d4   :  { %7766 = vmatpush1.bf16.msra.mxu0 %v10435_v58  ;;  %7111 = vmatprep.subr.bf16.mxu1 %v10440_v18  ;;  %v10513_v58 = vld [vmem:[%s14438_s1 + $0x1c10] ss:$8 sps:$4 sm:$0xff]   ;;  %v10518_v18 = vld [vmem:[%s14438_s1 + $0xc24] ss:$8 sps:$4 sm:$0xff]  }
 0x2d5   :  { %7767 = vmatprep.subr.bf16.mxu0 %v10443_v19  ;;  %v10521_v19 = vld [vmem:[%s14438_s1 + $0x1c24] ss:$8 sps:$4 sm:$0xff]  }
 0x2d7   :  { %7112 = vmatpush1.bf16.msra.mxu1 %v10438_v0  ;;  %v10516_v0 = vld [vmem:[%s14438_s1 + $0xc20] ss:$8 sps:$4 sm:$0xff]  }
 0x2d8   :  { %7768 = vmatpush1.bf16.msra.mxu0 %v10441_v1  ;;  %7113 = vmatprep.subr.bf16.mxu1 %v10446_v22  ;;  %v10519_v1 = vld [vmem:[%s14438_s1 + $0x1c20] ss:$8 sps:$4 sm:$0xff]   ;;  %v10524_v22 = vld [vmem:[%s14438_s1 + $0xc34] ss:$8 sps:$4 sm:$0xff]  }
 0x2d9   :  { %7769 = vmatprep.subr.bf16.mxu0 %v10449_v52  ;;  %v10527_v52 = vld [vmem:[%s14438_s1 + $0x1c34] ss:$8 sps:$4 sm:$0xff]  }
 0x2db   :  { %7114 = vmatpush1.bf16.msra.mxu1 %v10444_v59  ;;  %v10522_v59 = vld [vmem:[%s14438_s1 + $0xc30] ss:$8 sps:$4 sm:$0xff]  }
 0x2dc   :  { %7770 = vmatpush1.bf16.msra.mxu0 %v10447_v11  ;;  %7115 = vmatprep.subr.bf16.mxu1 %v10452_v24  ;;  %v10525_v11 = vld [vmem:[%s14438_s1 + $0x1c30] ss:$8 sps:$4 sm:$0xff]   ;;  %v10530_v24 = vld [vmem:[%s14438_s1 + $0xc44] ss:$8 sps:$4 sm:$0xff]  }
 0x2dd   :  { %7771 = vmatprep.subr.bf16.mxu0 %v10455_v25  ;;  %v10533_v25 = vld [vmem:[%s14438_s1 + $0x1c44] ss:$8 sps:$4 sm:$0xff]  }
 0x2df   :  { %7116 = vmatpush1.bf16.msra.mxu1 %v10450_v26  ;;  %v10528_v26 = vld [vmem:[%s14438_s1 + $0xc40] ss:$8 sps:$4 sm:$0xff]  }
 0x2e0   :  { %7772 = vmatpush1.bf16.msra.mxu0 %v10453_v27  ;;  %7117 = vmatprep.subr.bf16.mxu1 %v10458_v28  ;;  %v10531_v27 = vld [vmem:[%s14438_s1 + $0x1c40] ss:$8 sps:$4 sm:$0xff]   ;;  %v10536_v28 = vld [vmem:[%s14438_s1 + $0xc54] ss:$8 sps:$4 sm:$0xff]  }
 0x2e1   :  { %7773 = vmatprep.subr.bf16.mxu0 %v10461_v29  ;;  %v10539_v29 = vld [vmem:[%s14438_s1 + $0x1c54] ss:$8 sps:$4 sm:$0xff]  }
 0x2e3   :  { %7118 = vmatpush1.bf16.msra.mxu1 %v10456_v30  ;;  %v10534_v30 = vld [vmem:[%s14438_s1 + $0xc50] ss:$8 sps:$4 sm:$0xff]  }
 0x2e4   :  { %7774 = vmatpush1.bf16.msra.mxu0 %v10459_v14  ;;  %7119 = vmatprep.subr.bf16.mxu1 %v10464_v32  ;;  %v10537_v14 = vld [vmem:[%s14438_s1 + $0x1c50] ss:$8 sps:$4 sm:$0xff]   ;;  %v10542_v32 = vld [vmem:[%s14438_s1 + $0xc64] ss:$8 sps:$4 sm:$0xff]  }
 0x2e5   :  { %7775 = vmatprep.subr.bf16.mxu0 %v10467_v33  ;;  %v10545_v33 = vld [vmem:[%s14438_s1 + $0x1c64] ss:$8 sps:$4 sm:$0xff]  }
 0x2e7   :  { %7120 = vmatpush1.bf16.msra.mxu1 %v10462_v34  ;;  %v10540_v34 = vld [vmem:[%s14438_s1 + $0xc60] ss:$8 sps:$4 sm:$0xff]  }
 0x2e8   :  { %7776 = vmatpush1.bf16.msra.mxu0 %v10465_v16  ;;  %7121 = vmatprep.subr.bf16.mxu1 %v10470_v56  ;;  %v10543_v16 = vld [vmem:[%s14438_s1 + $0x1c60] ss:$8 sps:$4 sm:$0xff]   ;;  %v10548_v56 = vld [vmem:[%s14438_s1 + $0xc74] ss:$8 sps:$4 sm:$0xff]  }
 0x2e9   :  { %7777 = vmatprep.subr.bf16.mxu0 %v10473_v23  ;;  %v10551_v23 = vld [vmem:[%s14438_s1 + $0x1c74] ss:$8 sps:$4 sm:$0xff]  }
 0x2eb   :  { %7122 = vmatpush1.bf16.msra.mxu1 %v10468_v20  ;;  %v10546_v20 = vld [vmem:[%s14438_s1 + $0xc70] ss:$8 sps:$4 sm:$0xff]  }
 0x2ec   :  { %7778 = vmatpush1.bf16.msra.mxu0 %v10471_v21  ;;  %7123 = vmatprep.subr.bf16.mxu1 %v10476_v43  ;;  %v10549_v21 = vld [vmem:[%s14438_s1 + $0x1c70] ss:$8 sps:$4 sm:$0xff]   ;;  %v10554_v43 = vld [vmem:[%s14438_s1 + $0xc84] ss:$8 sps:$4 sm:$0xff]  }
 0x2ed   :  { %7779 = vmatprep.subr.bf16.mxu0 %v10479_v12  ;;  %v10557_v12 = vld [vmem:[%s14438_s1 + $0x1c84] ss:$8 sps:$4 sm:$0xff]  }
 0x2ef   :  { %7124 = vmatpush1.bf16.msra.mxu1 %v10474_v45  ;;  %v10552_v45 = vld [vmem:[%s14438_s1 + $0xc80] ss:$8 sps:$4 sm:$0xff]  }
 0x2f0   :  { %7780 = vmatpush1.bf16.msra.mxu0 %v10477_v46  ;;  %7125 = vmatprep.subr.bf16.mxu1 %v10482_v15  ;;  %v10555_v46 = vld [vmem:[%s14438_s1 + $0x1c80] ss:$8 sps:$4 sm:$0xff]   ;;  %v10560_v15 = vld [vmem:[%s14438_s1 + $0xc94] ss:$8 sps:$4 sm:$0xff]  }
 0x2f1   :  { %7781 = vmatprep.subr.bf16.mxu0 %v10485_v31  ;;  %v10563_v31 = vld [vmem:[%s14438_s1 + $0x1c94] ss:$8 sps:$4 sm:$0xff]  }
 0x2f3   :  { %7126 = vmatpush1.bf16.msra.mxu1 %v10480_v17  ;;  %v10558_v17 = vld [vmem:[%s14438_s1 + $0xc90] ss:$8 sps:$4 sm:$0xff]  }
 0x2f4   :  { %7782 = vmatpush1.bf16.msra.mxu0 %v10483_v35  ;;  %7127 = vmatprep.subr.bf16.mxu1 %v10488_v47  ;;  %v10561_v35 = vld [vmem:[%s14438_s1 + $0x1c90] ss:$8 sps:$4 sm:$0xff]   ;;  %v10566_v47 = vld [vmem:[%s14438_s1 + $0xca4] ss:$8 sps:$4 sm:$0xff]  }
 0x2f5   :  { %7783 = vmatprep.subr.bf16.mxu0 %v10491_v48  ;;  %v10569_v48 = vld [vmem:[%s14438_s1 + $0x1ca4] ss:$8 sps:$4 sm:$0xff]  }
 0x2f7   :  { %7128 = vmatpush1.bf16.msra.mxu1 %v10486_v50  ;;  %v10564_v50 = vld [vmem:[%s14438_s1 + $0xca0] ss:$8 sps:$4 sm:$0xff]  }
 0x2f8   :  { %7784 = vmatpush1.bf16.msra.mxu0 %v10489_v51  ;;  %7129 = vmatprep.subr.bf16.mxu1 %v10494_v53  ;;  %v10567_v51 = vld [vmem:[%s14438_s1 + $0x1ca0] ss:$8 sps:$4 sm:$0xff]   ;;  %v10572_v53 = vld [vmem:[%s14438_s1 + $0xcb4] ss:$8 sps:$4 sm:$0xff]  }
 0x2f9   :  { %7785 = vmatprep.subr.bf16.mxu0 %v10497_v36  ;;  %v10575_v36 = vld [vmem:[%s14438_s1 + $0x1cb4] ss:$8 sps:$4 sm:$0xff]  }
 0x2fb   :  { %7130 = vmatpush1.bf16.msra.mxu1 %v10492_v40  ;;  %v10570_v40 = vld [vmem:[%s14438_s1 + $0xcb0] ss:$8 sps:$4 sm:$0xff]  }
 0x2fc   :  { %7786 = vmatpush1.bf16.msra.mxu0 %v10495_v41  ;;  %7131 = vmatprep.subr.bf16.mxu1 %v10500_v13  ;;  %v10573_v41 = vld [vmem:[%s14438_s1 + $0x1cb0] ss:$8 sps:$4 sm:$0xff]   ;;  %v10578_v13 = vld [vmem:[%s14438_s1 + $0xcc4] ss:$8 sps:$4 sm:$0xff]  }
 0x2fd   :  { %7787 = vmatprep.subr.bf16.mxu0 %v10503_v44  ;;  %v10581_v44 = vld [vmem:[%s14438_s1 + $0x1cc4] ss:$8 sps:$4 sm:$0xff]  }
 0x2ff   :  { %7132 = vmatpush1.bf16.msra.mxu1 %v10498_v55  ;;  %v10576_v55 = vld [vmem:[%s14438_s1 + $0xcc0] ss:$8 sps:$4 sm:$0xff]  }
 0x300   :  { %7788 = vmatpush1.bf16.msra.mxu0 %v10501_v38  ;;  %7142 = vmatprep.subr.bf16.mxu1 %v10506_v37  ;;  %v10579_v38 = vld [vmem:[%s14438_s1 + $0x1cc0] ss:$8 sps:$4 sm:$0xff]   ;;  %v10584_v37 = vld [vmem:[%s14438_s1 + $0xcd4] ss:$8 sps:$4 sm:$0xff]  }
 0x301   :  { %7798 = vmatprep.subr.bf16.mxu0 %v10509_v54  ;;  %v10587_v54 = vld [vmem:[%s14438_s1 + $0x1cd4] ss:$8 sps:$4 sm:$0xff]  }
 0x302   :  { %7134 = vmatmul.mubr.bf16.vlgmr.msra.gmra.mrb[0].mxu1 %v1218_v4  ;;  %v10590_v4 = vld [vmem:[%s14438_s1 + $0xce4] ss:$8 sps:$4 sm:$0xff]  }
 0x303   :  { %7790 = vmatmul.mubr.bf16.vlgmr.msra.gmra.mrb[0].mxu0 %v1414_v5  ;;  %7143 = vmatpush1.bf16.msra.mxu1 %v10504_v6  ;;  %v10593_v5 = vld [vmem:[%s14438_s1 + $0x1ce4] ss:$8 sps:$4 sm:$0xff]   ;;  %v10588_v6 = vld [vmem:[%s14438_s1 + $0xce0] ss:$8 sps:$4 sm:$0xff]  }
 0x304   :  { %7799 = vmatpush1.bf16.msra.mxu0 %v10507_v7  ;;  %7144 = vmatprep.subr.bf16.mxu1 %v10512_v8  ;;  %v10591_v7 = vld [vmem:[%s14438_s1 + $0x1ce0] ss:$8 sps:$4 sm:$0xff]   ;;  %v10596_v8 = vld [vmem:[%s14438_s1 + $0xcf4] ss:$8 sps:$4 sm:$0xff]  }
 0x305   :  { %7800 = vmatprep.subr.bf16.mxu0 %v10515_v60  ;;  %7174 = vmatprep.mubr.bf16.mxu1 %v13554_v61  ;;  %v10599_v60 = vld [vmem:[%s14438_s1 + $0x1cf4] ss:$8 sps:$4 sm:$0xff]  }
 0x306   :  { %7830 = vmatprep.mubr.bf16.mxu0 %v13557_v9 }
 0x307   :  { %7145 = vmatpush1.bf16.msra.mxu1 %v10510_v10  ;;  %v10594_v10 = vld [vmem:[%s14438_s1 + $0xcf0] ss:$8 sps:$4 sm:$0xff]  }
 0x308   :  { %7801 = vmatpush1.bf16.msra.mxu0 %v10513_v58  ;;  %7146 = vmatprep.subr.bf16.mxu1 %v10518_v18  ;;  %v10597_v58 = vld [vmem:[%s14438_s1 + $0x1cf0] ss:$8 sps:$4 sm:$0xff]   ;;  %v10602_v18 = vld [vmem:[%s14438_s1 + $0xd04] ss:$8 sps:$4 sm:$0xff]  }
 0x309   :  { %7802 = vmatprep.subr.bf16.mxu0 %v10521_v19  ;;  %v10605_v19 = vld [vmem:[%s14438_s1 + $0x1d04] ss:$8 sps:$4 sm:$0xff]  }
 0x30b   :  { %7147 = vmatpush1.bf16.msra.mxu1 %v10516_v0  ;;  %v13743_v0 = vrot.slane %v13515_v62, %v11101_v49  ;;  %v10608_v62 = vld [vmem:[%s14438_s1 + $0xd14] ss:$8 sps:$4 sm:$0xff]  }
 0x30c   :  { %7803 = vmatpush1.bf16.msra.mxu0 %v10519_v1  ;;  %7148 = vmatprep.subr.bf16.mxu1 %v10524_v22  ;;  %v13747_v1 = vrot.slane %v13519_v63, %v11101_v49  ;;  %v10600_v22 = vld [vmem:[%s14438_s1 + $0xd00] ss:$8 sps:$4 sm:$0xff]   ;;  %v10611_v63 = vld [vmem:[%s14438_s1 + $0x1d14] ss:$8 sps:$4 sm:$0xff]  }
 0x30d   :  { %7804 = vmatprep.subr.bf16.mxu0 %v10527_v52  ;;  %v10603_v52 = vld [vmem:[%s14438_s1 + $0x1d00] ss:$8 sps:$4 sm:$0xff]  }
 0x30f   :  { %7149 = vmatpush1.bf16.msra.mxu1 %v10522_v59  ;;  %v1268_v59 = vcombine.high %v13554_v61, %v13554_v61  ;;  %v10614_v61 = vld [vmem:[%s14438_s1 + $0xd24] ss:$8 sps:$4 sm:$0xff]  }
 0x310   :  { %7805 = vmatpush1.bf16.msra.mxu0 %v10525_v11  ;;  %7150 = vmatprep.subr.bf16.mxu1 %v10530_v24  ;;  %v1464_v11 = vcombine.high %v13557_v9, %v13557_v9  ;;  %v10606_v24 = vld [vmem:[%s14438_s1 + $0xd10] ss:$8 sps:$4 sm:$0xff]   ;;  %v10617_v9 = vld [vmem:[%s14438_s1 + $0x1d24] ss:$8 sps:$4 sm:$0xff]  }
 0x311   :  { %7806 = vmatprep.subr.bf16.mxu0 %v10533_v25  ;;  %v10609_v25 = vld [vmem:[%s14438_s1 + $0x1d10] ss:$8 sps:$4 sm:$0xff]  }
 0x313   :  { %7151 = vmatpush1.bf16.msra.mxu1 %v10528_v26  ;;  %v10612_v26 = vld [vmem:[%s14438_s1 + $0xd20] ss:$8 sps:$4 sm:$0xff]  }
 0x314   :  { %7807 = vmatpush1.bf16.msra.mxu0 %v10531_v27  ;;  %7152 = vmatprep.subr.bf16.mxu1 %v10536_v28  ;;  %v10615_v27 = vld [vmem:[%s14438_s1 + $0x1d20] ss:$8 sps:$4 sm:$0xff]   ;;  %v10620_v28 = vld [vmem:[%s14438_s1 + $0xd34] ss:$8 sps:$4 sm:$0xff]  }
 0x315   :  { %7808 = vmatprep.subr.bf16.mxu0 %v10539_v29  ;;  %v10623_v29 = vld [vmem:[%s14438_s1 + $0x1d34] ss:$8 sps:$4 sm:$0xff]  }
 0x317   :  { %7153 = vmatpush1.bf16.msra.mxu1 %v10534_v30  ;;  %v10618_v30 = vld [vmem:[%s14438_s1 + $0xd30] ss:$8 sps:$4 sm:$0xff]  }
 0x318   :  { %7809 = vmatpush1.bf16.msra.mxu0 %v10537_v14  ;;  %7154 = vmatprep.subr.bf16.mxu1 %v10542_v32  ;;  %v10621_v14 = vld [vmem:[%s14438_s1 + $0x1d30] ss:$8 sps:$4 sm:$0xff]   ;;  %v10626_v32 = vld [vmem:[%s14438_s1 + $0xd44] ss:$8 sps:$4 sm:$0xff]  }
 0x319   :  { %7810 = vmatprep.subr.bf16.mxu0 %v10545_v33  ;;  %v10629_v33 = vld [vmem:[%s14438_s1 + $0x1d44] ss:$8 sps:$4 sm:$0xff]  }
 0x31b   :  { %7155 = vmatpush1.bf16.msra.mxu1 %v10540_v34  ;;  %v10624_v34 = vld [vmem:[%s14438_s1 + $0xd40] ss:$8 sps:$4 sm:$0xff]  }
 0x31c   :  { %7811 = vmatpush1.bf16.msra.mxu0 %v10543_v16  ;;  %7156 = vmatprep.subr.bf16.mxu1 %v10548_v56  ;;  %v10627_v16 = vld [vmem:[%s14438_s1 + $0x1d40] ss:$8 sps:$4 sm:$0xff]   ;;  %v10632_v56 = vld [vmem:[%s14438_s1 + $0xd54] ss:$8 sps:$4 sm:$0xff]  }
 0x31d   :  { %7812 = vmatprep.subr.bf16.mxu0 %v10551_v23  ;;  %v10635_v23 = vld [vmem:[%s14438_s1 + $0x1d54] ss:$8 sps:$4 sm:$0xff]  }
 0x31f   :  { %7157 = vmatpush1.bf16.msra.mxu1 %v10546_v20  ;;  %v10630_v20 = vld [vmem:[%s14438_s1 + $0xd50] ss:$8 sps:$4 sm:$0xff]  }
 0x320   :  { %7813 = vmatpush1.bf16.msra.mxu0 %v10549_v21  ;;  %7158 = vmatprep.subr.bf16.mxu1 %v10554_v43  ;;  %v10633_v21 = vld [vmem:[%s14438_s1 + $0x1d50] ss:$8 sps:$4 sm:$0xff]   ;;  %v10638_v43 = vld [vmem:[%s14438_s1 + $0xd64] ss:$8 sps:$4 sm:$0xff]  }
 0x321   :  { %7814 = vmatprep.subr.bf16.mxu0 %v10557_v12  ;;  %v10641_v12 = vld [vmem:[%s14438_s1 + $0x1d64] ss:$8 sps:$4 sm:$0xff]  }
 0x323   :  { %7159 = vmatpush1.bf16.msra.mxu1 %v10552_v45  ;;  %v10636_v45 = vld [vmem:[%s14438_s1 + $0xd60] ss:$8 sps:$4 sm:$0xff]  }
 0x324   :  { %7815 = vmatpush1.bf16.msra.mxu0 %v10555_v46  ;;  %7160 = vmatprep.subr.bf16.mxu1 %v10560_v15  ;;  %v10639_v46 = vld [vmem:[%s14438_s1 + $0x1d60] ss:$8 sps:$4 sm:$0xff]   ;;  %v10644_v15 = vld [vmem:[%s14438_s1 + $0xd74] ss:$8 sps:$4 sm:$0xff]  }
 0x325   :  { %7816 = vmatprep.subr.bf16.mxu0 %v10563_v31  ;;  %v10647_v31 = vld [vmem:[%s14438_s1 + $0x1d74] ss:$8 sps:$4 sm:$0xff]  }
 0x327   :  { %7161 = vmatpush1.bf16.msra.mxu1 %v10558_v17  ;;  %v10642_v17 = vld [vmem:[%s14438_s1 + $0xd70] ss:$8 sps:$4 sm:$0xff]  }
 0x328   :  { %7817 = vmatpush1.bf16.msra.mxu0 %v10561_v35  ;;  %7162 = vmatprep.subr.bf16.mxu1 %v10566_v47  ;;  %v10645_v35 = vld [vmem:[%s14438_s1 + $0x1d70] ss:$8 sps:$4 sm:$0xff]   ;;  %v10650_v47 = vld [vmem:[%s14438_s1 + $0xd84] ss:$8 sps:$4 sm:$0xff]  }
 0x329   :  { %7818 = vmatprep.subr.bf16.mxu0 %v10569_v48  ;;  %v10653_v48 = vld [vmem:[%s14438_s1 + $0x1d84] ss:$8 sps:$4 sm:$0xff]  }
 0x32b   :  { %7163 = vmatpush1.bf16.msra.mxu1 %v10564_v50  ;;  %v10648_v50 = vld [vmem:[%s14438_s1 + $0xd80] ss:$8 sps:$4 sm:$0xff]  }
 0x32c   :  { %7819 = vmatpush1.bf16.msra.mxu0 %v10567_v51  ;;  %7164 = vmatprep.subr.bf16.mxu1 %v10572_v53  ;;  %v10651_v51 = vld [vmem:[%s14438_s1 + $0x1d80] ss:$8 sps:$4 sm:$0xff]   ;;  %v10656_v53 = vld [vmem:[%s14438_s1 + $0xd94] ss:$8 sps:$4 sm:$0xff]  }
 0x32d   :  { %7820 = vmatprep.subr.bf16.mxu0 %v10575_v36  ;;  %v10659_v36 = vld [vmem:[%s14438_s1 + $0x1d94] ss:$8 sps:$4 sm:$0xff]  }
 0x32f   :  { %7165 = vmatpush1.bf16.msra.mxu1 %v10570_v40  ;;  %v10654_v40 = vld [vmem:[%s14438_s1 + $0xd90] ss:$8 sps:$4 sm:$0xff]  }
 0x330   :  { %7821 = vmatpush1.bf16.msra.mxu0 %v10573_v41  ;;  %7166 = vmatprep.subr.bf16.mxu1 %v10578_v13  ;;  %v10657_v41 = vld [vmem:[%s14438_s1 + $0x1d90] ss:$8 sps:$4 sm:$0xff]   ;;  %v10662_v13 = vld [vmem:[%s14438_s1 + $0xda4] ss:$8 sps:$4 sm:$0xff]  }
 0x331   :  { %7822 = vmatprep.subr.bf16.mxu0 %v10581_v44  ;;  %v10665_v44 = vld [vmem:[%s14438_s1 + $0x1da4] ss:$8 sps:$4 sm:$0xff]  }
 0x333   :  { %7167 = vmatpush1.bf16.msra.mxu1 %v10576_v55  ;;  %v10660_v55 = vld [vmem:[%s14438_s1 + $0xda0] ss:$8 sps:$4 sm:$0xff]  }
 0x334   :  { %7823 = vmatpush1.bf16.msra.mxu0 %v10579_v38  ;;  %7168 = vmatprep.subr.bf16.mxu1 %v10584_v37  ;;  %v10663_v38 = vld [vmem:[%s14438_s1 + $0x1da0] ss:$8 sps:$4 sm:$0xff]   ;;  %v10668_v37 = vld [vmem:[%s14438_s1 + $0xdb4] ss:$8 sps:$4 sm:$0xff]  }
 0x335   :  { %7824 = vmatprep.subr.bf16.mxu0 %v10587_v54  ;;  %v10671_v54 = vld [vmem:[%s14438_s1 + $0x1db4] ss:$8 sps:$4 sm:$0xff]  }
 0x337   :  { %7169 = vmatpush1.bf16.msra.mxu1 %v10582_v2  ;;  %v10666_v2 = vld [vmem:[%s14438_s1 + $0xdb0] ss:$8 sps:$4 sm:$0xff]  }
 0x338   :  { %7825 = vmatpush1.bf16.msra.mxu0 %v10585_v3  ;;  %7170 = vmatprep.subr.bf16.mxu1 %v10590_v4  ;;  %v10669_v3 = vld [vmem:[%s14438_s1 + $0x1db0] ss:$8 sps:$4 sm:$0xff]   ;;  %v10674_v4 = vld [vmem:[%s14438_s1 + $0xdc4] ss:$8 sps:$4 sm:$0xff]  }
 0x339   :  { %7826 = vmatprep.subr.bf16.mxu0 %v10593_v5  ;;  %v10677_v5 = vld [vmem:[%s14438_s1 + $0x1dc4] ss:$8 sps:$4 sm:$0xff]  }
 0x33b   :  { %7171 = vmatpush1.bf16.msra.mxu1 %v10588_v6  ;;  %v10672_v6 = vld [vmem:[%s14438_s1 + $0xdc0] ss:$8 sps:$4 sm:$0xff]  }
 0x33c   :  { %7827 = vmatpush1.bf16.msra.mxu0 %v10591_v7  ;;  %7172 = vmatprep.subr.bf16.mxu1 %v10596_v8  ;;  %v10675_v7 = vld [vmem:[%s14438_s1 + $0x1dc0] ss:$8 sps:$4 sm:$0xff]   ;;  %v10680_v8 = vld [vmem:[%s14438_s1 + $0xdd4] ss:$8 sps:$4 sm:$0xff]  }
 0x33d   :  { %7828 = vmatprep.subr.bf16.mxu0 %v10599_v60  ;;  %v10683_v60 = vld [vmem:[%s14438_s1 + $0x1dd4] ss:$8 sps:$4 sm:$0xff]  }
 0x33f   :  { %7173 = vmatpush1.bf16.msra.mxu1 %v10594_v10  ;;  %v10678_v10 = vld [vmem:[%s14438_s1 + $0xdd0] ss:$8 sps:$4 sm:$0xff]  }
 0x340   :  { %7829 = vmatpush1.bf16.msra.mxu0 %v10597_v58  ;;  %7183 = vmatprep.subr.bf16.mxu1 %v10602_v18  ;;  %v10681_v58 = vld [vmem:[%s14438_s1 + $0x1dd0] ss:$8 sps:$4 sm:$0xff]   ;;  %v10686_v18 = vld [vmem:[%s14438_s1 + $0xde4] ss:$8 sps:$4 sm:$0xff]  }
 0x341   :  { %7839 = vmatprep.subr.bf16.mxu0 %v10605_v19  ;;  %v10689_v19 = vld [vmem:[%s14438_s1 + $0x1de4] ss:$8 sps:$4 sm:$0xff]  }
 0x342   :  { %7175 = vmatmul.mubr.bf16.vlgmr.msra.gmra.mrb[0].mxu1 %v13743_v0 }
 0x343   :  { %7831 = vmatmul.mubr.bf16.vlgmr.msra.gmra.mrb[0].mxu0 %v13747_v1  ;;  %7184 = vmatpush1.bf16.msra.mxu1 %v10600_v22  ;;  %v1221_v22 = vcombine.high %v13494_v39, %v13494_v39  ;;  %v10695_v39 = vld [vmem:[%s14438_s1 + $0x1df4] ss:$8 sps:$4 sm:$0xff]  }
 0x344   :  { %7840 = vmatpush1.bf16.msra.mxu0 %v10603_v52  ;;  %7185 = vmatprep.subr.bf16.mxu1 %v10608_v62  ;;  %v1417_v52 = vcombine.high %v13499_v57, %v13499_v57  ;;  %v10684_v62 = vld [vmem:[%s14438_s1 + $0xde0] ss:$8 sps:$4 sm:$0xff]  }
 0x345   :  { %7841 = vmatprep.subr.bf16.mxu0 %v10611_v63  ;;  %7215 = vmatprep.mubr.bf16.mxu1 %v1268_v59  ;;  %v10687_v63 = vld [vmem:[%s14438_s1 + $0x1de0] ss:$8 sps:$4 sm:$0xff]   ;;  %v10692_v59 = vld [vmem:[%s14438_s1 + $0xdf4] ss:$8 sps:$4 sm:$0xff]   ;;  %v13940_v57 = vrot.slane %v1221_v22, %v11101_v49  ;;  %v10762_v22 = vld [vmem:[%s14438_s1 + $0xeb0] ss:$8 sps:$4 sm:$0xff]  }
 0x346   :  { %7871 = vmatprep.mubr.bf16.mxu0 %v1464_v11  ;;  %v13943_v11 = vrot.slane %v1417_v52, %v11101_v49  ;;  %v10765_v52 = vld [vmem:[%s14438_s1 + $0x1eb0] ss:$8 sps:$4 sm:$0xff]  }
 0x347   :  { %7186 = vmatpush1.bf16.msra.mxu1 %v10606_v24  ;;  %v10690_v24 = vld [vmem:[%s14438_s1 + $0xdf0] ss:$8 sps:$4 sm:$0xff]  }
 0x348   :  { %7842 = vmatpush1.bf16.msra.mxu0 %v10609_v25  ;;  %7187 = vmatprep.subr.bf16.mxu1 %v10614_v61  ;;  %v10693_v25 = vld [vmem:[%s14438_s1 + $0x1df0] ss:$8 sps:$4 sm:$0xff]   ;;  %v10698_v61 = vld [vmem:[%s14438_s1 + $0xe04] ss:$8 sps:$4 sm:$0xff]  }
 0x349   :  { %7843 = vmatprep.subr.bf16.mxu0 %v10617_v9  ;;  %v10701_v9 = vld [vmem:[%s14438_s1 + $0x1e04] ss:$8 sps:$4 sm:$0xff]  }
 0x34b   :  { %7188 = vmatpush1.bf16.msra.mxu1 %v10612_v26  ;;  %v1237_v26 = vcombine.high %v13940_v57, %v13940_v57 }
 0x34c   :  { %7844 = vmatpush1.bf16.msra.mxu0 %v10615_v27  ;;  %7189 = vmatprep.subr.bf16.mxu1 %v10620_v28  ;;  %v1433_v27 = vcombine.high %v13943_v11, %v13943_v11  ;;  %v1266_v28 = vcombine.high %v13743_v0, %v13743_v0  ;;  %v10707_v0 = vld [vmem:[%s14438_s1 + $0x1e14] ss:$8 sps:$4 sm:$0xff]  }
 0x34d   :  { %7845 = vmatprep.subr.bf16.mxu0 %v10623_v29  ;;  %v1462_v29 = vcombine.high %v13747_v1, %v13747_v1  ;;  %v13978_v1 = vrot.slane %v1237_v26, %v11101_v49  ;;  %v10782_v26 = vld [vmem:[%s14438_s1 + $0xee4] ss:$8 sps:$4 sm:$0xff]  }
 0x34f   :  { %7190 = vmatpush1.bf16.msra.mxu1 %v10618_v30  ;;  %v10696_v30 = vld [vmem:[%s14438_s1 + $0xe00] ss:$8 sps:$4 sm:$0xff]  }
 0x350   :  { %7846 = vmatpush1.bf16.msra.mxu0 %v10621_v14  ;;  %7191 = vmatprep.subr.bf16.mxu1 %v10626_v32  ;;  %v10699_v14 = vld [vmem:[%s14438_s1 + $0x1e00] ss:$8 sps:$4 sm:$0xff]   ;;  %v10704_v32 = vld [vmem:[%s14438_s1 + $0xe14] ss:$8 sps:$4 sm:$0xff]  }
 0x351   :  { %7847 = vmatprep.subr.bf16.mxu0 %v10629_v33  ;;  %v13981_v33 = vrot.slane %v1433_v27, %v11101_v49  ;;  %v10785_v27 = vld [vmem:[%s14438_s1 + $0x1ee4] ss:$8 sps:$4 sm:$0xff]  }
 0x353   :  { %7192 = vmatpush1.bf16.msra.mxu1 %v10624_v34  ;;  %v10702_v34 = vld [vmem:[%s14438_s1 + $0xe10] ss:$8 sps:$4 sm:$0xff]  }
 0x354   :  { %7848 = vmatpush1.bf16.msra.mxu0 %v10627_v16  ;;  %7193 = vmatprep.subr.bf16.mxu1 %v10632_v56  ;;  %v10705_v16 = vld [vmem:[%s14438_s1 + $0x1e10] ss:$8 sps:$4 sm:$0xff]   ;;  %v10710_v56 = vld [vmem:[%s14438_s1 + $0xe24] ss:$8 sps:$4 sm:$0xff]  }
 0x355   :  { %7849 = vmatprep.subr.bf16.mxu0 %v10635_v23  ;;  %v10713_v23 = vld [vmem:[%s14438_s1 + $0x1e24] ss:$8 sps:$4 sm:$0xff]  }
 0x357   :  { %7194 = vmatpush1.bf16.msra.mxu1 %v10630_v20  ;;  %v10708_v20 = vld [vmem:[%s14438_s1 + $0xe20] ss:$8 sps:$4 sm:$0xff]  }
 0x358   :  { %7850 = vmatpush1.bf16.msra.mxu0 %v10633_v21  ;;  %7195 = vmatprep.subr.bf16.mxu1 %v10638_v43  ;;  %v10711_v21 = vld [vmem:[%s14438_s1 + $0x1e20] ss:$8 sps:$4 sm:$0xff]   ;;  %v10716_v43 = vld [vmem:[%s14438_s1 + $0xe34] ss:$8 sps:$4 sm:$0xff]  }
 0x359   :  { %7851 = vmatprep.subr.bf16.mxu0 %v10641_v12  ;;  %v10719_v12 = vld [vmem:[%s14438_s1 + $0x1e34] ss:$8 sps:$4 sm:$0xff]  }
 0x35b   :  { %7196 = vmatpush1.bf16.msra.mxu1 %v10636_v45  ;;  %v10714_v45 = vld [vmem:[%s14438_s1 + $0xe30] ss:$8 sps:$4 sm:$0xff]  }
 0x35c   :  { %7852 = vmatpush1.bf16.msra.mxu0 %v10639_v46  ;;  %7197 = vmatprep.subr.bf16.mxu1 %v10644_v15  ;;  %v10717_v46 = vld [vmem:[%s14438_s1 + $0x1e30] ss:$8 sps:$4 sm:$0xff]   ;;  %v10722_v15 = vld [vmem:[%s14438_s1 + $0xe44] ss:$8 sps:$4 sm:$0xff]  }
 0x35d   :  { %7853 = vmatprep.subr.bf16.mxu0 %v10647_v31  ;;  %v10725_v31 = vld [vmem:[%s14438_s1 + $0x1e44] ss:$8 sps:$4 sm:$0xff]  }
 0x35f   :  { %7198 = vmatpush1.bf16.msra.mxu1 %v10642_v17  ;;  %v10720_v17 = vld [vmem:[%s14438_s1 + $0xe40] ss:$8 sps:$4 sm:$0xff]  }
 0x360   :  { %7854 = vmatpush1.bf16.msra.mxu0 %v10645_v35  ;;  %7199 = vmatprep.subr.bf16.mxu1 %v10650_v47  ;;  %v10723_v35 = vld [vmem:[%s14438_s1 + $0x1e40] ss:$8 sps:$4 sm:$0xff]   ;;  %v10728_v47 = vld [vmem:[%s14438_s1 + $0xe54] ss:$8 sps:$4 sm:$0xff]  }
 0x361   :  { %7855 = vmatprep.subr.bf16.mxu0 %v10653_v48  ;;  %v10731_v48 = vld [vmem:[%s14438_s1 + $0x1e54] ss:$8 sps:$4 sm:$0xff]  }
 0x363   :  { %7200 = vmatpush1.bf16.msra.mxu1 %v10648_v50  ;;  %v10726_v50 = vld [vmem:[%s14438_s1 + $0xe50] ss:$8 sps:$4 sm:$0xff]  }
 0x364   :  { %7856 = vmatpush1.bf16.msra.mxu0 %v10651_v51  ;;  %7201 = vmatprep.subr.bf16.mxu1 %v10656_v53  ;;  %v10729_v51 = vld [vmem:[%s14438_s1 + $0x1e50] ss:$8 sps:$4 sm:$0xff]   ;;  %v10734_v53 = vld [vmem:[%s14438_s1 + $0xe64] ss:$8 sps:$4 sm:$0xff]  }
 0x365   :  { %7857 = vmatprep.subr.bf16.mxu0 %v10659_v36  ;;  %v10737_v36 = vld [vmem:[%s14438_s1 + $0x1e64] ss:$8 sps:$4 sm:$0xff]  }
 0x367   :  { %7202 = vmatpush1.bf16.msra.mxu1 %v10654_v40  ;;  %v10732_v40 = vld [vmem:[%s14438_s1 + $0xe60] ss:$8 sps:$4 sm:$0xff]  }
 0x368   :  { %7858 = vmatpush1.bf16.msra.mxu0 %v10657_v41  ;;  %7203 = vmatprep.subr.bf16.mxu1 %v10662_v13  ;;  %v10735_v41 = vld [vmem:[%s14438_s1 + $0x1e60] ss:$8 sps:$4 sm:$0xff]   ;;  %v10740_v13 = vld [vmem:[%s14438_s1 + $0xe74] ss:$8 sps:$4 sm:$0xff]  }
 0x369   :  { %7859 = vmatprep.subr.bf16.mxu0 %v10665_v44  ;;  %v10743_v44 = vld [vmem:[%s14438_s1 + $0x1e74] ss:$8 sps:$4 sm:$0xff]  }
 0x36b   :  { %7204 = vmatpush1.bf16.msra.mxu1 %v10660_v55  ;;  %v10738_v55 = vld [vmem:[%s14438_s1 + $0xe70] ss:$8 sps:$4 sm:$0xff]  }
 0x36c   :  { %7860 = vmatpush1.bf16.msra.mxu0 %v10663_v38  ;;  %7205 = vmatprep.subr.bf16.mxu1 %v10668_v37  ;;  %v10741_v38 = vld [vmem:[%s14438_s1 + $0x1e70] ss:$8 sps:$4 sm:$0xff]   ;;  %v10746_v37 = vld [vmem:[%s14438_s1 + $0xe84] ss:$8 sps:$4 sm:$0xff]  }
 0x36d   :  { %7861 = vmatprep.subr.bf16.mxu0 %v10671_v54  ;;  %v10749_v54 = vld [vmem:[%s14438_s1 + $0x1e84] ss:$8 sps:$4 sm:$0xff]  }
 0x36f   :  { %7206 = vmatpush1.bf16.msra.mxu1 %v10666_v2  ;;  %v10744_v2 = vld [vmem:[%s14438_s1 + $0xe80] ss:$8 sps:$4 sm:$0xff]  }
 0x370   :  { %7862 = vmatpush1.bf16.msra.mxu0 %v10669_v3  ;;  %7207 = vmatprep.subr.bf16.mxu1 %v10674_v4  ;;  %v10747_v3 = vld [vmem:[%s14438_s1 + $0x1e80] ss:$8 sps:$4 sm:$0xff]   ;;  %v10752_v4 = vld [vmem:[%s14438_s1 + $0xe94] ss:$8 sps:$4 sm:$0xff]  }
 0x371   :  { %7863 = vmatprep.subr.bf16.mxu0 %v10677_v5  ;;  %v10755_v5 = vld [vmem:[%s14438_s1 + $0x1e94] ss:$8 sps:$4 sm:$0xff]  }
 0x373   :  { %7208 = vmatpush1.bf16.msra.mxu1 %v10672_v6  ;;  %v10750_v6 = vld [vmem:[%s14438_s1 + $0xe90] ss:$8 sps:$4 sm:$0xff]  }
 0x374   :  { %7864 = vmatpush1.bf16.msra.mxu0 %v10675_v7  ;;  %7209 = vmatprep.subr.bf16.mxu1 %v10680_v8  ;;  %v10753_v7 = vld [vmem:[%s14438_s1 + $0x1e90] ss:$8 sps:$4 sm:$0xff]   ;;  %v10758_v8 = vld [vmem:[%s14438_s1 + $0xea4] ss:$8 sps:$4 sm:$0xff]  }
 0x375   :  { %7865 = vmatprep.subr.bf16.mxu0 %v10683_v60  ;;  %v10761_v60 = vld [vmem:[%s14438_s1 + $0x1ea4] ss:$8 sps:$4 sm:$0xff]  }
 0x377   :  { %7210 = vmatpush1.bf16.msra.mxu1 %v10678_v10  ;;  %v10756_v10 = vld [vmem:[%s14438_s1 + $0xea0] ss:$8 sps:$4 sm:$0xff]  }
 0x378   :  { %7866 = vmatpush1.bf16.msra.mxu0 %v10681_v58  ;;  %7211 = vmatprep.subr.bf16.mxu1 %v10686_v18  ;;  %v10759_v58 = vld [vmem:[%s14438_s1 + $0x1ea0] ss:$8 sps:$4 sm:$0xff]   ;;  %v10764_v18 = vld [vmem:[%s14438_s1 + $0xeb4] ss:$8 sps:$4 sm:$0xff]  }
 0x379   :  { %7867 = vmatprep.subr.bf16.mxu0 %v10689_v19  ;;  %v10767_v19 = vld [vmem:[%s14438_s1 + $0x1eb4] ss:$8 sps:$4 sm:$0xff]  }
 0x37b   :  { %7212 = vmatpush1.bf16.msra.mxu1 %v10684_v62  ;;  %v10770_v62 = vld [vmem:[%s14438_s1 + $0xec4] ss:$8 sps:$4 sm:$0xff]  }
 0x37c   :  { %7868 = vmatpush1.bf16.msra.mxu0 %v10687_v63  ;;  %7213 = vmatprep.subr.bf16.mxu1 %v10692_v59  ;;  %v10773_v63 = vld [vmem:[%s14438_s1 + $0x1ec4] ss:$8 sps:$4 sm:$0xff]   ;;  %v10768_v59 = vld [vmem:[%s14438_s1 + $0xec0] ss:$8 sps:$4 sm:$0xff]  }
 0x37d   :  { %7869 = vmatprep.subr.bf16.mxu0 %v10695_v39  ;;  %v10771_v39 = vld [vmem:[%s14438_s1 + $0x1ec0] ss:$8 sps:$4 sm:$0xff]  }
 0x37f   :  { %7214 = vmatpush1.bf16.msra.mxu1 %v10690_v24  ;;  %v10776_v24 = vld [vmem:[%s14438_s1 + $0xed4] ss:$8 sps:$4 sm:$0xff]  }
 0x380   :  { %7870 = vmatpush1.bf16.msra.mxu0 %v10693_v25  ;;  %7224 = vmatprep.subr.bf16.mxu1 %v10698_v61  ;;  %v10779_v25 = vld [vmem:[%s14438_s1 + $0x1ed4] ss:$8 sps:$4 sm:$0xff]   ;;  %v10774_v61 = vld [vmem:[%s14438_s1 + $0xed0] ss:$8 sps:$4 sm:$0xff]  }
 0x381   :  { %7880 = vmatprep.subr.bf16.mxu0 %v10701_v9  ;;  %v10777_v9 = vld [vmem:[%s14438_s1 + $0x1ed0] ss:$8 sps:$4 sm:$0xff]  }
 0x382   :  { %7216 = vmatmul.mubr.bf16.vlgmr.msra.gmra.mrb[0].mxu1 %v1266_v28  ;;  %v10780_v28 = vld [vmem:[%s14438_s1 + $0xee0] ss:$8 sps:$4 sm:$0xff]  }
 0x383   :  { %7872 = vmatmul.mubr.bf16.vlgmr.msra.gmra.mrb[0].mxu0 %v1462_v29  ;;  %7225 = vmatpush1.bf16.msra.mxu1 %v10696_v30  ;;  %v10783_v29 = vld [vmem:[%s14438_s1 + $0x1ee0] ss:$8 sps:$4 sm:$0xff]   ;;  %v10788_v30 = vld [vmem:[%s14438_s1 + $0xef4] ss:$8 sps:$4 sm:$0xff]  }
 0x384   :  { %7881 = vmatpush1.bf16.msra.mxu0 %v10699_v14  ;;  %7226 = vmatprep.subr.bf16.mxu1 %v10704_v32  ;;  %v10791_v14 = vld [vmem:[%s14438_s1 + $0x1ef4] ss:$8 sps:$4 sm:$0xff]   ;;  %v10786_v32 = vld [vmem:[%s14438_s1 + $0xef0] ss:$8 sps:$4 sm:$0xff]  }
 0x385   :  { %7882 = vmatprep.subr.bf16.mxu0 %v10707_v0  ;;  %7256 = vmatprep.mubr.bf16.mxu1 %v13978_v1  ;;  %v10789_v0 = vld [vmem:[%s14438_s1 + $0x1ef0] ss:$8 sps:$4 sm:$0xff]  }
 0x386   :  { %7912 = vmatprep.mubr.bf16.mxu0 %v13981_v33 }
 0x387   :  { %7227 = vmatpush1.bf16.msra.mxu1 %v10702_v34  ;;  %v10795_v34 = vld [vmem:[%s14438_s1 + $0xf04] ss:$8 sps:$4 sm:$0xff]  }
 0x388   :  { %7883 = vmatpush1.bf16.msra.mxu0 %v10705_v16  ;;  %7228 = vmatprep.subr.bf16.mxu1 %v10710_v56  ;;  %v10799_v16 = vld [vmem:[%s14438_s1 + $0x1f04] ss:$8 sps:$4 sm:$0xff]   ;;  %v14167_v56 = vrot.slane %v13940_v57, %v11101_v49  ;;  %v10802_v57 = vld [vmem:[%s14438_s1 + $0xf14] ss:$8 sps:$4 sm:$0xff]  }
 0x389   :  { %7884 = vmatprep.subr.bf16.mxu0 %v10713_v23  ;;  %v14171_v23 = vrot.slane %v13943_v11, %v11101_v49  ;;  %v10805_v49 = vld [vmem:[%s14438_s1 + $0x1f14] ss:$8 sps:$4 sm:$0xff]   ;;  %v1269_v11 = vcombine.high %v13978_v1, %v13978_v1  ;;  %v10808_v1 = vld [vmem:[%s14438_s1 + $0xf24] ss:$8 sps:$4 sm:$0xff]  }
 0x38b   :  { %7229 = vmatpush1.bf16.msra.mxu1 %v10708_v20  ;;  %v10793_v20 = vld [vmem:[%s14438_s1 + $0xf00] ss:$8 sps:$4 sm:$0xff]  }
 0x38c   :  { %7885 = vmatpush1.bf16.msra.mxu0 %v10711_v21  ;;  %7230 = vmatprep.subr.bf16.mxu1 %v10716_v43  ;;  %v10797_v21 = vld [vmem:[%s14438_s1 + $0x1f00] ss:$8 sps:$4 sm:$0xff]   ;;  %v1465_v43 = vcombine.high %v13981_v33, %v13981_v33  ;;  %v10811_v33 = vld [vmem:[%s14438_s1 + $0x1f24] ss:$8 sps:$4 sm:$0xff]  }
 0x38d   :  { %7886 = vmatprep.subr.bf16.mxu0 %v10719_v12  ;;  %v10800_v12 = vld [vmem:[%s14438_s1 + $0xf10] ss:$8 sps:$4 sm:$0xff]  }
 0x38f   :  { %7231 = vmatpush1.bf16.msra.mxu1 %v10714_v45  ;;  %v10803_v45 = vld [vmem:[%s14438_s1 + $0x1f10] ss:$8 sps:$4 sm:$0xff]  }
 0x390   :  { %7887 = vmatpush1.bf16.msra.mxu0 %v10717_v46  ;;  %7232 = vmatprep.subr.bf16.mxu1 %v10722_v15  ;;  %v10806_v46 = vld [vmem:[%s14438_s1 + $0xf20] ss:$8 sps:$4 sm:$0xff]  }
 0x391   :  { %7888 = vmatprep.subr.bf16.mxu0 %v10725_v31  ;;  %v10809_v15 = vld [vmem:[%s14438_s1 + $0x1f20] ss:$8 sps:$4 sm:$0xff]   ;;  %v10814_v31 = vld [vmem:[%s14438_s1 + $0xf34] ss:$8 sps:$4 sm:$0xff]  }
 0x393   :  { %7233 = vmatpush1.bf16.msra.mxu1 %v10720_v17  ;;  %v10817_v17 = vld [vmem:[%s14438_s1 + $0x1f34] ss:$8 sps:$4 sm:$0xff]  }
 0x394   :  { %7889 = vmatpush1.bf16.msra.mxu0 %v10723_v35  ;;  %7234 = vmatprep.subr.bf16.mxu1 %v10728_v47  ;;  %v10812_v35 = vld [vmem:[%s14438_s1 + $0xf30] ss:$8 sps:$4 sm:$0xff]  }
 0x395   :  { %7890 = vmatprep.subr.bf16.mxu0 %v10731_v48  ;;  %v10815_v47 = vld [vmem:[%s14438_s1 + $0x1f30] ss:$8 sps:$4 sm:$0xff]   ;;  %v10820_v48 = vld [vmem:[%s14438_s1 + $0xf44] ss:$8 sps:$4 sm:$0xff]  }
 0x397   :  { %7235 = vmatpush1.bf16.msra.mxu1 %v10726_v50  ;;  %v10823_v50 = vld [vmem:[%s14438_s1 + $0x1f44] ss:$8 sps:$4 sm:$0xff]  }
 0x398   :  { %7891 = vmatpush1.bf16.msra.mxu0 %v10729_v51  ;;  %7236 = vmatprep.subr.bf16.mxu1 %v10734_v53  ;;  %v10818_v51 = vld [vmem:[%s14438_s1 + $0xf40] ss:$8 sps:$4 sm:$0xff]  }
 0x399   :  { %7892 = vmatprep.subr.bf16.mxu0 %v10737_v36  ;;  %v10821_v53 = vld [vmem:[%s14438_s1 + $0x1f40] ss:$8 sps:$4 sm:$0xff]   ;;  %v10826_v36 = vld [vmem:[%s14438_s1 + $0xf54] ss:$8 sps:$4 sm:$0xff]  }
 0x39b   :  { %7237 = vmatpush1.bf16.msra.mxu1 %v10732_v40  ;;  %v10829_v40 = vld [vmem:[%s14438_s1 + $0x1f54] ss:$8 sps:$4 sm:$0xff]  }
 0x39c   :  { %7893 = vmatpush1.bf16.msra.mxu0 %v10735_v41  ;;  %7238 = vmatprep.subr.bf16.mxu1 %v10740_v13  ;;  %v10824_v41 = vld [vmem:[%s14438_s1 + $0xf50] ss:$8 sps:$4 sm:$0xff]  }
 0x39d   :  { %7894 = vmatprep.subr.bf16.mxu0 %v10743_v44  ;;  %v10827_v13 = vld [vmem:[%s14438_s1 + $0x1f50] ss:$8 sps:$4 sm:$0xff]   ;;  %v10832_v44 = vld [vmem:[%s14438_s1 + $0xf64] ss:$8 sps:$4 sm:$0xff]  }
 0x39f   :  { %7239 = vmatpush1.bf16.msra.mxu1 %v10738_v55  ;;  %v10835_v55 = vld [vmem:[%s14438_s1 + $0x1f64] ss:$8 sps:$4 sm:$0xff]  }
 0x3a0   :  { %7895 = vmatpush1.bf16.msra.mxu0 %v10741_v38  ;;  %7240 = vmatprep.subr.bf16.mxu1 %v10746_v37  ;;  %v10830_v38 = vld [vmem:[%s14438_s1 + $0xf60] ss:$8 sps:$4 sm:$0xff]  }
 0x3a1   :  { %7896 = vmatprep.subr.bf16.mxu0 %v10749_v54  ;;  %v10833_v37 = vld [vmem:[%s14438_s1 + $0x1f60] ss:$8 sps:$4 sm:$0xff]   ;;  %v10838_v54 = vld [vmem:[%s14438_s1 + $0xf74] ss:$8 sps:$4 sm:$0xff]  }
 0x3a3   :  { %7241 = vmatpush1.bf16.msra.mxu1 %v10744_v2  ;;  %v10841_v2 = vld [vmem:[%s14438_s1 + $0x1f74] ss:$8 sps:$4 sm:$0xff]  }
 0x3a4   :  { %7897 = vmatpush1.bf16.msra.mxu0 %v10747_v3  ;;  %7242 = vmatprep.subr.bf16.mxu1 %v10752_v4  ;;  %v10836_v3 = vld [vmem:[%s14438_s1 + $0xf70] ss:$8 sps:$4 sm:$0xff]  }
 0x3a5   :  { %7898 = vmatprep.subr.bf16.mxu0 %v10755_v5  ;;  %v10839_v4 = vld [vmem:[%s14438_s1 + $0x1f70] ss:$8 sps:$4 sm:$0xff]   ;;  %v10844_v5 = vld [vmem:[%s14438_s1 + $0xf84] ss:$8 sps:$4 sm:$0xff]  }
 0x3a7   :  { %7243 = vmatpush1.bf16.msra.mxu1 %v10750_v6  ;;  %v10847_v6 = vld [vmem:[%s14438_s1 + $0x1f84] ss:$8 sps:$4 sm:$0xff]  }
 0x3a8   :  { %7899 = vmatpush1.bf16.msra.mxu0 %v10753_v7  ;;  %7244 = vmatprep.subr.bf16.mxu1 %v10758_v8  ;;  %v10842_v7 = vld [vmem:[%s14438_s1 + $0xf80] ss:$8 sps:$4 sm:$0xff]  }
 0x3a9   :  { %7900 = vmatprep.subr.bf16.mxu0 %v10761_v60  ;;  %v10845_v8 = vld [vmem:[%s14438_s1 + $0x1f80] ss:$8 sps:$4 sm:$0xff]   ;;  %v10850_v60 = vld [vmem:[%s14438_s1 + $0xf94] ss:$8 sps:$4 sm:$0xff]  }
 0x3ab   :  { %7245 = vmatpush1.bf16.msra.mxu1 %v10756_v10  ;;  %v10853_v10 = vld [vmem:[%s14438_s1 + $0x1f94] ss:$8 sps:$4 sm:$0xff]  }
 0x3ac   :  { %7901 = vmatpush1.bf16.msra.mxu0 %v10759_v58  ;;  %7246 = vmatprep.subr.bf16.mxu1 %v10764_v18  ;;  %v10848_v58 = vld [vmem:[%s14438_s1 + $0xf90] ss:$8 sps:$4 sm:$0xff]  }
 0x3ad   :  { %7902 = vmatprep.subr.bf16.mxu0 %v10767_v19  ;;  %v10851_v18 = vld [vmem:[%s14438_s1 + $0x1f90] ss:$8 sps:$4 sm:$0xff]   ;;  %v10856_v19 = vld [vmem:[%s14438_s1 + $0xfa4] ss:$8 sps:$4 sm:$0xff]  }
 0x3af   :  { %7247 = vmatpush1.bf16.msra.mxu1 %v10762_v22  ;;  %v10859_v22 = vld [vmem:[%s14438_s1 + $0x1fa4] ss:$8 sps:$4 sm:$0xff]  }
 0x3b0   :  { %7903 = vmatpush1.bf16.msra.mxu0 %v10765_v52  ;;  %7248 = vmatprep.subr.bf16.mxu1 %v10770_v62  ;;  %v10854_v52 = vld [vmem:[%s14438_s1 + $0xfa0] ss:$8 sps:$4 sm:$0xff]  }
 0x3b1   :  { %7904 = vmatprep.subr.bf16.mxu0 %v10773_v63  ;;  %v10857_v62 = vld [vmem:[%s14438_s1 + $0x1fa0] ss:$8 sps:$4 sm:$0xff]   ;;  %v10862_v63 = vld [vmem:[%s14438_s1 + $0xfb4] ss:$8 sps:$4 sm:$0xff]  }
 0x3b3   :  { %7249 = vmatpush1.bf16.msra.mxu1 %v10768_v59  ;;  %v10865_v59 = vld [vmem:[%s14438_s1 + $0x1fb4] ss:$8 sps:$4 sm:$0xff]  }
 0x3b4   :  { %7905 = vmatpush1.bf16.msra.mxu0 %v10771_v39  ;;  %7250 = vmatprep.subr.bf16.mxu1 %v10776_v24  ;;  %v10860_v39 = vld [vmem:[%s14438_s1 + $0xfb0] ss:$8 sps:$4 sm:$0xff]  }
 0x3b5   :  { %7906 = vmatprep.subr.bf16.mxu0 %v10779_v25  ;;  %v10863_v24 = vld [vmem:[%s14438_s1 + $0x1fb0] ss:$8 sps:$4 sm:$0xff]   ;;  %v10868_v25 = vld [vmem:[%s14438_s1 + $0xfc4] ss:$8 sps:$4 sm:$0xff]  }
 0x3b7   :  { %7251 = vmatpush1.bf16.msra.mxu1 %v10774_v61  ;;  %v10871_v61 = vld [vmem:[%s14438_s1 + $0x1fc4] ss:$8 sps:$4 sm:$0xff]  }
 0x3b8   :  { %7907 = vmatpush1.bf16.msra.mxu0 %v10777_v9  ;;  %7252 = vmatprep.subr.bf16.mxu1 %v10782_v26  ;;  %v10866_v9 = vld [vmem:[%s14438_s1 + $0xfc0] ss:$8 sps:$4 sm:$0xff]  }
 0x3b9   :  { %7908 = vmatprep.subr.bf16.mxu0 %v10785_v27  ;;  %v10869_v26 = vld [vmem:[%s14438_s1 + $0x1fc0] ss:$8 sps:$4 sm:$0xff]   ;;  %v10874_v27 = vld [vmem:[%s14438_s1 + $0xfd4] ss:$8 sps:$4 sm:$0xff]  }
 0x3bb   :  { %7253 = vmatpush1.bf16.msra.mxu1 %v10780_v28  ;;  %v10877_v28 = vld [vmem:[%s14438_s1 + $0x1fd4] ss:$8 sps:$4 sm:$0xff]  }
 0x3bc   :  { %7909 = vmatpush1.bf16.msra.mxu0 %v10783_v29  ;;  %7254 = vmatprep.subr.bf16.mxu1 %v10788_v30  ;;  %v10872_v29 = vld [vmem:[%s14438_s1 + $0xfd0] ss:$8 sps:$4 sm:$0xff]  }
 0x3bd   :  { %7910 = vmatprep.subr.bf16.mxu0 %v10791_v14  ;;  %v10875_v30 = vld [vmem:[%s14438_s1 + $0x1fd0] ss:$8 sps:$4 sm:$0xff]   ;;  %v10880_v14 = vld [vmem:[%s14438_s1 + $0xfe4] ss:$8 sps:$4 sm:$0xff]  }
 0x3bf   :  { %7255 = vmatpush1.bf16.msra.mxu1 %v10786_v32  ;;  %v10883_v32 = vld [vmem:[%s14438_s1 + $0x1fe4] ss:$8 sps:$4 sm:$0xff]  }
 0x3c0   :  { %7911 = vmatpush1.bf16.msra.mxu0 %v10789_v0  ;;  %7265 = vmatprep.subr.bf16.mxu1 %v10795_v34  ;;  %v10878_v0 = vld [vmem:[%s14438_s1 + $0xfe0] ss:$8 sps:$4 sm:$0xff]  }
 0x3c1   :  { %7921 = vmatprep.subr.bf16.mxu0 %v10799_v16  ;;  %v10881_v34 = vld [vmem:[%s14438_s1 + $0x1fe0] ss:$8 sps:$4 sm:$0xff]   ;;  %v10886_v16 = vld [vmem:[%s14438_s1 + $0xff4] ss:$8 sps:$4 sm:$0xff]  }
 0x3c2   :  { %7257 = vmatmul.mubr.bf16.vlgmr.msra.gmra.mrb[0].mxu1 %v14167_v56 }
 0x3c3   :  { %7913 = vmatmul.mubr.bf16.vlgmr.msra.gmra.mrb[0].mxu0 %v14171_v23  ;;  %7266 = vmatpush1.bf16.msra.mxu1 %v10793_v20  ;;  %v10889_v20 = vld [vmem:[%s14438_s1 + $0x1ff4] ss:$8 sps:$4 sm:$0xff]  }
 0x3c4   :  { %7922 = vmatpush1.bf16.msra.mxu0 %v10797_v21  ;;  %7267 = vmatprep.subr.bf16.mxu1 %v10802_v57  ;;  %v10884_v21 = vld [vmem:[%s14438_s1 + $0xff0] ss:$8 sps:$4 sm:$0xff]  }
 0x3c5   :  { %7923 = vmatprep.subr.bf16.mxu0 %v10805_v49  ;;  %7297 = vmatprep.mubr.bf16.mxu1 %v1269_v11  ;;  %v10887_v57 = vld [vmem:[%s14438_s1 + $0x1ff0] ss:$8 sps:$4 sm:$0xff]   ;;  %v10890_v49 = vld [vmem:[%s14440_s3 + $0x40] sm:$0xff]   ;;  %v1267_v11 = vcombine.high %v14167_v56, %v14167_v56  ;;  %v10893_v56 = vld [vmem:[%s14440_s3 + $0x8] sm:$0xff]  }
 0x3c6   :  { %7953 = vmatprep.mubr.bf16.mxu0 %v1465_v43  ;;  %v1463_v43 = vcombine.high %v14171_v23, %v14171_v23  ;;  %v10894_v23 = vld [vmem:[%s14440_s3 + $0x50] sm:$0xff]  }
 0x3c7   :  { %7268 = vmatpush1.bf16.msra.mxu1 %v10800_v12  ;;  %v10891_v12 = vld [vmem:[%s14440_s3] sm:$0xff]  }
 0x3c8   :  { %7924 = vmatpush1.bf16.msra.mxu0 %v10803_v45  ;;  %7269 = vmatprep.subr.bf16.mxu1 %v10808_v1  ;;  %v10892_v45 = vld [vmem:[%s14440_s3 + $0x48] sm:$0xff]   ;;  %v10895_v1 = vld [vmem:[%s14440_s3 + $0x10] sm:$0xff]  }
 0x3c9   :  { %7925 = vmatprep.subr.bf16.mxu0 %v10811_v33  ;;  %v10896_v33 = vld [vmem:[%s14440_s3 + $0x58] sm:$0xff]  }
 0x3cb   :  { %7270 = vmatpush1.bf16.msra.mxu1 %v10806_v46  ;;  %v10897_v46 = vld [vmem:[%s14440_s3 + $0x18] sm:$0xff]  }
 0x3cc   :  { %7926 = vmatpush1.bf16.msra.mxu0 %v10809_v15  ;;  %7271 = vmatprep.subr.bf16.mxu1 %v10814_v31  ;;  %v10898_v15 = vld [vmem:[%s14440_s3 + $0x60] sm:$0xff]  }
 0x3cd   :  { %7927 = vmatprep.subr.bf16.mxu0 %v10817_v17  ;;  %v10899_v31 = vld [vmem:[%s14440_s3 + $0x20] sm:$0xff]   ;;  %v10900_v17 = vld [vmem:[%s14440_s3 + $0x68] sm:$0xff]  }
 0x3cf   :  { %7272 = vmatpush1.bf16.msra.mxu1 %v10812_v35  ;;  %v10901_v35 = vld [vmem:[%s14440_s3 + $0x28] sm:$0xff]  }
 0x3d0   :  { %7928 = vmatpush1.bf16.msra.mxu0 %v10815_v47  ;;  %7273 = vmatprep.subr.bf16.mxu1 %v10820_v48  ;;  %v10902_v47 = vld [vmem:[%s14440_s3 + $0x70] sm:$0xff]  }
 0x3d1   :  { %7929 = vmatprep.subr.bf16.mxu0 %v10823_v50  ;;  %v10903_v48 = vld [vmem:[%s14440_s3 + $0x30] sm:$0xff]   ;;  %v10904_v50 = vld [vmem:[%s14440_s3 + $0x78] sm:$0xff]  }
 0x3d3   :  { %7274 = vmatpush1.bf16.msra.mxu1 %v10818_v51  ;;  %v10905_v51 = vld [vmem:[%s14440_s3 + $0x38] sm:$0xff]  }
 0x3d4   :  { %7930 = vmatpush1.bf16.msra.mxu0 %v10821_v53  ;;  %7275 = vmatprep.subr.bf16.mxu1 %v10826_v36  ;;  %v1058_v53 = vsub.s32 0, %v11083_v42  ;;  %v1054_v36 = vld [vmem:[%s14439_s2] sm:$0x3] }
 0x3d5   :  { %7931 = vmatprep.subr.bf16.mxu0 %v10829_v40  ;;  %v1062_v40 = vsub.s32 1, %v11083_v42 }
 0x3d7   :  { %7276 = vmatpush1.bf16.msra.mxu1 %v10824_v41  ;;  %v1059_v41 = vrot.slane %v1054_v36, %v1058_v53 }
 0x3d8   :  { %7932 = vmatpush1.bf16.msra.mxu0 %v10827_v13  ;;  %7277 = vmatprep.subr.bf16.mxu1 %v10832_v44  ;;  %v1063_v13 = vrot.slane %v1054_v36, %v1062_v40 }
 0x3d9   :  { %7933 = vmatprep.subr.bf16.mxu0 %v10835_v55 }
 0x3db   :  { %7278 = vmatpush1.bf16.msra.mxu1 %v10830_v38 }
 0x3dc   :  { %7934 = vmatpush1.bf16.msra.mxu0 %v10833_v37  ;;  %7279 = vmatprep.subr.bf16.mxu1 %v10838_v54 }
 0x3dd   :  { %7935 = vmatprep.subr.bf16.mxu0 %v10841_v2 }
 0x3df   :  { %7280 = vmatpush1.bf16.msra.mxu1 %v10836_v3 }
 0x3e0   :  { %7936 = vmatpush1.bf16.msra.mxu0 %v10839_v4  ;;  %7281 = vmatprep.subr.bf16.mxu1 %v10844_v5 }
 0x3e1   :  { %7937 = vmatprep.subr.bf16.mxu0 %v10847_v6 }
 0x3e3   :  { %7282 = vmatpush1.bf16.msra.mxu1 %v10842_v7 }
 0x3e4   :  { %7938 = vmatpush1.bf16.msra.mxu0 %v10845_v8  ;;  %7283 = vmatprep.subr.bf16.mxu1 %v10850_v60 }
 0x3e5   :  { %7939 = vmatprep.subr.bf16.mxu0 %v10853_v10 }
 0x3e7   :  { %7284 = vmatpush1.bf16.msra.mxu1 %v10848_v58 }
 0x3e8   :  { %7940 = vmatpush1.bf16.msra.mxu0 %v10851_v18  ;;  %7285 = vmatprep.subr.bf16.mxu1 %v10856_v19  ;;  %v9181_v19 = vld [vmem:[%s14441_s4] ss:$0 sm:$0xff] }
 0x3e9   :  { %7941 = vmatprep.subr.bf16.mxu0 %v10859_v22 }
 0x3eb   :  { %7286 = vmatpush1.bf16.msra.mxu1 %v10854_v52 }
 0x3ec   :  { %7942 = vmatpush1.bf16.msra.mxu0 %v10857_v62  ;;  %7287 = vmatprep.subr.bf16.mxu1 %v10862_v63 }
 0x3ed   :  { %7943 = vmatprep.subr.bf16.mxu0 %v10865_v59 }
 0x3ef   :  { %7288 = vmatpush1.bf16.msra.mxu1 %v10860_v39 }
 0x3f0   :  { %7944 = vmatpush1.bf16.msra.mxu0 %v10863_v24  ;;  %7289 = vmatprep.subr.bf16.mxu1 %v10868_v25 }
 0x3f1   :  { %7945 = vmatprep.subr.bf16.mxu0 %v10871_v61 }
 0x3f3   :  { %7290 = vmatpush1.bf16.msra.mxu1 %v10866_v9 }
 0x3f4   :  { %7946 = vmatpush1.bf16.msra.mxu0 %v10869_v26  ;;  %7291 = vmatprep.subr.bf16.mxu1 %v10874_v27 }
 0x3f5   :  { %7947 = vmatprep.subr.bf16.mxu0 %v10877_v28 }
 0x3f7   :  { %7292 = vmatpush1.bf16.msra.mxu1 %v10872_v29 }
 0x3f8   :  { %7948 = vmatpush1.bf16.msra.mxu0 %v10875_v30  ;;  %7293 = vmatprep.subr.bf16.mxu1 %v10880_v14 }
 0x3f9   :  { %7949 = vmatprep.subr.bf16.mxu0 %v10883_v32 }
 0x3fb   :  { %7294 = vmatpush1.bf16.msra.mxu1 %v10878_v0 }
 0x3fc   :  { %7950 = vmatpush1.bf16.msra.mxu0 %v10881_v34  ;;  %7295 = vmatprep.subr.bf16.mxu1 %v10886_v16 }
 0x3fd   :  { %7951 = vmatprep.subr.bf16.mxu0 %v10889_v20 }
 0x3ff   :  { %7296 = vmatpush1.bf16.msra.mxu1 %v10884_v21 }
 0x400   :  { %7952 = vmatpush1.bf16.msra.mxu0 %v10887_v57  ;;  %9198 = vmatprep.subr.bf16.mxu1 %v10890_v49 }
 0x402   :  { %7298 = vmatmul.mubr.bf16.vlgmr.msra.gmra.mrb[0].mxu1 %v1267_v11 }
 0x403   :  { %7954 = vmatmul.mubr.bf16.vlgmr.msra.gmra.mrb[0].mxu0 %v1463_v43  ;;  %9199 = vmatpush3.bf16.msra.mxu1 %v10891_v12 }
 0x404   :  { %9200 = vmatprep.subr.bf16.mxu1 %v10892_v45 }
 0x407   :  { %9201 = vmatpush3.bf16.msra.mxu1 %v10893_v56 }
 0x408   :  { %9202 = vmatprep.subr.bf16.mxu1 %v10894_v23 }
 0x40b   :  { %9203 = vmatpush3.bf16.msra.mxu1 %v10895_v1 }
 0x40c   :  { %9204 = vmatprep.subr.bf16.mxu1 %v10896_v33 }
 0x40f   :  { %9205 = vmatpush3.bf16.msra.mxu1 %v10897_v46 }
 0x410   :  { %9206 = vmatprep.subr.bf16.mxu1 %v10898_v15 }
 0x413   :  { %9207 = vmatpush3.bf16.msra.mxu1 %v10899_v31 }
 0x414   :  { %9208 = vmatprep.subr.bf16.mxu1 %v10900_v17 }
 0x417   :  { %9209 = vmatpush3.bf16.msra.mxu1 %v10901_v35 }
 0x418   :  { %9210 = vmatprep.subr.bf16.mxu1 %v10902_v47 }
 0x41b   :  { %9211 = vmatpush3.bf16.msra.mxu1 %v10903_v48 }
 0x41c   :  { %9212 = vmatprep.subr.bf16.mxu1 %v10904_v50 }
 0x41f   :  { %9213 = vmatpush3.bf16.msra.mxu1 %v10905_v51 }
 0x4d5   :  { %v7299_v44 = vpop.f32.mrb[0].mxu1 }
 0x4d6   :  { %v7955_v55 = vpop.f32.mrb[0].mxu0  ;;  %v9220_v38 = vadd.f32 %v7299_v44, %v1059_v41  ;;  %v7301_v37 = vpop.f32.mrb[1].mxu1 }
 0x4d7   :  { %v7957_v54 = vpop.f32.mrb[1].mxu0  ;;  %v9222_v2 = vadd.f32 %v7301_v37, %v1063_v13  ;;  %v7303_v3 = vpop.f32.mrb[2].mxu1 }
 0x4d8   :  { %v7959_v4 = vpop.f32.mrb[2].mxu0  ;;  %v9221_v5 = vadd.f32 %v9220_v38, %v7955_v55  ;;  %v7304_v6 = vpop.f32.mrb[3].mxu1 }
 0x4d9   :  { %v7960_v7 = vpop.f32.mrb[3].mxu0  ;;  %v9223_v8 = vadd.f32 %v9222_v2, %v7957_v54 }
 0x4da   :  { %v7962_v60 = vmax.f32 %v9221_v5, 0.0 }
 0x4db   :  { %v7963_v10 = vmax.f32 %v9223_v8, 0.0 }
 0x4dc   :  { %v7964_v18 = vpack.c.bf16 %v7962_v60, %v7962_v60 }
 0x4dd   :  { %v7965_v58 = vpack.c.bf16 %v7963_v10, %v7963_v10 }
 0x4df   :  { %8133 = vmatprep.mubr.bf16.mxu1 %v7965_v58 }
 0x4e0   :  { %8134 = vmatmul.mubr.bf16.vlgmr.msra.gmra.mrb[4].mxu1 %v7964_v18 }
 0x5b3   :  { %v9214_v42 = vpop.f32.mrb[4].mxu1 }
 0x5b4   :  { %v9215_v22 = vpop.f32.mrb[5].mxu1 }
 0x5b5   :  { %v9216_v52 = vadd.f32 %v9215_v22, %v9214_v42  ;;  %v9217_v62 = vpop.f32.mrb[6].mxu1 }
 0x5b6   :  { %v9218_v63 = vpop.f32.mrb[7].mxu1 }
 0x5b7   :  { %v8136_v59 = vadd.f32 %v9216_v52, %v9181_v19 }
 0x5b9   :  { %8142 = vst.msk [vmem:[#allocation2] sm:$0x3] %vm8141_vm0, %v8136_v59 }
 0x5ba   :  { %10921 = shalt.err (!%p10918_p4)
}
 0x5bb   :  { %s10922_s4 = scalar_lea.hbm %s14442_s5, 32 }
 0x5bc   :  { %p10923_p5 = scmp.ne.s32.totalorder %s14442_s5, %s10922_s4  ;;  %p10926_p6 = scmp.lt.u32.totalorder %s10922_s4, %s14442_s5 }
 0x5be   :  { %p10928_p7 = pnand %p10926_p6, %p10923_p5 }
 0x5c0   :  { %10931 = shalt.err (!%p10928_p7)
}
 0x5c1   :  { %8152 = dma.vmem_to_hbm [thread:$0]  %s8150_s22, 32, %s14442_s5, [#allocation3]  }
 0x5c2   :  { %10932 = dma.done.wait [#allocation3], 32  }
 0x5c3   :  { %10933 = vsyncadd [#allocation3], 4294967264 }
 0x5c4   :  { %8156 = vsyncpa [#allocation3], 1 }

</bundles_post_ra>
